<compile_context>
chip_gen: v5e
topology: v5e:2x2
jax: 0.10.0
libtpu: 0.0.40
codegen_flags: <defaults>
</compile_context>

<pallas_src>
import functools
import math

import jax
import jax.numpy as jnp
import numpy as np
from jax.experimental import pallas as pl
from jax.experimental.pallas import tpu as pltpu


def attention_pool_kernel(x_ref, pcls_ref, pspa_ref, wqkv_ref, bqkv_ref,
                          wc_ref, bc_ref, out_ref, ctx_ref, *, num_heads):
    """One grid step: B_tile batch elements, pooled-token attention only.

    x_ref:    (B_tile, S, E) spatial tokens (h-major, w-minor)
    pcls_ref: (1, E)   positional embedding row 0 (pooled token)
    pspa_ref: (S, E)   positional embedding rows 1..S
    wqkv_ref: (E, 3E)  fused [Wq^T | Wk^T | Wv^T]
    bqkv_ref: (1, 3E)  fused [bq | bk | bv]           (always f32)
    wc_ref:   (E, O)   Wc^T
    bc_ref:   (1, O)   bc                              (always f32)
    out_ref:  (B_tile, O) pooled output rows
    ctx_ref:  (B_tile, E) f32 VMEM scratch for the per-head context slab
    """
    B, S, E = x_ref.shape
    Dh = E // num_heads
    scale = 1.0 / math.sqrt(Dh)
    cdt = wqkv_ref.dtype          # dtype fed to the MXU (f32 or bf16)

    x = x_ref[...].astype(jnp.float32)                     # (B, S, E)
    pcls = pcls_ref[...].astype(jnp.float32)               # (1, E)
    pspa = pspa_ref[...].astype(jnp.float32)               # (S, E)
    bqkv = bqkv_ref[...]                                   # (1, 3E) f32
    bc = bc_ref[...]                                       # (1, O)  f32

    # Pooled (mean) token + positional row 0: the only query row per element.
    mean_in = jnp.mean(x, axis=1) + pcls                   # (B, E) f32

    # Fused q/k/v projection for the pooled row (one wide MXU op).
    qkv_m = jnp.dot(mean_in.astype(cdt), wqkv_ref[...],
                    preferred_element_type=jnp.float32) + bqkv       # (B, 3E)
    q = qkv_m[:, :E] * scale                               # (B, E)   scaled query
    kv_m = qkv_m[:, E:]                                    # (B, 2E)  [k | v] of pooled token

    # Spatial tokens + positional rows 1..S; fused k/v projection on the flat
    # (B*S, E) slab -> MXU-sized M, lane-dense 2E output.  (S is a multiple of
    # 8 in the demo so the merge/split reshapes are layout-aligned.)
    x_spa = (x + pspa[None, :, :]).reshape(B * S, E)
    kv_s = jnp.dot(x_spa.astype(cdt), wqkv_ref[:, E:],
                   preferred_element_type=jnp.float32) + bqkv[:, E:]  # (B*S, 2E)
    kv_s = kv_s.reshape(B, S, 2 * E)

    # Per-head single-query attention over L = 1 + S keys (pooled key first).
    # Scores/context use broadcast-multiply + reduce (VPU/XLU): for a single
    # query row this is cheaper than M=1 batched MXU matmuls.
    for h in range(num_heads):
        lo = h * Dh
        qh = q[:, lo:lo + Dh]                              # (B, Dh)
        kh_m = kv_m[:, lo:lo + Dh]                         # (B, Dh)
        vh_m = kv_m[:, E + lo:E + lo + Dh]                 # (B, Dh)
        kh_s = kv_s[:, :, lo:lo + Dh]                      # (B, S, Dh)
        vh_s = kv_s[:, :, E + lo:E + lo + Dh]              # (B, S, Dh)

        s_m = jnp.sum(qh * kh_m, axis=-1, keepdims=True)                 # (B, 1)
        s_s = jnp.sum(qh[:, None, :] * kh_s, axis=-1)                    # (B, S)

        m = jnp.maximum(jnp.max(s_s, axis=-1, keepdims=True), s_m)       # (B, 1)
        e_m = jnp.exp(s_m - m)                                           # (B, 1)
        e_s = jnp.exp(s_s - m)                                           # (B, S)
        denom = e_m + jnp.sum(e_s, axis=-1, keepdims=True)               # (B, 1)
        inv = pl.reciprocal(denom, approx=True)                          # EUP slot

        ctx_h = (e_m * vh_m
                 + jnp.sum(e_s[:, :, None] * vh_s, axis=1)) * inv        # (B, Dh)
        ctx_ref[:, lo:lo + Dh] = ctx_h

    # Output projection on the pooled rows only; lane/sublane-dense 2D store.
    out = jnp.dot(ctx_ref[...].astype(cdt), wc_ref[...],
                  preferred_element_type=jnp.float32) + bc               # (B, O)
    out_ref[...] = out.astype(out_ref.dtype)


def _vmem_bytes_estimate(b_tile, s, e, o, param_dtype):
    """Rough double-buffered VMEM footprint of one grid step (upper bound)."""
    wbytes = jnp.dtype(param_dtype).itemsize
    tok = b_tile * s * e * 4
    weights = (e * 3 * e + e * o + (s + 1) * e) * wbytes + (3 * e + o) * 4
    outb = b_tile * o * 4
    scratch = b_tile * e * 4
    return 2 * (tok + weights + outb) + scratch


def attention_pool2d(x, params, num_heads, *, batch_tile=8):
    """x: (N, C, H, W) float32.  Returns (N, output_dim) float32."""
    N, C, H, W = x.shape
    S = H * W
    E = C
    O = params["wc_t"].shape[1]
    assert E % num_heads == 0, "embed_dim must be divisible by num_heads"

    # Batch tile: multiple batch elements per grid step.  Keep the output block
    # sublane-friendly (either the whole batch, or a multiple of 8).
    if N <= batch_tile:
        B_tile = N
    else:
        assert batch_tile % 8 == 0, "batch_tile must be a multiple of 8"
        B_tile = batch_tile
    N_pad = -(-N // B_tile) * B_tile

    # NCHW -> (N, S, E) token matrix (h-major, w-minor), pad batch if needed.
    tokens = jnp.transpose(x.reshape(N, C, S), (0, 2, 1))
    if N_pad != N:
        tokens = jnp.pad(tokens, ((0, N_pad - N), (0, 0), (0, 0)))

    param_dtype = params["wqkv_t"].dtype
    vmem_limit = int(max(32 * 1024 * 1024,
                         _vmem_bytes_estimate(B_tile, S, E, O, param_dtype)))
    # NOTE: for very large models (e.g. E=2048 f32 on v7x) additionally store
    # weights in bf16 and/or single-buffer the constant-index weight specs.

    kernel = functools.partial(attention_pool_kernel, num_heads=num_heads)
    const = lambda b: (0, 0)
    out = pl.pallas_call(
        kernel,
        out_shape=jax.ShapeDtypeStruct((N_pad, O), jnp.float32),
        grid=(N_pad // B_tile,),
        in_specs=[
            pl.BlockSpec((B_tile, S, E), lambda b: (b, 0, 0)),  # tokens
            pl.BlockSpec((1, E), const),                        # pos row 0
            pl.BlockSpec((S, E), const),                        # pos rows 1..S
            pl.BlockSpec((E, 3 * E), const),                    # fused Wqkv^T
            pl.BlockSpec((1, 3 * E), const),                    # fused bqkv
            pl.BlockSpec((E, O), const),                        # Wc^T
            pl.BlockSpec((1, O), const),                        # bc
        ],
        out_specs=pl.BlockSpec((B_tile, O), lambda b: (b, 0)),
        scratch_shapes=[pltpu.VMEM((B_tile, E), jnp.float32)],
        compiler_params=pltpu.CompilerParams(
            dimension_semantics=("parallel",),
            vmem_limit_bytes=vmem_limit,
        ),
    )(tokens, params["pos_cls"], params["pos_spa"], params["wqkv_t"],
      params["bqkv"], params["wc_t"], params["bc"])
    return out[:N]


# ----------------------------- parameters --------------------------------- #

def make_raw_params(key, spacial_dim, embed_dim, output_dim):
    """PyTorch-layout parameters (Linear weights are (out, in))."""
    S = spacial_dim * spacial_dim
    ks = jax.random.split(key, 9)
    return {
        "pos": jax.random.normal(ks[0], (S + 1, embed_dim), jnp.float32)
               / math.sqrt(embed_dim),
        "wq": 0.05 * jax.random.normal(ks[1], (embed_dim, embed_dim), jnp.float32),
        "wk": 0.05 * jax.random.normal(ks[2], (embed_dim, embed_dim), jnp.float32),
        "wv": 0.05 * jax.random.normal(ks[3], (embed_dim, embed_dim), jnp.float32),
        "wc": 0.05 * jax.random.normal(ks[4], (output_dim, embed_dim), jnp.float32),
        "bq": 0.01 * jax.random.normal(ks[5], (embed_dim,), jnp.float32),
        "bk": 0.01 * jax.random.normal(ks[6], (embed_dim,), jnp.float32),
        "bv": 0.01 * jax.random.normal(ks[7], (embed_dim,), jnp.float32),
        "bc": 0.01 * jax.random.normal(ks[8], (output_dim,), jnp.float32),
    }


def pack_params(raw, param_dtype=jnp.float32):
    """Fuse q/k/v, pre-transpose (y = x @ W^T), split positional embedding."""
    wqkv_t = jnp.concatenate([raw["wq"].T, raw["wk"].T, raw["wv"].T], axis=1)
    bqkv = jnp.concatenate([raw["bq"], raw["bk"], raw["bv"]])[None, :]
    return {
        "pos_cls": raw["pos"][:1].astype(param_dtype),      # (1, E)
        "pos_spa": raw["pos"][1:].astype(param_dtype),      # (S, E)
        "wqkv_t": wqkv_t.astype(param_dtype),                # (E, 3E)
        "bqkv": bqkv.astype(jnp.float32),                    # biases stay f32
        "wc_t": raw["wc"].T.astype(param_dtype),             # (E, O)
        "bc": raw["bc"][None, :].astype(jnp.float32),        # (1, O)
    }


# ----------------------------- reference ---------------------------------- #

def reference(x, raw, num_heads):
    """Pure-JAX mirror of the PyTorch forward (for verification)."""
    N, C, H, W = x.shape
    S = H * W
    E = C
    t = x.reshape(N, C, S).transpose(2, 0, 1)                # (S, N, E)
    t = jnp.concatenate([t.mean(axis=0, keepdims=True), t], axis=0)
    t = t + raw["pos"][:, None, :]
    L = S + 1
    Dh = E // num_heads
    q = (t @ raw["wq"].T + raw["bq"]) * (1.0 / math.sqrt(Dh))
    k = t @ raw["wk"].T + raw["bk"]
    v = t @ raw["wv"].T + raw["bv"]
    q = q.reshape(L, N, num_heads, Dh)
    k = k.reshape(L, N, num_heads, Dh)
    v = v.reshape(L, N, num_heads, Dh)
    s = jnp.einsum("lnhd,mnhd->nhlm", q, k)
    p = jax.nn.softmax(s, axis=-1)
    ctx = jnp.einsum("nhlm,mnhd->lnhd", p, v).reshape(L, N, E)
    out = ctx @ raw["wc"].T + raw["bc"]
    return out[0]                                            # (N, O)


if __name__ == "__main__":
    # Small shapes: batch=16, channels(embed)=64, spatial=8x8 (S=64), heads=4,
    # output_dim=32.  batch_tile=8 -> 2 parallel grid steps.
    N, E, SP, NH, O = 16, 64, 8, 4, 32
    key = jax.random.PRNGKey(0)
    kx, kp = jax.random.split(key)
    x = jax.random.normal(kx, (N, E, SP, SP), jnp.float32)
    raw = make_raw_params(kp, SP, E, O)

    ref = jax.block_until_ready(reference(x, raw, NH))

    # f32 weights: tight check (tolerance accounts for the approx reciprocal).
    params_f32 = pack_params(raw, jnp.float32)
    out_f32 = jax.block_until_ready(attention_pool2d(x, params_f32, NH, batch_tile=8))
    np.testing.assert_allclose(np.asarray(out_f32), np.asarray(ref),
                               rtol=5e-3, atol=5e-3)

    # bf16 weights/pos (bf16 MXU feeds, f32 accumulation + f32 softmax): loose check.
    params_bf16 = pack_params(raw, jnp.bfloat16)
    out_bf16 = jax.block_until_ready(attention_pool2d(x, params_bf16, NH, batch_tile=8))
    np.testing.assert_allclose(np.asarray(out_bf16), np.asarray(ref),
                               rtol=5e-2, atol=5e-2)

    print("KERNEL_OK")
</pallas_src>

<mosaic_0001>
module attributes {stable_mosaic.version = 11 : i64} {
  func.func @attention_pool_kernel(%arg0: i32, %arg1: memref<8x64x64xf32, #tpu.memory_space<vmem>>, %arg2: memref<1x64xf32, #tpu.memory_space<vmem>>, %arg3: memref<64x64xf32, #tpu.memory_space<vmem>>, %arg4: memref<64x192xf32, #tpu.memory_space<vmem>>, %arg5: memref<1x192xf32, #tpu.memory_space<vmem>>, %arg6: memref<64x32xf32, #tpu.memory_space<vmem>>, %arg7: memref<1x32xf32, #tpu.memory_space<vmem>>, %arg8: memref<8x32xf32, #tpu.memory_space<vmem>>, %arg9: memref<8x64xf32, #tpu.memory_space<vmem>>) attributes {dimension_semantics = [#tpu.dimension_semantics<parallel>], iteration_bounds = array<i64: 2>, scalar_prefetch = 0 : i64, scratch_operands = 1 : i64, tpu.core_type = #tpu.core_type<tc>, window_params = [{transform_indices = @transform_0, window_bounds = array<i64: 8, 64, 64>}, {pipeline_mode = #tpu.pipeline_mode<synchronous>, transform_indices = @transform_1, window_bounds = array<i64: 1, 64>}, {pipeline_mode = #tpu.pipeline_mode<synchronous>, transform_indices = @transform_2, window_bounds = array<i64: 64, 64>}, {pipeline_mode = #tpu.pipeline_mode<synchronous>, transform_indices = @transform_3, window_bounds = array<i64: 64, 192>}, {pipeline_mode = #tpu.pipeline_mode<synchronous>, transform_indices = @transform_4, window_bounds = array<i64: 1, 192>}, {pipeline_mode = #tpu.pipeline_mode<synchronous>, transform_indices = @transform_5, window_bounds = array<i64: 64, 32>}, {pipeline_mode = #tpu.pipeline_mode<synchronous>, transform_indices = @transform_6, window_bounds = array<i64: 1, 32>}, {transform_indices = @transform_7, window_bounds = array<i64: 8, 32>}]} {
    %c0 = arith.constant 0 : index
    %c0_0 = arith.constant 0 : index
    %c0_1 = arith.constant 0 : index
    %0 = vector.load %arg1[%c0, %c0_0, %c0_1] : memref<8x64x64xf32, #tpu.memory_space<vmem>>, vector<8x64x64xf32>
    %c0_2 = arith.constant 0 : index
    %c0_3 = arith.constant 0 : index
    %1 = vector.load %arg2[%c0_2, %c0_3] : memref<1x64xf32, #tpu.memory_space<vmem>>, vector<1x64xf32>
    %c0_4 = arith.constant 0 : index
    %c0_5 = arith.constant 0 : index
    %2 = vector.load %arg3[%c0_4, %c0_5] : memref<64x64xf32, #tpu.memory_space<vmem>>, vector<64x64xf32>
    %c0_6 = arith.constant 0 : index
    %c0_7 = arith.constant 0 : index
    %3 = vector.load %arg5[%c0_6, %c0_7] : memref<1x192xf32, #tpu.memory_space<vmem>>, vector<1x192xf32>
    %c0_8 = arith.constant 0 : index
    %c0_9 = arith.constant 0 : index
    %4 = vector.load %arg7[%c0_8, %c0_9] : memref<1x32xf32, #tpu.memory_space<vmem>>, vector<1x32xf32>
    %cst = arith.constant dense<0.000000e+00> : vector<8x64xf32>
    %5 = vector.multi_reduction <add>, %0, %cst [1] : vector<8x64x64xf32> to vector<8x64xf32>
    %cst_10 = arith.constant 6.400000e+01 : f32
    %6 = vector.broadcast %cst_10 : f32 to vector<8x64xf32>
    %7 = arith.divf %5, %6 : vector<8x64xf32>
    %8 = vector.broadcast %1 : vector<1x64xf32> to vector<8x64xf32>
    %9 = arith.addf %7, %8 : vector<8x64xf32>
    %c0_11 = arith.constant 0 : index
    %c0_12 = arith.constant 0 : index
    %10 = vector.load %arg4[%c0_11, %c0_12] : memref<64x192xf32, #tpu.memory_space<vmem>>, vector<64x192xf32>
    %cst_13 = arith.constant dense<0.000000e+00> : vector<8x192xf32>
    %11 = tpu.matmul %9, %10, %cst_13 {dimension_numbers = #tpu.dot_dimension_numbers<[1], [0], [0], [1], [0, 0, 1, 1], [], []>} : vector<8x64xf32>, vector<64x192xf32>, vector<8x192xf32> -> vector<8x192xf32>
    %12 = vector.broadcast %3 : vector<1x192xf32> to vector<8x192xf32>
    %13 = arith.addf %11, %12 : vector<8x192xf32>
    %14 = vector.extract_strided_slice %13 {offsets = [0, 0], sizes = [8, 64], strides = [1, 1]} : vector<8x192xf32> to vector<8x64xf32>
    %cst_14 = arith.constant 2.500000e-01 : f32
    %15 = vector.broadcast %cst_14 : f32 to vector<8x64xf32>
    %16 = arith.mulf %14, %15 : vector<8x64xf32>
    %17 = vector.extract_strided_slice %13 {offsets = [0, 64], sizes = [8, 128], strides = [1, 1]} : vector<8x192xf32> to vector<8x128xf32>
    %18 = vector.shape_cast %2 : vector<64x64xf32> to vector<1x64x64xf32>
    %19 = vector.broadcast %18 : vector<1x64x64xf32> to vector<8x64x64xf32>
    %20 = arith.addf %0, %19 : vector<8x64x64xf32>
    %21 = vector.shape_cast %20 : vector<8x64x64xf32> to vector<512x64xf32>
    %c0_15 = arith.constant 0 : index
    %c64 = arith.constant 64 : index
    %22 = vector.load %arg4[%c0_15, %c64] : memref<64x192xf32, #tpu.memory_space<vmem>>, vector<64x128xf32>
    %cst_16 = arith.constant dense<0.000000e+00> : vector<512x128xf32>
    %23 = tpu.matmul %21, %22, %cst_16 {dimension_numbers = #tpu.dot_dimension_numbers<[1], [0], [0], [1], [0, 0, 1, 1], [], []>} : vector<512x64xf32>, vector<64x128xf32>, vector<512x128xf32> -> vector<512x128xf32>
    %24 = vector.extract_strided_slice %3 {offsets = [0, 64], sizes = [1, 128], strides = [1, 1]} : vector<1x192xf32> to vector<1x128xf32>
    %25 = vector.broadcast %24 : vector<1x128xf32> to vector<512x128xf32>
    %26 = arith.addf %23, %25 : vector<512x128xf32>
    %27 = vector.shape_cast %26 : vector<512x128xf32> to vector<8x64x128xf32>
    %28 = vector.extract_strided_slice %16 {offsets = [0, 0], sizes = [8, 16], strides = [1, 1]} : vector<8x64xf32> to vector<8x16xf32>
    %29 = vector.extract_strided_slice %17 {offsets = [0, 0], sizes = [8, 16], strides = [1, 1]} : vector<8x128xf32> to vector<8x16xf32>
    %30 = vector.extract_strided_slice %17 {offsets = [0, 64], sizes = [8, 16], strides = [1, 1]} : vector<8x128xf32> to vector<8x16xf32>
    %31 = vector.extract_strided_slice %27 {offsets = [0, 0, 0], sizes = [8, 64, 16], strides = [1, 1, 1]} : vector<8x64x128xf32> to vector<8x64x16xf32>
    %32 = vector.extract_strided_slice %27 {offsets = [0, 0, 64], sizes = [8, 64, 16], strides = [1, 1, 1]} : vector<8x64x128xf32> to vector<8x64x16xf32>
    %33 = arith.mulf %28, %29 : vector<8x16xf32>
    %cst_17 = arith.constant dense<0.000000e+00> : vector<8xf32>
    %34 = vector.multi_reduction <add>, %33, %cst_17 [1] : vector<8x16xf32> to vector<8xf32>
    %35 = vector.shape_cast %34 : vector<8xf32> to vector<8x1xf32>
    %36 = vector.shape_cast %28 : vector<8x16xf32> to vector<8x1x16xf32>
    %37 = vector.broadcast %36 : vector<8x1x16xf32> to vector<8x64x16xf32>
    %38 = arith.mulf %37, %31 : vector<8x64x16xf32>
    %cst_18 = arith.constant dense<0.000000e+00> : vector<8x64xf32>
    %39 = vector.multi_reduction <add>, %38, %cst_18 [2] : vector<8x64x16xf32> to vector<8x64xf32>
    %cst_19 = arith.constant dense<0xFF800000> : vector<8xf32>
    %40 = vector.multi_reduction <maximumf>, %39, %cst_19 [1] : vector<8x64xf32> to vector<8xf32>
    %41 = vector.shape_cast %40 : vector<8xf32> to vector<8x1xf32>
    %42 = arith.maximumf %41, %35 : vector<8x1xf32>
    %43 = arith.subf %35, %42 : vector<8x1xf32>
    %44 = math.exp %43 : vector<8x1xf32>
    %45 = vector.broadcast %42 : vector<8x1xf32> to vector<8x64xf32>
    %46 = arith.subf %39, %45 : vector<8x64xf32>
    %47 = math.exp %46 : vector<8x64xf32>
    %cst_20 = arith.constant dense<0.000000e+00> : vector<8xf32>
    %48 = vector.multi_reduction <add>, %47, %cst_20 [1] : vector<8x64xf32> to vector<8xf32>
    %49 = vector.shape_cast %48 : vector<8xf32> to vector<8x1xf32>
    %50 = arith.addf %44, %49 : vector<8x1xf32>
    %51 = tpu.reciprocal %50 {approx = true} : vector<8x1xf32> -> vector<8x1xf32>
    %52 = vector.broadcast %44 : vector<8x1xf32> to vector<8x16xf32>
    %53 = arith.mulf %52, %30 : vector<8x16xf32>
    %54 = vector.shape_cast %47 : vector<8x64xf32> to vector<8x64x1xf32>
    %55 = vector.broadcast %54 : vector<8x64x1xf32> to vector<8x64x16xf32>
    %56 = arith.mulf %55, %32 : vector<8x64x16xf32>
    %cst_21 = arith.constant dense<0.000000e+00> : vector<8x16xf32>
    %57 = vector.multi_reduction <add>, %56, %cst_21 [1] : vector<8x64x16xf32> to vector<8x16xf32>
    %58 = arith.addf %53, %57 : vector<8x16xf32>
    %59 = vector.broadcast %51 : vector<8x1xf32> to vector<8x16xf32>
    %60 = arith.mulf %58, %59 : vector<8x16xf32>
    %c0_22 = arith.constant 0 : index
    %c0_23 = arith.constant 0 : index
    %61 = vector.load %arg9[%c0_22, %c0_23] : memref<8x64xf32, #tpu.memory_space<vmem>>, vector<8x16xf32>
    tpu.vector_store %arg9[%c0_22, %c0_23], %60 {strides = array<i32>} : memref<8x64xf32, #tpu.memory_space<vmem>>, vector<8x16xf32>,
    %62 = vector.extract_strided_slice %16 {offsets = [0, 16], sizes = [8, 16], strides = [1, 1]} : vector<8x64xf32> to vector<8x16xf32>
    %63 = vector.extract_strided_slice %17 {offsets = [0, 16], sizes = [8, 16], strides = [1, 1]} : vector<8x128xf32> to vector<8x16xf32>
    %64 = vector.extract_strided_slice %17 {offsets = [0, 80], sizes = [8, 16], strides = [1, 1]} : vector<8x128xf32> to vector<8x16xf32>
    %65 = vector.extract_strided_slice %27 {offsets = [0, 0, 16], sizes = [8, 64, 16], strides = [1, 1, 1]} : vector<8x64x128xf32> to vector<8x64x16xf32>
    %66 = vector.extract_strided_slice %27 {offsets = [0, 0, 80], sizes = [8, 64, 16], strides = [1, 1, 1]} : vector<8x64x128xf32> to vector<8x64x16xf32>
    %67 = arith.mulf %62, %63 : vector<8x16xf32>
    %cst_24 = arith.constant dense<0.000000e+00> : vector<8xf32>
    %68 = vector.multi_reduction <add>, %67, %cst_24 [1] : vector<8x16xf32> to vector<8xf32>
    %69 = vector.shape_cast %68 : vector<8xf32> to vector<8x1xf32>
    %70 = vector.shape_cast %62 : vector<8x16xf32> to vector<8x1x16xf32>
    %71 = vector.broadcast %70 : vector<8x1x16xf32> to vector<8x64x16xf32>
    %72 = arith.mulf %71, %65 : vector<8x64x16xf32>
    %cst_25 = arith.constant dense<0.000000e+00> : vector<8x64xf32>
    %73 = vector.multi_reduction <add>, %72, %cst_25 [2] : vector<8x64x16xf32> to vector<8x64xf32>
    %cst_26 = arith.constant dense<0xFF800000> : vector<8xf32>
    %74 = vector.multi_reduction <maximumf>, %73, %cst_26 [1] : vector<8x64xf32> to vector<8xf32>
    %75 = vector.shape_cast %74 : vector<8xf32> to vector<8x1xf32>
    %76 = arith.maximumf %75, %69 : vector<8x1xf32>
    %77 = arith.subf %69, %76 : vector<8x1xf32>
    %78 = math.exp %77 : vector<8x1xf32>
    %79 = vector.broadcast %76 : vector<8x1xf32> to vector<8x64xf32>
    %80 = arith.subf %73, %79 : vector<8x64xf32>
    %81 = math.exp %80 : vector<8x64xf32>
    %cst_27 = arith.constant dense<0.000000e+00> : vector<8xf32>
    %82 = vector.multi_reduction <add>, %81, %cst_27 [1] : vector<8x64xf32> to vector<8xf32>
    %83 = vector.shape_cast %82 : vector<8xf32> to vector<8x1xf32>
    %84 = arith.addf %78, %83 : vector<8x1xf32>
    %85 = tpu.reciprocal %84 {approx = true} : vector<8x1xf32> -> vector<8x1xf32>
    %86 = vector.broadcast %78 : vector<8x1xf32> to vector<8x16xf32>
    %87 = arith.mulf %86, %64 : vector<8x16xf32>
    %88 = vector.shape_cast %81 : vector<8x64xf32> to vector<8x64x1xf32>
    %89 = vector.broadcast %88 : vector<8x64x1xf32> to vector<8x64x16xf32>
    %90 = arith.mulf %89, %66 : vector<8x64x16xf32>
    %cst_28 = arith.constant dense<0.000000e+00> : vector<8x16xf32>
    %91 = vector.multi_reduction <add>, %90, %cst_28 [1] : vector<8x64x16xf32> to vector<8x16xf32>
    %92 = arith.addf %87, %91 : vector<8x16xf32>
    %93 = vector.broadcast %85 : vector<8x1xf32> to vector<8x16xf32>
    %94 = arith.mulf %92, %93 : vector<8x16xf32>
    %c0_29 = arith.constant 0 : index
    %c16 = arith.constant 16 : index
    %95 = vector.load %arg9[%c0_29, %c16] : memref<8x64xf32, #tpu.memory_space<vmem>>, vector<8x16xf32>
    tpu.vector_store %arg9[%c0_29, %c16], %94 {strides = array<i32>} : memref<8x64xf32, #tpu.memory_space<vmem>>, vector<8x16xf32>,
    %96 = vector.extract_strided_slice %16 {offsets = [0, 32], sizes = [8, 16], strides = [1, 1]} : vector<8x64xf32> to vector<8x16xf32>
    %97 = vector.extract_strided_slice %17 {offsets = [0, 32], sizes = [8, 16], strides = [1, 1]} : vector<8x128xf32> to vector<8x16xf32>
    %98 = vector.extract_strided_slice %17 {offsets = [0, 96], sizes = [8, 16], strides = [1, 1]} : vector<8x128xf32> to vector<8x16xf32>
    %99 = vector.extract_strided_slice %27 {offsets = [0, 0, 32], sizes = [8, 64, 16], strides = [1, 1, 1]} : vector<8x64x128xf32> to vector<8x64x16xf32>
    %100 = vector.extract_strided_slice %27 {offsets = [0, 0, 96], sizes = [8, 64, 16], strides = [1, 1, 1]} : vector<8x64x128xf32> to vector<8x64x16xf32>
    %101 = arith.mulf %96, %97 : vector<8x16xf32>
    %cst_30 = arith.constant dense<0.000000e+00> : vector<8xf32>
    %102 = vector.multi_reduction <add>, %101, %cst_30 [1] : vector<8x16xf32> to vector<8xf32>
    %103 = vector.shape_cast %102 : vector<8xf32> to vector<8x1xf32>
    %104 = vector.shape_cast %96 : vector<8x16xf32> to vector<8x1x16xf32>
    %105 = vector.broadcast %104 : vector<8x1x16xf32> to vector<8x64x16xf32>
    %106 = arith.mulf %105, %99 : vector<8x64x16xf32>
    %cst_31 = arith.constant dense<0.000000e+00> : vector<8x64xf32>
    %107 = vector.multi_reduction <add>, %106, %cst_31 [2] : vector<8x64x16xf32> to vector<8x64xf32>
    %cst_32 = arith.constant dense<0xFF800000> : vector<8xf32>
    %108 = vector.multi_reduction <maximumf>, %107, %cst_32 [1] : vector<8x64xf32> to vector<8xf32>
    %109 = vector.shape_cast %108 : vector<8xf32> to vector<8x1xf32>
    %110 = arith.maximumf %109, %103 : vector<8x1xf32>
    %111 = arith.subf %103, %110 : vector<8x1xf32>
    %112 = math.exp %111 : vector<8x1xf32>
    %113 = vector.broadcast %110 : vector<8x1xf32> to vector<8x64xf32>
    %114 = arith.subf %107, %113 : vector<8x64xf32>
    %115 = math.exp %114 : vector<8x64xf32>
    %cst_33 = arith.constant dense<0.000000e+00> : vector<8xf32>
    %116 = vector.multi_reduction <add>, %115, %cst_33 [1] : vector<8x64xf32> to vector<8xf32>
    %117 = vector.shape_cast %116 : vector<8xf32> to vector<8x1xf32>
    %118 = arith.addf %112, %117 : vector<8x1xf32>
    %119 = tpu.reciprocal %118 {approx = true} : vector<8x1xf32> -> vector<8x1xf32>
    %120 = vector.broadcast %112 : vector<8x1xf32> to vector<8x16xf32>
    %121 = arith.mulf %120, %98 : vector<8x16xf32>
    %122 = vector.shape_cast %115 : vector<8x64xf32> to vector<8x64x1xf32>
    %123 = vector.broadcast %122 : vector<8x64x1xf32> to vector<8x64x16xf32>
    %124 = arith.mulf %123, %100 : vector<8x64x16xf32>
    %cst_34 = arith.constant dense<0.000000e+00> : vector<8x16xf32>
    %125 = vector.multi_reduction <add>, %124, %cst_34 [1] : vector<8x64x16xf32> to vector<8x16xf32>
    %126 = arith.addf %121, %125 : vector<8x16xf32>
    %127 = vector.broadcast %119 : vector<8x1xf32> to vector<8x16xf32>
    %128 = arith.mulf %126, %127 : vector<8x16xf32>
    %c0_35 = arith.constant 0 : index
    %c32 = arith.constant 32 : index
    %129 = vector.load %arg9[%c0_35, %c32] : memref<8x64xf32, #tpu.memory_space<vmem>>, vector<8x16xf32>
    tpu.vector_store %arg9[%c0_35, %c32], %128 {strides = array<i32>} : memref<8x64xf32, #tpu.memory_space<vmem>>, vector<8x16xf32>,
    %130 = vector.extract_strided_slice %16 {offsets = [0, 48], sizes = [8, 16], strides = [1, 1]} : vector<8x64xf32> to vector<8x16xf32>
    %131 = vector.extract_strided_slice %17 {offsets = [0, 48], sizes = [8, 16], strides = [1, 1]} : vector<8x128xf32> to vector<8x16xf32>
    %132 = vector.extract_strided_slice %17 {offsets = [0, 112], sizes = [8, 16], strides = [1, 1]} : vector<8x128xf32> to vector<8x16xf32>
    %133 = vector.extract_strided_slice %27 {offsets = [0, 0, 48], sizes = [8, 64, 16], strides = [1, 1, 1]} : vector<8x64x128xf32> to vector<8x64x16xf32>
    %134 = vector.extract_strided_slice %27 {offsets = [0, 0, 112], sizes = [8, 64, 16], strides = [1, 1, 1]} : vector<8x64x128xf32> to vector<8x64x16xf32>
    %135 = arith.mulf %130, %131 : vector<8x16xf32>
    %cst_36 = arith.constant dense<0.000000e+00> : vector<8xf32>
    %136 = vector.multi_reduction <add>, %135, %cst_36 [1] : vector<8x16xf32> to vector<8xf32>
    %137 = vector.shape_cast %136 : vector<8xf32> to vector<8x1xf32>
    %138 = vector.shape_cast %130 : vector<8x16xf32> to vector<8x1x16xf32>
    %139 = vector.broadcast %138 : vector<8x1x16xf32> to vector<8x64x16xf32>
    %140 = arith.mulf %139, %133 : vector<8x64x16xf32>
    %cst_37 = arith.constant dense<0.000000e+00> : vector<8x64xf32>
    %141 = vector.multi_reduction <add>, %140, %cst_37 [2] : vector<8x64x16xf32> to vector<8x64xf32>
    %cst_38 = arith.constant dense<0xFF800000> : vector<8xf32>
    %142 = vector.multi_reduction <maximumf>, %141, %cst_38 [1] : vector<8x64xf32> to vector<8xf32>
    %143 = vector.shape_cast %142 : vector<8xf32> to vector<8x1xf32>
    %144 = arith.maximumf %143, %137 : vector<8x1xf32>
    %145 = arith.subf %137, %144 : vector<8x1xf32>
    %146 = math.exp %145 : vector<8x1xf32>
    %147 = vector.broadcast %144 : vector<8x1xf32> to vector<8x64xf32>
    %148 = arith.subf %141, %147 : vector<8x64xf32>
    %149 = math.exp %148 : vector<8x64xf32>
    %cst_39 = arith.constant dense<0.000000e+00> : vector<8xf32>
    %150 = vector.multi_reduction <add>, %149, %cst_39 [1] : vector<8x64xf32> to vector<8xf32>
    %151 = vector.shape_cast %150 : vector<8xf32> to vector<8x1xf32>
    %152 = arith.addf %146, %151 : vector<8x1xf32>
    %153 = tpu.reciprocal %152 {approx = true} : vector<8x1xf32> -> vector<8x1xf32>
    %154 = vector.broadcast %146 : vector<8x1xf32> to vector<8x16xf32>
    %155 = arith.mulf %154, %132 : vector<8x16xf32>
    %156 = vector.shape_cast %149 : vector<8x64xf32> to vector<8x64x1xf32>
    %157 = vector.broadcast %156 : vector<8x64x1xf32> to vector<8x64x16xf32>
    %158 = arith.mulf %157, %134 : vector<8x64x16xf32>
    %cst_40 = arith.constant dense<0.000000e+00> : vector<8x16xf32>
    %159 = vector.multi_reduction <add>, %158, %cst_40 [1] : vector<8x64x16xf32> to vector<8x16xf32>
    %160 = arith.addf %155, %159 : vector<8x16xf32>
    %161 = vector.broadcast %153 : vector<8x1xf32> to vector<8x16xf32>
    %162 = arith.mulf %160, %161 : vector<8x16xf32>
    %c0_41 = arith.constant 0 : index
    %c48 = arith.constant 48 : index
    %163 = vector.load %arg9[%c0_41, %c48] : memref<8x64xf32, #tpu.memory_space<vmem>>, vector<8x16xf32>
    tpu.vector_store %arg9[%c0_41, %c48], %162 {strides = array<i32>} : memref<8x64xf32, #tpu.memory_space<vmem>>, vector<8x16xf32>,
    %c0_42 = arith.constant 0 : index
    %c0_43 = arith.constant 0 : index
    %164 = vector.load %arg9[%c0_42, %c0_43] : memref<8x64xf32, #tpu.memory_space<vmem>>, vector<8x64xf32>
    %c0_44 = arith.constant 0 : index
    %c0_45 = arith.constant 0 : index
    %165 = vector.load %arg6[%c0_44, %c0_45] : memref<64x32xf32, #tpu.memory_space<vmem>>, vector<64x32xf32>
    %cst_46 = arith.constant dense<0.000000e+00> : vector<8x32xf32>
    %166 = tpu.matmul %164, %165, %cst_46 {dimension_numbers = #tpu.dot_dimension_numbers<[1], [0], [0], [1], [0, 0, 1, 1], [], []>} : vector<8x64xf32>, vector<64x32xf32>, vector<8x32xf32> -> vector<8x32xf32>
    %167 = vector.broadcast %4 : vector<1x32xf32> to vector<8x32xf32>
    %168 = arith.addf %166, %167 : vector<8x32xf32>
    %c0_47 = arith.constant 0 : index
    %c0_48 = arith.constant 0 : index
    %169 = vector.load %arg8[%c0_47, %c0_48] : memref<8x32xf32, #tpu.memory_space<vmem>>, vector<8x32xf32>
    tpu.vector_store %arg8[%c0_47, %c0_48], %168 {strides = array<i32>} : memref<8x32xf32, #tpu.memory_space<vmem>>, vector<8x32xf32>,
    return
  }
  func.func @transform_0(%arg0: i32) -> (i32, i32, i32) {
    %c0_i32 = arith.constant 0 : i32
    %c0_i32_0 = arith.constant 0 : i32
    %c0_i32_1 = arith.constant 0 : i32
    return %arg0, %c0_i32, %c0_i32_0 : i32, i32, i32
  }
  func.func @transform_1(%arg0: i32) -> (i32, i32) {
    %c0_i32 = arith.constant 0 : i32
    %c0_i32_0 = arith.constant 0 : i32
    %c0_i32_1 = arith.constant 0 : i32
    return %c0_i32, %c0_i32_0 : i32, i32
  }
  func.func @transform_2(%arg0: i32) -> (i32, i32) {
    %c0_i32 = arith.constant 0 : i32
    %c0_i32_0 = arith.constant 0 : i32
    %c0_i32_1 = arith.constant 0 : i32
    return %c0_i32, %c0_i32_0 : i32, i32
  }
  func.func @transform_3(%arg0: i32) -> (i32, i32) {
    %c0_i32 = arith.constant 0 : i32
    %c0_i32_0 = arith.constant 0 : i32
    %c0_i32_1 = arith.constant 0 : i32
    return %c0_i32, %c0_i32_0 : i32, i32
  }
  func.func @transform_4(%arg0: i32) -> (i32, i32) {
    %c0_i32 = arith.constant 0 : i32
    %c0_i32_0 = arith.constant 0 : i32
    %c0_i32_1 = arith.constant 0 : i32
    return %c0_i32, %c0_i32_0 : i32, i32
  }
  func.func @transform_5(%arg0: i32) -> (i32, i32) {
    %c0_i32 = arith.constant 0 : i32
    %c0_i32_0 = arith.constant 0 : i32
    %c0_i32_1 = arith.constant 0 : i32
    return %c0_i32, %c0_i32_0 : i32, i32
  }
  func.func @transform_6(%arg0: i32) -> (i32, i32) {
    %c0_i32 = arith.constant 0 : i32
    %c0_i32_0 = arith.constant 0 : i32
    %c0_i32_1 = arith.constant 0 : i32
    return %c0_i32, %c0_i32_0 : i32, i32
  }
  func.func @transform_7(%arg0: i32) -> (i32, i32) {
    %c0_i32 = arith.constant 0 : i32
    %c0_i32_0 = arith.constant 0 : i32
    return %arg0, %c0_i32 : i32, i32
  }
}

</mosaic_0001>

<bundles_post_ra>
// kernel: tpu_custom_call.1
= control target key start
LH: loop header
LB: loop body
LE: loop exit
PB: predicated region body
PF: predicated region fallthrough
CT: control target
= control target key end

     0   :  { %s14775_s0 = inlined_call_operand.hbm [shape: f32[16,64,64], index: 0, kind: input, shape index: {}]   ;;  %s14776_s1 = inlined_call_operand.vmem [shape: f32[1,64], index: 1, kind: input, shape index: {}]   ;;  %s14777_s2 = inlined_call_operand.vmem [shape: f32[64,64], index: 2, kind: input, shape index: {}]   ;;  %s14778_s3 = inlined_call_operand.hbm [shape: f32[64,192], index: 3, kind: input, shape index: {}]   ;;  %s14779_s4 = inlined_call_operand.vmem [shape: f32[1,192], index: 4, kind: input, shape index: {}]   ;;  %s14780_s5 = inlined_call_operand.vmem [shape: f32[64,32], index: 5, kind: input, shape index: {}]   ;;  %s14781_s6 = inlined_call_operand.vmem [shape: f32[1,32], index: 6, kind: input, shape index: {}]   ;;  %s14782_s7 = inlined_call_operand.hbm [shape: f32[16,32], index: 7, kind: output, shape index: {}]  }
   0x1   :  { %15277 = sst [smem:[#allocation234_spill]] %s14778_s3 }
   0x2   :  { %12 = vsyncpa [#allocation4], 0 }
   0x3   :  { %14 = vsyncpa [#allocation4 + $0x1], 0 }
   0x4   :  { %15 = vsyncpa [#allocation7], 0 }
   0x5   :  { %16 = vsyncpa [#allocation5], 0 }
   0x6   :  { %18 = vsyncpa [#allocation5 + $0x1], 0  ;;  %s8290_s24 = smov 0   ;;  %s8292_s25 = smov 0  }
   0x7   :  { %s8294_s26 = smov 0   ;;  %s8296_s27 = smov 0  }
   0x8 LB: > { %s8311_s28 = sadd.s32 4294967295, %s8237_s27   ;;  %s7356_s29 = sadd.s32 4294967294, %s8237_s27   ;;  %s8237_s27 = sphi %s8296_s27, %s16592_s27   ;;  %s8233_s26 = sphi %s8294_s26, %s16591_s26   ;;  %s8229_s25 = sphi %s8292_s25, %s16590_s25   ;;  %s8225_s24 = sphi %s8290_s24, %s16589_s24  }
   0x9   : > { %p44_p0 = scmp.ne.s32.totalorder %s8229_s25, %s8225_s24  ;;  %p45_p1 = scmp.eq.s32.totalorder %s8311_s28, 0 }
   0xa   : > { %p194_p2 = scmp.eq.s32.totalorder %s8311_s28, 1  ;;  %p200_p3 = scmp.eq.s32.totalorder %s7356_s29, 1 }
   0xb   : > { %p8320_p4 = por %p45_p1, %p44_p0  ;;  %p7357_p5 = scmp.ge.s32.totalorder %s8237_s27, 1 }
   0xc   : > { %p8325_p6 = por %p200_p3, %p44_p0  ;;  %p207_p7 = scmp.lt.s32.totalorder %s8237_s27, 3 }
   0xd   : > { %s15280_s3 = sld [smem:[#allocation234_spill]]  ;;  %s8239_s13 = smov [#allocation6]  }
   0xe   : > { %p8333_p8 = pnand %p7357_p5, %p207_p7  ;;  %s226_s14 = sshll.u32 %s8239_s13, 4  ;;  %s227_s14 = int_to_ptr.vmem [resolvable:$true] %s226_s14 }
   0xf   : > { %s8343_s15 = sadd.s32 1, %s8237_s27   ;;  %s8240_s16 = smov 256  }
  0x10   : > { %p7473_p9 = pneg %p8333_p8  ;;  %s8241_s17 = smov 16  }
  0x11   : > { %s28_s18 = ssub.s32 %s8237_s27, %s8343_s15  ;;  %s31_s19 = sadd.s32 1, %s8233_s26 }
  0x12   : > { %p7474_p10 = pnand %p7473_p9, %p45_p1  ;;  %p29_p12 = scmp.eq.s32.totalorder %s28_s18, 0 }
  0x13   : > { %s224_s11 = sshll.u32 %s15280_s3, 4  ;;  %p38_p13 = scmp.ne.s32.totalorder %s8233_s26, %s8229_s25  ;;  %s225_s11 = int_to_ptr.hbm [resolvable:$true] %s224_s11 }
  0x14   : > { %7476 = dma.hbm_to_vmem [thread:$0]  (!%p7474_p10), %s225_s11, 2048, %s227_s14, [#allocation7], %s8240_s16, %s8240_s16, %s8241_s17  }
  0x15   : > { %p39_p0 = scmp.eq.s32.totalorder %s8237_s27, 0  ;;  %p7486_p3 = scmp.lt.s32.totalorder %s8237_s27, 2 }
  0x16   : > { %s8353_s20 = scalar_select %p29_p12, %s8233_s26, %s31_s19  }
  0x17   : > { %p40_p5 = por %p39_p0, %p38_p13  ;;  %p8357_p7 = por %p194_p2, %p38_p13 }
  0x18   : > { %s249_s22 = sand.u32 1, %s8233_s26   ;;  %s7440_s23 = sshll.u32 %s8237_s27, 9 }
  0x19   : > { %s7360_s29 = sshll.u32 %s249_s22, 9  ;;  %s259_s11 = scalar_lea.hbm %s14775_s0, %s7440_s23 }
  0x1a   : > { %s260_s13 = sshll.u32 %s259_s11, 4  ;;  %s253_s14 = scalar_lea.vmem [#allocation3], %s7360_s29  ;;  %s261_s13 = int_to_ptr.hbm [resolvable:$true] %s260_s13 }
  0x1b   : > { %s262_s16 = sshll.u32 %s253_s14, 4  ;;  %p8368_p9 = pnand %p7486_p3, %p40_p5  ;;  %s263_s16 = int_to_ptr.vmem [resolvable:$true] %s262_s16 }
  0x1c   : > { %s250_s18 = scalar_lea.sflag [#allocation4], %s249_s22  ;;  %s8137_s19 = sshra.s32 %s261_s13, 4  ;;  %s8138_s19 = int_to_ptr.hbm [resolvable:$true] %s8137_s19 }
  0x1d   : > { %s8139_s3 = scalar_lea.hbm %s8138_s19, 512  ;;  %p8141_p10 = pneg %p8368_p9 }
  0x1e   : > { %p8140_p2 = scmp.ne.s32.totalorder %s8138_s19, %s8139_s3  ;;  %s8144_s9 = scalar_lea.hbm %s14775_s0, 1024 }
  0x1f   : > { %p8145_p0 = scmp.lt.s32.totalorder %s8138_s19, %s14775_s0  ;;  %p8146_p3 = scmp.lt.s32.totalorder %s8144_s9, %s8139_s3 }
  0x20   : > { %p8142_p12 = pnand %p8141_p10, %p8140_p2 }
  0x21   : > { %p8147_p5 = por %p8146_p3, %p8145_p0 }
  0x22   : > { %p8143_p13 = pneg %p8142_p12 }
  0x24   : > { %p8148_p11 = pnand %p8147_p5, %p8143_p13 }
  0x26   : > { %8151 = shalt.err (!%p8148_p11)
}
  0x27   : > { %s8242_s22 = smov 128   ;;  %s8243_s14 = smov 8  }
  0x28   : > { %7480 = dma.hbm_to_vmem [thread:$0]  (!%p8368_p9), %s261_s13, 8192, %s263_s16, %s250_s18, %s8242_s22, %s8242_s22, %s8243_s14  }
  0x29   : > { %274 = sbr.rel (%p8333_p8) target bundleno = 4714 (0x126a), region = 48 }
  0x2e   : > { %s8385_s23 = sand.u32 1, %s8229_s25  }
  0x2f   : > { %s7365_s29 = sshll.u32 %s8385_s23, 9  ;;  %s277_s19 = scalar_lea.sflag [#allocation4], %s8385_s23 }
  0x30   : > { %s8389_s3 = scalar_lea.vmem [#allocation3], %s7365_s29 }
  0x31   : > { %8212 = dma.done.wait (%p8320_p4), %s277_s19, 8192  }
  0x32   : > { %8214 = vsyncadd (%p8320_p4), %s277_s19, 4294959104 }
  0x33   : > { %8216 = dma.done.wait (%p45_p1), [#allocation7], 2048  }
  0x34   : > { %8218 = vsyncadd (%p45_p1), [#allocation7], 4294965248  ;;  %v8399_v0 = vld [vmem:[#allocation6 + $0x20] sm:$0xff]  ;;  %v8401_v1 = vld [vmem:[#allocation6 + $0x28] sm:$0xff]  ;;  %s8244_s30 = smov 64   ;;  %vm15129_vm0 = vcmask 523264  }
  0x35   : > { %v8403_v2 = vld [vmem:[#allocation6] sm:$0xff]  ;;  %v7542_v3 = vpack.i.bf16 %v8401_v1, %v8399_v0  ;;  %v8407_v4 = vld [vmem:[#allocation6 + $0x8] sm:$0xff]  ;;  %v594_v6 = vld [vmem:[#allocation6 + $0x30] sm:$0xff]  ;;  %vm618_vm2 = vcmask 1041409   ;;  %vm621_vm3 = vcmask 1042434   ;;  %vm624_vm4 = vcmask 1043459  }
  0x36   : > { %v7532_v5 = vpack.i.bf16 %v8407_v4, %v8403_v2  ;;  %v8411_v7 = vld [vmem:[#allocation6 + $0x38] sm:$0xff]  ;;  %v8413_v8 = vld [vmem:[#allocation6 + $0x70] sm:$0xff]  ;;  %v8422_v12 = vld [vmem:[#allocation6 + $0x60] sm:$0xff]  ;;  %vm627_vm5 = vcmask 1044484   ;;  %vm630_vm6 = vcmask 1045509   ;;  %vm15194_vm7 = vcmask 1046534  }
  0x37   : > { %7543 = vrot.lane.b32.xlu1 %v7542_v3, %s8244_s30  ;;  %v8416_v9 = vld [vmem:[#allocation6 + $0x10] sm:$0xff]  ;;  %v8418_v10 = vld [vmem:[#allocation6 + $0x18] sm:$0xff]  ;;  %648 = vmatpush.msra.mxu0 %v8413_v8  ;;  %v8426_v13 = vld [vmem:[#allocation6 + $0x68] sm:$0xff]  ;;  %v7547_v24 = vpack.i.bf16 %v8411_v7, %v594_v6  ;;  %vm15193_vm8 = vcmask 1047559   ;;  %s8246_s11 = smov 112   ;;  %vm15187_vm9 = vcmask 130048  }
  0x38   : > { %v8420_v11 = vld [vmem:[#allocation6 + $0x78] sm:$0xff]  ;;  %7533 = vrot.lane.b32.xlu0 %v7532_v5, %s8244_s30  ;;  %v8428_v14 = vld [vmem:[#allocation6 + $0x50] sm:$0xff]  ;;  %v596_v15 = vld [vmem:[#allocation6 + $0x40] sm:$0xff]  ;;  %v7537_v29 = vpack.i.bf16 %v8418_v10, %v8416_v9  ;;  %vm1574_vm10 = vcmask 130112   ;;  %vm1578_vm11 = vcmask 195712   ;;  %vm1582_vm12 = vcmask 261312  }
  0x39   : > { %668 = vmatpush.msra.mxu1 %v8420_v11  ;;  %649 = vmatpush.msra.mxu0 %v8422_v12  ;;  %v597_v16 = vld [vmem:[#allocation6 + $0x48] sm:$0xff]  ;;  %v8433_v17 = vld [vmem:[%s8389_s3] sm:$0xff]  ;;  %v8439_v20 = vld [vmem:[%s8389_s3 + $0x10] sm:$0xff]  ;;  %v7567_v54 = vpack.i.bf16 %v8420_v11, %v8413_v8  ;;  %vm1586_vm13 = vcmask 326912   ;;  %vm1590_vm14 = vcmask 392512   ;;  %vm1594_vm15 = vcmask 458112  }
  0x3a   : > { %v8436_v18 = vld [vmem:[%s8389_s3 + $0x8] sm:$0xff]  ;;  %v7552_v19 = vpack.i.bf16 %v597_v16, %v596_v15  ;;  %v8442_v21 = vld [vmem:[%s8389_s3 + $0x18] sm:$0xff]  ;;  %v394_v22 = vsel %vm15129_vm0, %v8433_v17, 0.0  ;;  %v8454_v26 = vld [vmem:[%s8389_s3 + $0x20] sm:$0xff]  ;;  %v397_v28 = vsel %vm15129_vm0, %v8439_v20, 0.0  ;;  %s8248_s22 = smov 96  }
  0x3b   : > { %v395_v23 = vsel %vm15129_vm0, %v8436_v18, 0.0  ;;  %669 = vmatpush.msra.mxu1 %v8426_v13  ;;  %v8450_v25 = vld [vmem:[#allocation6 + $0x58] sm:$0xff]  ;;  %650 = vmatpush.msra.mxu0 %v8428_v14  ;;  %v8462_v30 = vld [vmem:[%s8389_s3 + $0x40] sm:$0xff]  ;;  %v8465_v31 = vld [vmem:[%s8389_s3 + $0x48] sm:$0xff]  ;;  %v399_v33 = vsel %vm15129_vm0, %v8442_v21, 0.0  ;;  %v401_v46 = vsel %vm15129_vm0, %v8454_v26, 0.0 }
  0x3c   : > { %v396_v27 = vadd.f32 %v395_v23, %v394_v22  ;;  %7553 = vrot.lane.b32.xlu2 %v7552_v19, %s8244_s30  ;;  %15284 = vst [vmem:[#allocation12_spill] sm:$0xff] %v8462_v30  ;;  %v8468_v32 = vld [vmem:[%s8389_s3 + $0x50] sm:$0xff]  ;;  %v8474_v34 = vld [vmem:[%s8389_s3 + $0x58] sm:$0xff]  ;;  %v415_v36 = vsel %vm15129_vm0, %v8462_v30, 0.0  ;;  %v416_v37 = vsel %vm15129_vm0, %v8465_v31, 0.0  ;;  %v8483_v39 = vld [vmem:[%s8389_s3 + $0x60] sm:$0xff]  ;;  %v7557_v49 = vpack.i.bf16 %v8450_v25, %v8428_v14 }
  0x3d   : > { %15285 = vst [vmem:[#allocation13_spill] sm:$0xff] %v8465_v31  ;;  %670 = vmatpush.msra.mxu1 %v8450_v25  ;;  %651 = vmatpush.msra.mxu0 %v596_v15  ;;  %v418_v38 = vsel %vm15129_vm0, %v8468_v32, 0.0  ;;  %v8486_v40 = vld [vmem:[%s8389_s3 + $0x80] sm:$0xff]  ;;  %v417_v41 = vadd.f32 %v416_v37, %v415_v36  ;;  %v8490_v42 = vld [vmem:[%s8389_s3 + $0x88] sm:$0xff]  ;;  %v8493_v43 = vld [vmem:[%s8389_s3 + $0x90] sm:$0xff]  ;;  %v420_v47 = vsel %vm15129_vm0, %v8474_v34, 0.0 }
  0x3e   : > { %15286 = vst [vmem:[#allocation14_spill] sm:$0xff] %v8468_v32  ;;  %v398_v35 = vadd.f32 %v397_v28, %v396_v27  ;;  %v8496_v44 = vld [vmem:[%s8389_s3 + $0x98] sm:$0xff]  ;;  %v436_v48 = vsel %vm15129_vm0, %v8486_v40, 0.0  ;;  %v8508_v50 = vld [vmem:[%s8389_s3 + $0x28] sm:$0xff]  ;;  %v437_v52 = vsel %vm15129_vm0, %v8490_v42, 0.0  ;;  %v439_v53 = vsel %vm15129_vm0, %v8493_v43, 0.0 }
  0x3f   : > { %15287 = vst [vmem:[#allocation15_spill] sm:$0xff] %v8474_v34  ;;  %671 = vmatpush.msra.mxu1 %v597_v16  ;;  %7548 = vrot.lane.b32.xlu1 %v7547_v24, %s8244_s30  ;;  %v419_v51 = vadd.f32 %v418_v38, %v417_v41  ;;  %v8519_v55 = vld [vmem:[%s8389_s3 + $0xa0] sm:$0xff]  ;;  %v8525_v57 = vld [vmem:[%s8389_s3 + $0xc8] sm:$0xff]  ;;  %v422_v58 = vsel %vm15129_vm0, %v8483_v39, 0.0  ;;  %v438_v59 = vadd.f32 %v437_v52, %v436_v48  ;;  %v8533_v61 = vld [vmem:[%s8389_s3 + $0xd0] sm:$0xff]  ;;  %v441_v3 = vsel %vm15129_vm0, %v8496_v44, 0.0 }
  0x40   : > { %15288 = vst [vmem:[#allocation16_spill] sm:$0xff] %v8483_v39  ;;  %652 = vmatpush.msra.mxu0 %v594_v6  ;;  %v400_v45 = vadd.f32 %v399_v33, %v398_v35  ;;  %7538 = vrot.lane.b32.xlu0 %v7537_v29, %s8244_s30  ;;  %v8522_v56 = vld [vmem:[%s8389_s3 + $0xc0] sm:$0xff]  ;;  %v8530_v60 = vld [vmem:[%s8389_s3 + $0x68] sm:$0xff]  ;;  %v8536_v62 = vld [vmem:[%s8389_s3 + $0xd8] sm:$0xff]  ;;  %v403_v8 = vsel %vm15129_vm0, %v8508_v50, 0.0  ;;  %v458_v14 = vsel %vm15129_vm0, %v8525_v57, 0.0 }
  0x41   : > { %672 = vmatpush.msra.mxu1 %v8411_v7  ;;  %15289 = vst [vmem:[#allocation17_spill] sm:$0xff] %v8522_v56  ;;  %v457_v5 = vsel %vm15129_vm0, %v8522_v56, 0.0  ;;  %v8545_v6 = vld [vmem:[%s8389_s3 + $0xa8] sm:$0xff]  ;;  %v8548_v7 = vld [vmem:[%s8389_s3 + $0xe0] sm:$0xff]  ;;  %v440_v11 = vadd.f32 %v439_v53, %v438_v59  ;;  %v460_v15 = vsel %vm15129_vm0, %v8533_v61, 0.0  ;;  %v8565_v19 = vld [vmem:[%s8389_s3 + $0x110] sm:$0xff] }
  0x42   : > { %653 = vmatpush.msra.mxu0 %v8399_v0  ;;  %15290 = vst [vmem:[#allocation18_spill] sm:$0xff] %v8525_v57  ;;  %v402_v63 = vadd.f32 %v401_v46, %v400_v45  ;;  %v421_v0 = vadd.f32 %v420_v47, %v419_v51  ;;  %v8562_v16 = vld [vmem:[%s8389_s3 + $0x108] sm:$0xff]  ;;  %v443_v22 = vsel %vm15129_vm0, %v8519_v55, 0.0  ;;  %v459_v23 = vadd.f32 %v458_v14, %v457_v5  ;;  %v8573_v24 = vld [vmem:[%s8389_s3 + $0x30] sm:$0xff]  ;;  %v8580_v28 = vld [vmem:[%s8389_s3 + $0x38] sm:$0xff]  ;;  %s8249_s14 = smov 80  }
  0x43   : > { %15291 = vst [vmem:[#allocation19_spill] sm:$0xff] %v8530_v60  ;;  %673 = vmatpush.msra.mxu1 %v8401_v1  ;;  %v7562_v1 = vpack.i.bf16 %v8426_v13, %v8422_v12  ;;  %v424_v13 = vsel %vm15129_vm0, %v8530_v60, 0.0  ;;  %v442_v25 = vadd.f32 %v441_v3, %v440_v11  ;;  %v462_v27 = vsel %vm15129_vm0, %v8536_v62, 0.0  ;;  %v8583_v29 = vld [vmem:[%s8389_s3 + $0xe8] sm:$0xff]  ;;  %v8595_v37 = vld [vmem:[%s8389_s3 + $0x70] sm:$0xff]  ;;  %v8611_v48 = vld [vmem:[%s8389_s3 + $0x140] sm:$0xff] }
  0x44   : > { %15292 = vst [vmem:[#allocation20_spill] sm:$0xff] %v8533_v61  ;;  %654 = vmatpush.msra.mxu0 %v8416_v9  ;;  %v8559_v9 = vld [vmem:[%s8389_s3 + $0x100] sm:$0xff]  ;;  %7558 = vrot.lane.b32.xlu2 %v7557_v49, %s8244_s30  ;;  %v423_v12 = vadd.f32 %v422_v58, %v421_v0  ;;  %v445_v33 = vsel %vm15129_vm0, %v8545_v6, 0.0  ;;  %v461_v35 = vadd.f32 %v460_v15, %v459_v23  ;;  %v464_v41 = vsel %vm15129_vm0, %v8548_v7, 0.0  ;;  %v8605_v47 = vld [vmem:[%s8389_s3 + $0xb0] sm:$0xff]  ;;  %v8628_v3 = vld [vmem:[%s8389_s3 + $0x128] sm:$0xff] }
  0x45   : > { %15293 = vst [vmem:[#allocation21_spill] sm:$0xff] %v8536_v62  ;;  %674 = vmatpush.msra.mxu1 %v8418_v10  ;;  %v8586_v10 = vld [vmem:[%s8389_s3 + $0x118] sm:$0xff]  ;;  %v478_v36 = vsel %vm15129_vm0, %v8559_v9, 0.0  ;;  %v444_v38 = vadd.f32 %v443_v22, %v442_v25  ;;  %v479_v45 = vsel %vm15129_vm0, %v8562_v16, 0.0  ;;  %v481_v46 = vsel %vm15129_vm0, %v8565_v19, 0.0  ;;  %v8616_v53 = vld [vmem:[%s8389_s3 + $0xf0] sm:$0xff] }
  0x46   : > { %15294 = vst [vmem:[#allocation22_spill] sm:$0xff] %v8548_v7  ;;  %655 = vmatpush.msra.mxu0 %v8403_v2  ;;  %v404_v2 = vadd.f32 %v403_v8, %v402_v63  ;;  %v405_v49 = vsel %vm15129_vm0, %v8573_v24, 0.0  ;;  %v463_v51 = vadd.f32 %v462_v27, %v461_v35  ;;  %v480_v52 = vadd.f32 %v479_v45, %v478_v36  ;;  %v8631_v5 = vld [vmem:[%s8389_s3 + $0x150] sm:$0xff]  ;;  %v8639_v22 = vld [vmem:[%s8389_s3 + $0x158] sm:$0xff]  ;;  %s7436_s12 = sshll.u32 %s8311_s28, 3 }
  0x47   : > { %15295 = vst [vmem:[#allocation23_spill] sm:$0xff] %v8583_v29  ;;  %675 = vmatpush.msra.mxu1 %v8407_v4  ;;  %7568 = vrot.lane.b32.xlu1 %v7567_v54, %s8244_s30  ;;  %v8608_v4 = vld [vmem:[%s8389_s3 + $0x120] sm:$0xff]  ;;  %v8619_v54 = vld [vmem:[%s8389_s3 + $0x148] sm:$0xff]  ;;  %v407_v58 = vsel %vm15129_vm0, %v8580_v28, 0.0  ;;  %v425_v59 = vadd.f32 %v424_v13, %v423_v12  ;;  %v466_v63 = vsel %vm15129_vm0, %v8583_v29, 0.0  ;;  %v483_v0 = vsel %vm15129_vm0, %v8586_v10, 0.0  ;;  %s7271_s17 = scalar_lea.hbm %s14782_s7, %s7436_s12 }
  0x48   : > { %15296 = vst [vmem:[#allocation24_spill] sm:$0xff] %v8595_v37  ;;  %7563 = vrot.lane.b32.xlu0 %v7562_v1, %s8244_s30  ;;  %v426_v8 = vsel %vm15129_vm0, %v8595_v37, 0.0  ;;  %v446_v11 = vadd.f32 %v445_v33, %v444_v38  ;;  %v465_v14 = vadd.f32 %v464_v41, %v463_v51  ;;  %v482_v15 = vadd.f32 %v481_v46, %v480_v52  ;;  %v8636_v1 = vld [vmem:[%s8389_s3 + $0x78] sm:$0xff]  ;;  %v8651_v33 = vld [vmem:[%s8389_s3 + $0x130] sm:$0xff]  ;;  %v8658_v41 = vld [vmem:[%s8389_s3 + $0x160] sm:$0xff] }
  0x49   : > { %15297 = vst [vmem:[#allocation25_spill] sm:$0xff] %v8611_v48  ;;  %v406_v23 = vadd.f32 %v405_v49, %v404_v2  ;;  %v447_v12 = vsel %vm15129_vm0, %v8605_v47, 0.0  ;;  %v485_v13 = vsel %vm15129_vm0, %v8608_v4, 0.0  ;;  %v499_v25 = vsel %vm15129_vm0, %v8611_v48, 0.0  ;;  %v8648_v27 = vld [vmem:[%s8389_s3 + $0xb8] sm:$0xff]  ;;  %v8682_v29 = vld [vmem:[%s8389_s3 + $0x180] sm:$0xff] }
  0x4a   : > { %15298 = vst [vmem:[#allocation26_spill] sm:$0xff] %v8616_v53  ;;  %v467_v35 = vadd.f32 %v466_v63, %v465_v14  ;;  %v468_v36 = vsel %vm15129_vm0, %v8616_v53, 0.0  ;;  %v484_v2 = vadd.f32 %v483_v0, %v482_v15  ;;  %v500_v38 = vsel %vm15129_vm0, %v8619_v54, 0.0  ;;  %v8665_v52 = vld [vmem:[%s8389_s3 + $0xf8] sm:$0xff]  ;;  %v8697_v60 = vld [vmem:[%s8389_s3 + $0x190] sm:$0xff] }
  0x4b   : > { %15299 = vst [vmem:[#allocation27_spill] sm:$0xff] %v8619_v54  ;;  %v427_v45 = vadd.f32 %v426_v8, %v425_v59  ;;  %v487_v46 = vsel %vm15129_vm0, %v8628_v3, 0.0  ;;  %v501_v49 = vadd.f32 %v500_v38, %v499_v25  ;;  %v502_v51 = vsel %vm15129_vm0, %v8631_v5, 0.0  ;;  %v8668_v63 = vld [vmem:[%s8389_s3 + $0x138] sm:$0xff]  ;;  %v8675_v8 = vld [vmem:[%s8389_s3 + $0x168] sm:$0xff]  ;;  %v8737_v39 = vld [vmem:[%s8389_s3 + $0x1b0] sm:$0xff] }
  0x4c   : > { %15300 = vst [vmem:[#allocation28_spill] sm:$0xff] %v8631_v5  ;;  %v428_v0 = vsel %vm15129_vm0, %v8636_v1, 0.0  ;;  %v448_v14 = vadd.f32 %v447_v12, %v446_v11  ;;  %v486_v15 = vadd.f32 %v485_v13, %v484_v2  ;;  %v504_v59 = vsel %vm15129_vm0, %v8639_v22, 0.0  ;;  %v8687_v2 = vld [vmem:[%s8389_s3 + $0x170] sm:$0xff]  ;;  %v8749_v32 = vld [vmem:[%s8389_s3 + $0x1b8] sm:$0xff]  ;;  %v8752_v54 = vld [vmem:[%s8389_s3 + $0x1e0] sm:$0xff] }
  0x4d   : > { %15301 = vst [vmem:[#allocation29_spill] sm:$0xff] %v8636_v1  ;;  %v408_v25 = vadd.f32 %v407_v58, %v406_v23  ;;  %v449_v38 = vsel %vm15129_vm0, %v8648_v27, 0.0  ;;  %v489_v53 = vsel %vm15129_vm0, %v8651_v33, 0.0  ;;  %v503_v37 = vadd.f32 %v502_v51, %v501_v49  ;;  %v8690_v1 = vld [vmem:[%s8389_s3 + $0x188] sm:$0xff] }
  0x4e   : > { %15302 = vst [vmem:[#allocation30_spill] sm:$0xff] %v8639_v22  ;;  %v469_v11 = vadd.f32 %v468_v36, %v467_v35  ;;  %v488_v12 = vadd.f32 %v487_v46, %v486_v15  ;;  %v506_v13 = vsel %vm15129_vm0, %v8658_v41, 0.0  ;;  %v429_v58 = vadd.f32 %v428_v0, %v427_v45  ;;  %v8702_v15 = vld [vmem:[%s8389_s3 + $0x178] sm:$0xff] }
  0x4f   : > { %15303 = vst [vmem:[#allocation31_spill] sm:$0xff] %v8648_v27  ;;  %v470_v23 = vsel %vm15129_vm0, %v8665_v52, 0.0  ;;  %v491_v49 = vsel %vm15129_vm0, %v8668_v63, 0.0  ;;  %v505_v51 = vadd.f32 %v504_v59, %v503_v37  ;;  %v450_v35 = vadd.f32 %v449_v38, %v448_v14  ;;  %v8714_v38 = vld [vmem:[%s8389_s3 + $0x1a0] sm:$0xff]  ;;  %v8740_v22 = vld [vmem:[%s8389_s3 + $0x1d8] sm:$0xff] }
  0x50   : > { %15304 = vst [vmem:[#allocation32_spill] sm:$0xff] %v8658_v41  ;;  %v490_v36 = vadd.f32 %v489_v53, %v488_v12  ;;  %v508_v46 = vsel %vm15129_vm0, %v8675_v8, 0.0  ;;  %v8705_v41 = vld [vmem:[%s8389_s3 + $0x198] sm:$0xff]  ;;  %v409_v45 = vrot.slane %v408_v25, 4  ;;  %v471_v37 = vadd.f32 %v470_v23, %v469_v11 }
  0x51   : > { %15305 = vst [vmem:[#allocation33_spill] sm:$0xff] %v8665_v52  ;;  %v507_v0 = vadd.f32 %v506_v13, %v505_v51  ;;  %v520_v52 = vsel %vm15129_vm0, %v8682_v29, 0.0  ;;  %v510_v53 = vsel %vm15129_vm0, %v8687_v2, 0.0  ;;  %v521_v14 = vsel %vm15129_vm0, %v8690_v1, 0.0 }
  0x52   : > { %15306 = vst [vmem:[#allocation34_spill] sm:$0xff] %v8668_v63  ;;  %v492_v59 = vadd.f32 %v491_v49, %v490_v36  ;;  %v430_v12 = vrot.slane %v429_v58, 4  ;;  %v522_v13 = vadd.f32 %v521_v14, %v520_v52  ;;  %v523_v51 = vsel %vm15129_vm0, %v8697_v60, 0.0  ;;  %v8723_v49 = vld [vmem:[%s8389_s3 + $0x1a8] sm:$0xff]  ;;  %v8726_v36 = vld [vmem:[%s8389_s3 + $0x1c0] sm:$0xff]  ;;  %v8732_v52 = vld [vmem:[%s8389_s3 + $0x1d0] sm:$0xff] }
  0x53   : > { %15307 = vst [vmem:[#allocation35_spill] sm:$0xff] %v8675_v8  ;;  %v509_v8 = vadd.f32 %v508_v46, %v507_v0  ;;  %v512_v11 = vsel %vm15129_vm0, %v8702_v15, 0.0  ;;  %v525_v23 = vsel %vm15129_vm0, %v8705_v41, 0.0  ;;  %v472_v0 = vrot.slane %v471_v37, 4 }
  0x54   : > { %15308 = vst [vmem:[#allocation36_spill] sm:$0xff] %v8682_v29  ;;  %v451_v29 = vrot.slane %v450_v35, 4  ;;  %v524_v46 = vadd.f32 %v523_v51, %v522_v13  ;;  %v493_v14 = vrot.slane %v492_v59, 4  ;;  %v410_v62 = vadd.f32 %v409_v45, %v408_v25 }
  0x55   : > { %15309 = vst [vmem:[#allocation37_spill] sm:$0xff] %v8687_v2  ;;  %v8729_v2 = vld [vmem:[%s8389_s3 + $0x1c8] sm:$0xff]  ;;  %v511_v7 = vadd.f32 %v510_v53, %v509_v8  ;;  %v431_v34 = vadd.f32 %v430_v12, %v429_v58  ;;  %v529_v53 = vsel %vm15129_vm0, %v8723_v49, 0.0  ;;  %v541_v13 = vsel %vm15129_vm0, %v8726_v36, 0.0 }
  0x56   : > { %15310 = vst [vmem:[#allocation38_spill] sm:$0xff] %v8702_v15  ;;  %v527_v15 = vsel %vm15129_vm0, %v8714_v38, 0.0  ;;  %v526_v61 = vadd.f32 %v525_v23, %v524_v46  ;;  %v452_v8 = vadd.f32 %v451_v29, %v450_v35  ;;  %v542_v51 = vsel %vm15129_vm0, %v8729_v2, 0.0 }
  0x57   : > { %15311 = vst [vmem:[#allocation39_spill] sm:$0xff] %v8726_v36  ;;  %v513_v5 = vadd.f32 %v512_v11, %v511_v7  ;;  %v543_v7 = vadd.f32 %v542_v51, %v541_v13  ;;  %v544_v29 = vsel %vm15129_vm0, %v8732_v52, 0.0  ;;  %v473_v58 = vadd.f32 %v472_v0, %v471_v37  ;;  %v8761_v11 = vld [vmem:[%s8389_s3 + $0x1e8] sm:$0xff] }
  0x58   : > { %15312 = vst [vmem:[#allocation40_spill] sm:$0xff] %v8729_v2  ;;  %v528_v25 = vadd.f32 %v527_v15, %v526_v61  ;;  %v494_v35 = vadd.f32 %v493_v14, %v492_v59  ;;  %v531_v45 = vsel %vm15129_vm0, %v8737_v39, 0.0  ;;  %v546_v12 = vsel %vm15129_vm0, %v8740_v22, 0.0  ;;  %v8768_v59 = vld [vmem:[%s8389_s3 + $0x1f0] sm:$0xff] }
  0x59   : > { %15313 = vst [vmem:[#allocation41_spill] sm:$0xff] %v8732_v52  ;;  %v514_v57 = vrot.slane %v513_v5, 4  ;;  %v411_v23 = vrot.slane %v410_v62, 2  ;;  %v545_v2 = vadd.f32 %v544_v29, %v543_v7  ;;  %v432_v61 = vrot.slane %v431_v34, 2 }
  0x5a   : > { %15314 = vst [vmem:[#allocation42_spill] sm:$0xff] %v8740_v22  ;;  %v530_v31 = vadd.f32 %v529_v53, %v528_v25  ;;  %v533_v15 = vsel %vm15129_vm0, %v8749_v32, 0.0  ;;  %v548_v37 = vsel %vm15129_vm0, %v8752_v54, 0.0  ;;  %v453_v0 = vrot.slane %v452_v8, 2  ;;  %v8773_v53 = vld [vmem:[%s8389_s3 + $0x1f8] sm:$0xff] }
  0x5b   : > { %15315 = vst [vmem:[#allocation43_spill] sm:$0xff] %v8752_v54  ;;  %v515_v46 = vadd.f32 %v514_v57, %v513_v5  ;;  %v547_v13 = vadd.f32 %v546_v12, %v545_v2  ;;  %v8245_v51 = vmov 64.0   ;;  %v474_v22 = vrot.slane %v473_v58, 2 }
  0x5c   : > { %15316 = vst [vmem:[#allocation44_spill] sm:$0xff] %v8761_v11  ;;  %v532_v14 = vadd.f32 %v531_v45, %v530_v31  ;;  %7577 = vrcp.f32 %v8245_v51  ;;  %v495_v52 = vrot.slane %v494_v35, 2  ;;  %v550_v5 = vsel %vm15129_vm0, %v8761_v11, 0.0 }
  0x5d   : > { %v516_v57 = vrot.slane %v515_v46, 2  ;;  %15317 = vst [vmem:[#allocation45_spill] sm:$0xff] %v8773_v53  ;;  %v549_v7 = vadd.f32 %v548_v37, %v547_v13  ;;  %v412_v29 = vadd.f32 %v411_v23, %v410_v62  ;;  %v433_v48 = vadd.f32 %v432_v61, %v431_v34 }
  0x5e   : > { %v534_v25 = vadd.f32 %v533_v15, %v532_v14  ;;  %v552_v54 = vsel %vm15129_vm0, %v8768_v59, 0.0  ;;  %v454_v56 = vadd.f32 %v453_v0, %v452_v8  ;;  %v475_v45 = vadd.f32 %v474_v22, %v473_v58 }
  0x5f   : > { %v551_v2 = vadd.f32 %v550_v5, %v549_v7  ;;  %v496_v12 = vadd.f32 %v495_v52, %v494_v35  ;;  %v517_v51 = vadd.f32 %v516_v57, %v515_v46  ;;  %v554_v30 = vsel %vm15129_vm0, %v8773_v53, 0.0 }
  0x60   : > { %v535_v31 = vrot.slane %v534_v25, 4  ;;  %v413_v27 = vrot.slane %v412_v29, 1  ;;  %v434_v15 = vrot.slane %v433_v48, 1  ;;  %v455_v62 = vrot.slane %v454_v56, 1 }
  0x61   : > { %v553_v63 = vadd.f32 %v552_v54, %v551_v2  ;;  %v476_v61 = vrot.slane %v475_v45, 1  ;;  %v497_v14 = vrot.slane %v496_v12, 1  ;;  %v518_v8 = vrot.slane %v517_v51, 1 }
  0x62   : > { %v7578_v36 = vpop.eup %7577  ;;  %v536_v11 = vadd.f32 %v535_v31, %v534_v25  ;;  %v414_v52 = vadd.f32 %v413_v27, %v412_v29  ;;  %v435_v58 = vadd.f32 %v434_v15, %v433_v48  ;;  %v456_v46 = vadd.f32 %v455_v62, %v454_v56 }
  0x63   : > { %v563_v37 = vmul.f32 64.0, %v7578_v36  ;;  %v555_v23 = vadd.f32 %v554_v30, %v553_v63  ;;  %vm567_vm1 = vweird.f32 %v7578_v36  ;;  %v477_v54 = vadd.f32 %v476_v61, %v475_v45  ;;  %v7575_v30 = vld [vmem:[%s14776_s1] ss:$0 sm:$0xff] }
  0x64   : > { %v537_v34 = vrot.slane %v536_v11, 2  ;;  %v498_v25 = vadd.f32 %v497_v14, %v496_v12  ;;  %v519_v7 = vadd.f32 %v518_v8, %v517_v51 }
  0x65   : > { %v564_v0 = vsub.f32 1.0, %v563_v37  ;;  %v556_v22 = vrot.slane %v555_v23, 4 }
  0x66   : > { %v538_v13 = vadd.f32 %v537_v34, %v536_v11 }
  0x67   : > { %v565_v35 = vmul.f32 %v7578_v36, %v564_v0  ;;  %v557_v5 = vadd.f32 %v556_v22, %v555_v23 }
  0x68   : > { %v539_v57 = vrot.slane %v538_v13, 1 }
  0x69   : > { %v566_v31 = vadd.f32 %v7578_v36, %v565_v35  ;;  %v558_v53 = vrot.slane %v557_v5, 2 }
  0x6a   : > { %v540_v2 = vadd.f32 %v539_v57, %v538_v13 }
  0x6b   : > { %v568_v63 = vsel %vm567_vm1, %v7578_v36, %v566_v31  ;;  %v559_v11 = vadd.f32 %v558_v53, %v557_v5  ;;  %vm15147_vm1 = vcmask 523712  }
  0x6c   : > { %v569_v27 = vmul.f32 %v568_v63, %v414_v52  ;;  %v570_v48 = vmul.f32 %v568_v63, %v435_v58  ;;  %v571_v29 = vmul.f32 %v568_v63, %v456_v46  ;;  %v572_v56 = vmul.f32 %v568_v63, %v477_v54 }
  0x6d   : > { %v573_v15 = vmul.f32 %v568_v63, %v498_v25  ;;  %v574_v37 = vmul.f32 %v568_v63, %v519_v7  ;;  %v575_v62 = vmul.f32 %v568_v63, %v540_v2  ;;  %v560_v45 = vrot.slane %v559_v11, 1 }
  0x6e   : > { %v580_v12 = vadd.f32 %v7575_v30, %v569_v27  ;;  %v581_v51 = vadd.f32 %v7575_v30, %v570_v48  ;;  %v582_v34 = vadd.f32 %v7575_v30, %v571_v29  ;;  %v583_v23 = vadd.f32 %v7575_v30, %v572_v56  ;;  %v8796_v56 = vld [vmem:[%s14779_s4] sm:$0x3] }
  0x6f   : > { %v584_v61 = vadd.f32 %v7575_v30, %v573_v15  ;;  %v585_v14 = vadd.f32 %v7575_v30, %v574_v37  ;;  %v586_v8 = vadd.f32 %v7575_v30, %v575_v62  ;;  %v561_v0 = vadd.f32 %v560_v45, %v559_v11  ;;  %15318 = vst [vmem:[#allocation46_spill] sm:$0xff] %v8796_v56 }
  0x70   : > { %v617_v13 = vrot.slane %v581_v51, 7  ;;  %v620_v36 = vrot.slane %v582_v34, 6  ;;  %v623_v53 = vrot.slane %v583_v23, 5  ;;  %v14817_v37 = vperm.slane %v8796_v56, 1 }
  0x71   : > { %v626_v22 = vrot.slane %v584_v61, 4  ;;  %v576_v52 = vmul.f32 %v568_v63, %v561_v0  ;;  %v629_v35 = vrot.slane %v585_v14, 3  ;;  %v632_v57 = vrot.slane %v586_v8, 2 }
  0x72   : > { %v619_v58 = vsel %vm618_vm2, %v617_v13, %v580_v12  ;;  %v605_v62 = vperm.slane %v8796_v56, 0  ;;  %811 = vrot.lane.b32.xlu0 %v14817_v37, %s8244_s30 }
  0x73   : > { %v622_v46 = vsel %vm621_vm3, %v620_v36, %v619_v58  ;;  %v587_v5 = vadd.f32 %v7575_v30, %v576_v52 }
  0x74   : > { %v625_v54 = vsel %vm624_vm4, %v623_v53, %v622_v46  ;;  %809 = vrot.lane.b32.xlu2 %v605_v62, %s8244_s30 }
  0x75   : > { %v628_v25 = vsel %vm627_vm5, %v626_v22, %v625_v54  ;;  %v635_v31 = vrot.slane %v587_v5, 1 }
  0x76   : > { %v631_v7 = vsel %vm630_vm6, %v629_v35, %v628_v25 }
  0x77   : > { %v634_v2 = vsel %vm15194_vm7, %v632_v57, %v631_v7 }
  0x78   : > { %v637_v63 = vsel %vm15193_vm8, %v635_v31, %v634_v2 }
  0x79   : > { %7368 = vmatmul.msk.f32.vlgmr.msra.gmra.mxu0 %vm15129_vm0, %v637_v63  ;;  %7369 = vmatmul.msk.f32.vlgmr.msra.gmra.mxu1 %vm15129_vm0, %v637_v63  ;;  %v8817_v63 = vld [vmem:[%s14777_s2] sm:$0xff] }
  0x96   : > { %v7554_v30 = vpop.permute.xlu2 %7553 }
  0x97   : > { %v7556_v36 = vunpack.i.h.bf16 %v7554_v30  ;;  %v7555_v53 = vunpack.i.l.bf16 %v7554_v30  ;;  %v681_v30 = vadd.f32 %v8817_v63, %v8433_v17  ;;  %v8841_v17 = vld [vmem:[%s14777_s2 + $0x10] sm:$0xff] }
  0x99   : > { %v797_v57 = vsel %vm15129_vm0, %v7555_v53, %v7556_v36  ;;  %v15322_v53 = vld [vmem:[#allocation12_spill] sm:$0xff] }
  0x9e   : > { %v7559_v15 = vpop.permute.xlu2 %7558 }
  0x9f   : > { %v7561_v23 = vunpack.i.h.bf16 %v7559_v15  ;;  %v7560_v61 = vunpack.i.l.bf16 %v7559_v15  ;;  %v713_v15 = vadd.f32 %v8817_v63, %v8559_v9 }
  0xa1   : > { %v798_v22 = vsel %vm15129_vm0, %v7560_v61, %v7561_v23 }
  0xa9   : > { %v7544_v11 = vpop.permute.xlu1 %7543 }
  0xaa   : > { %v8791_v27 = vpop.permute.xlu0 %7533  ;;  %v7546_v35 = vunpack.i.h.bf16 %v7544_v11  ;;  %v7545_v46 = vunpack.i.l.bf16 %v7544_v11  ;;  %v8822_v11 = vld [vmem:[%s14777_s2 + $0x8] sm:$0xff] }
  0xab   : > { %v7536_v7 = vunpack.i.h.bf16 %v8791_v27  ;;  %v7535_v31 = vunpack.i.l.bf16 %v8791_v27  ;;  %v698_v9 = vadd.f32 %v8822_v11, %v8490_v42  ;;  %v683_v42 = vadd.f32 %v8841_v17, %v8439_v20  ;;  %v8875_v20 = vld [vmem:[%s14777_s2 + $0x20] sm:$0xff] }
  0xac   : > { %v795_v2 = vsel %vm15129_vm0, %v7545_v46, %v7546_v35  ;;  %v15325_v46 = vld [vmem:[#allocation40_spill] sm:$0xff] }
  0xb1   : > { %v7549_v48 = vpop.permute.xlu1 %7548 }
  0xb2   : > { %v7539_v29 = vpop.permute.xlu0 %7538  ;;  %v7551_v52 = vunpack.i.h.bf16 %v7549_v48  ;;  %v7550_v58 = vunpack.i.l.bf16 %v7549_v48  ;;  %v697_v48 = vadd.f32 %v8817_v63, %v8486_v40  ;;  %v682_v40 = vadd.f32 %v8822_v11, %v8436_v18  ;;  %v8858_v18 = vld [vmem:[%s14777_s2 + $0x18] sm:$0xff] }
  0xb3   : > { %v7541_v5 = vunpack.i.h.bf16 %v7539_v29  ;;  %v7540_v54 = vunpack.i.l.bf16 %v7539_v29  ;;  %v793_v29 = vsel %vm15129_vm0, %v7535_v31, %v7536_v7  ;;  %v15328_v31 = vld [vmem:[#allocation27_spill] sm:$0xff] }
  0xb4   : > { %v796_v25 = vsel %vm15129_vm0, %v7550_v58, %v7551_v52  ;;  %v15324_v58 = vld [vmem:[#allocation25_spill] sm:$0xff] }
  0xb5   : > { %v794_v27 = vsel %vm15129_vm0, %v7540_v54, %v7541_v5  ;;  %v721_v35 = vadd.f32 %v8817_v63, %v15324_v58  ;;  %v15326_v5 = vld [vmem:[#allocation13_spill] sm:$0xff] }
  0xb6   : > { %v690_v54 = vadd.f32 %v8822_v11, %v15326_v5 }
  0xb9   : > { %v7569_v45 = vpop.permute.xlu1 %7568 }
  0xba   : > { %v7571_v12 = vunpack.i.h.bf16 %v7569_v45  ;;  %v7570_v51 = vunpack.i.l.bf16 %v7569_v45  ;;  %v7564_v34 = vpop.permute.xlu0 %7563  ;;  %v730_v45 = vadd.f32 %v8822_v11, %v8690_v1  ;;  %v714_v1 = vadd.f32 %v8822_v11, %v8562_v16 }
  0xbb   : > { %v7566_v14 = vunpack.i.h.bf16 %v7564_v34  ;;  %v7565_v8 = vunpack.i.l.bf16 %v7564_v34  ;;  %v699_v16 = vadd.f32 %v8841_v17, %v8493_v43  ;;  %v684_v43 = vadd.f32 %v8858_v18, %v8442_v21  ;;  %v8892_v21 = vld [vmem:[%s14777_s2 + $0x28] sm:$0xff] }
  0xbc   : > { %v800_v0 = vsel %vm15129_vm0, %v7570_v51, %v7571_v12  ;;  %v731_v12 = vadd.f32 %v8841_v17, %v8697_v60  ;;  %v715_v60 = vadd.f32 %v8841_v17, %v8565_v19  ;;  %v732_v51 = vadd.f32 %v8858_v18, %v8705_v41 }
  0xbd   : > { %1015 = vmatpush.msrb.mxu0 %v800_v0  ;;  %7441 = vmatpush.msrb.mxu1 %v800_v0  ;;  %v799_v13 = vsel %vm15129_vm0, %v7565_v8, %v7566_v14  ;;  %v700_v19 = vadd.f32 %v8858_v18, %v8496_v44  ;;  %v716_v41 = vadd.f32 %v8858_v18, %v8586_v10 }
  0xbe   : > { %7442 = vmatpush.msra.mxu2 %v800_v0  ;;  %7443 = vmatpush.msra.mxu3 %v800_v0  ;;  %v733_v34 = vadd.f32 %v8875_v20, %v8714_v38  ;;  %v685_v44 = vadd.f32 %v8875_v20, %v8454_v26  ;;  %v701_v10 = vadd.f32 %v8875_v20, %v8519_v55  ;;  %v8909_v26 = vld [vmem:[%s14777_s2 + $0x30] sm:$0xff] }
  0xbf   : > { %1016 = vmatpush.msrb.mxu0 %v799_v13  ;;  %7444 = vmatpush.msrb.mxu1 %v799_v13  ;;  %v717_v38 = vadd.f32 %v8875_v20, %v8608_v4  ;;  %v734_v23 = vadd.f32 %v8892_v21, %v8723_v49  ;;  %v686_v55 = vadd.f32 %v8892_v21, %v8508_v50  ;;  %v8926_v50 = vld [vmem:[%s14777_s2 + $0x38] sm:$0xff] }
  0xc0   : > { %7445 = vmatpush.msra.mxu2 %v799_v13  ;;  %7446 = vmatpush.msra.mxu3 %v799_v13  ;;  %v702_v4 = vadd.f32 %v8892_v21, %v8545_v6  ;;  %v718_v49 = vadd.f32 %v8892_v21, %v8628_v3  ;;  %v735_v61 = vadd.f32 %v8909_v26, %v8737_v39  ;;  %v15321_v13 = vld [vmem:[#allocation39_spill] sm:$0xff] }
  0xc1   : > { %1017 = vmatpush.msrb.mxu0 %v798_v22  ;;  %7447 = vmatpush.msrb.mxu1 %v798_v22  ;;  %v687_v3 = vadd.f32 %v8909_v26, %v8573_v24  ;;  %v703_v39 = vadd.f32 %v8909_v26, %v8605_v47  ;;  %v719_v8 = vadd.f32 %v8909_v26, %v8651_v33  ;;  %v15319_v47 = vld [vmem:[#allocation31_spill] sm:$0xff] }
  0xc2   : > { %7448 = vmatpush.msra.mxu2 %v798_v22  ;;  %7449 = vmatpush.msra.mxu3 %v798_v22  ;;  %v736_v0 = vadd.f32 %v8926_v50, %v8749_v32  ;;  %v688_v24 = vadd.f32 %v8926_v50, %v8580_v28  ;;  %v704_v33 = vadd.f32 %v8926_v50, %v15319_v47  ;;  %v15323_v22 = vld [vmem:[#allocation17_spill] sm:$0xff] }
  0xc3   : > { %1018 = vmatpush.msrb.mxu0 %v797_v57  ;;  %7450 = vmatpush.msrb.mxu1 %v797_v57  ;;  %v737_v36 = vadd.f32 %v8817_v63, %v15321_v13  ;;  %v689_v28 = vadd.f32 %v8817_v63, %v15322_v53  ;;  %v705_v52 = vadd.f32 %v8817_v63, %v15323_v22  ;;  %v15352_v22 = vld [vmem:[#allocation38_spill] sm:$0xff] }
  0xc4   : > { %7451 = vmatpush.msra.mxu2 %v797_v57  ;;  %7452 = vmatpush.msra.mxu3 %v797_v57  ;;  %v738_v57 = vadd.f32 %v8822_v11, %v15325_v46 }
  0xc5   : > { %1019 = vmatpush.msrb.mxu0 %v796_v25  ;;  %7453 = vmatpush.msrb.mxu1 %v796_v25 }
  0xc6   : > { %7454 = vmatpush.msra.mxu2 %v796_v25  ;;  %7455 = vmatpush.msra.mxu3 %v796_v25  ;;  %v15327_v25 = vld [vmem:[#allocation18_spill] sm:$0xff] }
  0xc7   : > { %1020 = vmatpush.msrb.mxu0 %v795_v2  ;;  %7456 = vmatpush.msrb.mxu1 %v795_v2  ;;  %v706_v7 = vadd.f32 %v8822_v11, %v15327_v25  ;;  %v15353_v25 = vld [vmem:[#allocation36_spill] sm:$0xff] }
  0xc8   : > { %7457 = vmatpush.msra.mxu2 %v795_v2  ;;  %7458 = vmatpush.msra.mxu3 %v795_v2  ;;  %v722_v2 = vadd.f32 %v8822_v11, %v15328_v31 }
  0xc9   : > { %1021 = vmatpush.msrb.mxu0 %v794_v27  ;;  %7459 = vmatpush.msrb.mxu1 %v794_v27 }
  0xca   : > { %7460 = vmatpush.msra.mxu2 %v794_v27  ;;  %7461 = vmatpush.msra.mxu3 %v794_v27  ;;  %v15329_v27 = vld [vmem:[#allocation41_spill] sm:$0xff] }
  0xcb   : > { %1022 = vmatpush.msrb.mxu0 %v793_v29  ;;  %7462 = vmatpush.msrb.mxu1 %v793_v29 }
  0xcc   : > { %7463 = vmatpush.msra.mxu2 %v793_v29  ;;  %7464 = vmatpush.msra.mxu3 %v793_v29 }
  0xcd   : > { %7370 = vmatmul.msk.f32.vlgmr.msrb.gmra.mxu0 %vm15129_vm0, %v681_v30  ;;  %7386 = vmatmul.msk.f32.vlgmr.msrb.gmra.mxu1 %vm15129_vm0, %v697_v48  ;;  %v739_v30 = vadd.f32 %v8841_v17, %v15329_v27  ;;  %v15330_v48 = vld [vmem:[#allocation14_spill] sm:$0xff] }
  0xce   : > { %7402 = vmatmul.msk.f32.vlgmr.msra.gmra.mxu2 %vm15129_vm0, %v713_v15  ;;  %7419 = vmatmul.msk.f32.vlgmr.msra.gmra.mxu3 %vm15129_vm0, %v730_v45  ;;  %v691_v29 = vadd.f32 %v8841_v17, %v15330_v48  ;;  %v15331_v15 = vld [vmem:[#allocation20_spill] sm:$0xff] }
  0xcf   : > { %v707_v45 = vadd.f32 %v8841_v17, %v15331_v15 }
  0xd5   : > { %7371 = vmatmul.msk.f32.gmra.mxu0 %vm15129_vm0, %v682_v40  ;;  %7387 = vmatmul.msk.f32.gmra.mxu1 %vm15129_vm0, %v698_v9  ;;  %v15332_v40 = vld [vmem:[#allocation28_spill] sm:$0xff]  ;;  %v15333_v9 = vld [vmem:[#allocation42_spill] sm:$0xff] }
  0xd6   : > { %7403 = vmatmul.msk.f32.gmra.mxu2 %vm15129_vm0, %v714_v1  ;;  %7420 = vmatmul.msk.f32.gmra.mxu3 %vm15129_vm0, %v731_v12  ;;  %v723_v11 = vadd.f32 %v8841_v17, %v15332_v40  ;;  %v740_v1 = vadd.f32 %v8858_v18, %v15333_v9  ;;  %v15334_v12 = vld [vmem:[#allocation15_spill] sm:$0xff] }
  0xdd   : > { %7372 = vmatmul.msk.f32.gmra.mxu0 %vm15129_vm0, %v683_v42  ;;  %7388 = vmatmul.msk.f32.gmra.mxu1 %vm15129_vm0, %v699_v16  ;;  %v692_v42 = vadd.f32 %v8858_v18, %v15334_v12  ;;  %v15335_v16 = vld [vmem:[#allocation21_spill] sm:$0xff] }
  0xde   : > { %7404 = vmatmul.msk.f32.gmra.mxu2 %vm15129_vm0, %v715_v60  ;;  %7421 = vmatmul.msk.f32.gmra.mxu3 %vm15129_vm0, %v732_v51  ;;  %v708_v60 = vadd.f32 %v8858_v18, %v15335_v16  ;;  %v15336_v51 = vld [vmem:[#allocation30_spill] sm:$0xff] }
  0xdf   : > { %v724_v17 = vadd.f32 %v8858_v18, %v15336_v51 }
  0xe4   : > { %v812_v58 = vpop.permute.xlu0 %811 }
  0xe5   : > { %7373 = vmatmul.msk.f32.gmra.mxu0 %vm15129_vm0, %v684_v43  ;;  %7389 = vmatmul.msk.f32.gmra.mxu1 %vm15129_vm0, %v700_v19  ;;  %v15337_v43 = vld [vmem:[#allocation43_spill] sm:$0xff] }
  0xe6   : > { %7405 = vmatmul.msk.f32.gmra.mxu2 %vm15129_vm0, %v716_v41  ;;  %7422 = vmatmul.msk.f32.gmra.mxu3 %vm15129_vm0, %v733_v34  ;;  %v741_v19 = vadd.f32 %v8875_v20, %v15337_v43  ;;  %v15338_v41 = vld [vmem:[#allocation16_spill] sm:$0xff] }
  0xe7   : > { %v693_v34 = vadd.f32 %v8875_v20, %v15338_v41 }
  0xed   : > { %7374 = vmatmul.msk.f32.gmra.mxu0 %vm15129_vm0, %v685_v44  ;;  %7390 = vmatmul.msk.f32.gmra.mxu1 %vm15129_vm0, %v701_v10  ;;  %v15339_v44 = vld [vmem:[#allocation22_spill] sm:$0xff] }
  0xee   : > { %7406 = vmatmul.msk.f32.gmra.mxu2 %vm15129_vm0, %v717_v38  ;;  %7423 = vmatmul.msk.f32.gmra.mxu3 %vm15129_vm0, %v734_v23  ;;  %v709_v10 = vadd.f32 %v8875_v20, %v15339_v44  ;;  %v15340_v38 = vld [vmem:[#allocation32_spill] sm:$0xff] }
  0xef   : > { %v725_v18 = vadd.f32 %v8875_v20, %v15340_v38  ;;  %v15341_v23 = vld [vmem:[#allocation44_spill] sm:$0xff] }
  0xf5   : > { %7375 = vmatmul.msk.f32.gmra.mxu0 %vm15129_vm0, %v686_v55  ;;  %7391 = vmatmul.msk.f32.gmra.mxu1 %vm15129_vm0, %v702_v4  ;;  %v742_v55 = vadd.f32 %v8892_v21, %v15341_v23  ;;  %v15342_v4 = vld [vmem:[#allocation19_spill] sm:$0xff] }
  0xf6   : > { %7407 = vmatmul.msk.f32.gmra.mxu2 %vm15129_vm0, %v718_v49  ;;  %7424 = vmatmul.msk.f32.gmra.mxu3 %vm15129_vm0, %v735_v61  ;;  %v657_v6 = vpop.f32.mrf.mxu0  ;;  %v694_v49 = vadd.f32 %v8892_v21, %v15342_v4  ;;  %v15343_v61 = vld [vmem:[#allocation23_spill] sm:$0xff] }
  0xf7   : > { %v8934_v14 = vadd.f32 %v657_v6, %v605_v62  ;;  %v15320_v62 = vld [vmem:[#allocation34_spill] sm:$0xff]  ;;  %v710_v6 = vadd.f32 %v8892_v21, %v15343_v61 }
  0xf8   : > { %v720_v32 = vadd.f32 %v8926_v50, %v15320_v62  ;;  %v15348_v62 = vld [vmem:[#allocation45_spill] sm:$0xff] }
  0xf9   : > { %1217 = vrot.lane.b32.xlu1 %v8934_v14, %s8244_s30  ;;  %v9045_v13 = vmul.f32 0.25, %v8934_v14 }
  0xfb   : > { %v1227_v46 = vrot.slane %v9045_v13, 2  ;;  %v1229_v48 = vrot.slane %v9045_v13, 4 }
  0xfd   : > { %7376 = vmatmul.msk.f32.gmra.mxu0 %vm15129_vm0, %v687_v3  ;;  %7392 = vmatmul.msk.f32.gmra.mxu1 %vm15129_vm0, %v703_v39  ;;  %v15344_v3 = vld [vmem:[#allocation35_spill] sm:$0xff]  ;;  %v743_v39 = vadd.f32 %v8909_v26, %v8768_v59  ;;  %v744_v59 = vadd.f32 %v8926_v50, %v15348_v62  ;;  %v9063_v5 = vperm.slane %v1227_v46, 0 }
  0xfe   : > { %7408 = vmatmul.msk.f32.gmra.mxu2 %vm15129_vm0, %v719_v8  ;;  %7425 = vmatmul.msk.f32.gmra.mxu3 %vm15129_vm0, %v736_v0  ;;  %v726_v20 = vadd.f32 %v8892_v21, %v15344_v3  ;;  %v15345_v8 = vld [vmem:[#allocation24_spill] sm:$0xff] }
  0xff   : > { %v695_v0 = vadd.f32 %v8909_v26, %v15345_v8 }
 0x105   : > { %7377 = vmatmul.msk.f32.gmra.mxu0 %vm15129_vm0, %v688_v24  ;;  %7393 = vmatmul.msk.f32.gmra.mxu1 %vm15129_vm0, %v704_v33  ;;  %v15346_v24 = vld [vmem:[#allocation26_spill] sm:$0xff]  ;;  %v15347_v33 = vld [vmem:[#allocation37_spill] sm:$0xff] }
 0x106   : > { %7409 = vmatmul.msk.f32.gmra.mxu2 %vm15129_vm0, %v720_v32  ;;  %7426 = vmatmul.msk.f32.gmra.mxu3 %vm15129_vm0, %v737_v36  ;;  %v711_v47 = vadd.f32 %v8909_v26, %v15346_v24  ;;  %v727_v21 = vadd.f32 %v8909_v26, %v15347_v33  ;;  %v9042_v32 = vpop.f32.mrf.mxu1  ;;  %v15350_v36 = vld [vmem:[#allocation29_spill] sm:$0xff] }
 0x107   : > { %15349 = vst [vmem:[#allocation31_spill] sm:$0xff] %v9042_v32  ;;  %v696_v53 = vadd.f32 %v8926_v50, %v15350_v36  ;;  %v15351_v26 = vld [vmem:[#allocation33_spill] sm:$0xff] }
 0x10d   : > { %7378 = vmatmul.msk.f32.gmra.mxu0 %vm15129_vm0, %v689_v28  ;;  %7394 = vmatmul.msk.f32.gmra.mxu1 %vm15129_vm0, %v705_v52  ;;  %v712_v28 = vadd.f32 %v8926_v50, %v15351_v26  ;;  %v728_v52 = vadd.f32 %v8926_v50, %v15352_v22 }
 0x10e   : > { %7410 = vmatmul.msk.f32.gmra.mxu2 %vm15129_vm0, %v721_v35  ;;  %7427 = vmatmul.msk.f32.gmra.mxu3 %vm15129_vm0, %v738_v57  ;;  %v810_v35 = vpop.permute.xlu2 %809  ;;  %v9061_v57 = vperm.slane %v9045_v13, 0 }
 0x10f   : > { %v9058_v14 = vsel %vm15129_vm0, %v810_v35, %v812_v58 }
 0x115   : > { %7379 = vmatmul.msk.f32.gmra.mxu0 %vm15129_vm0, %v690_v54  ;;  %7395 = vmatmul.msk.f32.gmra.mxu1 %vm15129_vm0, %v706_v7  ;;  %v729_v7 = vadd.f32 %v8817_v63, %v15353_v25  ;;  %v9087_v63 = vperm.slane %v1229_v48, 0 }
 0x116   : > { %7411 = vmatmul.msk.f32.gmra.mxu2 %vm15129_vm0, %v722_v2  ;;  %7428 = vmatmul.msk.f32.gmra.mxu3 %vm15129_vm0, %v739_v30 }
 0x11d   : > { %7380 = vmatmul.msk.f32.gmra.mxu0 %vm15129_vm0, %v691_v29  ;;  %7396 = vmatmul.msk.f32.gmra.mxu1 %vm15129_vm0, %v707_v45 }
 0x11e   : > { %7412 = vmatmul.msk.f32.gmra.mxu2 %vm15129_vm0, %v723_v11  ;;  %7429 = vmatmul.msk.f32.gmra.mxu3 %vm15129_vm0, %v740_v1 }
 0x125   : > { %7381 = vmatmul.msk.f32.gmra.mxu0 %vm15129_vm0, %v692_v42  ;;  %7397 = vmatmul.msk.f32.gmra.mxu1 %vm15129_vm0, %v708_v60 }
 0x126   : > { %7413 = vmatmul.msk.f32.gmra.mxu2 %vm15129_vm0, %v724_v17  ;;  %7430 = vmatmul.msk.f32.gmra.mxu3 %vm15129_vm0, %v741_v19  ;;  %v1231_v19 = vrot.slane %v9045_v13, 6 }
 0x128   : > { %v9129_v23 = vperm.slane %v1231_v19, 0 }
 0x12d   : > { %7382 = vmatmul.msk.f32.gmra.mxu0 %vm15129_vm0, %v693_v34  ;;  %7398 = vmatmul.msk.f32.gmra.mxu1 %vm15129_vm0, %v709_v10 }
 0x12e   : > { %7414 = vmatmul.msk.f32.gmra.mxu2 %vm15129_vm0, %v725_v18  ;;  %7431 = vmatmul.msk.f32.gmra.mxu3 %vm15129_vm0, %v742_v55 }
 0x135   : > { %7383 = vmatmul.msk.f32.gmra.mxu0 %vm15129_vm0, %v694_v49  ;;  %7399 = vmatmul.msk.f32.gmra.mxu1 %vm15129_vm0, %v710_v6 }
 0x136   : > { %7415 = vmatmul.msk.f32.gmra.mxu2 %vm15129_vm0, %v726_v20  ;;  %7432 = vmatmul.msk.f32.gmra.mxu3 %vm15129_vm0, %v743_v39 }
 0x13d   : > { %7384 = vmatmul.msk.f32.gmra.mxu0 %vm15129_vm0, %v695_v0  ;;  %7400 = vmatmul.msk.f32.gmra.mxu1 %vm15129_vm0, %v711_v47 }
 0x13e   : > { %7416 = vmatmul.msk.f32.gmra.mxu2 %vm15129_vm0, %v727_v21  ;;  %7433 = vmatmul.msk.f32.gmra.mxu3 %vm15129_vm0, %v744_v59 }
 0x145   : > { %7385 = vmatmul.msk.f32.gmra.mxu0 %vm15129_vm0, %v696_v53  ;;  %7401 = vmatmul.msk.f32.gmra.mxu1 %vm15129_vm0, %v712_v28 }
 0x146   : > { %7417 = vmatmul.msk.f32.gmra.mxu2 %vm15129_vm0, %v728_v52 }
 0x14a   : > { %v1024_v54 = vpop.f32.mrf.mxu0  ;;  %v1072_v50 = vpop.f32.mrf.mxu1 }
 0x14b   : > { %v9068_v31 = vadd.f32 %v1024_v54, %v9058_v14  ;;  %v9071_v2 = vadd.f32 %v1072_v50, %v9058_v14 }
 0x14d   : > { %15354 = vst [vmem:[#allocation34_spill] sm:$0xff] %v9068_v31  ;;  %v9075_v27 = vmul.f32 %v9061_v57, %v9068_v31  ;;  %v9079_v30 = vmul.f32 %v9063_v5, %v9071_v2 }
 0x14e   : > { %15355 = vst [vmem:[#allocation39_spill] sm:$0xff] %v9071_v2  ;;  %7418 = vmatmul.msk.f32.gmra.mxu2 %vm15129_vm0, %v729_v7 }
 0x14f   : > { %15356 = vst [vmem:[#allocation12_spill] sm:$0xff] %v9075_v27  ;;  %2708 = vrot.lane.b32.xlu0 %v9075_v27, %s8246_s11  ;;  %2740 = vrot.lane.b32.xlu2 %v9079_v30, %s8246_s11  ;;  %v1313_v51 = vsel %vm15187_vm9, %v9075_v27, 0.0  ;;  %v1361_v18 = vsel %vm15187_vm9, %v9079_v30, 0.0 }
 0x150   : > { %15357 = vst [vmem:[#allocation17_spill] sm:$0xff] %v9079_v30 }
 0x151   : > { %v1120_v29 = vpop.f32.mrf.mxu2  ;;  %v1171_v41 = vpop.f32.mrf.mxu3 }
 0x152   : > { %v9090_v15 = vadd.f32 %v1120_v29, %v9058_v14  ;;  %v1027_v40 = vpop.f32.mrf.mxu0  ;;  %v1075_v1 = vpop.f32.mrf.mxu1  ;;  %v9125_v38 = vadd.f32 %v1171_v41, %v9058_v14 }
 0x153   : > { %v9144_v6 = vadd.f32 %v1075_v1, %v9058_v14  ;;  %v9147_v3 = vadd.f32 %v1027_v40, %v9058_v14 }
 0x154   : > { %15358 = vst [vmem:[#allocation25_spill] sm:$0xff] %v9090_v15  ;;  %v9094_v45 = vmul.f32 %v9087_v63, %v9090_v15  ;;  %v9137_v4 = vmul.f32 %v9129_v23, %v9125_v38 }
 0x155   : > { %15365 = vst [vmem:[#allocation20_spill] sm:$0xff] %v9125_v38  ;;  %v9151_v39 = vmul.f32 %v9063_v5, %v9144_v6  ;;  %v9160_v0 = vmul.f32 %v9061_v57, %v9147_v3 }
 0x156   : > { %15359 = vst [vmem:[#allocation40_spill] sm:$0xff] %v9094_v45  ;;  %2772 = vrot.lane.b32.xlu1 %v9094_v45, %s8246_s11  ;;  %v1409_v44 = vsel %vm15187_vm9, %v9094_v45, 0.0  ;;  %v1460_v61 = vsel %vm15187_vm9, %v9137_v4, 0.0 }
 0x157   : > { %15367 = vst [vmem:[#allocation42_spill] sm:$0xff] %v9137_v4  ;;  %v1316_v62 = vsel %vm15187_vm9, %v9160_v0, 0.0  ;;  %v1364_v26 = vsel %vm15187_vm9, %v9151_v39, 0.0 }
 0x158   : > { %15368 = vst [vmem:[#allocation15_spill] sm:$0xff] %v9144_v6 }
 0x159   : > { %v1123_v11 = vpop.f32.mrf.mxu2  ;;  %15369 = vst [vmem:[#allocation21_spill] sm:$0xff] %v9147_v3  ;;  %v1174_v47 = vpop.f32.mrf.mxu3 }
 0x15a   : > { %v9099_v9 = vadd.f32 %v1123_v11, %v9058_v14  ;;  %v1030_v42 = vpop.f32.mrf.mxu0  ;;  %v1078_v43 = vpop.f32.mrf.mxu1  ;;  %15370 = vst [vmem:[#allocation30_spill] sm:$0xff] %v9151_v39  ;;  %v9188_v53 = vadd.f32 %v1174_v47, %v9058_v14 }
 0x15b   : > { %v9106_v16 = vadd.f32 %v1030_v42, %v9058_v14  ;;  %v9118_v34 = vadd.f32 %v1078_v43, %v9058_v14  ;;  %15372 = vst [vmem:[#allocation16_spill] sm:$0xff] %v9160_v0 }
 0x15c   : > { %15360 = vst [vmem:[#allocation13_spill] sm:$0xff] %v9099_v9  ;;  %v9103_v12 = vmul.f32 %v9087_v63, %v9099_v9  ;;  %v9194_v28 = vmul.f32 %v9129_v23, %v9188_v53 }
 0x15d   : > { %15362 = vst [vmem:[#allocation27_spill] sm:$0xff] %v9106_v16  ;;  %v9114_v17 = vmul.f32 %v9061_v57, %v9106_v16  ;;  %v9133_v55 = vmul.f32 %v9063_v5, %v9118_v34 }
 0x15e   : > { %15361 = vst [vmem:[#allocation18_spill] sm:$0xff] %v9103_v12  ;;  %v1412_v60 = vsel %vm15187_vm9, %v9103_v12, 0.0  ;;  %v1463_v22 = vsel %vm15187_vm9, %v9194_v28, 0.0 }
 0x15f   : > { %15363 = vst [vmem:[#allocation41_spill] sm:$0xff] %v9114_v17  ;;  %v1319_v10 = vsel %vm15187_vm9, %v9114_v17, 0.0  ;;  %v1367_v49 = vsel %vm15187_vm9, %v9133_v55, 0.0 }
 0x160   : > { %15364 = vst [vmem:[#allocation14_spill] sm:$0xff] %v9118_v34 }
 0x161   : > { %15366 = vst [vmem:[#allocation28_spill] sm:$0xff] %v9133_v55  ;;  %v1126_v20 = vpop.f32.mrf.mxu2  ;;  %v1177_v33 = vpop.f32.mrf.mxu3 }
 0x162   : > { %v9156_v8 = vadd.f32 %v1126_v20, %v9058_v14  ;;  %v9177_v21 = vadd.f32 %v1177_v33, %v9058_v14  ;;  %15376 = vst [vmem:[#allocation19_spill] sm:$0xff] %v9188_v53  ;;  %v1081_v52 = vpop.f32.mrf.mxu1  ;;  %v1033_v29 = vpop.f32.mrf.mxu0 }
 0x163   : > { %15377 = vst [vmem:[#allocation23_spill] sm:$0xff] %v9194_v28  ;;  %v9199_v58 = vadd.f32 %v1081_v52, %v9058_v14  ;;  %v9224_v40 = vadd.f32 %v1033_v29, %v9058_v14 }
 0x164   : > { %15371 = vst [vmem:[#allocation43_spill] sm:$0xff] %v9156_v8  ;;  %v9166_v24 = vmul.f32 %v9087_v63, %v9156_v8  ;;  %v9183_v59 = vmul.f32 %v9129_v23, %v9177_v21 }
 0x165   : > { %15374 = vst [vmem:[#allocation32_spill] sm:$0xff] %v9177_v21  ;;  %v9205_v46 = vmul.f32 %v9063_v5, %v9199_v58  ;;  %v9228_v11 = vmul.f32 %v9061_v57, %v9224_v40 }
 0x166   : > { %15373 = vst [vmem:[#allocation22_spill] sm:$0xff] %v9166_v24  ;;  %v1466_v36 = vsel %vm15187_vm9, %v9183_v59, 0.0  ;;  %v1415_v35 = vsel %vm15187_vm9, %v9166_v24, 0.0 }
 0x167   : > { %15375 = vst [vmem:[#allocation44_spill] sm:$0xff] %v9183_v59  ;;  %v1322_v43 = vsel %vm15187_vm9, %v9228_v11, 0.0  ;;  %v1370_v33 = vsel %vm15187_vm9, %v9205_v46, 0.0 }
 0x168   : > { %15378 = vst [vmem:[#allocation35_spill] sm:$0xff] %v9199_v58 }
 0x169   : > { %15379 = vst [vmem:[#allocation24_spill] sm:$0xff] %v9205_v46  ;;  %v1129_v54 = vpop.f32.mrf.mxu2 }
 0x16a   : > { %v9210_v50 = vadd.f32 %v1129_v54, %v9058_v14  ;;  %15383 = vst [vmem:[#allocation29_spill] sm:$0xff] %v9224_v40  ;;  %v1084_v42 = vpop.f32.mrf.mxu1 }
 0x16b   : > { %v1218_v7 = vpop.permute.xlu1 %1217  ;;  %15384 = vst [vmem:[#allocation33_spill] sm:$0xff] %v9228_v11 }
 0x16c   : > { %15380 = vst [vmem:[#allocation26_spill] sm:$0xff] %v9210_v50  ;;  %v9214_v25 = vmul.f32 %v9087_v63, %v9210_v50  ;;  %v9219_v48 = vmul.f32 %v1218_v7, %v9045_v13 }
 0x16e   : > { %15381 = vst [vmem:[#allocation37_spill] sm:$0xff] %v9214_v25  ;;  %v1222_v1 = vsel %vm15187_vm9, %v9219_v48, 0.0  ;;  %v1418_v19 = vsel %vm15187_vm9, %v9214_v25, 0.0 }
 0x16f   : > { %15382 = vst [vmem:[#allocation45_spill] sm:$0xff] %v9219_v48 }
 0x178   : > { %1413 = vadd.xlane.f32.xlu2 %v1412_v60  ;;  %v1132_v60 = vpop.f32.mrf.mxu2 }
 0x179   : > { %1314 = vadd.xlane.f32.xlu0 %v1313_v51  ;;  %v9235_v51 = vadd.f32 %v1132_v60, %v9058_v14 }
 0x17b   : > { %15385 = vst [vmem:[#allocation38_spill] sm:$0xff] %v9235_v51  ;;  %v9243_v41 = vmul.f32 %v9087_v63, %v9235_v51 }
 0x17d   : > { %15386 = vst [vmem:[#allocation36_spill] sm:$0xff] %v9243_v41 }
 0x180   : > { %1410 = vadd.xlane.f32.xlu1 %v1409_v44  ;;  %1320 = vadd.xlane.f32.xlu2 %v1319_v10  ;;  %v1087_v44 = vpop.f32.mrf.mxu1  ;;  %v1135_v54 = vpop.f32.mrf.mxu2 }
 0x181   : > { %1362 = vadd.xlane.f32.xlu0 %v1361_v18  ;;  %v9246_v10 = vadd.f32 %v1087_v44, %v9058_v14  ;;  %v1421_v18 = vsel %vm15187_vm9, %v9243_v41, 0.0  ;;  %v9280_v7 = vadd.f32 %v1135_v54, %v9058_v14 }
 0x183   : > { %15387 = vst [vmem:[#allocation47_spill] sm:$0xff] %v9246_v10  ;;  %v9292_v60 = vmul.f32 %v9087_v63, %v9280_v7 }
 0x184   : > { %15394 = vst [vmem:[#allocation54_spill] sm:$0xff] %v9280_v7 }
 0x185   : > { %15396 = vst [vmem:[#allocation56_spill] sm:$0xff] %v9292_v60  ;;  %v1424_v37 = vsel %vm15187_vm9, %v9292_v60, 0.0 }
 0x188   : > { %1368 = vadd.xlane.f32.xlu2 %v1367_v49  ;;  %v9252_v49 = vmul.f32 %v9063_v5, %v9246_v10 }
 0x189   : > { %1461 = vadd.xlane.f32.xlu0 %v1460_v61  ;;  %v1180_v61 = vpop.f32.mrf.mxu3 }
 0x18a   : > { %15388 = vst [vmem:[#allocation48_spill] sm:$0xff] %v9252_v49  ;;  %v1376_v20 = vsel %vm15187_vm9, %v9252_v49, 0.0  ;;  %v9257_v47 = vadd.f32 %v1180_v61, %v9058_v14 }
 0x18c   : > { %15389 = vst [vmem:[#allocation49_spill] sm:$0xff] %v9257_v47 }
 0x199   : > { %2742 = vrot.lane.b32.xlu1 %v9151_v39, %s8246_s11 }
 0x19d   : > { %2710 = vrot.lane.b32.xlu0 %v9160_v0, %s8246_s11 }
 0x1a0   : > { %2776 = vrot.lane.b32.xlu2 %v9166_v24, %s8246_s11 }
 0x1a5   : > { %2774 = vrot.lane.b32.xlu0 %v9103_v12, %s8246_s11 }
 0x1ad   : > { %2712 = vrot.lane.b32.xlu0 %v9114_v17, %s8246_s11 }
 0x1b5   : > { %2744 = vrot.lane.b32.xlu0 %v9133_v55, %s8246_s11 }
 0x1c3   : > { %1317 = vadd.xlane.f32.xlu1 %v1316_v62  ;;  %v1036_v62 = vpop.f32.mrf.mxu0 }
 0x1c9   : > { %1467 = vadd.xlane.f32.xlu2 %v1466_v36  ;;  %v9263_v36 = vmul.f32 %v9129_v23, %v9257_v47 }
 0x1cb   : > { %1365 = vadd.xlane.f32.xlu1 %v1364_v26  ;;  %15390 = vst [vmem:[#allocation50_spill] sm:$0xff] %v9263_v36  ;;  %v9266_v26 = vadd.f32 %v1036_v62, %v9058_v14 }
 0x1cd   : > { %15391 = vst [vmem:[#allocation51_spill] sm:$0xff] %v9266_v26  ;;  %v9272_v52 = vmul.f32 %v9061_v57, %v9266_v26 }
 0x1cf   : > { %15392 = vst [vmem:[#allocation52_spill] sm:$0xff] %v9272_v52  ;;  %v1325_v29 = vsel %vm15187_vm9, %v9272_v52, 0.0 }
 0x1d3   : > { %1464 = vadd.xlane.f32.xlu1 %v1463_v22  ;;  %v1469_v22 = vsel %vm15187_vm9, %v9263_v36, 0.0 }
 0x1df   : > { %1416 = vadd.xlane.f32.xlu0 %v1415_v35  ;;  %v9277_v35 = vadd.f32 %v1084_v42, %v9058_v14  ;;  %v1039_v42 = vpop.f32.mrf.mxu0 }
 0x1e1   : > { %2746 = vrot.lane.b32.xlu2 %v9205_v46, %s8246_s11  ;;  %15393 = vst [vmem:[#allocation53_spill] sm:$0xff] %v9277_v35 }
 0x1ec   : > { %2778 = vrot.lane.b32.xlu1 %v9214_v25, %s8246_s11 }
 0x1f3   : > { %2638 = vrot.lane.b32.xlu0 %v9219_v48, %s8246_s11 }
 0x1fb   : > { %2714 = vrot.lane.b32.xlu0 %v9228_v11, %s8246_s11 }
 0x20a   : > { %1223 = vadd.xlane.f32.xlu2 %v1222_v1  ;;  %v9286_v1 = vmul.f32 %v9063_v5, %v9277_v35 }
 0x20c   : > { %15395 = vst [vmem:[#allocation55_spill] sm:$0xff] %v9286_v1  ;;  %v1373_v62 = vsel %vm15187_vm9, %v9286_v1, 0.0 }
 0x212   : > { %1323 = vadd.xlane.f32.xlu2 %v1322_v43  ;;  %v9299_v43 = vadd.f32 %v1039_v42, %v9058_v14 }
 0x214   : > { %15397 = vst [vmem:[#allocation57_spill] sm:$0xff] %v9299_v43  ;;  %v9303_v44 = vmul.f32 %v9061_v57, %v9299_v43 }
 0x216   : > { %1419 = vadd.xlane.f32.xlu1 %v1418_v19  ;;  %v1183_v19 = vpop.f32.mrf.mxu3  ;;  %15398 = vst [vmem:[#allocation58_spill] sm:$0xff] %v9303_v44  ;;  %v1328_v42 = vsel %vm15187_vm9, %v9303_v44, 0.0 }
 0x21a   : > { %1422 = vadd.xlane.f32.xlu2 %v1421_v18 }
 0x21e   : > { %v1186_v18 = vpop.f32.mrf.mxu3 }
 0x21f   : > { %v9310_v61 = vadd.f32 %v1186_v18, %v9058_v14 }
 0x221   : > { %15399 = vst [vmem:[#allocation59_spill] sm:$0xff] %v9310_v61 }
 0x222   : > { %1377 = vadd.xlane.f32.xlu2 %v1376_v20  ;;  %v9314_v20 = vmul.f32 %v9129_v23, %v9310_v61 }
 0x224   : > { %15400 = vst [vmem:[#allocation60_spill] sm:$0xff] %v9314_v20 }
 0x225   : > { %1371 = vadd.xlane.f32.xlu0 %v1370_v33  ;;  %v9317_v33 = vadd.f32 %v1183_v19, %v9058_v14  ;;  %v1090_v19 = vpop.f32.mrf.mxu1 }
 0x226   : > { %v9332_v18 = vadd.f32 %v1090_v19, %v9058_v14  ;;  %v1042_v19 = vpop.f32.mrf.mxu0  ;;  %v1189_v55 = vpop.f32.mrf.mxu3 }
 0x227   : > { %15401 = vst [vmem:[#allocation61_spill] sm:$0xff] %v9317_v33  ;;  %v9325_v54 = vmul.f32 %v9129_v23, %v9317_v33  ;;  %v9374_v45 = vadd.f32 %v1189_v55, %v9058_v14 }
 0x228   : > { %15403 = vst [vmem:[#allocation63_spill] sm:$0xff] %v9332_v18 }
 0x229   : > { %15402 = vst [vmem:[#allocation62_spill] sm:$0xff] %v9325_v54 }
 0x22a   : > { %15411 = vst [vmem:[#allocation71_spill] sm:$0xff] %v9374_v45 }
 0x22d   : > { %1470 = vadd.xlane.f32.xlu0 %v1469_v22  ;;  %v1475_v22 = vsel %vm15187_vm9, %v9314_v20, 0.0 }
 0x22f   : > { %2716 = vrot.lane.b32.xlu1 %v9272_v52, %s8246_s11  ;;  %v1228_v52 = vrot.slane %v9045_v13, 3 }
 0x235   : > { %1326 = vadd.xlane.f32.xlu0 %v1325_v29  ;;  %v1472_v29 = vsel %vm15187_vm9, %v9325_v54, 0.0 }
 0x237   : > { %2748 = vrot.lane.b32.xlu1 %v9286_v1, %s8246_s11 }
 0x23a   : > { %2782 = vrot.lane.b32.xlu2 %v9292_v60, %s8246_s11 }
 0x249   : > { %2780 = vrot.lane.b32.xlu0 %v9243_v41, %s8246_s11  ;;  %v9352_v41 = vadd.f32 %v1042_v19, %v9058_v14 }
 0x24b   : > { %15407 = vst [vmem:[#allocation67_spill] sm:$0xff] %v9352_v41  ;;  %v9356_v12 = vmul.f32 %v9061_v57, %v9352_v41 }
 0x24d   : > { %15408 = vst [vmem:[#allocation68_spill] sm:$0xff] %v9356_v12 }
 0x251   : > { %2718 = vrot.lane.b32.xlu0 %v9303_v44, %s8246_s11 }
 0x259   : > { %2750 = vrot.lane.b32.xlu0 %v9252_v49, %s8246_s11 }
 0x261   : > { %1374 = vadd.xlane.f32.xlu1 %v1373_v62  ;;  %v9336_v62 = vmul.f32 %v9063_v5, %v9332_v18 }
 0x263   : > { %1476 = vadd.xlane.f32.xlu2 %v1475_v22  ;;  %15404 = vst [vmem:[#allocation64_spill] sm:$0xff] %v9336_v62  ;;  %v1138_v22 = vpop.f32.mrf.mxu2 }
 0x269   : > { %1473 = vadd.xlane.f32.xlu1 %v1472_v29  ;;  %v9343_v29 = vadd.f32 %v1138_v22, %v9058_v14  ;;  %v1045_v22 = vpop.f32.mrf.mxu0 }
 0x26a   : > { %v9365_v25 = vadd.f32 %v1045_v22, %v9058_v14 }
 0x26b   : > { %15405 = vst [vmem:[#allocation65_spill] sm:$0xff] %v9343_v29  ;;  %v1141_v1 = vpop.f32.mrf.mxu2 }
 0x26c   : > { %15409 = vst [vmem:[#allocation69_spill] sm:$0xff] %v9365_v25  ;;  %v9369_v19 = vmul.f32 %v9061_v57, %v9365_v25  ;;  %v9396_v39 = vadd.f32 %v1141_v1, %v9058_v14  ;;  %v1226_v1 = vrot.slane %v9045_v13, 1 }
 0x26e   : > { %15410 = vst [vmem:[#allocation70_spill] sm:$0xff] %v9369_v19 }
 0x26f   : > { %15415 = vst [vmem:[#allocation75_spill] sm:$0xff] %v9396_v39 }
 0x271   : > { %1329 = vadd.xlane.f32.xlu1 %v1328_v42  ;;  %v9347_v42 = vmul.f32 %v9087_v63, %v9343_v29 }
 0x273   : > { %15406 = vst [vmem:[#allocation66_spill] sm:$0xff] %v9347_v42  ;;  %v1427_v49 = vsel %vm15187_vm9, %v9347_v42, 0.0 }
 0x27b   : > { %2752 = vrot.lane.b32.xlu2 %v9336_v62, %s8246_s11 }
 0x283   : > { %1425 = vadd.xlane.f32.xlu0 %v1424_v37  ;;  %v1331_v37 = vsel %vm15187_vm9, %v9356_v12, 0.0 }
 0x28a   : > { %2784 = vrot.lane.b32.xlu1 %v9347_v42, %s8246_s11  ;;  %v1093_v42 = vpop.f32.mrf.mxu1 }
 0x28b   : > { %v9383_v22 = vadd.f32 %v1093_v42, %v9058_v14  ;;  %v9400_v42 = vmul.f32 %v9087_v63, %v9396_v39 }
 0x28d   : > { %15413 = vst [vmem:[#allocation73_spill] sm:$0xff] %v9383_v22  ;;  %v9389_v55 = vmul.f32 %v9063_v5, %v9383_v22  ;;  %v1048_v5 = vpop.f32.mrf.mxu0  ;;  %v1430_v24 = vsel %vm15187_vm9, %v9400_v42, 0.0 }
 0x28e   : > { %15416 = vst [vmem:[#allocation76_spill] sm:$0xff] %v9400_v42  ;;  %v9414_v63 = vadd.f32 %v1048_v5, %v9058_v14  ;;  %v1232_v5 = vrot.slane %v9045_v13, 7 }
 0x28f   : > { %15414 = vst [vmem:[#allocation74_spill] sm:$0xff] %v9389_v55 }
 0x290   : > { %15418 = vst [vmem:[#allocation78_spill] sm:$0xff] %v9414_v63  ;;  %v9438_v46 = vperm.slane %v1232_v5, 0 }
 0x297   : > { %2720 = vrot.lane.b32.xlu0 %v9356_v12, %s8246_s11  ;;  %v1230_v12 = vrot.slane %v9045_v13, 5  ;;  %v1051_v13 = vpop.f32.mrf.mxu0 }
 0x298   : > { %v9461_v11 = vadd.f32 %v1051_v13, %v9058_v14 }
 0x29a   : > { %15425 = vst [vmem:[#allocation85_spill] sm:$0xff] %v9461_v11 }
 0x2a4   : > { %1332 = vadd.xlane.f32.xlu2 %v1331_v37  ;;  %v1379_v37 = vsel %vm15187_vm9, %v9336_v62, 0.0 }
 0x2b4   : > { %1428 = vadd.xlane.f32.xlu1 %v1427_v49  ;;  %v9380_v49 = vmul.f32 %v9129_v23, %v9374_v45 }
 0x2b6   : > { %15412 = vst [vmem:[#allocation72_spill] sm:$0xff] %v9380_v49  ;;  %v1478_v57 = vsel %vm15187_vm9, %v9380_v49, 0.0 }
 0x2bc   : > { %2722 = vrot.lane.b32.xlu2 %v9369_v19, %s8246_s11 }
 0x2c1   : > { %1380 = vadd.xlane.f32.xlu0 %v1379_v37  ;;  %v1334_v37 = vsel %vm15187_vm9, %v9369_v19, 0.0 }
 0x2c9   : > { %1479 = vadd.xlane.f32.xlu0 %v1478_v57  ;;  %v1096_v57 = vpop.f32.mrf.mxu1 }
 0x2ca   : > { %v9404_v60 = vadd.f32 %v1096_v57, %v9058_v14  ;;  %v9420_v57 = vperm.slane %v1226_v1, 0 }
 0x2cc   : > { %15417 = vst [vmem:[#allocation77_spill] sm:$0xff] %v9404_v60  ;;  %v9424_v62 = vmul.f32 %v9420_v57, %v9414_v63 }
 0x2cd   : > { %2754 = vrot.lane.b32.xlu1 %v9389_v55, %s8246_s11 }
 0x2ce   : > { %15420 = vst [vmem:[#allocation80_spill] sm:$0xff] %v9424_v62  ;;  %v1337_v5 = vsel %vm15187_vm9, %v9424_v62, 0.0 }
 0x2d1   : > { %1335 = vadd.xlane.f32.xlu0 %v1334_v37  ;;  %v9411_v37 = vperm.slane %v1228_v52, 0  ;;  %v1192_v52 = vpop.f32.mrf.mxu3 }
 0x2d2   : > { %v9434_v1 = vadd.f32 %v1192_v52, %v9058_v14  ;;  %v9450_v52 = vperm.slane %v1230_v12, 0 }
 0x2d3   : > { %v9418_v19 = vmul.f32 %v9411_v37, %v9404_v60 }
 0x2d4   : > { %15421 = vst [vmem:[#allocation81_spill] sm:$0xff] %v9434_v1  ;;  %v9442_v30 = vmul.f32 %v9438_v46, %v9434_v1 }
 0x2d5   : > { %15419 = vst [vmem:[#allocation79_spill] sm:$0xff] %v9418_v19 }
 0x2d6   : > { %15422 = vst [vmem:[#allocation82_spill] sm:$0xff] %v9442_v30  ;;  %v1481_v44 = vsel %vm15187_vm9, %v9442_v30, 0.0 }
 0x2e5   : > { %2786 = vrot.lane.b32.xlu0 %v9400_v42, %s8246_s11  ;;  %1431 = vadd.xlane.f32.xlu2 %v1430_v24  ;;  %v1385_v24 = vsel %vm15187_vm9, %v9418_v19, 0.0  ;;  %v1382_v42 = vsel %vm15187_vm9, %v9389_v55, 0.0  ;;  %v1195_v55 = vpop.f32.mrf.mxu3 }
 0x2ed   : > { %2724 = vrot.lane.b32.xlu0 %v9424_v62, %s8246_s11  ;;  %1386 = vadd.xlane.f32.xlu2 %v1385_v24  ;;  %v1144_v24 = vpop.f32.mrf.mxu2  ;;  %v9482_v62 = vadd.f32 %v1195_v55, %v9058_v14 }
 0x2ef   : > { %15430 = vst [vmem:[#allocation90_spill] sm:$0xff] %v9482_v62 }
 0x2f5   : > { %2756 = vrot.lane.b32.xlu0 %v9418_v19, %s8246_s11  ;;  %v9448_v19 = vadd.f32 %v1144_v24, %v9058_v14  ;;  %v1099_v24 = vpop.f32.mrf.mxu1  ;;  %v1147_v0 = vpop.f32.mrf.mxu2 }
 0x2f6   : > { %v9464_v12 = vadd.f32 %v1099_v24, %v9058_v14  ;;  %v1198_v24 = vpop.f32.mrf.mxu3 }
 0x2f7   : > { %1383 = vadd.xlane.f32.xlu1 %v1382_v42  ;;  %15423 = vst [vmem:[#allocation83_spill] sm:$0xff] %v9448_v19  ;;  %v9454_v42 = vmul.f32 %v9450_v52, %v9448_v19  ;;  %v9485_v27 = vadd.f32 %v1198_v24, %v9058_v14 }
 0x2f8   : > { %15426 = vst [vmem:[#allocation86_spill] sm:$0xff] %v9464_v12  ;;  %v9479_v13 = vmul.f32 %v9411_v37, %v9464_v12 }
 0x2f9   : > { %15424 = vst [vmem:[#allocation84_spill] sm:$0xff] %v9454_v42  ;;  %v1433_v17 = vsel %vm15187_vm9, %v9454_v42, 0.0  ;;  %v9501_v55 = vmul.f32 %v9438_v46, %v9485_v27 }
 0x2fa   : > { %15429 = vst [vmem:[#allocation89_spill] sm:$0xff] %v9479_v13 }
 0x2fb   : > { %15431 = vst [vmem:[#allocation91_spill] sm:$0xff] %v9485_v27  ;;  %v1487_v48 = vsel %vm15187_vm9, %v9501_v55, 0.0 }
 0x2fc   : > { %15434 = vst [vmem:[#allocation94_spill] sm:$0xff] %v9501_v55 }
 0x2fd   : > { %v1102_v45 = vpop.f32.mrf.mxu1  ;;  %v1150_v61 = vpop.f32.mrf.mxu2 }
 0x2ff   : > { %1482 = vadd.xlane.f32.xlu1 %v1481_v44  ;;  %v9468_v44 = vmul.f32 %v9420_v57, %v9461_v11 }
 0x301   : > { %15427 = vst [vmem:[#allocation87_spill] sm:$0xff] %v9468_v44 }
 0x305   : > { %2788 = vrot.lane.b32.xlu2 %v9454_v42, %s8246_s11  ;;  %v1388_v42 = vsel %vm15187_vm9, %v9479_v13, 0.0 }
 0x307   : > { %1338 = vadd.xlane.f32.xlu1 %v1337_v5  ;;  %v9475_v5 = vadd.f32 %v1147_v0, %v9058_v14  ;;  %v9497_v0 = vmul.f32 %v9438_v46, %v9482_v62 }
 0x309   : > { %15428 = vst [vmem:[#allocation88_spill] sm:$0xff] %v9475_v5  ;;  %v1484_v24 = vsel %vm15187_vm9, %v9497_v0, 0.0 }
 0x30a   : > { %15433 = vst [vmem:[#allocation93_spill] sm:$0xff] %v9497_v0 }
 0x31f   : > { %1434 = vadd.xlane.f32.xlu0 %v1433_v17  ;;  %v9489_v17 = vmul.f32 %v9450_v52, %v9475_v5 }
 0x320   : > { %2726 = vrot.lane.b32.xlu1 %v9468_v44, %s8246_s11 }
 0x321   : > { %15432 = vst [vmem:[#allocation92_spill] sm:$0xff] %v9489_v17 }
 0x327   : > { %1389 = vadd.xlane.f32.xlu0 %v1388_v42  ;;  %v1054_v42 = vpop.f32.mrf.mxu0 }
 0x328   : > { %2790 = vrot.lane.b32.xlu1 %v9489_v17, %s8246_s11  ;;  %v9508_v32 = vadd.f32 %v1054_v42, %v9058_v14 }
 0x32a   : > { %15435 = vst [vmem:[#allocation95_spill] sm:$0xff] %v9508_v32  ;;  %v9512_v56 = vmul.f32 %v9420_v57, %v9508_v32 }
 0x32c   : > { %15436 = vst [vmem:[#allocation96_spill] sm:$0xff] %v9512_v56  ;;  %v1343_v39 = vsel %vm15187_vm9, %v9512_v56, 0.0 }
 0x32e   : > { %1485 = vadd.xlane.f32.xlu2 %v1484_v24  ;;  %v1436_v24 = vsel %vm15187_vm9, %v9489_v17, 0.0  ;;  %v1105_v17 = vpop.f32.mrf.mxu1 }
 0x32f   : > { %1488 = vadd.xlane.f32.xlu0 %v1487_v48  ;;  %v9521_v48 = vadd.f32 %v1102_v45, %v9058_v14  ;;  %v9541_v33 = vadd.f32 %v1105_v17, %v9058_v14  ;;  %v1153_v17 = vpop.f32.mrf.mxu2 }
 0x331   : > { %15437 = vst [vmem:[#allocation97_spill] sm:$0xff] %v9521_v48  ;;  %v9525_v42 = vmul.f32 %v9411_v37, %v9521_v48 }
 0x332   : > { %15441 = vst [vmem:[#allocation101_spill] sm:$0xff] %v9541_v33 }
 0x333   : > { %15438 = vst [vmem:[#allocation98_spill] sm:$0xff] %v9525_v42 }
 0x337   : > { %v1156_v1 = vpop.f32.mrf.mxu2 }
 0x338   : > { %v9621_v38 = vadd.f32 %v1156_v1, %v9058_v14 }
 0x33a   : > { %15456 = vst [vmem:[#allocation116_spill] sm:$0xff] %v9621_v38 }
 0x343   : > { %2728 = vrot.lane.b32.xlu0 %v9512_v56, %s8246_s11  ;;  %v1391_v56 = vsel %vm15187_vm9, %v9525_v42, 0.0 }
 0x346   : > { %2758 = vrot.lane.b32.xlu2 %v9479_v13, %s8246_s11  ;;  %v9532_v13 = vadd.f32 %v1150_v61, %v9058_v14 }
 0x348   : > { %15439 = vst [vmem:[#allocation99_spill] sm:$0xff] %v9532_v13  ;;  %v9538_v45 = vmul.f32 %v9450_v52, %v9532_v13 }
 0x34a   : > { %15440 = vst [vmem:[#allocation100_spill] sm:$0xff] %v9538_v45  ;;  %v1439_v47 = vsel %vm15187_vm9, %v9538_v45, 0.0 }
 0x352   : > { %1437 = vadd.xlane.f32.xlu1 %v1436_v24  ;;  %v1340_v24 = vsel %vm15187_vm9, %v9468_v44, 0.0  ;;  %v9556_v44 = vadd.f32 %v1153_v17, %v9058_v14 }
 0x354   : > { %15443 = vst [vmem:[#allocation103_spill] sm:$0xff] %v9556_v44 }
 0x36b   : > { %2760 = vrot.lane.b32.xlu1 %v9525_v42, %s8246_s11 }
 0x36d   : > { %1344 = vadd.xlane.f32.xlu0 %v1343_v39  ;;  %v9547_v39 = vmul.f32 %v9411_v37, %v9541_v33 }
 0x36f   : > { %1341 = vadd.xlane.f32.xlu2 %v1340_v24  ;;  %15442 = vst [vmem:[#allocation102_spill] sm:$0xff] %v9547_v39  ;;  %v1394_v61 = vsel %vm15187_vm9, %v9547_v39, 0.0  ;;  %v1201_v24 = vpop.f32.mrf.mxu3 }
 0x377   : > { %1440 = vadd.xlane.f32.xlu2 %v1439_v47  ;;  %v9559_v47 = vadd.f32 %v1201_v24, %v9058_v14  ;;  %v1057_v24 = vpop.f32.mrf.mxu0  ;;  %v1204_v42 = vpop.f32.mrf.mxu3 }
 0x379   : > { %15444 = vst [vmem:[#allocation104_spill] sm:$0xff] %v9559_v47 }
 0x37f   : > { %1395 = vadd.xlane.f32.xlu2 %v1394_v61  ;;  %v9565_v61 = vmul.f32 %v9450_v52, %v9556_v44 }
 0x381   : > { %2792 = vrot.lane.b32.xlu0 %v9538_v45, %s8246_s11  ;;  %15445 = vst [vmem:[#allocation105_spill] sm:$0xff] %v9565_v61  ;;  %v9571_v45 = vmul.f32 %v9438_v46, %v9559_v47  ;;  %v9587_v47 = vadd.f32 %v1204_v42, %v9058_v14  ;;  %v1108_v42 = vpop.f32.mrf.mxu1 }
 0x382   : > { %v9605_v27 = vadd.f32 %v1108_v42, %v9058_v14 }
 0x383   : > { %15446 = vst [vmem:[#allocation106_spill] sm:$0xff] %v9571_v45  ;;  %v1490_v17 = vsel %vm15187_vm9, %v9571_v45, 0.0 }
 0x384   : > { %15449 = vst [vmem:[#allocation109_spill] sm:$0xff] %v9587_v47 }
 0x385   : > { %15453 = vst [vmem:[#allocation113_spill] sm:$0xff] %v9605_v27 }
 0x389   : > { %2762 = vrot.lane.b32.xlu0 %v9547_v39, %s8246_s11  ;;  %v9576_v39 = vadd.f32 %v1057_v24, %v9058_v14  ;;  %v1060_v24 = vpop.f32.mrf.mxu0 }
 0x38b   : > { %15447 = vst [vmem:[#allocation107_spill] sm:$0xff] %v9576_v39  ;;  %v9582_v21 = vmul.f32 %v9420_v57, %v9576_v39 }
 0x38d   : > { %15448 = vst [vmem:[#allocation108_spill] sm:$0xff] %v9582_v21 }
 0x391   : > { %v1063_v7 = vpop.f32.mrf.mxu0 }
 0x395   : > { %1392 = vadd.xlane.f32.xlu1 %v1391_v56  ;;  %v1442_v56 = vsel %vm15187_vm9, %v9565_v61, 0.0 }
 0x397   : > { %2794 = vrot.lane.b32.xlu2 %v9565_v61, %s8246_s11 }
 0x399   : > { %v1066_v48 = vpop.f32.mrf.mxu0 }
 0x39d   : > { %1491 = vadd.xlane.f32.xlu1 %v1490_v17  ;;  %v9591_v17 = vmul.f32 %v9438_v46, %v9587_v47  ;;  %v9609_v47 = vmul.f32 %v9411_v37, %v9605_v27  ;;  %v1159_v27 = vpop.f32.mrf.mxu2 }
 0x39f   : > { %15450 = vst [vmem:[#allocation110_spill] sm:$0xff] %v9591_v17  ;;  %v1493_v61 = vsel %vm15187_vm9, %v9591_v17, 0.0  ;;  %v1397_v42 = vsel %vm15187_vm9, %v9609_v47, 0.0 }
 0x3a0   : > { %15454 = vst [vmem:[#allocation114_spill] sm:$0xff] %v9609_v47 }
 0x3a5   : > { %v1162_v15 = vpop.f32.mrf.mxu2 }
 0x3a6   : > { %v9685_v9 = vadd.f32 %v1162_v15, %v9058_v14 }
 0x3a8   : > { %15475 = vst [vmem:[#allocation135_spill] sm:$0xff] %v9685_v9 }
 0x3b3   : > { %1443 = vadd.xlane.f32.xlu0 %v1442_v56  ;;  %v9596_v56 = vadd.f32 %v1060_v24, %v9058_v14  ;;  %v1207_v24 = vpop.f32.mrf.mxu3 }
 0x3b4   : > { %v9616_v62 = vadd.f32 %v1207_v24, %v9058_v14 }
 0x3b5   : > { %15451 = vst [vmem:[#allocation111_spill] sm:$0xff] %v9596_v56  ;;  %v9600_v44 = vmul.f32 %v9420_v57, %v9596_v56 }
 0x3b6   : > { %2730 = vrot.lane.b32.xlu1 %v9582_v21, %s8246_s11  ;;  %15455 = vst [vmem:[#allocation115_spill] sm:$0xff] %v9616_v62  ;;  %v9625_v53 = vmul.f32 %v9438_v46, %v9616_v62  ;;  %v9646_v62 = vpop.permute.xlu0 %2708 }
 0x3b7   : > { %15452 = vst [vmem:[#allocation112_spill] sm:$0xff] %v9600_v44 }
 0x3b8   : > { %15457 = vst [vmem:[#allocation117_spill] sm:$0xff] %v9625_v53  ;;  %v1496_v24 = vsel %vm15187_vm9, %v9625_v53, 0.0 }
 0x3b9   : > { %15461 = vst [vmem:[#allocation121_spill] sm:$0xff] %v9646_v62 }
 0x3bb   : > { %v1210_v12 = vpop.f32.mrf.mxu3 }
 0x3be   : > { %v9648_v19 = vpop.xlane.xlu0 %1314 }
 0x3bf   : > { %15462 = vst [vmem:[#allocation122_spill] sm:$0xff] %v9648_v19 }
 0x3c0   : > { %1494 = vadd.xlane.f32.xlu2 %v1493_v61  ;;  %v1346_v61 = vsel %vm15187_vm9, %v9582_v21, 0.0  ;;  %v9632_v21 = vadd.f32 %v1063_v7, %v9058_v14  ;;  %v1111_v7 = vpop.f32.mrf.mxu1 }
 0x3c2   : > { %15459 = vst [vmem:[#allocation119_spill] sm:$0xff] %v9632_v21  ;;  %v9640_v1 = vmul.f32 %v9420_v57, %v9632_v21  ;;  %v1069_v21 = vpop.f32.mrf.mxu0 }
 0x3c3   : > { %v1213_v58 = vpop.f32.mrf.mxu3 }
 0x3c4   : > { %15460 = vst [vmem:[#allocation120_spill] sm:$0xff] %v9640_v1  ;;  %v9721_v35 = vadd.f32 %v1213_v58, %v9058_v14 }
 0x3c6   : > { %v9655_v29 = vpop.xlane.xlu0 %1362  ;;  %15485 = vst [vmem:[#allocation145_spill] sm:$0xff] %v9721_v35  ;;  %v9736_v2 = vmul.f32 %v9438_v46, %v9721_v35 }
 0x3c7   : > { %2732 = vrot.lane.b32.xlu0 %v9600_v44, %s8246_s11  ;;  %15465 = vst [vmem:[#allocation125_spill] sm:$0xff] %v9655_v29 }
 0x3c8   : > { %15490 = vst [vmem:[#allocation150_spill] sm:$0xff] %v9736_v2  ;;  %v1502_v25 = vsel %vm15187_vm9, %v9736_v2, 0.0 }
 0x3d8   : > { %2764 = vrot.lane.b32.xlu2 %v9609_v47, %s8246_s11  ;;  %v1349_v47 = vsel %vm15187_vm9, %v9600_v44, 0.0 }
 0x3e0   : > { %1347 = vadd.xlane.f32.xlu1 %v1346_v61  ;;  %v9629_v61 = vmul.f32 %v9450_v52, %v9621_v38  ;;  %v9650_v38 = vpop.permute.xlu2 %2740 }
 0x3e1   : > { %15463 = vst [vmem:[#allocation123_spill] sm:$0xff] %v9650_v38 }
 0x3e2   : > { %15458 = vst [vmem:[#allocation118_spill] sm:$0xff] %v9629_v61 }
 0x3e8   : > { %v9661_v44 = vpop.xlane.xlu2 %1413 }
 0x3e9   : > { %15467 = vst [vmem:[#allocation127_spill] sm:$0xff] %v9661_v44 }
 0x3f1   : > { %1398 = vadd.xlane.f32.xlu0 %v1397_v42  ;;  %v1352_v42 = vsel %vm15187_vm9, %v9640_v1, 0.0 }
 0x3f9   : > { %2796 = vrot.lane.b32.xlu1 %v9629_v61, %s8246_s11  ;;  %1497 = vadd.xlane.f32.xlu0 %v1496_v24  ;;  %v1114_v24 = vpop.f32.mrf.mxu1 }
 0x3fa   : > { %v9653_v13 = vadd.f32 %v1114_v24, %v9058_v14  ;;  %v1445_v24 = vsel %vm15187_vm9, %v9629_v61, 0.0 }
 0x3fc   : > { %15464 = vst [vmem:[#allocation124_spill] sm:$0xff] %v9653_v13  ;;  %v9659_v5 = vmul.f32 %v9411_v37, %v9653_v13  ;;  %v9688_v13 = vadd.f32 %v1159_v27, %v9058_v14 }
 0x3fe   : > { %15466 = vst [vmem:[#allocation126_spill] sm:$0xff] %v9659_v5  ;;  %v9708_v27 = vmul.f32 %v9450_v52, %v9688_v13 }
 0x3ff   : > { %15476 = vst [vmem:[#allocation136_spill] sm:$0xff] %v9688_v13 }
 0x400   : > { %15481 = vst [vmem:[#allocation141_spill] sm:$0xff] %v9708_v27 }
 0x401   : > { %1353 = vadd.xlane.f32.xlu0 %v1352_v42  ;;  %1350 = vadd.xlane.f32.xlu2 %v1349_v47  ;;  %v9667_v47 = vpop.xlane.xlu0 %1461  ;;  %v9669_v42 = vpop.xlane.xlu2 %1320 }
 0x402   : > { %15468 = vst [vmem:[#allocation128_spill] sm:$0xff] %v9667_v47  ;;  %v1117_v39 = vpop.f32.mrf.mxu1 }
 0x403   : > { %15469 = vst [vmem:[#allocation129_spill] sm:$0xff] %v9669_v42  ;;  %v9759_v63 = vadd.f32 %v1117_v39, %v9058_v14 }
 0x405   : > { %15497 = vst [vmem:[#allocation157_spill] sm:$0xff] %v9759_v63  ;;  %v9772_v11 = vmul.f32 %v9411_v37, %v9759_v63 }
 0x407   : > { %15501 = vst [vmem:[#allocation161_spill] sm:$0xff] %v9772_v11 }
 0x409   : > { %v9673_v51 = vpop.permute.xlu0 %2710  ;;  %v9675_v8 = vpop.xlane.xlu2 %1368 }
 0x40a   : > { %15470 = vst [vmem:[#allocation130_spill] sm:$0xff] %v9673_v51 }
 0x40b   : > { %15471 = vst [vmem:[#allocation131_spill] sm:$0xff] %v9675_v8 }
 0x411   : > { %v9677_v50 = vpop.permute.xlu0 %2774  ;;  %v9679_v18 = vpop.permute.xlu2 %2776 }
 0x412   : > { %15472 = vst [vmem:[#allocation132_spill] sm:$0xff] %v9677_v50 }
 0x413   : > { %15473 = vst [vmem:[#allocation133_spill] sm:$0xff] %v9679_v18 }
 0x415   : > { %2768 = vrot.lane.b32.xlu0 %v9659_v5, %s8246_s11 }
 0x419   : > { %2734 = vrot.lane.b32.xlu2 %v9640_v1, %s8246_s11  ;;  %v9682_v1 = vadd.f32 %v1111_v7, %v9058_v14  ;;  %v9692_v61 = vpop.permute.xlu0 %2712  ;;  %v9694_v33 = vpop.xlane.xlu2 %1467  ;;  %v9702_v7 = vmul.f32 %v9450_v52, %v9685_v9 }
 0x41a   : > { %15478 = vst [vmem:[#allocation138_spill] sm:$0xff] %v9692_v61 }
 0x41b   : > { %15474 = vst [vmem:[#allocation134_spill] sm:$0xff] %v9682_v1  ;;  %v9698_v22 = vmul.f32 %v9411_v37, %v9682_v1  ;;  %v1451_v15 = vsel %vm15187_vm9, %v9702_v7, 0.0  ;;  %v1448_v1 = vsel %vm15187_vm9, %v9708_v27, 0.0 }
 0x41c   : > { %15480 = vst [vmem:[#allocation140_spill] sm:$0xff] %v9702_v7 }
 0x41d   : > { %15479 = vst [vmem:[#allocation139_spill] sm:$0xff] %v9698_v22  ;;  %v1400_v43 = vsel %vm15187_vm9, %v9698_v22, 0.0 }
 0x421   : > { %v9716_v9 = vpop.permute.xlu0 %2744  ;;  %v9718_v10 = vpop.permute.xlu2 %2746 }
 0x422   : > { %15483 = vst [vmem:[#allocation143_spill] sm:$0xff] %v9716_v9 }
 0x423   : > { %1446 = vadd.xlane.f32.xlu1 %v1445_v24  ;;  %v9690_v24 = vpop.permute.xlu1 %2772  ;;  %15484 = vst [vmem:[#allocation144_spill] sm:$0xff] %v9718_v10  ;;  %v1165_v10 = vpop.f32.mrf.mxu2 }
 0x424   : > { %15477 = vst [vmem:[#allocation137_spill] sm:$0xff] %v9690_v24 }
 0x429   : > { %v9727_v34 = vpop.xlane.xlu0 %1416  ;;  %v9729_v6 = vpop.xlane.xlu2 %1223 }
 0x42a   : > { %15487 = vst [vmem:[#allocation147_spill] sm:$0xff] %v9727_v34 }
 0x42b   : > { %v9712_v60 = vpop.xlane.xlu1 %1410  ;;  %15488 = vst [vmem:[#allocation148_spill] sm:$0xff] %v9729_v6  ;;  %v1168_v24 = vpop.f32.mrf.mxu2 }
 0x42c   : > { %15482 = vst [vmem:[#allocation142_spill] sm:$0xff] %v9712_v60 }
 0x433   : > { %v9723_v13 = vpop.permute.xlu1 %2742 }
 0x434   : > { %15486 = vst [vmem:[#allocation146_spill] sm:$0xff] %v9723_v13 }
 0x43b   : > { %v9738_v58 = vpop.xlane.xlu1 %1317 }
 0x43c   : > { %2766 = vrot.lane.b32.xlu1 %v9698_v22, %s8246_s11  ;;  %15491 = vst [vmem:[#allocation151_spill] sm:$0xff] %v9738_v58 }
 0x43f   : > { %1452 = vadd.xlane.f32.xlu0 %v1451_v15  ;;  %v1403_v15 = vsel %vm15187_vm9, %v9659_v5, 0.0 }
 0x442   : > { %1449 = vadd.xlane.f32.xlu2 %v1448_v1  ;;  %v9732_v1 = vadd.f32 %v1069_v21, %v9058_v14  ;;  %v9750_v21 = vpop.xlane.xlu2 %1323 }
 0x443   : > { %15493 = vst [vmem:[#allocation153_spill] sm:$0xff] %v9750_v21  ;;  %v9752_v56 = vpop.xlane.xlu1 %1365 }
 0x444   : > { %15489 = vst [vmem:[#allocation149_spill] sm:$0xff] %v9732_v1  ;;  %v9744_v5 = vmul.f32 %v9420_v57, %v9732_v1  ;;  %v9762_v1 = vadd.f32 %v1210_v12, %v9058_v14 }
 0x445   : > { %15494 = vst [vmem:[#allocation154_spill] sm:$0xff] %v9752_v56 }
 0x446   : > { %15492 = vst [vmem:[#allocation152_spill] sm:$0xff] %v9744_v5  ;;  %v9776_v26 = vmul.f32 %v9438_v46, %v9762_v1 }
 0x447   : > { %15498 = vst [vmem:[#allocation158_spill] sm:$0xff] %v9762_v1  ;;  %v1406_v1 = vsel %vm15187_vm9, %v9772_v11, 0.0 }
 0x448   : > { %15502 = vst [vmem:[#allocation162_spill] sm:$0xff] %v9776_v26  ;;  %v1499_v40 = vsel %vm15187_vm9, %v9776_v26, 0.0 }
 0x44a   : > { %1404 = vadd.xlane.f32.xlu2 %v1403_v15  ;;  %v9746_v15 = vpop.permute.xlu0 %2638  ;;  %v9756_v32 = vpop.xlane.xlu2 %1422 }
 0x44b   : > { %15496 = vst [vmem:[#allocation156_spill] sm:$0xff] %v9756_v32 }
 0x452   : > { %1503 = vadd.xlane.f32.xlu2 %v1502_v25  ;;  %v9754_v35 = vpop.permute.xlu0 %2714  ;;  %v9764_v25 = vpop.xlane.xlu1 %1464 }
 0x453   : > { %2738 = vrot.lane.b32.xlu0 %v9744_v5, %s8246_s11  ;;  %15495 = vst [vmem:[#allocation155_spill] sm:$0xff] %v9754_v35  ;;  %v9778_v39 = vpop.xlane.xlu2 %1377 }
 0x454   : > { %15499 = vst [vmem:[#allocation159_spill] sm:$0xff] %v9764_v25 }
 0x455   : > { %15503 = vst [vmem:[#allocation163_spill] sm:$0xff] %v9778_v39 }
 0x45a   : > { %v9766_v41 = vpop.xlane.xlu0 %1371  ;;  %v9782_v12 = vpop.permute.xlu1 %2778 }
 0x45b   : > { %15500 = vst [vmem:[#allocation160_spill] sm:$0xff] %v9766_v41  ;;  %v9788_v22 = vpop.permute.xlu2 %2782 }
 0x45c   : > { %15504 = vst [vmem:[#allocation164_spill] sm:$0xff] %v9782_v12  ;;  %v9801_v12 = vadd.f32 %v1066_v48, %v9058_v14 }
 0x45d   : > { %15506 = vst [vmem:[#allocation166_spill] sm:$0xff] %v9788_v22 }
 0x45e   : > { %15510 = vst [vmem:[#allocation170_spill] sm:$0xff] %v9801_v12  ;;  %v9807_v22 = vmul.f32 %v9420_v57, %v9801_v12  ;;  %v1358_v57 = vsel %vm15187_vm9, %v9744_v5, 0.0  ;;  %v9826_v12 = vadd.f32 %v1168_v24, %v9058_v14 }
 0x460   : > { %15512 = vst [vmem:[#allocation172_spill] sm:$0xff] %v9807_v22  ;;  %v1355_v31 = vsel %vm15187_vm9, %v9807_v22, 0.0 }
 0x461   : > { %15517 = vst [vmem:[#allocation177_spill] sm:$0xff] %v9826_v12 }
 0x462   : > { %v9790_v37 = vpop.xlane.xlu1 %1419 }
 0x463   : > { %15507 = vst [vmem:[#allocation167_spill] sm:$0xff] %v9790_v37  ;;  %v9794_v46 = vpop.xlane.xlu2 %1476 }
 0x464   : > { %15508 = vst [vmem:[#allocation168_spill] sm:$0xff] %v9794_v46 }
 0x466   : > { %1401 = vadd.xlane.f32.xlu1 %v1400_v43  ;;  %v9786_v43 = vpop.xlane.xlu0 %1470 }
 0x467   : > { %15505 = vst [vmem:[#allocation165_spill] sm:$0xff] %v9786_v43 }
 0x46a   : > { %2770 = vrot.lane.b32.xlu2 %v9772_v11, %s8246_s11  ;;  %v9798_v16 = vpop.permute.xlu1 %2716 }
 0x46b   : > { %15509 = vst [vmem:[#allocation169_spill] sm:$0xff] %v9798_v16  ;;  %v9809_v3 = vpop.permute.xlu2 %2752 }
 0x46c   : > { %15513 = vst [vmem:[#allocation173_spill] sm:$0xff] %v9809_v3  ;;  %v9832_v3 = vmul.f32 %v9129_v23, %v9826_v12 }
 0x46e   : > { %1500 = vadd.xlane.f32.xlu1 %v1499_v40  ;;  %v9792_v63 = vpop.xlane.xlu0 %1326  ;;  %15519 = vst [vmem:[#allocation179_spill] sm:$0xff] %v9832_v3 }
 0x472   : > { %v9811_v18 = vpop.permute.xlu1 %2748 }
 0x473   : > { %15514 = vst [vmem:[#allocation174_spill] sm:$0xff] %v9811_v18 }
 0x476   : > { %v9803_v40 = vpop.permute.xlu0 %2780 }
 0x477   : > { %15511 = vst [vmem:[#allocation171_spill] sm:$0xff] %v9803_v40 }
 0x47a   : > { %v9819_v48 = vpop.xlane.xlu1 %1374 }
 0x47b   : > { %15516 = vst [vmem:[#allocation176_spill] sm:$0xff] %v9819_v48 }
 0x47d   : > { %1407 = vadd.xlane.f32.xlu0 %v1406_v1  ;;  %v9817_v1 = vpop.xlane.xlu2 %1332 }
 0x47e   : > { %v9815_v11 = vpop.permute.xlu0 %2718 }
 0x47f   : > { %15515 = vst [vmem:[#allocation175_spill] sm:$0xff] %v9815_v11 }
 0x482   : > { %v9836_v50 = vpop.xlane.xlu1 %1473 }
 0x483   : > { %15521 = vst [vmem:[#allocation181_spill] sm:$0xff] %v9836_v50 }
 0x485   : > { %v9834_v18 = vpop.permute.xlu2 %2722 }
 0x486   : > { %v9828_v40 = vpop.permute.xlu0 %2750  ;;  %15520 = vst [vmem:[#allocation180_spill] sm:$0xff] %v9834_v18 }
 0x487   : > { %2736 = vrot.lane.b32.xlu1 %v9807_v22, %s8246_s11  ;;  %15518 = vst [vmem:[#allocation178_spill] sm:$0xff] %v9828_v40 }
 0x48a   : > { %v9846_v24 = vpop.xlane.xlu1 %1329 }
 0x48d   : > { %v9842_v5 = vpop.xlane.xlu2 %1431 }
 0x491   : > { %2798 = vrot.lane.b32.xlu0 %v9708_v27, %s8246_s11  ;;  %v9840_v27 = vpop.xlane.xlu0 %1425 }
 0x492   : > { %v9854_v12 = vpop.permute.xlu1 %2784 }
 0x493   : > { %1359 = vadd.xlane.f32.xlu2 %v1358_v57  ;;  %15523 = vst [vmem:[#allocation183_spill] sm:$0xff] %v9854_v12 }
 0x495   : > { %v9852_v23 = vpop.xlane.xlu2 %1386 }
 0x499   : > { %2804 = vrot.lane.b32.xlu0 %v9832_v3, %s8246_s11  ;;  %v9848_v57 = vpop.permute.xlu0 %2720 }
 0x49a   : > { %15522 = vst [vmem:[#allocation182_spill] sm:$0xff] %v9848_v57  ;;  %v1569_v57 = vlaneseq }
 0x4a1   : > { %2810 = vrot.lane.b32.xlu0 %v9183_v59, %s8246_s11  ;;  %v9858_v13 = vpop.xlane.xlu0 %1380  ;;  %v9864_v59 = vpop.xlane.xlu1 %1428 }
 0x4a2   : > { %15524 = vst [vmem:[#allocation184_spill] sm:$0xff] %v9858_v13 }
 0x4a9   : > { %2816 = vrot.lane.b32.xlu0 %v9314_v20, %s8246_s11  ;;  %v9868_v20 = vpop.permute.xlu2 %2788  ;;  %v9870_v12 = vpop.xlane.xlu0 %1479 }
 0x4aa   : > { %15525 = vst [vmem:[#allocation185_spill] sm:$0xff] %v9868_v20 }
 0x4ab   : > { %2800 = vrot.lane.b32.xlu2 %v9702_v7, %s8246_s11  ;;  %15526 = vst [vmem:[#allocation186_spill] sm:$0xff] %v9870_v12  ;;  %v9874_v7 = vpop.permute.xlu1 %2754 }
 0x4ac   : > { %15527 = vst [vmem:[#allocation187_spill] sm:$0xff] %v9874_v7 }
 0x4b1   : > { %1356 = vadd.xlane.f32.xlu1 %v1355_v31  ;;  %2822 = vrot.lane.b32.xlu0 %v9497_v0, %s8246_s11  ;;  %v9876_v38 = vpop.xlane.xlu2 %1485  ;;  %v9878_v31 = vpop.xlane.xlu0 %1335 }
 0x4b2   : > { %15528 = vst [vmem:[#allocation188_spill] sm:$0xff] %v9876_v38 }
 0x4b3   : > { %2806 = vrot.lane.b32.xlu2 %v9137_v4, %s8246_s11  ;;  %v9882_v0 = vpop.xlane.xlu1 %1383 }
 0x4b9   : > { %2828 = vrot.lane.b32.xlu0 %v9591_v17, %s8246_s11  ;;  %v9884_v22 = vpop.permute.xlu2 %2758  ;;  %v9886_v4 = vpop.permute.xlu0 %2786  ;;  %v9891_v17 = vadd.f32 %v1165_v10, %v9058_v14  ;;  %v1457_v14 = vsel %vm15187_vm9, %v9832_v3, 0.0 }
 0x4ba   : > { %15529 = vst [vmem:[#allocation189_spill] sm:$0xff] %v9884_v22 }
 0x4bb   : > { %15530 = vst [vmem:[#allocation190_spill] sm:$0xff] %v9886_v4  ;;  %v9893_v20 = vpop.xlane.xlu1 %1482  ;;  %v9899_v40 = vmul.f32 %v9450_v52, %v9891_v17  ;;  %v2641_v52 = vsel %vm15187_vm9, %v9746_v15, 0.0 }
 0x4bc   : > { %15531 = vst [vmem:[#allocation191_spill] sm:$0xff] %v9891_v17 }
 0x4bd   : > { %15532 = vst [vmem:[#allocation192_spill] sm:$0xff] %v9893_v20  ;;  %v1454_v15 = vsel %vm15187_vm9, %v9899_v40, 0.0 }
 0x4be   : > { %15533 = vst [vmem:[#allocation193_spill] sm:$0xff] %v9899_v40 }
 0x4c1   : > { %2834 = vrot.lane.b32.xlu0 %v9736_v2, %s8246_s11  ;;  %v9895_v7 = vpop.xlane.xlu2 %1341  ;;  %v9903_v2 = vpop.permute.xlu0 %2724 }
 0x4c2   : > { %15534 = vst [vmem:[#allocation194_spill] sm:$0xff] %v9903_v2 }
 0x4c3   : > { %v9905_v4 = vpop.xlane.xlu1 %1338 }
 0x4c9   : > { %v9907_v22 = vpop.xlane.xlu2 %1440  ;;  %v9911_v10 = vpop.permute.xlu0 %2756 }
 0x4ca   : > { %2808 = vrot.lane.b32.xlu1 %v9194_v28, %s8246_s11  ;;  %15535 = vst [vmem:[#allocation195_spill] sm:$0xff] %v9911_v10 }
 0x4cb   : > { %v9913_v28 = vpop.permute.xlu1 %2726 }
 0x4cc   : > { %15536 = vst [vmem:[#allocation196_spill] sm:$0xff] %v9913_v28 }
 0x4d1   : > { %v9915_v9 = vpop.xlane.xlu2 %1395  ;;  %v9919_v17 = vpop.xlane.xlu0 %1434 }
 0x4d2   : > { %2802 = vrot.lane.b32.xlu1 %v9899_v40, %s8246_s11 }
 0x4d3   : > { %v9921_v2 = vpop.permute.xlu1 %2790 }
 0x4d4   : > { %15537 = vst [vmem:[#allocation197_spill] sm:$0xff] %v9921_v2 }
 0x4d9   : > { %v9923_v18 = vpop.permute.xlu2 %2794  ;;  %v9925_v11 = vpop.xlane.xlu0 %1389 }
 0x4da   : > { %15538 = vst [vmem:[#allocation198_spill] sm:$0xff] %v9923_v18 }
 0x4db   : > { %15539 = vst [vmem:[#allocation199_spill] sm:$0xff] %v9925_v11  ;;  %v9927_v3 = vpop.xlane.xlu1 %1437 }
 0x4dc   : > { %1458 = vadd.xlane.f32.xlu2 %v1457_v14 }
 0x4e1   : > { %v9929_v14 = vpop.xlane.xlu2 %1494  ;;  %v9931_v10 = vpop.xlane.xlu0 %1488 }
 0x4e2   : > { %15540 = vst [vmem:[#allocation200_spill] sm:$0xff] %v9929_v14 }
 0x4e3   : > { %15541 = vst [vmem:[#allocation201_spill] sm:$0xff] %v9931_v10  ;;  %v9933_v16 = vpop.permute.xlu1 %2760 }
 0x4e4   : > { %2642 = vadd.xlane.f32.xlu2 %v2641_v52  ;;  %15542 = vst [vmem:[#allocation202_spill] sm:$0xff] %v9933_v16 }
 0x4e9   : > { %v9939_v52 = vpop.permute.xlu2 %2764  ;;  %v9941_v18 = vpop.permute.xlu0 %2728 }
 0x4ea   : > { %15543 = vst [vmem:[#allocation203_spill] sm:$0xff] %v9939_v52 }
 0x4eb   : > { %15544 = vst [vmem:[#allocation204_spill] sm:$0xff] %v9941_v18  ;;  %v9943_v2 = vpop.xlane.xlu1 %1392 }
 0x4f1   : > { %v9947_v35 = vpop.xlane.xlu2 %1350  ;;  %v9949_v51 = vpop.xlane.xlu0 %1344 }
 0x4f2   : > { %15545 = vst [vmem:[#allocation205_spill] sm:$0xff] %v9949_v51 }
 0x4f3   : > { %v9951_v16 = vpop.xlane.xlu1 %1491 }
 0x4f4   : > { %15546 = vst [vmem:[#allocation206_spill] sm:$0xff] %v9951_v16 }
 0x4f9   : > { %v9957_v40 = vpop.permute.xlu0 %2792 }
 0x4fa   : > { %15548 = vst [vmem:[#allocation208_spill] sm:$0xff] %v9957_v40 }
 0x4fc   : > { %1455 = vadd.xlane.f32.xlu1 %v1454_v15  ;;  %2812 = vrot.lane.b32.xlu2 %v9263_v36, %s8246_s11  ;;  %v9955_v15 = vpop.permute.xlu2 %2734  ;;  %v9959_v36 = vpop.permute.xlu1 %2730 }
 0x4fd   : > { %15547 = vst [vmem:[#allocation207_spill] sm:$0xff] %v9955_v15 }
 0x4fe   : > { %15549 = vst [vmem:[#allocation209_spill] sm:$0xff] %v9959_v36 }
 0x501   : > { %v9967_v52 = vpop.permute.xlu0 %2762 }
 0x502   : > { %15551 = vst [vmem:[#allocation211_spill] sm:$0xff] %v9967_v52 }
 0x504   : > { %2818 = vrot.lane.b32.xlu2 %v9380_v49, %s8246_s11  ;;  %v9965_v49 = vpop.xlane.xlu2 %1449  ;;  %v9969_v18 = vpop.xlane.xlu1 %1347 }
 0x505   : > { %15550 = vst [vmem:[#allocation210_spill] sm:$0xff] %v9965_v49 }
 0x509   : > { %v9975_v40 = vpop.xlane.xlu0 %1443 }
 0x50c   : > { %2824 = vrot.lane.b32.xlu2 %v9501_v55, %s8246_s11  ;;  %v9973_v55 = vpop.xlane.xlu2 %1404  ;;  %v9977_v15 = vpop.permute.xlu1 %2796 }
 0x50d   : > { %15552 = vst [vmem:[#allocation212_spill] sm:$0xff] %v9973_v55 }
 0x50e   : > { %15553 = vst [vmem:[#allocation213_spill] sm:$0xff] %v9977_v15 }
 0x514   : > { %2830 = vrot.lane.b32.xlu2 %v9625_v53, %s8246_s11  ;;  %v9981_v53 = vpop.permute.xlu0 %2732  ;;  %v9985_v36 = vpop.xlane.xlu2 %1503 }
 0x515   : > { %2814 = vrot.lane.b32.xlu1 %v9325_v54, %s8246_s11  ;;  %15554 = vst [vmem:[#allocation214_spill] sm:$0xff] %v9981_v53  ;;  %v9983_v54 = vpop.xlane.xlu1 %1446 }
 0x516   : > { %15555 = vst [vmem:[#allocation215_spill] sm:$0xff] %v9985_v36 }
 0x51c   : > { %v9989_v52 = vpop.xlane.xlu0 %1398  ;;  %v9993_v28 = vpop.permute.xlu2 %2770 }
 0x51d   : > { %2820 = vrot.lane.b32.xlu1 %v9442_v30, %s8246_s11  ;;  %v9991_v30 = vpop.permute.xlu1 %2766  ;;  %15557 = vst [vmem:[#allocation217_spill] sm:$0xff] %v9993_v28 }
 0x51e   : > { %15556 = vst [vmem:[#allocation216_spill] sm:$0xff] %v9991_v30 }
 0x524   : > { %v9997_v15 = vpop.xlane.xlu0 %1497 }
 0x525   : > { %2826 = vrot.lane.b32.xlu1 %v9571_v45, %s8246_s11  ;;  %v9995_v62 = vpop.xlane.xlu1 %1401  ;;  %15558 = vst [vmem:[#allocation218_spill] sm:$0xff] %v9997_v15  ;;  %v9999_v45 = vpop.xlane.xlu2 %1359 }
 0x52c   : > { %v10003_v61 = vpop.xlane.xlu0 %1353 }
 0x52d   : > { %2832 = vrot.lane.b32.xlu1 %v9776_v26, %s8246_s11  ;;  %v10001_v53 = vpop.xlane.xlu1 %1500  ;;  %15560 = vst [vmem:[#allocation220_spill] sm:$0xff] %v10003_v61  ;;  %v10005_v6 = vpop.permute.xlu2 %2800  ;;  %v10007_v26 = vand.u32 127, %v1569_v57 }
 0x52e   : > { %15559 = vst [vmem:[#allocation219_spill] sm:$0xff] %v10001_v53 }
 0x52f   : > { %15561 = vst [vmem:[#allocation221_spill] sm:$0xff] %v10005_v6  ;;  %v10012_v30 = vadd.s32 4294967288, %v10007_v26  ;;  %v10015_v28 = vadd.s32 4294967280, %v10007_v26  ;;  %v1645_v46 = vperm.slane %v9712_v60, %v10007_v26  ;;  %v10026_v6 = vadd.s32 4294967264, %v10007_v26 }
 0x530   : > { %15562 = vst [vmem:[#allocation222_spill] sm:$0xff] %v10007_v26  ;;  %v1571_v15 = vperm.slane %v9648_v19, %v10007_v26 }
 0x531   : > { %15564 = vst [vmem:[#allocation224_spill] sm:$0xff] %v10012_v30  ;;  %v1573_v53 = vperm.slane %v9738_v58, %v10012_v30  ;;  %v1616_v57 = vperm.slane %v9752_v56, %v10012_v30  ;;  %v1577_v58 = vperm.slane %v9669_v42, %v10015_v28  ;;  %v1615_v56 = vperm.slane %v9655_v29, %v10007_v26 }
 0x532   : > { %15565 = vst [vmem:[#allocation225_spill] sm:$0xff] %v10015_v28  ;;  %v1648_v55 = vperm.slane %v9727_v34, %v10015_v28  ;;  %v1652_v29 = vperm.slane %v9756_v32, %v10026_v6 }
 0x533   : > { %15567 = vst [vmem:[#allocation227_spill] sm:$0xff] %v10026_v6  ;;  %v1617_v49 = vsel %vm1574_vm10, %v1616_v57, %v1615_v56  ;;  %v1618_v56 = vperm.slane %v9675_v8, %v10015_v28  ;;  %v1600_v8 = vperm.slane %v9905_v4, %v10007_v26 }
 0x534   : > { %v10017_v12 = vpop.permute.xlu0 %2768 }
 0x535   : > { %v10009_v36 = vpop.permute.xlu1 %2736  ;;  %15566 = vst [vmem:[#allocation226_spill] sm:$0xff] %v10017_v12  ;;  %v10033_v12 = vadd.s32 4294967272, %v10007_v26  ;;  %v10035_v60 = vpop.permute.xlu2 %2806 }
 0x536   : > { %15563 = vst [vmem:[#allocation223_spill] sm:$0xff] %v10009_v36  ;;  %v1646_v36 = vperm.slane %v9661_v44, %v10012_v30  ;;  %v1575_v44 = vsel %vm1574_vm10, %v1573_v53, %v1571_v15  ;;  %v1676_v15 = vperm.slane %v9667_v47, %v10012_v30  ;;  %v1678_v47 = vperm.slane %v9764_v25, %v10015_v28 }
 0x537   : > { %15568 = vst [vmem:[#allocation228_spill] sm:$0xff] %v10033_v12  ;;  %v1650_v19 = vperm.slane %v9790_v37, %v10033_v12  ;;  %v1620_v53 = vperm.slane %v9766_v41, %v10033_v12  ;;  %v1579_v34 = vsel %vm1578_vm11, %v1577_v58, %v1575_v44  ;;  %v1619_v58 = vsel %vm1578_vm11, %v1618_v56, %v1617_v49 }
 0x538   : > { %15569 = vst [vmem:[#allocation229_spill] sm:$0xff] %v10035_v60  ;;  %v1647_v14 = vsel %vm1574_vm10, %v1646_v36, %v1645_v46  ;;  %v1581_v60 = vperm.slane %v9750_v21, %v10033_v12  ;;  %v10055_v36 = vadd.s32 4294967256, %v10007_v26  ;;  %v1601_v46 = vperm.slane %v9895_v7, %v10012_v30 }
 0x539   : > { %v1649_v57 = vsel %vm1578_vm11, %v1648_v55, %v1647_v14  ;;  %v1622_v21 = vperm.slane %v9819_v48, %v10026_v6  ;;  %v1605_v32 = vperm.slane %v9969_v18, %v10033_v12 }
 0x53a   : > { %v1651_v41 = vsel %vm1582_vm12, %v1650_v19, %v1649_v57  ;;  %v1583_v55 = vsel %vm1582_vm12, %v1581_v60, %v1579_v34  ;;  %v1624_v14 = vperm.slane %v9778_v39, %v10055_v36  ;;  %v1621_v19 = vsel %vm1582_vm12, %v1620_v53, %v1619_v58 }
 0x53b   : > { %v10080_v44 = vsel %vm1586_vm13, %v1652_v29, %v1651_v41  ;;  %v1602_v57 = vsel %vm1574_vm10, %v1601_v46, %v1600_v8  ;;  %v1585_v41 = vperm.slane %v9792_v63, %v10026_v6  ;;  %v1603_v60 = vperm.slane %v9949_v51, %v10015_v28 }
 0x53c   : > { %v10067_v37 = vpop.xlane.xlu0 %1452  ;;  %v1607_v29 = vperm.slane %v9947_v35, %v10026_v6  ;;  %v1623_v49 = vsel %vm1586_vm13, %v1622_v21, %v1621_v19  ;;  %v10101_v8 = vadd.s32 4294967248, %v10007_v26  ;;  %v1589_v53 = vperm.slane %v9846_v24, %v10055_v36 }
 0x53d   : > { %v10052_v42 = vpop.xlane.xlu1 %1356  ;;  %v10106_v46 = vadd.s32 4294967240, %v10007_v26  ;;  %v1604_v56 = vsel %vm1578_vm11, %v1603_v60, %v1602_v57  ;;  %v1609_v39 = vperm.slane %v10003_v61, %v10055_v36  ;;  %v1631_v57 = vperm.slane %v9925_v11, %v10012_v30 }
 0x53e   : > { %v1593_v21 = vperm.slane %v9817_v1, %v10101_v8  ;;  %v1626_v19 = vperm.slane %v9858_v13, %v10101_v8  ;;  %v1606_v25 = vsel %vm1582_vm12, %v1605_v32, %v1604_v56  ;;  %v1587_v13 = vsel %vm1586_vm13, %v1585_v41, %v1583_v55 }
 0x53f   : > { %v1597_v51 = vperm.slane %v9878_v31, %v10106_v46  ;;  %v1608_v60 = vsel %vm1586_vm13, %v1607_v29, %v1606_v25  ;;  %v1684_v32 = vperm.slane %v9836_v50, %v10055_v36  ;;  %v1625_v56 = vsel %vm1590_vm14, %v1624_v14, %v1623_v49 }
 0x540   : > { %v1591_v61 = vsel %vm1590_vm14, %v1589_v53, %v1587_v13  ;;  %v1630_v11 = vperm.slane %v9852_v23, %v10007_v26  ;;  %v1633_v25 = vperm.slane %v9943_v2, %v10015_v28  ;;  %v1656_v41 = vperm.slane %v9864_v59, %v10101_v8 }
 0x541   : > { %v1595_v55 = vsel %vm1594_vm15, %v1593_v21, %v1591_v61  ;;  %v1610_v14 = vsel %vm1590_vm14, %v1609_v39, %v1608_v60  ;;  %v1627_v13 = vsel %vm1594_vm15, %v1626_v19, %v1625_v56  ;;  %v1613_v61 = vperm.slane %v9999_v45, %v10106_v46 }
 0x542   : > { %v1599_v49 = vsel %vm15147_vm1, %v1597_v51, %v1595_v55  ;;  %v1632_v53 = vsel %vm1574_vm10, %v1631_v57, %v1630_v11  ;;  %v1658_v39 = vperm.slane %v9842_v5, %v10106_v46  ;;  %v1690_v51 = vperm.slane %v9893_v20, %v10007_v26 }
 0x543   : > { %v1634_v11 = vsel %vm1578_vm11, %v1633_v25, %v1632_v53  ;;  %v1660_v19 = vperm.slane %v9919_v17, %v10007_v26  ;;  %v1635_v57 = vperm.slane %v9915_v9, %v10033_v12  ;;  %v1628_v56 = vperm.slane %v9882_v0, %v10106_v46 }
 0x544   : > { %v1693_v25 = vperm.slane %v9931_v10, %v10015_v28  ;;  %v15574_v53 = vperm.slane %v9694_v33, %v10033_v12 }
 0x545   : > { %v10109_v58 = vpop.permute.xlu1 %2808  ;;  %v1636_v10 = vsel %vm1582_vm12, %v1635_v57, %v1634_v11  ;;  %v15576_v11 = vperm.slane %v9786_v43, %v10026_v6  ;;  %v15577_v57 = vld [vmem:[#allocation200_spill] sm:$0xff] }
 0x546   : > { %15571 = vst [vmem:[#allocation231_spill] sm:$0xff] %v10109_v58  ;;  %v10125_v58 = vpop.permute.xlu0 %2738 }
 0x547   : > { %15572 = vst [vmem:[#allocation232_spill] sm:$0xff] %v10125_v58  ;;  %v1654_v58 = vperm.slane %v9840_v27, %v10055_v36 }
 0x54e   : > { %v10176_v55 = vpop.xlane.xlu0 %1407 }
 0x54f   : > { %v10089_v48 = vpop.xlane.xlu2 %1458 }
 0x550   : > { %15570 = vst [vmem:[#allocation230_spill] sm:$0xff] %v10089_v48  ;;  %v1675_v34 = vperm.slane %v10089_v48, %v10007_v26  ;;  %v1611_v48 = vperm.slane %v10052_v42, %v10101_v8  ;;  %v1665_v26 = vperm.slane %v9975_v40, %v10033_v12 }
 0x552   : > { %v1677_v29 = vsel %vm1574_vm10, %v1676_v15, %v1675_v34  ;;  %v1612_v50 = vsel %vm1594_vm15, %v1611_v48, %v1610_v14  ;;  %v1691_v15 = vperm.slane %v9876_v38, %v10012_v30  ;;  %v1661_v34 = vperm.slane %v9927_v3, %v10012_v30  ;;  %v10178_v14 = vpop.permute.xlu1 %2802 }
 0x553   : > { %v1679_v21 = vsel %vm1578_vm11, %v1678_v47, %v1677_v29  ;;  %v1637_v48 = vperm.slane %v9989_v52, %v10026_v6  ;;  %v1639_v47 = vperm.slane %v9995_v62, %v10055_v36  ;;  %v1614_v60 = vsel %vm15147_vm1, %v1613_v61, %v1612_v50  ;;  %15573 = vst [vmem:[#allocation233_spill] sm:$0xff] %v10178_v14 }
 0x554   : > { %v1663_v29 = vperm.slane %v9907_v22, %v10015_v28  ;;  %v1681_v30 = vsel %vm1582_vm12, %v15574_v53, %v1679_v21  ;;  %v1692_v50 = vsel %vm1574_vm10, %v1691_v15, %v1690_v51  ;;  %v1662_v61 = vsel %vm1574_vm10, %v1661_v34, %v1660_v19  ;;  %v15575_v21 = vld [vmem:[#allocation210_spill] sm:$0xff] }
 0x555   : > { %v1695_v28 = vperm.slane %v9951_v16, %v10033_v12  ;;  %v1638_v20 = vsel %vm1586_vm13, %v1637_v48, %v1636_v10  ;;  %v1667_v14 = vperm.slane %v9983_v54, %v10026_v6  ;;  %v1705_v38 = vsel %vm618_vm2, %v1614_v60, %v1599_v49  ;;  %v15578_v60 = vld [vmem:[#allocation212_spill] sm:$0xff]  ;;  %v15579_v12 = vld [vmem:[#allocation218_spill] sm:$0xff] }
 0x556   : > { %v1669_v15 = vperm.slane %v15575_v21, %v10055_v36  ;;  %v1640_v34 = vsel %vm1590_vm14, %v1639_v47, %v1638_v20  ;;  %v1643_v51 = vperm.slane %v10176_v55, %v10106_v46  ;;  %v1683_v19 = vsel %vm1586_vm13, %v15576_v11, %v1681_v30  ;;  %v15581_v11 = vld [vmem:[#allocation168_spill] sm:$0xff] }
 0x557   : > { %v1629_v10 = vsel %vm15147_vm1, %v1628_v56, %v1627_v13  ;;  %v1664_v48 = vsel %vm1578_vm11, %v1663_v29, %v1662_v61  ;;  %v1697_v49 = vperm.slane %v15577_v57, %v10026_v6  ;;  %v1641_v53 = vperm.slane %v15578_v60, %v10101_v8  ;;  %v15580_v13 = vld [vmem:[#allocation219_spill] sm:$0xff] }
 0x558   : > { %v1694_v20 = vsel %vm1578_vm11, %v1693_v25, %v1692_v50  ;;  %v1666_v47 = vsel %vm1582_vm12, %v1665_v26, %v1664_v48  ;;  %v1699_v16 = vperm.slane %v15579_v12, %v10055_v36  ;;  %v1706_v43 = vsel %vm621_vm3, %v1629_v10, %v1705_v38 }
 0x559   : > { %v1668_v30 = vsel %vm1586_vm13, %v1667_v14, %v1666_v47  ;;  %v1701_v56 = vperm.slane %v15580_v13, %v10101_v8  ;;  %v1642_v29 = vsel %vm1594_vm15, %v1641_v53, %v1640_v34  ;;  %v1685_v61 = vsel %vm1590_vm14, %v1684_v32, %v1683_v19 }
 0x55a   : > { %v1686_v6 = vperm.slane %v15581_v11, %v10101_v8  ;;  %v1696_v25 = vsel %vm1582_vm12, %v1695_v28, %v1694_v20  ;;  %v1670_v26 = vsel %vm1590_vm14, %v1669_v15, %v1668_v30  ;;  %v1644_v50 = vsel %vm15147_vm1, %v1643_v51, %v1642_v29 }
 0x55b   : > { %v1655_v38 = vsel %vm1590_vm14, %v1654_v58, %v10080_v44  ;;  %v1698_v14 = vsel %vm1586_vm13, %v1697_v49, %v1696_v25  ;;  %v1671_v10 = vperm.slane %v10067_v37, %v10101_v8  ;;  %v1707_v32 = vsel %vm624_vm4, %v1644_v50, %v1706_v43  ;;  %v15582_v44 = vld [vmem:[#allocation186_spill] sm:$0xff]  ;;  %v15583_v43 = vld [vmem:[#allocation215_spill] sm:$0xff] }
 0x55c   : > { %v1657_v19 = vsel %vm1594_vm15, %v1656_v41, %v1655_v38  ;;  %v1700_v28 = vsel %vm1590_vm14, %v1699_v16, %v1698_v14  ;;  %v1687_v51 = vsel %vm1594_vm15, %v1686_v6, %v1685_v61  ;;  %v1688_v58 = vperm.slane %v15582_v44, %v10106_v46 }
 0x55d   : > { %v1659_v48 = vsel %vm15147_vm1, %v1658_v39, %v1657_v19  ;;  %v1672_v49 = vsel %vm1594_vm15, %v1671_v10, %v1670_v26  ;;  %v1702_v53 = vsel %vm1594_vm15, %v1701_v56, %v1700_v28  ;;  %v1703_v20 = vperm.slane %v15583_v43, %v10106_v46  ;;  %v10253_v56 = vpop.permute.xlu0 %2798  ;;  %v15586_v28 = vld [vmem:[#allocation148_spill] sm:$0xff] }
 0x55e   : > { %v1708_v16 = vsel %vm627_vm5, %v1659_v48, %v1707_v32  ;;  %v1689_v47 = vsel %vm15147_vm1, %v1688_v58, %v1687_v51  ;;  %v8247_v14 = vmov 0   ;;  %v15588_v48 = vld [vmem:[#allocation129_spill] sm:$0xff] }
 0x55f   : > { %v1704_v30 = vsel %vm15147_vm1, %v1703_v20, %v1702_v53  ;;  %7574 = vset.pattern.permute.xlu0 %v8247_v14  ;;  %7573 = vset.pattern.permute.xlu2 %v8247_v14  ;;  %v15589_v53 = vld [vmem:[#allocation151_spill] sm:$0xff] }
 0x560   : > { %7572 = vset.pattern.permute.xlu1 %v8247_v14 }
 0x565   : > { %v10255_v25 = vpop.permute.xlu0 %2804 }
 0x56d   : > { %v10257_v26 = vpop.permute.xlu0 %2810 }
 0x56f   : > { %v10230_v34 = vpop.xlane.xlu1 %1455 }
 0x570   : > { %v1673_v15 = vperm.slane %v10230_v34, %v10106_v46 }
 0x572   : > { %v1674_v41 = vsel %vm15147_vm1, %v1673_v15, %v1672_v49 }
 0x573   : > { %v1709_v6 = vsel %vm630_vm6, %v1674_v41, %v1708_v16  ;;  %v15590_v41 = vld [vmem:[#allocation122_spill] sm:$0xff] }
 0x574   : > { %v1710_v29 = vsel %vm15194_vm7, %v1689_v47, %v1709_v6 }
 0x575   : > { %v1711_v39 = vsel %vm15193_vm8, %v1704_v30, %v1710_v29  ;;  %v10259_v50 = vpop.permute.xlu0 %2816 }
 0x576   : > { %v1713_v61 = vsel %vm15129_vm0, %v1711_v39, -inf  ;;  %vm2447_vm0 = vcmask 654848  }
 0x577   : > { %1714 = vmax.xlane.f32.xlu0 %v1713_v61  ;;  %v15591_v61 = vld [vmem:[#allocation153_spill] sm:$0xff] }
 0x57d   : > { %v10261_v38 = vpop.permute.xlu0 %2822 }
 0x585   : > { %v10263_v10 = vpop.permute.xlu0 %2828 }
 0x586   : > { %15584 = vst [vmem:[#allocation210_spill] sm:$0xff] %v10263_v10  ;;  %v15666_v10 = vld [vmem:[#allocation21_spill] sm:$0xff] }
 0x58d   : > { %v10265_v32 = vpop.permute.xlu0 %2834 }
 0x58e   : > { %15585 = vst [vmem:[#allocation200_spill] sm:$0xff] %v10265_v32 }
 0x5ea   : > { %v1715_v19 = vpop.xlane.xlu0 %1714 }
 0x5eb   : > { %v10268_v15 = vmax.f32 %v1715_v19, %v15586_v28 }
 0x5ed   : > { %15587 = vst [vmem:[#allocation212_spill] sm:$0xff] %v10268_v15  ;;  %v1721_v51 = vperm.slane %v10268_v15, 0  ;;  %v10272_v58 = vperm.slane %v10268_v15, 1 }
 0x5ef   : > { %v1739_v49 = vsub.f32 %v15588_v48, %v1721_v51  ;;  %v1738_v20 = vsub.f32 %v15589_v53, %v1721_v51  ;;  %v1737_v16 = vsub.f32 %v15590_v41, %v1721_v51  ;;  %v1746_v29 = vsub.f32 %v9895_v7, %v10272_v58 }
 0x5f0   : > { %v1741_v39 = vsub.f32 %v9792_v63, %v1721_v51  ;;  %v1740_v14 = vsub.f32 %v15591_v61, %v1721_v51  ;;  %v1743_v7 = vsub.f32 %v9817_v1, %v1721_v51  ;;  %v1742_v63 = vsub.f32 %v9846_v24, %v1721_v51 }
 0x5f1   : > { %v1805_v47 = vmul.f32 1.442695, %v1739_v49  ;;  %v1803_v6 = vmul.f32 1.442695, %v1738_v20  ;;  %v1801_v30 = vmul.f32 1.442695, %v1737_v16  ;;  %v1749_v49 = vsub.f32 %v9947_v35, %v10272_v58 }
 0x5f2   : > { %v1819_v19 = vmul.f32 1.442695, %v1746_v29  ;;  %v1809_v28 = vmul.f32 1.442695, %v1741_v39  ;;  %v1807_v32 = vmul.f32 1.442695, %v1740_v14  ;;  %v1752_v39 = vsub.f32 %v9999_v45, %v10272_v58 }
 0x5f3   : > { %7579 = vpow2.f32 %v1805_v47  ;;  %v1825_v20 = vmul.f32 1.442695, %v1749_v49  ;;  %v1813_v16 = vmul.f32 1.442695, %v1743_v7  ;;  %v1745_v35 = vsub.f32 %v9905_v4, %v10272_v58  ;;  %v15592_v45 = vld [vmem:[#allocation131_spill] sm:$0xff] }
 0x5f4   : > { %7581 = vpow2.f32 %v1803_v6  ;;  %v1811_v6 = vmul.f32 1.442695, %v1742_v63  ;;  %v1744_v1 = vsub.f32 %v9878_v31, %v1721_v51  ;;  %v10291_v24 = vperm.slane %v10268_v15, 2  ;;  %v15593_v31 = vld [vmem:[#allocation205_spill] sm:$0xff] }
 0x5f5   : > { %7583 = vpow2.f32 %v1801_v30  ;;  %v1748_v4 = vsub.f32 %v9969_v18, %v10272_v58  ;;  %v1747_v51 = vsub.f32 %v15593_v31, %v10272_v58  ;;  %v1751_v18 = vsub.f32 %v10052_v42, %v10272_v58  ;;  %v15596_v42 = vld [vmem:[#allocation154_spill] sm:$0xff] }
 0x5f6   : > { %7585 = vpow2.f32 %v1819_v19  ;;  %v1815_v14 = vmul.f32 1.442695, %v1744_v1 }
 0x5f7   : > { %7587 = vpow2.f32 %v1809_v28  ;;  %v1817_v28 = vmul.f32 1.442695, %v1745_v35  ;;  %v1823_v49 = vmul.f32 1.442695, %v1748_v4  ;;  %v1821_v63 = vmul.f32 1.442695, %v1747_v51 }
 0x5f8   : > { %7589 = vpow2.f32 %v1807_v32  ;;  %v1831_v32 = vmul.f32 1.442695, %v1752_v39  ;;  %v10306_v39 = vperm.slane %v10268_v15, 3  ;;  %v1829_v1 = vmul.f32 1.442695, %v1751_v18 }
 0x5f9   : > { %v7580_v48 = vpop.eup %7579  ;;  %7591 = vpow2.f32 %v1825_v20 }
 0x5fa   : > { %v7582_v53 = vpop.eup %7581  ;;  %2000 = vperm.xlu0 %7574, %v7580_v48   ;;  %7593 = vpow2.f32 %v1813_v16 }
 0x5fb   : > { %v7584_v41 = vpop.eup %7583  ;;  %1997 = vperm.xlu2 %7573, %v7582_v53   ;;  %7595 = vpow2.f32 %v1811_v6  ;;  %v1755_v53 = vsub.f32 %v15592_v45, %v10291_v24 }
 0x5fc   : > { %1994 = vperm.xlu1 %7572, %v7584_v41   ;;  %v7586_v47 = vpop.eup %7585  ;;  %7597 = vpow2.f32 %v1831_v32 }
 0x5fd   : > { %v7588_v30 = vpop.eup %7587  ;;  %7599 = vpow2.f32 %v1817_v28  ;;  %v1837_v41 = vmul.f32 1.442695, %v1755_v53 }
 0x5fe   : > { %v7590_v29 = vpop.eup %7589  ;;  %7601 = vpow2.f32 %v1815_v14 }
 0x5ff   : > { %v7592_v61 = vpop.eup %7591  ;;  %7603 = vpow2.f32 %v1837_v41 }
 0x600   : > { %v7594_v19 = vpop.eup %7593  ;;  %7605 = vpow2.f32 %v1823_v49 }
 0x601   : > { %v7596_v48 = vpop.eup %7595  ;;  %7607 = vpow2.f32 %v1821_v63 }
 0x602   : > { %2021 = vperm.xlu0 %7574, %v7586_v47   ;;  %v7598_v7 = vpop.eup %7597  ;;  %v15594_v47 = vld [vmem:[#allocation163_spill] sm:$0xff] }
 0x603   : > { %2006 = vperm.xlu2 %7573, %v7588_v30   ;;  %v7600_v20 = vpop.eup %7599  ;;  %v1758_v6 = vsub.f32 %v15594_v47, %v10291_v24  ;;  %v15595_v30 = vld [vmem:[#allocation220_spill] sm:$0xff] }
 0x604   : > { %2003 = vperm.xlu1 %7572, %v7590_v29   ;;  %v7602_v16 = vpop.eup %7601  ;;  %v1750_v29 = vsub.f32 %v15595_v30, %v10272_v58  ;;  %v1754_v58 = vsub.f32 %v15596_v42, %v10291_v24 }
 0x605   : > { %v1843_v35 = vmul.f32 1.442695, %v1758_v6  ;;  %v7604_v32 = vpop.eup %7603 }
 0x606   : > { %v1827_v28 = vmul.f32 1.442695, %v1750_v29  ;;  %v1835_v4 = vmul.f32 1.442695, %v1754_v58 }
 0x607   : > { %7609 = vpow2.f32 %v1843_v35 }
 0x608   : > { %7611 = vpow2.f32 %v1829_v1  ;;  %v1760_v1 = vsub.f32 %v9882_v0, %v10291_v24  ;;  %v1763_v0 = vsub.f32 %v9943_v2, %v10306_v39  ;;  %v1766_v2 = vsub.f32 %v9995_v62, %v10306_v39  ;;  %v15606_v62 = vld [vmem:[#allocation142_spill] sm:$0xff] }
 0x609   : > { %7613 = vpow2.f32 %v1827_v28 }
 0x60a   : > { %2030 = vperm.xlu0 %7574, %v7592_v61   ;;  %v7606_v61 = vpop.eup %7605 }
 0x60b   : > { %2012 = vperm.xlu2 %7573, %v7594_v19   ;;  %v7608_v14 = vpop.eup %7607  ;;  %v1761_v19 = vsub.f32 %v9852_v23, %v10306_v39  ;;  %v1764_v23 = vsub.f32 %v9915_v9, %v10306_v39  ;;  %v1767_v9 = vsub.f32 %v15578_v60, %v10306_v39  ;;  %v15601_v60 = vld [vmem:[#allocation127_spill] sm:$0xff] }
 0x60c   : > { %2009 = vperm.xlu1 %7572, %v7596_v48   ;;  %v15597_v48 = vld [vmem:[#allocation125_spill] sm:$0xff] }
 0x60d   : > { %v1753_v45 = vsub.f32 %v15597_v48, %v10291_v24  ;;  %v1849_v53 = vmul.f32 1.442695, %v1761_v19  ;;  %v7610_v31 = vpop.eup %7609  ;;  %v1855_v47 = vmul.f32 1.442695, %v1764_v23  ;;  %v1847_v19 = vmul.f32 1.442695, %v1760_v1 }
 0x60e   : > { %v7612_v41 = vpop.eup %7611 }
 0x60f   : > { %v1833_v51 = vmul.f32 1.442695, %v1753_v45  ;;  %v7614_v49 = vpop.eup %7613  ;;  %7615 = vpow2.f32 %v1849_v53 }
 0x610   : > { %7617 = vpow2.f32 %v1835_v4  ;;  %v15603_v4 = vld [vmem:[#allocation199_spill] sm:$0xff] }
 0x611   : > { %7619 = vpow2.f32 %v1833_v51 }
 0x612   : > { %2039 = vperm.xlu0 %7574, %v7598_v7   ;;  %v15598_v7 = vld [vmem:[#allocation176_spill] sm:$0xff]  ;;  %7621 = vpow2.f32 %v1855_v47  ;;  %v1765_v47 = vsub.f32 %v9989_v52, %v10306_v39  ;;  %v1768_v52 = vsub.f32 %v10176_v55, %v10306_v39  ;;  %v15609_v55 = vld [vmem:[#allocation167_spill] sm:$0xff] }
 0x613   : > { %2018 = vperm.xlu2 %7573, %v7600_v20   ;;  %v1757_v63 = vsub.f32 %v15598_v7, %v10291_v24  ;;  %v15599_v20 = vld [vmem:[#allocation160_spill] sm:$0xff] }
 0x614   : > { %2015 = vperm.xlu1 %7572, %v7602_v16   ;;  %v1756_v16 = vsub.f32 %v15599_v20, %v10291_v24  ;;  %v15604_v20 = vld [vmem:[#allocation156_spill] sm:$0xff] }
 0x615   : > { %v1841_v6 = vmul.f32 1.442695, %v1757_v63  ;;  %v7616_v18 = vpop.eup %7615 }
 0x616   : > { %v1839_v30 = vmul.f32 1.442695, %v1756_v16  ;;  %v7618_v29 = vpop.eup %7617 }
 0x617   : > { %v7620_v35 = vpop.eup %7619  ;;  %7623 = vpow2.f32 %v1841_v6 }
 0x618   : > { %7625 = vpow2.f32 %v1839_v30  ;;  %v7622_v42 = vpop.eup %7621  ;;  %v1859_v30 = vmul.f32 1.442695, %v1766_v2 }
 0x61a   : > { %2048 = vperm.xlu0 %7574, %v7604_v32   ;;  %v15600_v32 = vld [vmem:[#allocation184_spill] sm:$0xff] }
 0x61b   : > { %2027 = vperm.xlu2 %7573, %v7606_v61   ;;  %v1759_v28 = vsub.f32 %v15600_v32, %v10291_v24  ;;  %v10327_v61 = vperm.slane %v10268_v15, 4  ;;  %v10333_v24 = vpop.xlane.xlu2 %2642 }
 0x61c   : > { %2024 = vperm.xlu1 %7572, %v7608_v14   ;;  %v1861_v14 = vmul.f32 1.442695, %v1767_v9  ;;  %15602 = vst [vmem:[#allocation218_spill] sm:$0xff] %v10333_v24 }
 0x61d   : > { %v1845_v58 = vmul.f32 1.442695, %v1759_v28  ;;  %v7624_v48 = vpop.eup %7623  ;;  %v1770_v53 = vsub.f32 %v15601_v60, %v10327_v61  ;;  %v1773_v16 = vsub.f32 %v15604_v20, %v10327_v61  ;;  %v1776_v32 = vsub.f32 %v9842_v5, %v10327_v61 }
 0x61e   : > { %v7626_v45 = vpop.eup %7625  ;;  %7627 = vpow2.f32 %v1861_v14  ;;  %v1769_v28 = vsub.f32 %v15606_v62, %v10327_v61  ;;  %v10352_v14 = vperm.slane %v10268_v15, 5  ;;  %v1863_v5 = vmul.f32 1.442695, %v1768_v52 }
 0x61f   : > { %7629 = vpow2.f32 %v1847_v19  ;;  %v1867_v51 = vmul.f32 1.442695, %v1770_v53  ;;  %v1879_v19 = vmul.f32 1.442695, %v1776_v32  ;;  %v1775_v2 = vsub.f32 %v9864_v59, %v10327_v61 }
 0x620   : > { %7631 = vpow2.f32 %v1845_v58  ;;  %v1865_v58 = vmul.f32 1.442695, %v1769_v28  ;;  %v1777_v28 = vsub.f32 %v9919_v17, %v10352_v14  ;;  %v1780_v17 = vsub.f32 %v9975_v40, %v10352_v14 }
 0x621   : > { %7633 = vpow2.f32 %v1867_v51  ;;  %v1783_v40 = vsub.f32 %v10067_v37, %v10352_v14  ;;  %v15618_v37 = vld [vmem:[#allocation159_spill] sm:$0xff] }
 0x622   : > { %2057 = vperm.xlu0 %7574, %v7610_v31   ;;  %v1762_v31 = vsub.f32 %v15603_v4, %v10306_v39  ;;  %v1772_v39 = vsub.f32 %v15609_v55, %v10327_v61  ;;  %v15610_v4 = vld [vmem:[#allocation147_spill] sm:$0xff] }
 0x623   : > { %2036 = vperm.xlu2 %7573, %v7612_v41   ;;  %v1853_v41 = vmul.f32 1.442695, %v1763_v0  ;;  %v10343_v6 = vpop.permute.xlu2 %2812  ;;  %v1779_v0 = vsub.f32 %v9907_v22, %v10352_v14  ;;  %v1782_v22 = vsub.f32 %v15575_v21, %v10352_v14  ;;  %v15613_v21 = vld [vmem:[#allocation230_spill] sm:$0xff] }
 0x624   : > { %2033 = vperm.xlu1 %7572, %v7614_v49   ;;  %v7628_v49 = vpop.eup %7627  ;;  %v1851_v23 = vmul.f32 1.442695, %v1762_v31  ;;  %15605 = vst [vmem:[#allocation219_spill] sm:$0xff] %v10343_v6  ;;  %v1771_v31 = vsub.f32 %v15610_v4, %v10327_v61 }
 0x625   : > { %v7630_v7 = vpop.eup %7629  ;;  %7635 = vpow2.f32 %v1853_v41  ;;  %v1885_v51 = vmul.f32 1.442695, %v1779_v0  ;;  %v1871_v41 = vmul.f32 1.442695, %v1772_v39 }
 0x626   : > { %v7632_v63 = vpop.eup %7631  ;;  %7637 = vpow2.f32 %v1851_v23  ;;  %v1869_v23 = vmul.f32 1.442695, %v1771_v31 }
 0x62a   : > { %2066 = vperm.xlu0 %7574, %v7616_v18   ;;  %v1873_v18 = vmul.f32 1.442695, %v1773_v16 }
 0x62b   : > { %2045 = vperm.xlu2 %7573, %v7618_v29   ;;  %v7634_v29 = vpop.eup %7633 }
 0x62c   : > { %2042 = vperm.xlu1 %7572, %v7620_v35   ;;  %v1857_v35 = vmul.f32 1.442695, %v1765_v47  ;;  %v7636_v9 = vpop.eup %7635  ;;  %7639 = vpow2.f32 %v1873_v18  ;;  %v1774_v47 = vsub.f32 %v9840_v27, %v10327_v61  ;;  %v10375_v18 = vperm.slane %v10268_v15, 6 }
 0x62d   : > { %v7638_v1 = vpop.eup %7637  ;;  %7641 = vpow2.f32 %v1859_v30  ;;  %v1891_v30 = vmul.f32 1.442695, %v1782_v22  ;;  %v1778_v27 = vsub.f32 %v9927_v3, %v10352_v14  ;;  %v1781_v3 = vsub.f32 %v9983_v54, %v10352_v14 }
 0x62e   : > { %7643 = vpow2.f32 %v1857_v35  ;;  %v1785_v62 = vsub.f32 %v15613_v21, %v10375_v18  ;;  %v1791_v54 = vsub.f32 %v15581_v11, %v10375_v18  ;;  %v1893_v11 = vmul.f32 1.442695, %v1783_v40  ;;  %v15622_v40 = vld [vmem:[#allocation192_spill] sm:$0xff] }
 0x62f   : > { %7645 = vpow2.f32 %v1879_v19  ;;  %v1883_v19 = vmul.f32 1.442695, %v1778_v27  ;;  %v1889_v4 = vmul.f32 1.442695, %v1781_v3  ;;  %v15621_v3 = vld [vmem:[#allocation165_spill] sm:$0xff] }
 0x630   : > { %7647 = vpow2.f32 %v1865_v58  ;;  %v1897_v52 = vmul.f32 1.442695, %v1785_v62  ;;  %v1909_v22 = vmul.f32 1.442695, %v1791_v54 }
 0x631   : > { %7649 = vpow2.f32 %v1863_v5 }
 0x632   : > { %2075 = vperm.xlu0 %7574, %v7622_v42   ;;  %v10354_v42 = vpop.permute.xlu1 %2814  ;;  %7651 = vpow2.f32 %v1885_v51  ;;  %v1887_v51 = vmul.f32 1.442695, %v1780_v17  ;;  %v1789_v17 = vsub.f32 %v15621_v3, %v10375_v18 }
 0x633   : > { %2054 = vperm.xlu2 %7573, %v7624_v48   ;;  %15607 = vst [vmem:[#allocation168_spill] sm:$0xff] %v10354_v42  ;;  %v7640_v48 = vpop.eup %7639  ;;  %7653 = vpow2.f32 %v1871_v41  ;;  %v15655_v42 = vld [vmem:[#allocation195_spill] sm:$0xff] }
 0x634   : > { %2051 = vperm.xlu1 %7572, %v7626_v45   ;;  %v10356_v45 = vpop.permute.xlu2 %2818  ;;  %v7642_v60 = vpop.eup %7641  ;;  %7655 = vpow2.f32 %v1869_v23 }
 0x635   : > { %15608 = vst [vmem:[#allocation186_spill] sm:$0xff] %v10356_v45  ;;  %v7644_v53 = vpop.eup %7643  ;;  %7657 = vpow2.f32 %v1891_v30 }
 0x63a   : > { %2084 = vperm.xlu0 %7574, %v7628_v49   ;;  %v7646_v49 = vpop.eup %7645 }
 0x63b   : > { %2063 = vperm.xlu2 %7573, %v7630_v7   ;;  %v7648_v7 = vpop.eup %7647 }
 0x63c   : > { %2060 = vperm.xlu1 %7572, %v7632_v63   ;;  %v10364_v63 = vpop.permute.xlu1 %2820  ;;  %v7650_v20 = vpop.eup %7649 }
 0x63d   : > { %15611 = vst [vmem:[#allocation215_spill] sm:$0xff] %v10364_v63  ;;  %v10366_v16 = vpop.permute.xlu2 %2824  ;;  %v7652_v35 = vpop.eup %7651 }
 0x63e   : > { %15612 = vst [vmem:[#allocation129_spill] sm:$0xff] %v10366_v16  ;;  %v15660_v16 = vld [vmem:[#allocation146_spill] sm:$0xff] }
 0x63f   : > { %v2951_v45 = vsel %vm15187_vm9, %v15660_v16, 0.0 }
 0x642   : > { %2093 = vperm.xlu0 %7574, %v7634_v29   ;;  %v1877_v29 = vmul.f32 1.442695, %v1775_v2 }
 0x643   : > { %2072 = vperm.xlu2 %7573, %v7636_v9   ;;  %v1875_v9 = vmul.f32 1.442695, %v1774_v47 }
 0x644   : > { %2069 = vperm.xlu1 %7572, %v7638_v1   ;;  %v7654_v1 = vpop.eup %7653  ;;  %v10379_v59 = vpop.permute.xlu1 %2826  ;;  %7659 = vpow2.f32 %v1877_v29 }
 0x645   : > { %v7656_v32 = vpop.eup %7655  ;;  %15614 = vst [vmem:[#allocation151_spill] sm:$0xff] %v10379_v59  ;;  %v10383_v61 = vpop.permute.xlu2 %2830  ;;  %7661 = vpow2.f32 %v1875_v9  ;;  %v15619_v9 = vld [vmem:[#allocation128_spill] sm:$0xff]  ;;  %v15650_v59 = vld [vmem:[#allocation178_spill] sm:$0xff] }
 0x646   : > { %15615 = vst [vmem:[#allocation122_spill] sm:$0xff] %v10383_v61  ;;  %v7658_v58 = vpop.eup %7657  ;;  %7663 = vpow2.f32 %v1897_v52  ;;  %v2963_v63 = vsel %vm15187_vm9, %v15650_v59, 0.0  ;;  %v2972_v61 = vsel %vm15187_vm9, %v15655_v42, 0.0  ;;  %v15657_v59 = vld [vmem:[#allocation123_spill] sm:$0xff]  ;;  %v15662_v42 = vld [vmem:[#allocation137_spill] sm:$0xff] }
 0x647   : > { %7665 = vpow2.f32 %v1883_v19 }
 0x64a   : > { %2102 = vperm.xlu0 %7574, %v7640_v48   ;;  %v1881_v48 = vmul.f32 1.442695, %v1777_v28  ;;  %v7660_v5 = vpop.eup %7659 }
 0x64b   : > { %2081 = vperm.xlu2 %7573, %v7642_v60   ;;  %v7662_v60 = vpop.eup %7661 }
 0x64c   : > { %2078 = vperm.xlu1 %7572, %v7644_v53   ;;  %v1788_v53 = vsub.f32 %v9694_v33, %v10375_v18  ;;  %7667 = vpow2.f32 %v1881_v48  ;;  %v10395_v55 = vpop.permute.xlu1 %2832  ;;  %v7664_v31 = vpop.eup %7663 }
 0x64d   : > { %15616 = vst [vmem:[#allocation153_spill] sm:$0xff] %v10395_v55  ;;  %v7666_v41 = vpop.eup %7665 }
 0x64e   : > { %v1903_v39 = vmul.f32 1.442695, %v1788_v53 }
 0x650   : > { %7669 = vpow2.f32 %v1903_v39 }
 0x651   : > { %7671 = vpow2.f32 %v1889_v4 }
 0x652   : > { %2111 = vperm.xlu0 %7574, %v7646_v49   ;;  %v7668_v33 = vpop.eup %7667  ;;  %v1784_v49 = vsub.f32 %v10230_v34, %v10352_v14  ;;  %7673 = vpow2.f32 %v1887_v51  ;;  %v15617_v34 = vld [vmem:[#allocation188_spill] sm:$0xff]  ;;  %v1787_v14 = vsub.f32 %v15618_v37, %v10375_v18 }
 0x653   : > { %2090 = vperm.xlu2 %7573, %v7648_v7   ;;  %v10406_v7 = vperm.slane %v10268_v15, 7  ;;  %7675 = vpow2.f32 %v1909_v22  ;;  %v15645_v15 = vld [vmem:[#allocation143_spill] sm:$0xff] }
 0x654   : > { %2087 = vperm.xlu1 %7572, %v7650_v20   ;;  %v1895_v2 = vmul.f32 1.442695, %v1784_v49  ;;  %v1901_v62 = vmul.f32 1.442695, %v1787_v14  ;;  %v15623_v14 = vld [vmem:[#allocation206_spill] sm:$0xff] }
 0x655   : > { %v10391_v0 = vpop.permute.xlu2 %1997  ;;  %v1797_v48 = vsub.f32 %v15577_v57, %v10406_v7  ;;  %v1800_v49 = vsub.f32 %v15583_v43, %v10406_v7  ;;  %v1793_v22 = vsub.f32 %v15622_v40, %v10406_v7 }
 0x656   : > { %v7670_v47 = vpop.eup %7669  ;;  %7677 = vpow2.f32 %v1895_v2  ;;  %v1792_v2 = vsub.f32 %v15582_v44, %v10375_v18  ;;  %v15624_v44 = vld [vmem:[#allocation201_spill] sm:$0xff] }
 0x657   : > { %v7672_v30 = vpop.eup %7671  ;;  %7679 = vpow2.f32 %v1893_v11  ;;  %v1921_v4 = vmul.f32 1.442695, %v1797_v48 }
 0x658   : > { %v7674_v29 = vpop.eup %7673 }
 0x659   : > { %v7676_v27 = vpop.eup %7675 }
 0x65a   : > { %2120 = vperm.xlu0 %7574, %v7652_v35   ;;  %v1794_v35 = vsub.f32 %v15617_v34, %v10406_v7 }
 0x65b   : > { %2099 = vperm.xlu2 %7573, %v7654_v1   ;;  %v1786_v1 = vsub.f32 %v15619_v9, %v10375_v18  ;;  %v1796_v9 = vsub.f32 %v15623_v14, %v10406_v7 }
 0x65c   : > { %2096 = vperm.xlu1 %7572, %v7656_v32   ;;  %v1915_v21 = vmul.f32 1.442695, %v1794_v35  ;;  %v7678_v19 = vpop.eup %7677  ;;  %v1911_v35 = vmul.f32 1.442695, %v1792_v2 }
 0x65d   : > { %v10408_v20 = vpop.permute.xlu2 %2006  ;;  %v1899_v52 = vmul.f32 1.442695, %v1786_v1 }
 0x65e   : > { %7681 = vpow2.f32 %v1915_v21 }
 0x65f   : > { %7683 = vpow2.f32 %v1901_v62 }
 0x660   : > { %7685 = vpow2.f32 %v1899_v52 }
 0x661   : > { %7687 = vpow2.f32 %v1921_v4 }
 0x662   : > { %2129 = vperm.xlu0 %7574, %v7658_v58   ;;  %v7680_v58 = vpop.eup %7679 }
 0x663   : > { %2108 = vperm.xlu2 %7573, %v7660_v5  }
 0x664   : > { %2105 = vperm.xlu1 %7572, %v7662_v60   ;;  %v15620_v60 = vld [vmem:[#allocation181_spill] sm:$0xff]  ;;  %v7682_v51 = vpop.eup %7681 }
 0x665   : > { %v10418_v28 = vpop.permute.xlu2 %2012  ;;  %v1790_v53 = vsub.f32 %v15620_v60, %v10375_v18  ;;  %v1795_v18 = vsub.f32 %v15624_v44, %v10406_v7  ;;  %v1799_v60 = vsub.f32 %v15580_v13, %v10406_v7  ;;  %v15626_v44 = vld [vmem:[#allocation182_spill] sm:$0xff] }
 0x667   : > { %v1925_v4 = vmul.f32 1.442695, %v1799_v60 }
 0x66a   : > { %2138 = vperm.xlu0 %7574, %v7664_v31   ;;  %v1907_v31 = vmul.f32 1.442695, %v1790_v53  ;;  %v1798_v53 = vsub.f32 %v15579_v12, %v10406_v7 }
 0x66b   : > { %2117 = vperm.xlu2 %7573, %v7666_v41   ;;  %v1905_v41 = vmul.f32 1.442695, %v1789_v17 }
 0x66c   : > { %2114 = vperm.xlu1 %7572, %v7668_v33   ;;  %v10422_v5 = vpop.permute.xlu0 %2000  ;;  %v7684_v33 = vpop.eup %7683  ;;  %7689 = vpow2.f32 %v1907_v31  ;;  %v1923_v31 = vmul.f32 1.442695, %v1798_v53 }
 0x66d   : > { %v7686_v57 = vpop.eup %7685  ;;  %v10430_v54 = vpop.permute.xlu2 %2018  ;;  %7691 = vpow2.f32 %v1905_v41 }
 0x66e   : > { %v10403_v23 = vpop.permute.xlu1 %1994  ;;  %v7688_v34 = vpop.eup %7687 }
 0x672   : > { %2147 = vperm.xlu0 %7574, %v7670_v47   ;;  %v7690_v37 = vpop.eup %7689 }
 0x673   : > { %2126 = vperm.xlu2 %7573, %v7672_v30   ;;  %v1927_v30 = vmul.f32 1.442695, %v1800_v49  ;;  %v7692_v43 = vpop.eup %7691 }
 0x674   : > { %2123 = vperm.xlu1 %7572, %v7674_v29   ;;  %v10438_v47 = vpop.permute.xlu0 %2021  ;;  %v1913_v29 = vmul.f32 1.442695, %v1793_v22 }
 0x675   : > { %7693 = vpow2.f32 %v1927_v30  ;;  %v10444_v1 = vpop.permute.xlu2 %2027 }
 0x676   : > { %v10416_v32 = vpop.permute.xlu1 %2003  ;;  %7695 = vpow2.f32 %v1913_v29 }
 0x677   : > { %7697 = vpow2.f32 %v1911_v35 }
 0x67a   : > { %2156 = vperm.xlu0 %7574, %v7676_v27   ;;  %v1919_v27 = vmul.f32 1.442695, %v1796_v9 }
 0x67b   : > { %2135 = vperm.xlu2 %7573, %v7678_v19   ;;  %v7694_v52 = vpop.eup %7693  ;;  %v1917_v19 = vmul.f32 1.442695, %v1795_v18  ;;  %v2918_v18 = vsel %vm15187_vm9, %v15626_v44, 0.0  ;;  %v15635_v44 = vld [vmem:[#allocation169_spill] sm:$0xff] }
 0x67c   : > { %2132 = vperm.xlu1 %7572, %v7680_v58   ;;  %v10450_v62 = vpop.permute.xlu0 %2030  ;;  %v7696_v58 = vpop.eup %7695  ;;  %7699 = vpow2.f32 %v1919_v27 }
 0x67d   : > { %v7698_v48 = vpop.eup %7697  ;;  %7701 = vpow2.f32 %v1917_v19  ;;  %v10458_v17 = vpop.permute.xlu2 %2036  ;;  %v15627_v19 = vld [vmem:[#allocation121_spill] sm:$0xff] }
 0x67e   : > { %v10428_v39 = vpop.permute.xlu1 %2009  ;;  %7703 = vpow2.f32 %v1925_v4  ;;  %v15630_v4 = vld [vmem:[#allocation130_spill] sm:$0xff] }
 0x67f   : > { %7705 = vpow2.f32 %v1923_v31  ;;  %v2903_v31 = vsel %vm15187_vm9, %v15630_v4, 0.0  ;;  %v15639_v4 = vld [vmem:[#allocation232_spill] sm:$0xff] }
 0x682   : > { %2165 = vperm.xlu0 %7574, %v7682_v51   ;;  %v7700_v51 = vpop.eup %7699 }
 0x683   : > { %2144 = vperm.xlu2 %7573, %v7684_v33   ;;  %v7702_v33 = vpop.eup %7701 }
 0x684   : > { %2141 = vperm.xlu1 %7572, %v7686_v57   ;;  %v10460_v41 = vpop.permute.xlu0 %2039  ;;  %v7704_v49 = vpop.eup %7703 }
 0x685   : > { %v10464_v13 = vpop.permute.xlu2 %2045  ;;  %v7706_v12 = vpop.eup %7705 }
 0x686   : > { %v10440_v11 = vpop.permute.xlu1 %2015 }
 0x68a   : > { %2174 = vperm.xlu0 %7574, %v7688_v34  }
 0x68b   : > { %2153 = vperm.xlu2 %7573, %v7690_v37   ;;  %v15625_v37 = vld [vmem:[#allocation138_spill] sm:$0xff] }
 0x68c   : > { %2150 = vperm.xlu1 %7572, %v7692_v43   ;;  %v10466_v7 = vpop.permute.xlu0 %2048  ;;  %v2906_v43 = vsel %vm15187_vm9, %v15625_v37, 0.0  ;;  %v15634_v37 = vld [vmem:[#allocation214_spill] sm:$0xff] }
 0x68d   : > { %v10470_v22 = vpop.permute.xlu2 %2054 }
 0x68e   : > { %v10448_v21 = vpop.permute.xlu1 %2024 }
 0x692   : > { %2183 = vperm.xlu0 %7574, %v7694_v52  }
 0x693   : > { %2162 = vperm.xlu2 %7573, %v7696_v58   ;;  %v2900_v58 = vsel %vm15187_vm9, %v15627_v19, 0.0 }
 0x694   : > { %2159 = vperm.xlu1 %7572, %v7698_v48   ;;  %v10472_v2 = vpop.permute.xlu0 %2057  ;;  %v15628_v48 = vld [vmem:[#allocation196_spill] sm:$0xff] }
 0x695   : > { %v10476_v29 = vpop.permute.xlu2 %2063  ;;  %v2927_v60 = vsel %vm15187_vm9, %v15628_v48, 0.0  ;;  %v15638_v48 = vld [vmem:[#allocation175_spill] sm:$0xff] }
 0x696   : > { %v10456_v3 = vpop.permute.xlu1 %2033 }
 0x69b   : > { %2171 = vperm.xlu2 %7573, %v7700_v51  }
 0x69c   : > { %2168 = vperm.xlu1 %7572, %v7702_v33   ;;  %v10478_v34 = vpop.permute.xlu0 %2066 }
 0x69d   : > { %v10484_v14 = vpop.permute.xlu2 %2072 }
 0x69e   : > { %v10462_v57 = vpop.permute.xlu1 %2042 }
 0x6a3   : > { %2180 = vperm.xlu2 %7573, %v7704_v49   ;;  %v15633_v49 = vld [vmem:[#allocation155_spill] sm:$0xff] }
 0x6a4   : > { %2177 = vperm.xlu1 %7572, %v7706_v12   ;;  %v10486_v9 = vpop.permute.xlu0 %2075  ;;  %v2909_v12 = vsel %vm15187_vm9, %v15633_v49, 0.0 }
 0x6a5   : > { %v10492_v52 = vpop.permute.xlu2 %2081 }
 0x6a6   : > { %v10468_v40 = vpop.permute.xlu1 %2051 }
 0x6ac   : > { %v10498_v53 = vpop.permute.xlu0 %2084 }
 0x6ad   : > { %15629 = vst [vmem:[#allocation131_spill] sm:$0xff] %v10498_v53  ;;  %v10504_v33 = vpop.permute.xlu2 %2090 }
 0x6ae   : > { %v10474_v30 = vpop.permute.xlu1 %2060  ;;  %15632 = vst [vmem:[#allocation163_spill] sm:$0xff] %v10504_v33  ;;  %v15696_v33 = vld [vmem:[#allocation226_spill] sm:$0xff] }
 0x6b4   : > { %v10512_v19 = vpop.permute.xlu0 %2093 }
 0x6b5   : > { %15636 = vst [vmem:[#allocation220_spill] sm:$0xff] %v10512_v19  ;;  %v10520_v49 = vpop.permute.xlu2 %2099 }
 0x6b6   : > { %v10480_v35 = vpop.permute.xlu1 %2069  ;;  %15640 = vst [vmem:[#allocation125_spill] sm:$0xff] %v10520_v49 }
 0x6bc   : > { %2907 = vadd.xlane.f32.xlu0 %v2906_v43  ;;  %v2936_v43 = vsel %vm15187_vm9, %v15634_v37, 0.0 }
 0x6be   : > { %v10490_v27 = vpop.permute.xlu1 %2078 }
 0x6c4   : > { %2919 = vadd.xlane.f32.xlu0 %v2918_v18  ;;  %v2912_v18 = vsel %vm15187_vm9, %v15635_v44, 0.0 }
 0x6c6   : > { %v10502_v51 = vpop.permute.xlu1 %2087 }
 0x6c7   : > { %15631 = vst [vmem:[#allocation205_spill] sm:$0xff] %v10502_v51  ;;  %v15688_v51 = vld [vmem:[#allocation202_spill] sm:$0xff] }
 0x6cc   : > { %2901 = vadd.xlane.f32.xlu2 %v2900_v58  ;;  %2928 = vadd.xlane.f32.xlu0 %v2927_v60  ;;  %v2915_v60 = vsel %vm15187_vm9, %v15638_v48, 0.0  ;;  %v2954_v48 = vsel %vm15187_vm9, %v15645_v15, 0.0  ;;  %v15652_v15 = vld [vmem:[#allocation207_spill] sm:$0xff] }
 0x6ce   : > { %2904 = vadd.xlane.f32.xlu1 %v2903_v31  ;;  %v10514_v58 = vpop.permute.xlu1 %2096  ;;  %v2945_v31 = vsel %vm15187_vm9, %v15639_v4, 0.0 }
 0x6cf   : > { %15637 = vst [vmem:[#allocation154_spill] sm:$0xff] %v10514_v58 }
 0x6d4   : > { %2910 = vadd.xlane.f32.xlu2 %v2909_v12  ;;  %2937 = vadd.xlane.f32.xlu0 %v2936_v43  ;;  %v15641_v12 = vld [vmem:[#allocation180_spill] sm:$0xff]  ;;  %v10524_v43 = vpop.permute.xlu0 %2102 }
 0x6d5   : > { %v2921_v37 = vsel %vm15187_vm9, %v15641_v12, 0.0  ;;  %15642 = vst [vmem:[#allocation176_spill] sm:$0xff] %v10524_v43  ;;  %v15682_v43 = vld [vmem:[#allocation185_spill] sm:$0xff] }
 0x6d6   : > { %2913 = vadd.xlane.f32.xlu1 %v2912_v18  ;;  %v10526_v44 = vpop.permute.xlu1 %2105  ;;  %v15644_v18 = vld [vmem:[#allocation194_spill] sm:$0xff] }
 0x6d7   : > { %15643 = vst [vmem:[#allocation160_spill] sm:$0xff] %v10526_v44  ;;  %v2924_v24 = vsel %vm15187_vm9, %v15644_v18, 0.0  ;;  %v15668_v44 = vld [vmem:[#allocation164_spill] sm:$0xff] }
 0x6d8   : > { %v10580_v16 = vsel %vm15187_vm9, %v15668_v44, 0.0  ;;  %v15676_v44 = vld [vmem:[#allocation211_spill] sm:$0xff] }
 0x6d9   : > { %15669 = vst [vmem:[#allocation188_spill] sm:$0xff] %v10580_v16  ;;  %v2981_v16 = vsel %vm15187_vm9, %v15676_v44, 0.0  ;;  %v10617_v44 = vsel %vm15187_vm9, %v15682_v43, 0.0  ;;  %v15690_v43 = vld [vmem:[#allocation203_spill] sm:$0xff] }
 0x6da   : > { %15683 = vst [vmem:[#allocation165_spill] sm:$0xff] %v10617_v44 }
 0x6dc   : > { %2916 = vadd.xlane.f32.xlu2 %v2915_v60  ;;  %2946 = vadd.xlane.f32.xlu0 %v2945_v31  ;;  %v15646_v60 = vld [vmem:[#allocation204_spill] sm:$0xff]  ;;  %v10534_v31 = vpop.permute.xlu2 %2108  ;;  %v10536_v12 = vpop.permute.xlu0 %2111 }
 0x6dd   : > { %v2930_v4 = vsel %vm15187_vm9, %v15646_v60, 0.0  ;;  %15647 = vst [vmem:[#allocation184_spill] sm:$0xff] %v10534_v31  ;;  %v15654_v60 = vld [vmem:[#allocation223_spill] sm:$0xff] }
 0x6de   : > { %2922 = vadd.xlane.f32.xlu1 %v2921_v37  ;;  %15648 = vst [vmem:[#allocation127_spill] sm:$0xff] %v10536_v12  ;;  %v15649_v37 = vld [vmem:[#allocation209_spill] sm:$0xff]  ;;  %v10542_v18 = vpop.permute.xlu1 %2114  ;;  %v15674_v31 = vld [vmem:[#allocation171_spill] sm:$0xff] }
 0x6df   : > { %v2933_v55 = vsel %vm15187_vm9, %v15649_v37, 0.0  ;;  %15651 = vst [vmem:[#allocation199_spill] sm:$0xff] %v10542_v18 }
 0x6e4   : > { %2925 = vadd.xlane.f32.xlu2 %v2924_v24  ;;  %2955 = vadd.xlane.f32.xlu0 %v2954_v48  ;;  %v2939_v24 = vsel %vm15187_vm9, %v15652_v15, 0.0  ;;  %v10546_v48 = vpop.permute.xlu2 %2117  ;;  %v10552_v37 = vpop.permute.xlu0 %2120  ;;  %v15659_v15 = vld [vmem:[#allocation34_spill] sm:$0xff] }
 0x6e5   : > { %15653 = vst [vmem:[#allocation156_spill] sm:$0xff] %v10546_v48  ;;  %v15678_v48 = vld [vmem:[#allocation183_spill] sm:$0xff] }
 0x6e6   : > { %2931 = vadd.xlane.f32.xlu1 %v2930_v4  ;;  %v2942_v4 = vsel %vm15187_vm9, %v15654_v60, 0.0  ;;  %15656 = vst [vmem:[#allocation142_spill] sm:$0xff] %v10552_v37  ;;  %v15661_v60 = vld [vmem:[#allocation132_spill] sm:$0xff] }
 0x6e7   : > { %v10564_v6 = vsel %vm15187_vm9, %v15661_v60, 0.0  ;;  %v15670_v60 = vld [vmem:[#allocation166_spill] sm:$0xff] }
 0x6e8   : > { %v10584_v12 = vsel %vm15187_vm9, %v15670_v60, 0.0  ;;  %v15677_v60 = vld [vmem:[#allocation187_spill] sm:$0xff] }
 0x6e9   : > { %15671 = vst [vmem:[#allocation159_spill] sm:$0xff] %v10584_v12  ;;  %v10601_v12 = vsel %vm15187_vm9, %v15677_v60, 0.0  ;;  %v15684_v60 = vld [vmem:[#allocation197_spill] sm:$0xff] }
 0x6ec   : > { %2934 = vadd.xlane.f32.xlu2 %v2933_v55  ;;  %2964 = vadd.xlane.f32.xlu0 %v2963_v63  ;;  %v2948_v55 = vsel %vm15187_vm9, %v15657_v59, 0.0  ;;  %v10556_v63 = vpop.permute.xlu1 %2123  ;;  %v10632_v49 = vpop.permute.xlu0 %2129 }
 0x6ed   : > { %15658 = vst [vmem:[#allocation167_spill] sm:$0xff] %v10556_v63  ;;  %v15667_v63 = vld [vmem:[#allocation144_spill] sm:$0xff] }
 0x6ee   : > { %2940 = vadd.xlane.f32.xlu1 %v2939_v24  ;;  %v2383_v24 = vmul.f32 %v10403_v23, %v15659_v15  ;;  %v2957_v15 = vsel %vm15187_vm9, %v15667_v63, 0.0  ;;  %15689 = vst [vmem:[#allocation206_spill] sm:$0xff] %v10632_v49 }
 0x6f0   : > { %v2448_v63 = vsel %vm2447_vm0, %v2383_v24, 0.0  ;;  %v15681_v24 = vld [vmem:[#allocation190_spill] sm:$0xff] }
 0x6f4   : > { %2943 = vadd.xlane.f32.xlu2 %v2942_v4  ;;  %2973 = vadd.xlane.f32.xlu0 %v2972_v61  ;;  %v10568_v4 = vsel %vm15187_vm9, %v15662_v42, 0.0  ;;  %v15664_v61 = vld [vmem:[#allocation133_spill] sm:$0xff]  ;;  %v15672_v42 = vld [vmem:[#allocation174_spill] sm:$0xff] }
 0x6f5   : > { %15663 = vst [vmem:[#allocation147_spill] sm:$0xff] %v10568_v4  ;;  %v10572_v59 = vsel %vm15187_vm9, %v15664_v61, 0.0  ;;  %v2960_v18 = vsel %vm15187_vm9, %v15672_v42, 0.0  ;;  %v15673_v61 = vld [vmem:[#allocation173_spill] sm:$0xff]  ;;  %v10605_v42 = vsel %vm15187_vm9, %v15678_v48, 0.0  ;;  %v10621_v4 = vsel %vm15187_vm9, %v15684_v60, 0.0 }
 0x6f6   : > { %2949 = vadd.xlane.f32.xlu1 %v2948_v55  ;;  %15665 = vst [vmem:[#allocation230_spill] sm:$0xff] %v10572_v59  ;;  %v2384_v55 = vmul.f32 %v10391_v0, %v15666_v10  ;;  %v2966_v37 = vsel %vm15187_vm9, %v15673_v61, 0.0  ;;  %v10592_v10 = vsel %vm15187_vm9, %v15674_v31, 0.0  ;;  %v10595_v59 = vpop.permute.xlu2 %2126  ;;  %v15680_v61 = vld [vmem:[#allocation189_spill] sm:$0xff]  ;;  %v10636_v60 = vsel %vm15187_vm9, %v15690_v43, 0.0 }
 0x6f7   : > { %15675 = vst [vmem:[#allocation128_spill] sm:$0xff] %v10595_v59  ;;  %v10609_v31 = vsel %vm15187_vm9, %v15680_v61, 0.0  ;;  %v10613_v59 = vsel %vm15187_vm9, %v15681_v24, 0.0  ;;  %v10630_v24 = vsel %vm15187_vm9, %v15688_v51, 0.0  ;;  %v15698_v43 = vld [vmem:[#allocation213_spill] sm:$0xff] }
 0x6f8   : > { %15679 = vst [vmem:[#allocation181_spill] sm:$0xff] %v10605_v42  ;;  %v2449_v48 = vsel %vm2447_vm0, %v2384_v55, 0.0  ;;  %v15687_v42 = vld [vmem:[#allocation29_spill] sm:$0xff]  ;;  %v10656_v49 = vsel %vm15187_vm9, %v15698_v43, 0.0  ;;  %v15706_v43 = vld [vmem:[#allocation224_spill] sm:$0xff] }
 0x6f9   : > { %15685 = vst [vmem:[#allocation192_spill] sm:$0xff] %v10621_v4  ;;  %v2386_v61 = vmul.f32 %v10416_v32, %v15687_v42  ;;  %v2450_v58 = vadd.f32 %v2449_v48, %v2448_v63  ;;  %v15691_v4 = vld [vmem:[#allocation208_spill] sm:$0xff]  ;;  %v15695_v42 = vld [vmem:[#allocation222_spill] sm:$0xff]  ;;  %v2990_v63 = vsel %vm15187_vm9, %v15696_v33, 0.0  ;;  %v10670_v33 = vsel %vm15187_vm9, %v10255_v25, 0.0 }
 0x6fa   : > { %v10640_v55 = vsel %vm15187_vm9, %v15691_v4, 0.0  ;;  %v2185_v51 = vperm.slane %v10403_v23, %v15695_v42  ;;  %v15697_v48 = vld [vmem:[#allocation216_spill] sm:$0xff]  ;;  %15699 = vst [vmem:[#allocation182_spill] sm:$0xff] %v10656_v49  ;;  %v10658_v4 = vpop.permute.xlu1 %2132  ;;  %v10666_v23 = vsel %vm15187_vm9, %v10253_v56, 0.0  ;;  %v2186_v49 = vperm.slane %v10391_v0, %v15706_v43  ;;  %v15708_v56 = vld [vmem:[#allocation225_spill] sm:$0xff] }
 0x6fb   : > { %15692 = vst [vmem:[#allocation201_spill] sm:$0xff] %v10640_v55  ;;  %v15701_v55 = vld [vmem:[#allocation217_spill] sm:$0xff]  ;;  %v10686_v25 = vsel %vm15187_vm9, %v10259_v50, 0.0  ;;  %v15715_v50 = vld [vmem:[#allocation67_spill] sm:$0xff] }
 0x6fc   : > { %2952 = vadd.xlane.f32.xlu2 %v2951_v45  ;;  %2982 = vadd.xlane.f32.xlu0 %v2981_v16  ;;  %v15686_v45 = vld [vmem:[#allocation27_spill] sm:$0xff]  ;;  %15700 = vst [vmem:[#allocation121_spill] sm:$0xff] %v10658_v4  ;;  %v2187_v0 = vsel %vm1574_vm10, %v2186_v49, %v2185_v51 }
 0x6fd   : > { %v2385_v16 = vmul.f32 %v10422_v5, %v15686_v45  ;;  %v15693_v45 = vld [vmem:[#allocation198_spill] sm:$0xff]  ;;  %15703 = vst [vmem:[#allocation130_spill] sm:$0xff] %v10666_v23  ;;  %v2188_v23 = vperm.slane %v10422_v5, %v15708_v56 }
 0x6fe   : > { %2958 = vadd.xlane.f32.xlu1 %v2957_v15  ;;  %v10644_v44 = vsel %vm15187_vm9, %v15693_v45, 0.0  ;;  %v10652_v15 = vsel %vm15187_vm9, %v15697_v48, 0.0  ;;  %v10662_v45 = vsel %vm15187_vm9, %v15701_v55, 0.0  ;;  %15704 = vst [vmem:[#allocation155_spill] sm:$0xff] %v10670_v33  ;;  %v10674_v48 = vsel %vm15187_vm9, %v10257_v26, 0.0  ;;  %v15713_v33 = vld [vmem:[#allocation57_spill] sm:$0xff] }
 0x6ff   : > { %15694 = vst [vmem:[#allocation138_spill] sm:$0xff] %v10644_v44  ;;  %v15707_v44 = vld [vmem:[#allocation51_spill] sm:$0xff]  ;;  %v2451_v55 = vsel %vm2447_vm0, %v2385_v16, 0.0  ;;  %v10690_v26 = vsel %vm15187_vm9, %v10261_v38, 0.0  ;;  %v15712_v16 = vld [vmem:[#allocation228_spill] sm:$0xff]  ;;  %v2388_v5 = vmul.f32 %v10428_v39, %v15713_v33  ;;  %v15716_v38 = vld [vmem:[#allocation233_spill] sm:$0xff] }
 0x700   : > { %15702 = vst [vmem:[#allocation196_spill] sm:$0xff] %v10662_v45  ;;  %v2387_v4 = vmul.f32 %v10408_v20, %v15707_v44  ;;  %v2453_v45 = vsel %vm2447_vm0, %v2386_v61, 0.0  ;;  %v2452_v19 = vadd.f32 %v2451_v55, %v2450_v58  ;;  %v2190_v61 = vperm.slane %v10416_v32, %v15712_v16  ;;  %v15714_v58 = vld [vmem:[#allocation227_spill] sm:$0xff] }
 0x701   : > { %15705 = vst [vmem:[#allocation214_spill] sm:$0xff] %v10674_v48  ;;  %v15711_v48 = vld [vmem:[#allocation85_spill] sm:$0xff]  ;;  %v2192_v55 = vperm.slane %v10408_v20, %v15714_v58  ;;  %v10705_v49 = vsel %vm15187_vm9, %v15716_v38, 0.0  ;;  %v2196_v32 = vperm.slane %v10418_v28, %v10101_v8  ;;  %v2201_v20 = vperm.slane %v10438_v47, %v15706_v43 }
 0x702   : > { %15709 = vst [vmem:[#allocation169_spill] sm:$0xff] %v10686_v25  ;;  %v2392_v44 = vmul.f32 %v10438_v47, %v15711_v48  ;;  %v2389_v25 = vmul.f32 %v10418_v28, %v15715_v50  ;;  %v2454_v53 = vadd.f32 %v2453_v45, %v2452_v19  ;;  %v2455_v51 = vsel %vm2447_vm0, %v2387_v4, 0.0  ;;  %v15718_v48 = vld [vmem:[#allocation78_spill] sm:$0xff]  ;;  %v15721_v4 = vld [vmem:[#allocation95_spill] sm:$0xff] }
 0x703   : > { %15710 = vst [vmem:[#allocation175_spill] sm:$0xff] %v10690_v26  ;;  %v2391_v33 = vmul.f32 %v10430_v54, %v15718_v48  ;;  %v10714_v26 = vpop.permute.xlu2 %2135  ;;  %v2200_v19 = vperm.slane %v10430_v54, %v15695_v42  ;;  %v2393_v38 = vmul.f32 %v10448_v21, %v15721_v4  ;;  %v2194_v47 = vperm.slane %v10428_v39, %v10055_v36  ;;  %v10733_v4 = vpop.permute.xlu0 %2138 }
 0x704   : > { %2961 = vadd.xlane.f32.xlu2 %v2960_v18  ;;  %2991 = vadd.xlane.f32.xlu0 %v2990_v63  ;;  %15717 = vst [vmem:[#allocation232_spill] sm:$0xff] %v10705_v49  ;;  %v2189_v18 = vsel %vm1578_vm11, %v2188_v23, %v2187_v0  ;;  %v15720_v63 = vld [vmem:[#allocation107_spill] sm:$0xff]  ;;  %v2470_v28 = vsel %vm2447_vm0, %v2392_v44, 0.0  ;;  %v2457_v48 = vsel %vm2447_vm0, %v2388_v5, 0.0  ;;  %v2459_v54 = vsel %vm2447_vm0, %v2389_v25, 0.0 }
 0x705   : > { %15719 = vst [vmem:[#allocation180_spill] sm:$0xff] %v10714_v26  ;;  %v2394_v45 = vmul.f32 %v10444_v1, %v15720_v63  ;;  %v2191_v50 = vsel %vm1582_vm12, %v2190_v61, %v2189_v18  ;;  %v15722_v49 = vld [vmem:[#allocation111_spill] sm:$0xff]  ;;  %v2456_v0 = vadd.f32 %v2455_v51, %v2454_v53  ;;  %v15723_v63 = vld [vmem:[#allocation170_spill] sm:$0xff]  ;;  %v2202_v44 = vsel %vm1574_vm10, %v2201_v20, %v2200_v19  ;;  %v10743_v51 = vpop.permute.xlu1 %2141  ;;  %v15724_v19 = vld [vmem:[#allocation69_spill] sm:$0xff] }
 0x706   : > { %2967 = vadd.xlane.f32.xlu1 %v2966_v37  ;;  %v2395_v23 = vmul.f32 %v10450_v62, %v15722_v49  ;;  %v2397_v26 = vmul.f32 %v10458_v17, %v15723_v63  ;;  %v2469_v37 = vsel %vm2447_vm0, %v2391_v33, 0.0  ;;  %v2205_v39 = vperm.slane %v10444_v1, %v15712_v16 }
 0x707   : > { %v2203_v61 = vperm.slane %v10448_v21, %v15708_v56  ;;  %v2471_v25 = vadd.f32 %v2470_v28, %v2469_v37  ;;  %v2193_v5 = vsel %vm1586_vm13, %v2192_v55, %v2191_v50  ;;  %v2458_v18 = vadd.f32 %v2457_v48, %v2456_v0  ;;  %v15725_v50 = vld [vmem:[#allocation39_spill] sm:$0xff] }
 0x708   : > { %v2472_v53 = vsel %vm2447_vm0, %v2393_v38, 0.0  ;;  %v2474_v63 = vsel %vm2447_vm0, %v2394_v45, 0.0  ;;  %v2207_v33 = vperm.slane %v10450_v62, %v15714_v58  ;;  %v2195_v20 = vsel %vm1590_vm14, %v2194_v47, %v2193_v5  ;;  %v15726_v62 = vld [vmem:[#allocation149_spill] sm:$0xff]  ;;  %v15727_v28 = vld [vmem:[#allocation15_spill] sm:$0xff] }
 0x709   : > { %v2390_v1 = vmul.f32 %v10440_v11, %v15724_v19  ;;  %v2476_v21 = vsel %vm2447_vm0, %v2395_v23, 0.0  ;;  %v2211_v55 = vperm.slane %v10458_v17, %v10101_v8  ;;  %v10755_v48 = vsel %vm2447_vm0, %v2397_v26, 0.0 }
 0x70a   : > { %v2399_v38 = vmul.f32 %v10462_v57, %v15725_v50  ;;  %v2398_v45 = vmul.f32 %v10460_v41, %v15726_v62  ;;  %v2400_v47 = vmul.f32 %v10464_v13, %v15727_v28  ;;  %v2204_v23 = vsel %vm1578_vm11, %v2203_v61, %v2202_v44  ;;  %v15728_v61 = vld [vmem:[#allocation14_spill] sm:$0xff] }
 0x70b   : > { %v2473_v0 = vadd.f32 %v2472_v53, %v2471_v25  ;;  %v2197_v17 = vsel %vm1594_vm15, %v2196_v32, %v2195_v20  ;;  %v2198_v26 = vperm.slane %v10440_v11, %v10106_v46  ;;  %v2460_v37 = vadd.f32 %v2459_v54, %v2458_v18  ;;  %v10779_v25 = vpop.permute.xlu2 %2144  ;;  %v15729_v54 = vld [vmem:[#allocation119_spill] sm:$0xff]  ;;  %v15730_v20 = vld [vmem:[#allocation53_spill] sm:$0xff] }
 0x70c   : > { %2970 = vadd.xlane.f32.xlu2 %v10601_v12  ;;  %3000 = vadd.xlane.f32.xlu0 %v10564_v6  ;;  %v2215_v12 = vperm.slane %v10462_v57, %v15695_v42  ;;  %v2213_v6 = vperm.slane %v10460_v41, %v10106_v46  ;;  %v2461_v5 = vsel %vm2447_vm0, %v2390_v1, 0.0  ;;  %v2216_v44 = vperm.slane %v10464_v13, %v15706_v43  ;;  %v15775_v19 = vld [vmem:[#allocation180_spill] sm:$0xff] }
 0x70d   : > { %v2401_v32 = vmul.f32 %v10466_v7, %v15728_v61  ;;  %v2206_v11 = vsel %vm1582_vm12, %v2205_v39, %v2204_v23  ;;  %v2209_v57 = vperm.slane %v10456_v3, %v10055_v36  ;;  %v2490_v41 = vsel %vm2447_vm0, %v2399_v38, 0.0  ;;  %v10801_v61 = vpop.permute.xlu0 %2147 }
 0x70e   : > { %2976 = vadd.xlane.f32.xlu1 %v10609_v31  ;;  %v2396_v31 = vmul.f32 %v10456_v3, %v15729_v54  ;;  %v10788_v18 = vsel %vm2447_vm0, %v2398_v45, 0.0  ;;  %v2491_v13 = vsel %vm2447_vm0, %v2400_v47, 0.0  ;;  %v2475_v53 = vadd.f32 %v2474_v63, %v2473_v0  ;;  %v15731_v3 = vld [vmem:[#allocation35_spill] sm:$0xff] }
 0x70f   : > { %v2403_v1 = vmul.f32 %v10470_v22, %v15730_v20  ;;  %v10794_v62 = vsel %vm15147_vm1, %v2198_v26, %v2197_v17  ;;  %v2217_v39 = vsel %vm1574_vm10, %v2216_v44, %v2215_v12  ;;  %v2220_v23 = vperm.slane %v10468_v40, %v15712_v16 }
 0x710   : > { %v2402_v38 = vmul.f32 %v10468_v40, %v15731_v3  ;;  %v10803_v45 = vadd.f32 %v2461_v5, %v2460_v37  ;;  %v2218_v63 = vperm.slane %v10466_v7, %v15708_v56  ;;  %v2208_v47 = vsel %vm1586_vm13, %v2207_v33, %v2206_v11  ;;  %v10813_v40 = vpop.permute.xlu1 %2150 }
 0x711   : > { %v2492_v0 = vadd.f32 %v2491_v13, %v2490_v41  ;;  %v2493_v17 = vsel %vm2447_vm0, %v2401_v32, 0.0  ;;  %v2222_v26 = vperm.slane %v10470_v22, %v15714_v58  ;;  %v2210_v12 = vsel %vm1590_vm14, %v2209_v57, %v2208_v47  ;;  %v15732_v32 = vld [vmem:[#allocation47_spill] sm:$0xff]  ;;  %v15733_v41 = vld [vmem:[#allocation77_spill] sm:$0xff] }
 0x712   : > { %v2478_v44 = vsel %vm2447_vm0, %v2396_v31, 0.0  ;;  %v2497_v7 = vsel %vm2447_vm0, %v2403_v1, 0.0  ;;  %v2224_v33 = vperm.slane %v10472_v2, %v10055_v36  ;;  %v2477_v37 = vadd.f32 %v2476_v21, %v2475_v53  ;;  %v15734_v1 = vld [vmem:[#allocation97_spill] sm:$0xff] }
 0x713   : > { %v2219_v5 = vsel %vm1578_vm11, %v2218_v63, %v2217_v39  ;;  %v2404_v22 = vmul.f32 %v10472_v2, %v15732_v32  ;;  %v2495_v57 = vsel %vm2447_vm0, %v2402_v38, 0.0  ;;  %v2407_v21 = vmul.f32 %v10478_v34, %v15733_v41 }
 0x714   : > { %2979 = vadd.xlane.f32.xlu2 %v10630_v24  ;;  %3009 = vadd.xlane.f32.xlu0 %v10592_v10  ;;  %v2221_v11 = vsel %vm1582_vm12, %v2220_v23, %v2219_v5  ;;  %v2231_v24 = vperm.slane %v10480_v35, %v15706_v43  ;;  %v2212_v10 = vsel %vm1594_vm15, %v2211_v55, %v2210_v12  ;;  %v15735_v23 = vld [vmem:[#allocation86_spill] sm:$0xff] }
 0x715   : > { %v2479_v31 = vadd.f32 %v2478_v44, %v2477_v37  ;;  %v2494_v13 = vadd.f32 %v2493_v17, %v2492_v0  ;;  %v2228_v53 = vperm.slane %v10476_v29, %v10106_v46  ;;  %v2230_v2 = vperm.slane %v10478_v34, %v15695_v42  ;;  %v10846_v17 = vpop.permute.xlu2 %2153  ;;  %v15737_v44 = vld [vmem:[#allocation101_spill] sm:$0xff] }
 0x716   : > { %2985 = vadd.xlane.f32.xlu1 %v10636_v60  ;;  %v2409_v39 = vmul.f32 %v10484_v14, %v15734_v1  ;;  %v2408_v38 = vmul.f32 %v10480_v35, %v15735_v23  ;;  %v15736_v60 = vld [vmem:[#allocation73_spill] sm:$0xff]  ;;  %v2223_v63 = vsel %vm1586_vm13, %v2222_v26, %v2221_v11  ;;  %v2226_v0 = vperm.slane %v10474_v30, %v10101_v8  ;;  %v15738_v11 = vld [vmem:[#allocation134_spill] sm:$0xff] }
 0x717   : > { %v10841_v55 = vmul.f32 %v10476_v29, %v15736_v60  ;;  %v2496_v47 = vadd.f32 %v2495_v57, %v2494_v13  ;;  %v2499_v34 = vsel %vm2447_vm0, %v2404_v22, 0.0  ;;  %v2214_v12 = vsel %vm15147_vm1, %v2213_v6, %v2212_v10  ;;  %v10866_v13 = vpop.permute.xlu0 %2156  ;;  %v15757_v60 = vld [vmem:[#allocation88_spill] sm:$0xff] }
 0x718   : > { %v2410_v37 = vmul.f32 %v10486_v9, %v15737_v44  ;;  %v2232_v35 = vsel %vm1574_vm10, %v2231_v24, %v2230_v2  ;;  %v10854_v29 = vadd.f32 %v10755_v48, %v2479_v31  ;;  %v2511_v26 = vsel %vm2447_vm0, %v2407_v21, 0.0  ;;  %v15739_v2 = vld [vmem:[#allocation124_spill] sm:$0xff] }
 0x719   : > { %v2233_v5 = vperm.slane %v10484_v14, %v15708_v56  ;;  %v2412_v57 = vmul.f32 %v10492_v52, %v15738_v11  ;;  %v2514_v22 = vsel %vm2447_vm0, %v2409_v39, 0.0  ;;  %v2235_v6 = vperm.slane %v10486_v9, %v15712_v16  ;;  %v15740_v39 = vld [vmem:[#allocation131_spill] sm:$0xff] }
 0x71a   : > { %v2225_v10 = vsel %vm1590_vm14, %v2224_v33, %v2223_v63  ;;  %v2512_v24 = vsel %vm2447_vm0, %v2408_v38, 0.0  ;;  %v2498_v48 = vadd.f32 %v2497_v7, %v2496_v47  ;;  %v2237_v21 = vperm.slane %v10490_v27, %v15714_v58  ;;  %v15741_v63 = vld [vmem:[#allocation13_spill] sm:$0xff]  ;;  %v15743_v7 = vld [vmem:[#allocation196_spill] sm:$0xff] }
 0x71b   : > { %v2227_v14 = vsel %vm1594_vm15, %v2226_v0, %v2225_v10  ;;  %v2234_v31 = vsel %vm1578_vm11, %v2233_v5, %v2232_v35  ;;  %v2516_v9 = vsel %vm2447_vm0, %v2410_v37, 0.0  ;;  %v2239_v33 = vperm.slane %v10492_v52, %v10055_v36  ;;  %v15744_v0 = vld [vmem:[#allocation25_spill] sm:$0xff]  ;;  %v15745_v35 = vld [vmem:[#allocation163_spill] sm:$0xff] }
 0x71c   : > { %2988 = vadd.xlane.f32.xlu2 %v10652_v15  ;;  %3018 = vadd.xlane.f32.xlu0 %v10613_v59  ;;  %v2413_v38 = vmul.f32 %v15740_v39, %v15739_v2  ;;  %v15742_v15 = vld [vmem:[#allocation220_spill] sm:$0xff]  ;;  %v10881_v59 = vpop.permute.xlu1 %2159  ;;  %v10885_v47 = vsel %vm2447_vm0, %v2412_v57, 0.0  ;;  %v2415_v5 = vmul.f32 %v15745_v35, %v15744_v0  ;;  %v2513_v37 = vadd.f32 %v2512_v24, %v2511_v26  ;;  %v15747_v24 = vld [vmem:[#allocation26_spill] sm:$0xff] }
 0x71d   : > { %v2416_v11 = vmul.f32 %v15742_v15, %v15741_v63  ;;  %v2305_v52 = vsel %vm618_vm2, %v2214_v12, %v10794_v62  ;;  %v2241_v10 = vperm.slane %v15740_v39, %v10101_v8  ;;  %v2229_v2 = vsel %vm15147_vm1, %v2228_v53, %v2227_v14  ;;  %v15746_v63 = vld [vmem:[#allocation63_spill] sm:$0xff]  ;;  %v15748_v14 = vld [vmem:[#allocation125_spill] sm:$0xff] }
 0x71e   : > { %2994 = vadd.xlane.f32.xlu1 %v15743_v7  ;;  %v2405_v44 = vmul.f32 %v10474_v30, %v15746_v63  ;;  %v2236_v7 = vsel %vm1582_vm12, %v2235_v6, %v2234_v31  ;;  %v10897_v1 = vadd.f32 %v2499_v34, %v2498_v48  ;;  %v2245_v57 = vperm.slane %v15745_v35, %v15695_v42  ;;  %v15749_v39 = vld [vmem:[#allocation113_spill] sm:$0xff]  ;;  %v15750_v35 = vld [vmem:[#allocation43_spill] sm:$0xff] }
 0x71f   : > { %v2246_v26 = vperm.slane %v15742_v15, %v15706_v43  ;;  %v2238_v62 = vsel %vm1586_vm13, %v2237_v21, %v2236_v7  ;;  %v10905_v12 = vsel %vm2447_vm0, %v2413_v38, 0.0  ;;  %v2533_v53 = vsel %vm2447_vm0, %v2416_v11, 0.0  ;;  %v15751_v15 = vld [vmem:[#allocation154_spill] sm:$0xff]  ;;  %v10916_v21 = vpop.permute.xlu2 %2162  ;;  %v15752_v7 = vld [vmem:[#allocation205_spill] sm:$0xff]  ;;  %v15762_v63 = vld [vmem:[#allocation99_spill] sm:$0xff] }
 0x720   : > { %v2418_v30 = vmul.f32 %v15748_v14, %v15747_v24  ;;  %v2411_v34 = vmul.f32 %v10490_v27, %v15749_v39  ;;  %v2532_v6 = vsel %vm2447_vm0, %v2415_v5, 0.0  ;;  %v2515_v48 = vadd.f32 %v2514_v22, %v2513_v37  ;;  %v15753_v5 = vld [vmem:[#allocation147_spill] sm:$0xff]  ;;  %v15754_v22 = vld [vmem:[#allocation201_spill] sm:$0xff] }
 0x721   : > { %v2306_v31 = vsel %vm621_vm3, %v2229_v2, %v2305_v52  ;;  %v2417_v0 = vmul.f32 %v15751_v15, %v15750_v35  ;;  %v10919_v38 = vsel %vm2447_vm0, %v2405_v44, 0.0  ;;  %v2240_v11 = vsel %vm1590_vm14, %v2239_v33, %v2238_v62  ;;  %v15755_v44 = vld [vmem:[#allocation38_spill] sm:$0xff]  ;;  %v15756_v35 = vld [vmem:[#allocation176_spill] sm:$0xff] }
 0x722   : > { %v2243_v24 = vperm.slane %v15752_v7, %v10106_v46  ;;  %v2248_v27 = vperm.slane %v15751_v15, %v15708_v56  ;;  %v2247_v2 = vsel %vm1574_vm10, %v2246_v26, %v2245_v57  ;;  %v2534_v37 = vadd.f32 %v2533_v53, %v2532_v6  ;;  %v15759_v57 = vld [vmem:[#allocation230_spill] sm:$0xff]  ;;  %v15760_v53 = vld [vmem:[#allocation184_spill] sm:$0xff] }
 0x723   : > { %v2250_v52 = vperm.slane %v15748_v14, %v15712_v16  ;;  %v2419_v39 = vmul.f32 %v15756_v35, %v15755_v44  ;;  %v2537_v33 = vsel %vm2447_vm0, %v2418_v30, 0.0  ;;  %v2252_v62 = vperm.slane %v15756_v35, %v15714_v58  ;;  %v15761_v44 = vld [vmem:[#allocation65_spill] sm:$0xff] }
 0x724   : > { %2997 = vadd.xlane.f32.xlu2 %v15753_v5  ;;  %3027 = vadd.xlane.f32.xlu0 %v15754_v22  ;;  %v2518_v15 = vsel %vm2447_vm0, %v2411_v34, 0.0  ;;  %v15758_v5 = vld [vmem:[#allocation156_spill] sm:$0xff]  ;;  %v10939_v22 = vpop.permute.xlu0 %2165  ;;  %v2517_v26 = vadd.f32 %v2516_v9, %v2515_v48  ;;  %v2256_v14 = vperm.slane %v15760_v53, %v10101_v8  ;;  %v2242_v6 = vsel %vm1594_vm15, %v2241_v10, %v2240_v11 }
 0x725   : > { %v2424_v23 = vmul.f32 %v15758_v5, %v15757_v60  ;;  %v2535_v30 = vsel %vm2447_vm0, %v2417_v0, 0.0  ;;  %v10948_v35 = vmul.f32 %v15760_v53, %v15761_v44  ;;  %v2244_v34 = vsel %vm15147_vm1, %v2243_v24, %v2242_v6  ;;  %v15763_v60 = vld [vmem:[#allocation142_spill] sm:$0xff]  ;;  %v15764_v10 = vld [vmem:[#allocation116_spill] sm:$0xff]  ;;  %v15766_v53 = vld [vmem:[#allocation199_spill] sm:$0xff] }
 0x726   : > { %3003 = vadd.xlane.f32.xlu1 %v15759_v57  ;;  %v2425_v41 = vmul.f32 %v15763_v60, %v15762_v63  ;;  %v2249_v32 = vsel %vm1578_vm11, %v2248_v27, %v2247_v2  ;;  %v10954_v57 = vpop.permute.xlu1 %2168  ;;  %v10957_v9 = vsel %vm2447_vm0, %v2419_v39, 0.0  ;;  %v10959_v48 = vadd.f32 %v2518_v15, %v2517_v26  ;;  %v15765_v0 = vld [vmem:[#allocation128_spill] sm:$0xff]  ;;  %v15767_v24 = vld [vmem:[#allocation127_spill] sm:$0xff] }
 0x727   : > { %v2427_v11 = vmul.f32 %v15765_v0, %v15764_v10  ;;  %v2260_v44 = vperm.slane %v15766_v53, %v15695_v42  ;;  %v2261_v63 = vperm.slane %v15758_v5, %v15706_v43  ;;  %v2554_v27 = vsel %vm2447_vm0, %v2424_v23, 0.0  ;;  %v15768_v10 = vld [vmem:[#allocation160_spill] sm:$0xff]  ;;  %v15769_v5 = vld [vmem:[#allocation83_spill] sm:$0xff] }
 0x728   : > { %v2536_v2 = vadd.f32 %v2535_v30, %v2534_v37  ;;  %v10971_v39 = vsel %vm624_vm4, %v2244_v34, %v2306_v31  ;;  %v2263_v15 = vperm.slane %v15763_v60, %v15708_v56  ;;  %v2251_v26 = vsel %vm1582_vm12, %v2250_v52, %v2249_v32  ;;  %v15770_v37 = vld [vmem:[#allocation188_spill] sm:$0xff]  ;;  %v15771_v30 = vld [vmem:[#allocation130_spill] sm:$0xff] }
 0x729   : > { %v2254_v20 = vperm.slane %v15768_v10, %v10055_v36  ;;  %v2556_v3 = vsel %vm2447_vm0, %v2425_v41, 0.0  ;;  %v2267_v6 = vperm.slane %v15765_v0, %v15714_v58  ;;  %v2423_v23 = vmul.f32 %v15766_v53, %v15769_v5  ;;  %v15772_v41 = vld [vmem:[#allocation167_spill] sm:$0xff]  ;;  %v10995_v0 = vpop.permute.xlu2 %2171 }
 0x72a   : > { %v2276_v31 = vperm.slane %v10743_v51, %v15706_v43  ;;  %v10988_v32 = vsel %vm2447_vm0, %v2427_v11, 0.0  ;;  %v2262_v60 = vsel %vm1574_vm10, %v2261_v63, %v2260_v44  ;;  %v2265_v52 = vperm.slane %v15772_v41, %v15712_v16  ;;  %v15774_v63 = vld [vmem:[#allocation206_spill] sm:$0xff] }
 0x72b   : > { %v2291_v34 = vperm.slane %v10939_v22, %v15706_v43  ;;  %v10997_v53 = vadd.f32 %v2537_v33, %v2536_v2  ;;  %v2253_v5 = vsel %vm1586_vm13, %v2252_v62, %v2251_v26  ;;  %v2293_v11 = vperm.slane %v10954_v57, %v15708_v56  ;;  %v15776_v62 = vld [vmem:[#allocation177_spill] sm:$0xff]  ;;  %v15777_v43 = vld [vmem:[#allocation54_spill] sm:$0xff] }
 0x72c   : > { %3006 = vadd.xlane.f32.xlu2 %v15770_v37  ;;  %3036 = vadd.xlane.f32.xlu0 %v15771_v30  ;;  %v2275_v37 = vperm.slane %v10733_v4, %v15695_v42  ;;  %v15773_v30 = vld [vmem:[#allocation159_spill] sm:$0xff]  ;;  %v2269_v44 = vperm.slane %v15774_v63, %v10055_v36  ;;  %v2255_v54 = vsel %vm1590_vm14, %v2254_v20, %v2253_v5  ;;  %v2553_v26 = vsel %vm2447_vm0, %v2423_v23, 0.0  ;;  %v11017_v28 = vpop.permute.xlu0 %2174 }
 0x72d   : > { %v2290_v33 = vperm.slane %v10916_v21, %v15695_v42  ;;  %v2431_v2 = vmul.f32 %v10733_v4, %v15776_v62  ;;  %v2264_v50 = vsel %vm1578_vm11, %v2263_v15, %v2262_v60  ;;  %v11021_v20 = vmul.f32 %v15768_v10, %v15777_v43  ;;  %v15778_v23 = vld [vmem:[#allocation19_spill] sm:$0xff]  ;;  %v15779_v60 = vld [vmem:[#allocation20_spill] sm:$0xff] }
 0x72e   : > { %3012 = vadd.xlane.f32.xlu1 %v15773_v30  ;;  %v2277_v30 = vsel %vm1574_vm10, %v2276_v31, %v2275_v37  ;;  %v2278_v5 = vperm.slane %v10779_v25, %v15708_v56  ;;  %v2266_v49 = vsel %vm1582_vm12, %v2265_v52, %v2264_v50  ;;  %v2257_v4 = vsel %vm1594_vm15, %v2256_v14, %v2255_v54  ;;  %v11033_v62 = vpop.permute.xlu1 %2177  ;;  %v15780_v14 = vld [vmem:[#allocation90_spill] sm:$0xff] }
 0x72f   : > { %v2292_v42 = vsel %vm1574_vm10, %v2291_v34, %v2290_v33  ;;  %v2433_v15 = vmul.f32 %v10779_v25, %v15778_v23  ;;  %v2432_v31 = vmul.f32 %v10743_v51, %v15779_v60  ;;  %v2555_v10 = vadd.f32 %v2554_v27, %v2553_v26  ;;  %v15781_v34 = vld [vmem:[#allocation181_spill] sm:$0xff]  ;;  %v15782_v27 = vld [vmem:[#allocation155_spill] sm:$0xff] }
 0x730   : > { %v2294_v37 = vsel %vm1578_vm11, %v2293_v11, %v2292_v42  ;;  %v2279_v43 = vsel %vm1578_vm11, %v2278_v5, %v2277_v30  ;;  %v2295_v50 = vperm.slane %v10995_v0, %v15712_v16  ;;  %v2282_v52 = vperm.slane %v10813_v40, %v15714_v58  ;;  %v15783_v11 = vld [vmem:[#allocation121_spill] sm:$0xff] }
 0x731   : > { %v2574_v54 = vsel %vm2447_vm0, %v2431_v2, 0.0  ;;  %v2280_v25 = vperm.slane %v10801_v61, %v15712_v16  ;;  %v2268_v51 = vsel %vm1586_vm13, %v2267_v6, %v2266_v49  ;;  %v2440_v42 = vmul.f32 %v10939_v22, %v15780_v14  ;;  %v15784_v26 = vld [vmem:[#allocation81_spill] sm:$0xff] }
 0x732   : > { %v2271_v33 = vperm.slane %v15783_v11, %v10101_v8  ;;  %v2439_v30 = vmul.f32 %v10916_v21, %v15784_v26  ;;  %v2296_v2 = vsel %vm1582_vm12, %v2295_v50, %v2294_v37  ;;  %v2299_v5 = vperm.slane %v11033_v62, %v10055_v36  ;;  %v15786_v14 = vld [vmem:[#allocation165_spill] sm:$0xff]  ;;  %v11066_v26 = vpop.permute.xlu2 %2180 }
 0x733   : > { %v2575_v49 = vsel %vm2447_vm0, %v2432_v31, 0.0  ;;  %v2297_v22 = vperm.slane %v11017_v28, %v15714_v58  ;;  %v2281_v6 = vsel %vm1582_vm12, %v2280_v25, %v2279_v43  ;;  %v2577_v23 = vsel %vm2447_vm0, %v2433_v15, 0.0  ;;  %v15787_v31 = vld [vmem:[#allocation103_spill] sm:$0xff] }
 0x734   : > { %3015 = vadd.xlane.f32.xlu2 %v15781_v34  ;;  %3045 = vadd.xlane.f32.xlu0 %v15782_v27  ;;  %v15785_v34 = vld [vmem:[#allocation91_spill] sm:$0xff]  ;;  %v2557_v21 = vadd.f32 %v2556_v3, %v2555_v10  ;;  %v2284_v37 = vperm.slane %v10846_v17, %v10055_v36  ;;  %v2283_v50 = vsel %vm1586_vm13, %v2282_v52, %v2281_v6  ;;  %v2596_v25 = vsel %vm2447_vm0, %v2440_v42, 0.0 }
 0x735   : > { %v2441_v27 = vmul.f32 %v10954_v57, %v15785_v34  ;;  %v2426_v60 = vmul.f32 %v15772_v41, %v15787_v31  ;;  %v2270_v43 = vsel %vm1590_vm14, %v2269_v44, %v2268_v51  ;;  %v2298_v57 = vsel %vm1586_vm13, %v2297_v22, %v2296_v2  ;;  %v11079_v34 = vpop.permute.xlu0 %2183  ;;  %v15788_v51 = vld [vmem:[#allocation32_spill] sm:$0xff] }
 0x736   : > { %3021 = vadd.xlane.f32.xlu1 %v15786_v14  ;;  %v2272_v14 = vsel %vm1594_vm15, %v2271_v33, %v2270_v43  ;;  %v2595_v3 = vsel %vm2447_vm0, %v2439_v30, 0.0  ;;  %v2576_v15 = vadd.f32 %v2575_v49, %v2574_v54  ;;  %v2300_v10 = vsel %vm1590_vm14, %v2299_v5, %v2298_v57  ;;  %v15789_v30 = vld [vmem:[#allocation104_spill] sm:$0xff]  ;;  %v15790_v49 = vld [vmem:[#allocation49_spill] sm:$0xff] }
 0x737   : > { %v2285_v52 = vsel %vm1590_vm14, %v2284_v37, %v2283_v50  ;;  %v2301_v6 = vperm.slane %v11066_v26, %v10101_v8  ;;  %v2288_v41 = vperm.slane %v10881_v59, %v10106_v46  ;;  %v2598_v44 = vsel %vm2447_vm0, %v2441_v27, 0.0  ;;  %v15791_v37 = vld [vmem:[#allocation192_spill] sm:$0xff]  ;;  %v15792_v50 = vld [vmem:[#allocation214_spill] sm:$0xff] }
 0x738   : > { %v2434_v42 = vmul.f32 %v10801_v61, %v15788_v51  ;;  %v2286_v54 = vperm.slane %v10866_v13, %v10101_v8  ;;  %v2597_v33 = vadd.f32 %v2596_v25, %v2595_v3  ;;  %v2442_v2 = vmul.f32 %v10995_v0, %v15789_v30  ;;  %v15795_v3 = vld [vmem:[#allocation136_spill] sm:$0xff] }
 0x739   : > { %v2558_v5 = vsel %vm2447_vm0, %v2426_v60, 0.0  ;;  %v2435_v22 = vmul.f32 %v10813_v40, %v15790_v49  ;;  %v15793_v27 = vperm.slane %v15767_v24, %v10106_v46  ;;  %v2302_v43 = vsel %vm1594_vm15, %v2301_v6, %v2300_v10  ;;  %v15850_v49 = vld [vmem:[#allocation46_spill] sm:$0xff] }
 0x73a   : > { %v2303_v25 = vperm.slane %v11079_v34, %v10106_v46  ;;  %v2599_v0 = vadd.f32 %v2598_v44, %v2597_v33  ;;  %v15794_v60 = vperm.slane %v15775_v19, %v10106_v46  ;;  %v2287_v57 = vsel %vm1594_vm15, %v2286_v54, %v2285_v52  ;;  %v15798_v54 = vld [vmem:[#allocation109_spill] sm:$0xff] }
 0x73b   : > { %v2259_v61 = vsel %vm15147_vm1, %v15793_v27, %v2257_v4  ;;  %v2578_v4 = vadd.f32 %v2577_v23, %v2576_v15  ;;  %v15796_v27 = vld [vmem:[#allocation138_spill] sm:$0xff]  ;;  %v2289_v10 = vsel %vm15147_vm1, %v2288_v41, %v2287_v57  ;;  %v2541_v6 = vsel %vm2447_vm0, %v11021_v20, 0.0 }
 0x73c   : > { %3024 = vadd.xlane.f32.xlu2 %v15791_v37  ;;  %3054 = vadd.xlane.f32.xlu0 %v15792_v50  ;;  %v2274_v40 = vsel %vm15147_vm1, %v15794_v60, %v2272_v14  ;;  %v2428_v37 = vmul.f32 %v15774_v63, %v15795_v3  ;;  %v2540_v50 = vadd.f32 %v10957_v9, %v10997_v53  ;;  %v2600_v63 = vsel %vm2447_vm0, %v2442_v2, 0.0  ;;  %v15799_v53 = vld [vmem:[#allocation115_spill] sm:$0xff] }
 0x73d   : > { %v2559_v44 = vadd.f32 %v2558_v5, %v2557_v21  ;;  %v2304_v14 = vsel %vm15147_vm1, %v2303_v25, %v2302_v43  ;;  %v2308_v52 = vsel %vm627_vm5, %v2259_v61, %v10971_v39  ;;  %v2443_v9 = vmul.f32 %v11017_v28, %v15798_v54  ;;  %v15801_v39 = vld [vmem:[#allocation61_spill] sm:$0xff]  ;;  %v15802_v61 = vld [vmem:[#allocation135_spill] sm:$0xff] }
 0x73e   : > { %3030 = vadd.xlane.f32.xlu1 %v15796_v27  ;;  %v2444_v23 = vmul.f32 %v11033_v62, %v15799_v53  ;;  %v2309_v15 = vsel %vm630_vm6, %v2274_v40, %v2308_v52  ;;  %v2579_v20 = vsel %vm2447_vm0, %v2434_v42, 0.0  ;;  %v2581_v21 = vsel %vm2447_vm0, %v2435_v22, 0.0  ;;  %v15803_v22 = vld [vmem:[#allocation157_spill] sm:$0xff] }
 0x73f   : > { %v11115_v33 = vpop.xlane.xlu2 %2901  ;;  %v2601_v41 = vadd.f32 %v2600_v63, %v2599_v0  ;;  %v2310_v43 = vsel %vm15194_vm7, %v2289_v10, %v2309_v15  ;;  %v2436_v2 = vmul.f32 %v10846_v17, %v15801_v39  ;;  %v2429_v28 = vmul.f32 %v15783_v11, %v15802_v61  ;;  %v15805_v10 = vld [vmem:[#allocation169_spill] sm:$0xff]  ;;  %v15809_v63 = vld [vmem:[#allocation59_spill] sm:$0xff] }
 0x740   : > { %15797 = vst [vmem:[#allocation194_spill] sm:$0xff] %v11115_v33  ;;  %v2580_v25 = vadd.f32 %v2579_v20, %v2578_v4  ;;  %v2311_v62 = vsel %vm15193_vm8, %v2304_v14, %v2310_v43  ;;  %v2502_v60 = vadd.f32 %v10919_v38, %v10897_v1  ;;  %v2543_v42 = vsel %vm2447_vm0, %v10948_v35, 0.0  ;;  %v15804_v4 = vld [vmem:[#allocation182_spill] sm:$0xff]  ;;  %v15806_v38 = vld [vmem:[#allocation75_spill] sm:$0xff] }
 0x741   : > { %v11128_v5 = vpop.xlane.xlu1 %2904  ;;  %v2414_v0 = vmul.f32 %v15752_v7, %v15803_v22  ;;  %v2561_v40 = vadd.f32 %v10988_v32, %v2559_v44  ;;  %v2542_v57 = vadd.f32 %v2541_v6, %v2540_v50  ;;  %v2602_v17 = vsel %vm2447_vm0, %v2443_v9, 0.0  ;;  %v15808_v44 = vld [vmem:[#allocation158_spill] sm:$0xff] }
 0x742   : > { %15800 = vst [vmem:[#allocation143_spill] sm:$0xff] %v11128_v5  ;;  %v2582_v27 = vadd.f32 %v2581_v21, %v2580_v25  ;;  %v2604_v11 = vsel %vm2447_vm0, %v2444_v23, 0.0  ;;  %v2521_v1 = vadd.f32 %v10885_v47, %v10959_v48  ;;  %v2422_v35 = vmul.f32 %v15767_v24, %v15806_v38  ;;  %v15810_v48 = vld [vmem:[#allocation71_spill] sm:$0xff] }
 0x743   : > { %v2603_v14 = vadd.f32 %v2602_v17, %v2601_v41  ;;  %vm15807_vm1 = vcmask 523264   ;;  %v2562_v32 = vsel %vm2447_vm0, %v2428_v37, 0.0  ;;  %v2583_v50 = vsel %vm2447_vm0, %v2436_v2, 0.0  ;;  %v15812_v21 = vld [vmem:[#allocation191_spill] sm:$0xff] }
 0x744   : > { %3033 = vadd.xlane.f32.xlu2 %v15804_v4  ;;  %3063 = vadd.xlane.f32.xlu0 %v15805_v10  ;;  %v2313_v7 = vsel %vm15807_vm1, %v2311_v62, 0.0  ;;  %v2564_v6 = vsel %vm2447_vm0, %v2429_v28, 0.0  ;;  %v2445_v52 = vmul.f32 %v11066_v26, %v15808_v44  ;;  %v2437_v9 = vmul.f32 %v10866_v13, %v15809_v63  ;;  %v15816_v10 = vld [vmem:[#allocation221_spill] sm:$0xff]  ;;  %v15852_v38 = vld [vmem:[#allocation31_spill] sm:$0xff] }
 0x745   : > { %v2563_v47 = vadd.f32 %v2562_v32, %v2561_v40  ;;  %v2438_v24 = vmul.f32 %v10881_v59, %v15810_v48  ;;  %v2605_v23 = vadd.f32 %v2604_v11, %v2603_v14  ;;  %v2524_v37 = vsel %vm2447_vm0, %v2414_v0, 0.0  ;;  %v15813_v0 = vld [vmem:[#allocation145_spill] sm:$0xff] }
 0x746   : > { %2314 = vadd.xlane.f32.xlu1 %v2313_v7  ;;  %v2544_v20 = vadd.f32 %v2543_v42, %v2542_v57  ;;  %v2430_v41 = vmul.f32 %v15775_v19, %v15812_v21  ;;  %v2584_v43 = vadd.f32 %v2583_v50, %v2582_v27  ;;  %v2483_v26 = vadd.f32 %v10788_v18, %v10854_v29  ;;  %v15814_v27 = vld [vmem:[#allocation232_spill] sm:$0xff] }
 0x747   : > { %v11161_v15 = vpop.xlane.xlu2 %2910  ;;  %v2503_v13 = vsel %vm2447_vm0, %v10841_v55, 0.0  ;;  %v2523_v2 = vadd.f32 %v10905_v12, %v2521_v1  ;;  %v2565_v28 = vadd.f32 %v2564_v6, %v2563_v47  ;;  %v2545_v62 = vsel %vm2447_vm0, %v2422_v35, 0.0 }
 0x748   : > { %15811 = vst [vmem:[#allocation204_spill] sm:$0xff] %v11161_v15  ;;  %v2504_v25 = vadd.f32 %v2503_v13, %v2502_v60  ;;  %v2606_v42 = vsel %vm2447_vm0, %v2445_v52, 0.0  ;;  %v2446_v19 = vmul.f32 %v11079_v34, %v15813_v0  ;;  %v2585_v57 = vsel %vm2447_vm0, %v2437_v9, 0.0  ;;  %v15815_v60 = vld [vmem:[#allocation175_spill] sm:$0xff] }
 0x749   : > { %v11171_v59 = vpop.xlane.xlu1 %2913  ;;  %v2525_v40 = vadd.f32 %v2524_v37, %v2523_v2  ;;  %v2587_v18 = vsel %vm2447_vm0, %v2438_v24, 0.0  ;;  %v2607_v29 = vadd.f32 %v2606_v42, %v2605_v23  ;;  %v2546_v55 = vadd.f32 %v2545_v62, %v2544_v20  ;;  %v15817_v20 = vld [vmem:[#allocation210_spill] sm:$0xff] }
 0x74a   : > { %v2566_v12 = vsel %vm2447_vm0, %v2430_v41, 0.0  ;;  %v2586_v17 = vadd.f32 %v2585_v57, %v2584_v43  ;;  %v2484_v11 = vrot.slane %v2483_v26, 4  ;;  %v3038_v1 = vsel %vm15187_vm9, %v15816_v10, 0.0  ;;  %v15819_v57 = vld [vmem:[#allocation229_spill] sm:$0xff] }
 0x74b   : > { %v2567_v4 = vadd.f32 %v2566_v12, %v2565_v28  ;;  %v2505_v34 = vrot.slane %v2504_v25, 4  ;;  %v2608_v35 = vsel %vm2447_vm0, %v2446_v19, 0.0  ;;  %v2463_v7 = vrot.slane %v10803_v45, 4  ;;  %v15818_v28 = vld [vmem:[#allocation231_spill] sm:$0xff] }
 0x74c   : > { %3042 = vadd.xlane.f32.xlu2 %v15814_v27  ;;  %3072 = vadd.xlane.f32.xlu0 %v15815_v60  ;;  %v2588_v14 = vadd.f32 %v2587_v18, %v2586_v17  ;;  %v2526_v32 = vrot.slane %v2525_v40, 4  ;;  %v2609_v50 = vadd.f32 %v2608_v35, %v2607_v29  ;;  %v2547_v52 = vrot.slane %v2546_v55, 4  ;;  %v11197_v27 = vpop.xlane.xlu0 %2907 }
 0x74d   : > { %v2485_v9 = vadd.f32 %v2484_v11, %v2483_v26  ;;  %v2568_v47 = vrot.slane %v2567_v4, 4  ;;  %v2506_v23 = vadd.f32 %v2505_v34, %v2504_v25  ;;  %v3080_v41 = vsel %vm15187_vm9, %v15817_v20, 0.0  ;;  %v15823_v20 = vld [vmem:[#allocation219_spill] sm:$0xff] }
 0x74e   : > { %3039 = vadd.xlane.f32.xlu1 %v3038_v1  ;;  %v2589_v37 = vrot.slane %v2588_v14, 4  ;;  %v2464_v43 = vadd.f32 %v2463_v7, %v10803_v45  ;;  %v2527_v13 = vadd.f32 %v2526_v32, %v2525_v40  ;;  %v2610_v2 = vrot.slane %v2609_v50, 4  ;;  %v15822_v7 = vld [vmem:[#allocation200_spill] sm:$0xff] }
 0x74f   : > { %v11186_v6 = vpop.xlane.xlu2 %2916  ;;  %v3050_v62 = vsel %vm15187_vm9, %v15818_v28, 0.0  ;;  %v2548_v42 = vadd.f32 %v2547_v52, %v2546_v55  ;;  %v2486_v19 = vrot.slane %v2485_v9, 2  ;;  %v2569_v26 = vadd.f32 %v2568_v47, %v2567_v4 }
 0x750   : > { %v3047_v18 = vsel %vm15187_vm9, %v15819_v57, 0.0  ;;  %v2507_v25 = vrot.slane %v2506_v23, 2  ;;  %v2590_v29 = vadd.f32 %v2589_v37, %v2588_v14  ;;  %v2465_v12 = vrot.slane %v2464_v43, 2 }
 0x751   : > { %v11188_v24 = vpop.xlane.xlu1 %2922  ;;  %v2528_v17 = vrot.slane %v2527_v13, 2  ;;  %v2611_v40 = vadd.f32 %v2610_v2, %v2609_v50  ;;  %v2549_v60 = vrot.slane %v2548_v42, 2  ;;  %v2487_v11 = vadd.f32 %v2486_v19, %v2485_v9 }
 0x752   : > { %v2570_v55 = vrot.slane %v2569_v26, 2  ;;  %v2508_v1 = vadd.f32 %v2507_v25, %v2506_v23  ;;  %v2591_v4 = vrot.slane %v2590_v29, 2  ;;  %v2466_v34 = vadd.f32 %v2465_v12, %v2464_v43 }
 0x753   : > { %v2529_v35 = vadd.f32 %v2528_v17, %v2527_v13  ;;  %v3089_v14 = vsel %vm15187_vm9, %v15822_v7, 0.0  ;;  %v2612_v32 = vrot.slane %v2611_v40, 2  ;;  %v2550_v52 = vadd.f32 %v2549_v60, %v2548_v42 }
 0x754   : > { %3051 = vadd.xlane.f32.xlu2 %v3050_v62  ;;  %3081 = vadd.xlane.f32.xlu0 %v3080_v41  ;;  %v2488_v47 = vrot.slane %v2487_v11, 1  ;;  %v2571_v37 = vadd.f32 %v2570_v55, %v2569_v26  ;;  %v3056_v50 = vsel %vm15187_vm9, %v15823_v20, 0.0  ;;  %v2509_v41 = vrot.slane %v2508_v1, 1  ;;  %v11209_v19 = vpop.xlane.xlu0 %2919 }
 0x755   : > { %v2592_v9 = vadd.f32 %v2591_v4, %v2590_v29  ;;  %v2467_v2 = vrot.slane %v2466_v34, 1  ;;  %v2530_v28 = vrot.slane %v2529_v35, 1  ;;  %v2613_v43 = vadd.f32 %v2612_v32, %v2611_v40  ;;  %v15826_v29 = vld [vmem:[#allocation186_spill] sm:$0xff] }
 0x756   : > { %3048 = vadd.xlane.f32.xlu1 %v3047_v18  ;;  %v2551_v13 = vrot.slane %v2550_v52, 1  ;;  %v2489_v62 = vadd.f32 %v2488_v47, %v2487_v11  ;;  %v2572_v42 = vrot.slane %v2571_v37, 1  ;;  %v2510_v18 = vadd.f32 %v2509_v41, %v2508_v1 }
 0x757   : > { %v11199_v45 = vpop.xlane.xlu2 %2925  ;;  %v2593_v26 = vrot.slane %v2592_v9, 1  ;;  %v2468_v25 = vadd.f32 %v2467_v2, %v2466_v34  ;;  %v2531_v12 = vadd.f32 %v2530_v28, %v2529_v35  ;;  %v2614_v17 = vrot.slane %v2613_v43, 1 }
 0x758   : > { %15820 = vst [vmem:[#allocation209_spill] sm:$0xff] %v11199_v45  ;;  %v2552_v60 = vadd.f32 %v2551_v13, %v2550_v52  ;;  %v3065_v55 = vsel %vm15187_vm9, %v15826_v29, 0.0  ;;  %v2573_v4 = vadd.f32 %v2572_v42, %v2571_v37  ;;  %v15851_v3 = vperm.slane %v15850_v49, 1 }
 0x759   : > { %v11201_v10 = vpop.xlane.xlu1 %2931  ;;  %v2624_v7 = vsel %vm618_vm2, %v2489_v62, %v2468_v25  ;;  %v2594_v40 = vadd.f32 %v2593_v26, %v2592_v9  ;;  %v2615_v32 = vadd.f32 %v2614_v17, %v2613_v43  ;;  %v15832_v43 = vld [vmem:[#allocation122_spill] sm:$0xff]  ;;  %vm15864_vm0 = vcmask 523712  }
 0x75a   : > { %15821 = vst [vmem:[#allocation178_spill] sm:$0xff] %v11201_v10  ;;  %v2625_v11 = vsel %vm621_vm3, %v2510_v18, %v2624_v7  ;;  %v3083_v13 = vsel %vm15187_vm9, %v15832_v43, 0.0  ;;  %v15837_v7 = vld [vmem:[#allocation168_spill] sm:$0xff]  ;;  %vm15871_vm1 = vmmov %vm15864_vm0 }
 0x75b   : > { %v2626_v1 = vsel %vm624_vm4, %v2531_v12, %v2625_v11 }
 0x75c   : > { %3090 = vadd.xlane.f32.xlu0 %v3089_v14  ;;  %v2627_v34 = vsel %vm627_vm5, %v2552_v60, %v2626_v1  ;;  %v11225_v37 = vpop.xlane.xlu0 %2928  ;;  %v15840_v1 = vld [vmem:[#allocation215_spill] sm:$0xff] }
 0x75d   : > { %v2628_v52 = vsel %vm630_vm6, %v2573_v4, %v2627_v34  ;;  %15829 = vst [vmem:[#allocation146_spill] sm:$0xff] %v11225_v37  ;;  %v3068_v34 = vsel %vm15187_vm9, %v15840_v1, 0.0 }
 0x75e   : > { %3057 = vadd.xlane.f32.xlu1 %v3056_v50  ;;  %v2629_v47 = vsel %vm15194_vm7, %v2594_v40, %v2628_v52  ;;  %v15830_v50 = vld [vmem:[#allocation129_spill] sm:$0xff]  ;;  %v3059_v40 = vsel %vm15187_vm9, %v15837_v7, 0.0 }
 0x75f   : > { %v11207_v23 = vpop.xlane.xlu2 %2934  ;;  %v2630_v20 = vsel %vm15193_vm8, %v2615_v32, %v2629_v47  ;;  %v3074_v41 = vsel %vm15187_vm9, %v15830_v50, 0.0  ;;  %v15843_v7 = vld [vmem:[#allocation153_spill] sm:$0xff] }
 0x760   : > { %15824 = vst [vmem:[#allocation207_spill] sm:$0xff] %v11207_v23 }
 0x761   : > { %v11211_v57 = vpop.xlane.xlu1 %2940 }
 0x762   : > { %15825 = vst [vmem:[#allocation223_spill] sm:$0xff] %v11211_v57 }
 0x764   : > { %v11235_v28 = vpop.xlane.xlu0 %2937 }
 0x766   : > { %3066 = vadd.xlane.f32.xlu1 %v3065_v55 }
 0x767   : > { %v11217_v14 = vpop.xlane.xlu2 %2943 }
 0x768   : > { %15827 = vst [vmem:[#allocation195_spill] sm:$0xff] %v11217_v14 }
 0x769   : > { %v11221_v35 = vpop.xlane.xlu1 %2949 }
 0x76a   : > { %15828 = vst [vmem:[#allocation123_spill] sm:$0xff] %v11221_v35 }
 0x76c   : > { %2631 = vrot.lane.b32.xlu2 %v2630_v20, %s8244_s30  ;;  %v11243_v18 = vpop.xlane.xlu0 %2946  ;;  %v15842_v20 = vld [vmem:[#allocation151_spill] sm:$0xff] }
 0x76d   : > { %v3077_v50 = vsel %vm15187_vm9, %v15842_v20, 0.0  ;;  %v15846_v20 = vld [vmem:[#allocation212_spill] sm:$0xff] }
 0x76e   : > { %3075 = vadd.xlane.f32.xlu1 %v3074_v41 }
 0x76f   : > { %v11231_v9 = vpop.xlane.xlu2 %2952 }
 0x770   : > { %15831 = vst [vmem:[#allocation132_spill] sm:$0xff] %v11231_v9 }
 0x771   : > { %v11233_v2 = vpop.xlane.xlu1 %2958 }
 0x774   : > { %v11251_v17 = vpop.xlane.xlu0 %2955 }
 0x776   : > { %3084 = vadd.xlane.f32.xlu1 %v3083_v13 }
 0x777   : > { %v11239_v62 = vpop.xlane.xlu2 %2961 }
 0x778   : > { %15833 = vst [vmem:[#allocation137_spill] sm:$0xff] %v11239_v62 }
 0x779   : > { %v11241_v42 = vpop.xlane.xlu1 %2967 }
 0x77c   : > { %v11259_v4 = vpop.xlane.xlu0 %2964 }
 0x77f   : > { %v11245_v26 = vpop.xlane.xlu2 %2970 }
 0x781   : > { %v11247_v25 = vpop.xlane.xlu1 %2976 }
 0x782   : > { %15834 = vst [vmem:[#allocation133_spill] sm:$0xff] %v11247_v25 }
 0x784   : > { %v11269_v52 = vpop.xlane.xlu0 %2973 }
 0x787   : > { %v11249_v12 = vpop.xlane.xlu2 %2979 }
 0x788   : > { %15835 = vst [vmem:[#allocation144_spill] sm:$0xff] %v11249_v12 }
 0x789   : > { %v11253_v60 = vpop.xlane.xlu1 %2985 }
 0x78c   : > { %v11277_v43 = vpop.xlane.xlu0 %2982 }
 0x78f   : > { %v11255_v29 = vpop.xlane.xlu2 %2988 }
 0x791   : > { %v11257_v55 = vpop.xlane.xlu1 %2994 }
 0x792   : > { %15836 = vst [vmem:[#allocation164_spill] sm:$0xff] %v11257_v55  ;;  %v3176_v55 = vperm.slane %v11207_v23, %v15712_v16  ;;  %v3178_v23 = vperm.slane %v11235_v28, %v15714_v58 }
 0x795   : > { %3060 = vadd.xlane.f32.xlu2 %v3059_v40  ;;  %v3086_v40 = vsel %vm15187_vm9, %v15843_v7, 0.0 }
 0x797   : > { %v11263_v11 = vpop.xlane.xlu2 %2997 }
 0x798   : > { %15838 = vst [vmem:[#allocation166_spill] sm:$0xff] %v11263_v11 }
 0x799   : > { %v11265_v32 = vpop.xlane.xlu1 %3003 }
 0x79a   : > { %15839 = vst [vmem:[#allocation174_spill] sm:$0xff] %v11265_v32 }
 0x79d   : > { %3069 = vadd.xlane.f32.xlu2 %v3068_v34  ;;  %v11287_v34 = vpop.xlane.xlu0 %2991 }
 0x79f   : > { %v11271_v47 = vpop.xlane.xlu2 %3006 }
 0x7a0   : > { %15841 = vst [vmem:[#allocation173_spill] sm:$0xff] %v11271_v47 }
 0x7a1   : > { %v11275_v41 = vpop.xlane.xlu1 %3012 }
 0x7a5   : > { %3078 = vadd.xlane.f32.xlu2 %v3077_v50  ;;  %v15847_v50 = vld [vmem:[#allocation148_spill] sm:$0xff]  ;;  %v11295_v54 = vpop.xlane.xlu0 %3000 }
 0x7a6   : > { %v1717_v53 = vsub.f32 %v15847_v50, %v15846_v20  ;;  %v11306_v20 = vadd.f32 %v15852_v38, %v15851_v3 }
 0x7a7   : > { %v11279_v13 = vpop.xlane.xlu2 %3015 }
 0x7a8   : > { %v1718_v48 = vmul.f32 1.442695, %v1717_v53  ;;  %15853 = vst [vmem:[#allocation189_spill] sm:$0xff] %v11306_v20 }
 0x7a9   : > { %v11285_v44 = vpop.xlane.xlu1 %3021 }
 0x7aa   : > { %15845 = vst [vmem:[#allocation211_spill] sm:$0xff] %v11285_v44  ;;  %7707 = vpow2.f32 %v1718_v48 }
 0x7ad   : > { %3087 = vadd.xlane.f32.xlu2 %v3086_v40  ;;  %v11299_v40 = vpop.xlane.xlu0 %3009 }
 0x7af   : > { %v11283_v1 = vpop.xlane.xlu2 %3024 }
 0x7b0   : > { %15844 = vst [vmem:[#allocation171_spill] sm:$0xff] %v11283_v1  ;;  %v7708_v21 = vpop.eup %7707 }
 0x7b1   : > { %v11293_v30 = vpop.xlane.xlu1 %3030  ;;  %v2318_v50 = vmul.f32 %v7708_v21, %v11306_v20 }
 0x7b5   : > { %v11309_v51 = vpop.xlane.xlu0 %3018 }
 0x7b6   : > { %15854 = vst [vmem:[#allocation190_spill] sm:$0xff] %v11309_v51 }
 0x7b7   : > { %v11289_v0 = vpop.xlane.xlu2 %3033 }
 0x7b9   : > { %v2315_v7 = vpop.xlane.xlu1 %2314 }
 0x7ba   : > { %v2316_v39 = vadd.f32 %v7708_v21, %v2315_v7  ;;  %v15859_v21 = vld [vmem:[#allocation222_spill] sm:$0xff] }
 0x7bb   : > { %v3171_v20 = vperm.slane %v11199_v45, %v15859_v21 }
 0x7bc   : > { %7709 = vrcp.f32 %v2316_v39 }
 0x7bf   : > { %v11297_v63 = vpop.xlane.xlu2 %3042 }
 0x7c0   : > { %15848 = vst [vmem:[#allocation187_spill] sm:$0xff] %v11297_v63  ;;  %v11312_v63 = vpop.xlane.xlu0 %3027 }
 0x7c1   : > { %v11316_v39 = vpop.xlane.xlu1 %3039 }
 0x7c2   : > { %v7710_v48 = vpop.eup %7709  ;;  %15856 = vst [vmem:[#allocation197_spill] sm:$0xff] %v11316_v39 }
 0x7c7   : > { %v11301_v61 = vpop.xlane.xlu2 %3051 }
 0x7c8   : > { %15849 = vst [vmem:[#allocation183_spill] sm:$0xff] %v11301_v61  ;;  %v11314_v7 = vpop.xlane.xlu0 %3036 }
 0x7c9   : > { %15855 = vst [vmem:[#allocation185_spill] sm:$0xff] %v11314_v7  ;;  %v11320_v3 = vpop.xlane.xlu1 %3048 }
 0x7ca   : > { %15858 = vst [vmem:[#allocation203_spill] sm:$0xff] %v11320_v3 }
 0x7cf   : > { %v2632_v53 = vpop.permute.xlu2 %2631 }
 0x7d0   : > { %v2634_v31 = vadd.f32 %v2632_v53, %v2318_v50  ;;  %v11318_v49 = vpop.xlane.xlu0 %3045  ;;  %v15860_v50 = vld [vmem:[#allocation224_spill] sm:$0xff] }
 0x7d1   : > { %15857 = vst [vmem:[#allocation202_spill] sm:$0xff] %v11318_v49  ;;  %v3157_v53 = vperm.slane %v11128_v5, %v15860_v50  ;;  %v11334_v51 = vpop.xlane.xlu1 %3057  ;;  %v3159_v5 = vperm.slane %v11197_v27, %v15708_v56 }
 0x7d2   : > { %v2635_v22 = vmul.f32 %v7710_v48, %v2634_v31  ;;  %v3156_v31 = vperm.slane %v11115_v33, %v15859_v21  ;;  %v3174_v48 = vperm.slane %v11201_v10, %v15708_v56  ;;  %15861 = vst [vmem:[#allocation208_spill] sm:$0xff] %v11334_v51 }
 0x7d4   : > { %2636 = vst.msk [vmem:[#allocation2] sm:$0xff] %vm15187_vm9, %v2635_v22  ;;  %v3172_v22 = vperm.slane %v11225_v37, %v15860_v50  ;;  %v3158_v33 = vsel %vm1574_vm10, %v3157_v53, %v3156_v31  ;;  %v3161_v37 = vperm.slane %v11161_v15, %v15712_v16  ;;  %v3163_v31 = vperm.slane %v11171_v59, %v15714_v58  ;;  %vm15874_vm9 = vmmov %vm15864_vm0 }
 0x7d5   : > { %v3165_v15 = vperm.slane %v11186_v6, %v10055_v36 }
 0x7d6   : > { %v3173_v7 = vsel %vm1574_vm10, %v3172_v22, %v3171_v20  ;;  %v3187_v20 = vperm.slane %v11231_v9, %v15860_v50  ;;  %v3160_v22 = vsel %vm1578_vm11, %v3159_v5, %v3158_v33  ;;  %v3182_v33 = vperm.slane %v11217_v14, %v10101_v8 }
 0x7d7   : > { %v3175_v39 = vsel %vm1578_vm11, %v3174_v48, %v3173_v7  ;;  %v3162_v53 = vsel %vm1582_vm12, %v3161_v37, %v3160_v22  ;;  %v3180_v7 = vperm.slane %v11211_v57, %v10055_v36  ;;  %v3189_v22 = vperm.slane %v11251_v17, %v15708_v56 }
 0x7d8   : > { %v11322_v38 = vpop.xlane.xlu0 %3054  ;;  %v3177_v10 = vsel %vm1582_vm12, %v3176_v55, %v3175_v39  ;;  %v3186_v55 = vperm.slane %v11221_v35, %v15859_v21  ;;  %v3164_v37 = vsel %vm1586_vm13, %v3163_v31, %v3162_v53 }
 0x7d9   : > { %v3179_v39 = vsel %vm1586_vm13, %v3178_v23, %v3177_v10  ;;  %v11371_v9 = vpop.xlane.xlu1 %3066  ;;  %v3166_v57 = vsel %vm1590_vm14, %v3165_v15, %v3164_v37  ;;  %v3191_v10 = vperm.slane %v11233_v2, %v15712_v16  ;;  %v3202_v23 = vperm.slane %v11247_v25, %v15860_v50 }
 0x7da   : > { %v3188_v5 = vsel %vm1574_vm10, %v3187_v20, %v3186_v55  ;;  %v3181_v35 = vsel %vm1590_vm14, %v3180_v7, %v3179_v39  ;;  %v3167_v20 = vperm.slane %v11209_v19, %v10101_v8  ;;  %v3204_v55 = vperm.slane %v11249_v12, %v15708_v56 }
 0x7db   : > { %v3183_v31 = vsel %vm1594_vm15, %v3182_v33, %v3181_v35  ;;  %v3190_v53 = vsel %vm1578_vm11, %v3189_v22, %v3188_v5  ;;  %v3184_v15 = vperm.slane %v11243_v18, %v10106_v46  ;;  %v3201_v7 = vperm.slane %v11269_v52, %v15859_v21 }
 0x7dc   : > { %v3193_v39 = vperm.slane %v11239_v62, %v15714_v58  ;;  %v3216_v37 = vperm.slane %v11263_v11, %v15859_v21  ;;  %v11396_v35 = vsel %vm1594_vm15, %v3167_v20, %v3166_v57  ;;  %v3195_v5 = vperm.slane %v11259_v4, %v10055_v36 }
 0x7dd   : > { %v3232_v22 = vperm.slane %v11283_v1, %v15860_v50  ;;  %v11405_v12 = vsel %vm15864_vm0, %v3184_v15, %v3183_v31  ;;  %v3192_v25 = vsel %vm1582_vm12, %v3191_v10, %v3190_v53  ;;  %v3217_v11 = vperm.slane %v11295_v54, %v15860_v50 }
 0x7de   : > { %v3203_v57 = vsel %vm1574_vm10, %v3202_v23, %v3201_v7  ;;  %v3219_v33 = vperm.slane %v11265_v32, %v15708_v56  ;;  %v3231_v62 = vperm.slane %v11285_v44, %v15859_v21  ;;  %v3247_v1 = vperm.slane %v11320_v3, %v15860_v50 }
 0x7df   : > { %v3205_v20 = vsel %vm1578_vm11, %v3204_v55, %v3203_v57  ;;  %v3206_v31 = vperm.slane %v11277_v43, %v15712_v16  ;;  %v3194_v10 = vsel %vm1586_vm13, %v3193_v39, %v3192_v25  ;;  %v3212_v53 = vperm.slane %v11287_v34, %v10101_v8 }
 0x7e0   : > { %v11339_v45 = vpop.xlane.xlu0 %3063  ;;  %v3218_v23 = vsel %vm1574_vm10, %v3217_v11, %v3216_v37  ;;  %v3208_v15 = vperm.slane %v11253_v60, %v15714_v58  ;;  %v3221_v7 = vperm.slane %v11271_v47, %v15712_v16  ;;  %v3246_v57 = vperm.slane %v11318_v49, %v15859_v21 }
 0x7e1   : > { %v3233_v3 = vsel %vm1574_vm10, %v3232_v22, %v3231_v62  ;;  %v3197_v25 = vperm.slane %v11241_v42, %v10101_v8  ;;  %v3207_v39 = vsel %vm1582_vm12, %v3206_v31, %v3205_v20  ;;  %v3210_v11 = vperm.slane %v11255_v29, %v10055_v36  ;;  %v11445_v22 = vpop.xlane.xlu1 %3075 }
 0x7e2   : > { %v3234_v37 = vperm.slane %v11312_v63, %v15708_v56  ;;  %v3196_v44 = vsel %vm1590_vm14, %v3195_v5, %v3194_v10  ;;  %v3220_v47 = vsel %vm1578_vm11, %v3219_v33, %v3218_v23  ;;  %v3236_v49 = vperm.slane %v11293_v30, %v15712_v16  ;;  %15866 = vst [vmem:[#allocation213_spill] sm:$0xff] %v11445_v22 }
 0x7e3   : > { %v3248_v62 = vsel %vm1574_vm10, %v3247_v1, %v3246_v57  ;;  %v3238_v20 = vperm.slane %v11289_v0, %v15714_v58  ;;  %v3249_v31 = vperm.slane %v11301_v61, %v15708_v56  ;;  %v3199_v33 = vperm.slane %v11245_v26, %v10106_v46 }
 0x7e4   : > { %v3235_v32 = vsel %vm1578_vm11, %v3234_v37, %v3233_v3  ;;  %v3223_v10 = vperm.slane %v11299_v40, %v15714_v58  ;;  %v3209_v1 = vsel %vm1586_vm13, %v3208_v15, %v3207_v39  ;;  %v3222_v23 = vsel %vm1582_vm12, %v3221_v7, %v3220_v47 }
 0x7e5   : > { %v3211_v57 = vsel %vm1590_vm14, %v3210_v11, %v3209_v1  ;;  %v3250_v61 = vsel %vm1578_vm11, %v3249_v31, %v3248_v62  ;;  %v3251_v15 = vperm.slane %v11322_v38, %v15712_v16  ;;  %v3237_v47 = vsel %vm1582_vm12, %v3236_v49, %v3235_v32 }
 0x7e6   : > { %v3224_v39 = vsel %vm1586_vm13, %v3223_v10, %v3222_v23  ;;  %v3227_v11 = vperm.slane %v11279_v13, %v10101_v8  ;;  %v3239_v62 = vsel %vm1586_vm13, %v3238_v20, %v3237_v47  ;;  %v3264_v32 = vperm.slane %v11445_v22, %v15708_v56  ;;  %v15869_v23 = vld [vmem:[#allocation164_spill] sm:$0xff] }
 0x7e7   : > { %v3198_v10 = vsel %vm1594_vm15, %v3197_v25, %v3196_v44  ;;  %v3214_v20 = vperm.slane %v15869_v23, %v10106_v46  ;;  %v3257_v44 = vperm.slane %v11339_v45, %v10101_v8 }
 0x7e8   : > { %v11385_v14 = vpop.xlane.xlu0 %3072  ;;  %v3200_v22 = vsel %vm15871_vm1, %v3199_v33, %v3198_v10  ;;  %v15875_v33 = vld [vmem:[#allocation187_spill] sm:$0xff]  ;;  %vm15876_vm1 = vmmov %vm15864_vm0 }
 0x7e9   : > { %15863 = vst [vmem:[#allocation226_spill] sm:$0xff] %v11385_v14  ;;  %v3262_v37 = vperm.slane %v11385_v14, %v15860_v50  ;;  %v15868_v50 = vld [vmem:[#allocation197_spill] sm:$0xff] }
 0x7ea   : > { %v3242_v14 = vperm.slane %v15868_v50, %v10101_v8 }
 0x7f0   : > { %v11460_v3 = vpop.xlane.xlu0 %3081 }
 0x808   : > { %v11366_v48 = vpop.xlane.xlu2 %3060 }
 0x809   : > { %15862 = vst [vmem:[#allocation198_spill] sm:$0xff] %v11366_v48  ;;  %v3255_v7 = vperm.slane %v11366_v48, %v10055_v36  ;;  %v3213_v48 = vsel %vm1594_vm15, %v3212_v53, %v3211_v57  ;;  %v11510_v57 = vpop.xlane.xlu1 %3084 }
 0x810   : > { %v11424_v55 = vpop.xlane.xlu2 %3069 }
 0x811   : > { %15865 = vst [vmem:[#allocation216_spill] sm:$0xff] %v11424_v55  ;;  %v3261_v5 = vperm.slane %v11424_v55, %v15859_v21  ;;  %v3253_v21 = vperm.slane %v11334_v51, %v15714_v58  ;;  %v3225_v55 = vperm.slane %v11275_v41, %v10055_v36  ;;  %v3252_v51 = vsel %vm1582_vm12, %v3251_v15, %v3250_v61 }
 0x813   : > { %v3263_v31 = vsel %vm1574_vm10, %v3262_v37, %v3261_v5  ;;  %v15870_v5 = vld [vmem:[#allocation185_spill] sm:$0xff]  ;;  %v3254_v47 = vsel %vm1586_vm13, %v3253_v21, %v3252_v51  ;;  %v3226_v61 = vsel %vm1590_vm14, %v3225_v55, %v3224_v39  ;;  %v15872_v51 = vld [vmem:[#allocation190_spill] sm:$0xff]  ;;  %v3268_v55 = vperm.slane %v11460_v3, %v15714_v58 }
 0x814   : > { %v3240_v37 = vperm.slane %v15870_v5, %v10055_v36  ;;  %v3256_v15 = vsel %vm1590_vm14, %v3255_v7, %v3254_v47  ;;  %v3265_v56 = vsel %vm1578_vm11, %v3264_v32, %v3263_v31  ;;  %v3229_v21 = vperm.slane %v15872_v51, %v10106_v46  ;;  %v11524_v32 = vpop.xlane.xlu0 %3090 }
 0x815   : > { %v15873_v7 = vperm.slane %v11188_v24, %v10106_v46 }
 0x816   : > { %v3241_v25 = vsel %vm1590_vm14, %v3240_v37, %v3239_v62  ;;  %v3258_v62 = vsel %vm1594_vm15, %v3257_v44, %v3256_v15 }
 0x817   : > { %v3243_v53 = vsel %vm1594_vm15, %v3242_v14, %v3241_v25  ;;  %v3170_v39 = vsel %vm15864_vm0, %v15873_v7, %v11396_v35 }
 0x818   : > { %v11480_v1 = vpop.xlane.xlu2 %3078  ;;  %v3276_v14 = vsel %vm618_vm2, %v11405_v12, %v3170_v39  ;;  %v15880_v39 = vld [vmem:[#allocation218_spill] sm:$0xff] }
 0x819   : > { %15867 = vst [vmem:[#allocation217_spill] sm:$0xff] %v11480_v1  ;;  %v3266_v49 = vperm.slane %v11480_v1, %v15712_v16  ;;  %v3228_v16 = vsel %vm1594_vm15, %v3227_v11, %v3226_v61  ;;  %v3244_v11 = vperm.slane %v15875_v33, %v10106_v46  ;;  %v3277_v35 = vsel %vm621_vm3, %v3200_v22, %v3276_v14  ;;  %v15882_v14 = vld [vmem:[#allocation143_spill] sm:$0xff] }
 0x81a   : > { %v3230_v31 = vsel %vm15876_vm1, %v3229_v21, %v3228_v16  ;;  %v3274_v61 = vperm.slane %v11524_v32, %v10106_v46  ;;  %vm15878_vm1 = vmmov %vm15864_vm0 }
 0x81b   : > { %v3267_v1 = vsel %vm1582_vm12, %v3266_v49, %v3265_v56  ;;  %v3215_v56 = vsel %vm15874_vm9, %v3214_v20, %v3213_v48  ;;  %v3259_v49 = vperm.slane %v11371_v9, %v10106_v46  ;;  %v3270_v48 = vperm.slane %v11510_v57, %v10055_v36  ;;  %vm15877_vm9 = vmmov %vm15864_vm0 }
 0x81c   : > { %v3269_v10 = vsel %vm1586_vm13, %v3268_v55, %v3267_v1  ;;  %v3245_v37 = vsel %vm15877_vm9, %v3244_v11, %v3243_v53  ;;  %v3278_v12 = vsel %vm624_vm4, %v3215_v56, %v3277_v35  ;;  %vm15879_vm9 = vcmask 523264  }
 0x81d   : > { %v3260_v47 = vsel %vm15864_vm0, %v3259_v49, %v3258_v62  ;;  %v3271_v1 = vsel %vm1590_vm14, %v3270_v48, %v3269_v10  ;;  %v3279_v22 = vsel %vm627_vm5, %v3230_v31, %v3278_v12  ;;  %v15883_v49 = vld [vmem:[#allocation194_spill] sm:$0xff]  ;;  %vm4018_vm0 = vcmask 786048  }
 0x81e   : > { %v3280_v44 = vsel %vm630_vm6, %v3245_v37, %v3279_v22 }
 0x81f   : > { %v3281_v21 = vsel %vm15194_vm7, %v3260_v47, %v3280_v44 }
 0x820   : > { %v11532_v20 = vpop.xlane.xlu2 %3087 }
 0x821   : > { %v3272_v16 = vperm.slane %v11532_v20, %v10101_v8 }
 0x823   : > { %v3273_v15 = vsel %vm1594_vm15, %v3272_v16, %v3271_v1  ;;  %v15884_v16 = vld [vmem:[#allocation204_spill] sm:$0xff] }
 0x824   : > { %v3275_v25 = vsel %vm15878_vm1, %v3274_v61, %v3273_v15 }
 0x825   : > { %v3282_v53 = vsel %vm15193_vm8, %v3275_v25, %v3281_v21 }
 0x826   : > { %v3284_v55 = vsel %vm15879_vm9, %v3282_v53, -inf  ;;  %vm15955_vm9 = vmmov %vm15878_vm1 }
 0x827   : > { %3285 = vmax.xlane.f32.xlu1 %v3284_v55 }
 0x89a   : > { %v3286_v7 = vpop.xlane.xlu1 %3285 }
 0x89b   : > { %v11550_v56 = vmax.f32 %v3286_v7, %v15880_v39  ;;  %v15934_v39 = vld [vmem:[#allocation224_spill] sm:$0xff] }
 0x89d   : > { %15881 = vst [vmem:[#allocation227_spill] sm:$0xff] %v11550_v56  ;;  %v3292_v11 = vperm.slane %v11550_v56, 0  ;;  %v11560_v1 = vperm.slane %v11550_v56, 1 }
 0x89f   : > { %v3310_v62 = vsub.f32 %v11197_v27, %v3292_v11  ;;  %v3309_v31 = vsub.f32 %v15882_v14, %v3292_v11  ;;  %v3308_v10 = vsub.f32 %v15883_v49, %v3292_v11  ;;  %v3314_v12 = vsub.f32 %v11209_v19, %v3292_v11  ;;  %v15885_v19 = vld [vmem:[#allocation146_spill] sm:$0xff] }
 0x8a0   : > { %v3311_v47 = vsub.f32 %v15884_v16, %v3292_v11  ;;  %v3312_v61 = vsub.f32 %v11171_v59, %v3292_v11  ;;  %v3317_v53 = vsub.f32 %v15885_v19, %v11560_v1  ;;  %v3313_v55 = vsub.f32 %v11186_v6, %v3292_v11 }
 0x8a1   : > { %v3376_v35 = vmul.f32 1.442695, %v3310_v62  ;;  %v3374_v48 = vmul.f32 1.442695, %v3309_v31  ;;  %v3372_v37 = vmul.f32 1.442695, %v3308_v10  ;;  %v3315_v59 = vsub.f32 %v11188_v24, %v3292_v11 }
 0x8a2   : > { %v3384_v27 = vmul.f32 1.442695, %v3314_v12  ;;  %v3378_v22 = vmul.f32 1.442695, %v3311_v47  ;;  %v3380_v44 = vmul.f32 1.442695, %v3312_v61 }
 0x8a3   : > { %7711 = vpow2.f32 %v3376_v35  ;;  %v3390_v7 = vmul.f32 1.442695, %v3317_v53  ;;  %v3382_v62 = vmul.f32 1.442695, %v3313_v55  ;;  %v3386_v31 = vmul.f32 1.442695, %v3315_v59 }
 0x8a4   : > { %7713 = vpow2.f32 %v3374_v48  ;;  %v3320_v35 = vsub.f32 %v11235_v28, %v11560_v1  ;;  %v15886_v48 = vld [vmem:[#allocation209_spill] sm:$0xff]  ;;  %v15887_v24 = vld [vmem:[#allocation178_spill] sm:$0xff]  ;;  %v3323_v28 = vsub.f32 %v11243_v18, %v11560_v1 }
 0x8a5   : > { %7715 = vpow2.f32 %v3372_v37  ;;  %v3316_v6 = vsub.f32 %v15886_v48, %v11560_v1  ;;  %v3318_v11 = vsub.f32 %v15887_v24, %v11560_v1 }
 0x8a6   : > { %7717 = vpow2.f32 %v3384_v27  ;;  %v3396_v37 = vmul.f32 1.442695, %v3320_v35  ;;  %v3402_v19 = vmul.f32 1.442695, %v3323_v28 }
 0x8a7   : > { %7719 = vpow2.f32 %v3378_v22  ;;  %v3388_v12 = vmul.f32 1.442695, %v3316_v6  ;;  %v3392_v47 = vmul.f32 1.442695, %v3318_v11  ;;  %v15888_v22 = vld [vmem:[#allocation207_spill] sm:$0xff] }
 0x8a8   : > { %7721 = vpow2.f32 %v3380_v44  ;;  %v15889_v44 = vld [vmem:[#allocation223_spill] sm:$0xff] }
 0x8a9   : > { %v7712_v15 = vpop.eup %7711  ;;  %7723 = vpow2.f32 %v3390_v7 }
 0x8aa   : > { %v7714_v25 = vpop.eup %7713  ;;  %3571 = vperm.xlu1 %7572, %v7712_v15   ;;  %7725 = vpow2.f32 %v3382_v62  ;;  %v3319_v15 = vsub.f32 %v15888_v22, %v11560_v1 }
 0x8ab   : > { %v7716_v21 = vpop.eup %7715  ;;  %3568 = vperm.xlu0 %7574, %v7714_v25   ;;  %7727 = vpow2.f32 %v3386_v31  ;;  %v3321_v25 = vsub.f32 %v15889_v44, %v11560_v1 }
 0x8ac   : > { %3565 = vperm.xlu2 %7573, %v7716_v21   ;;  %v7718_v14 = vpop.eup %7717  ;;  %7729 = vpow2.f32 %v3396_v37  ;;  %v11579_v21 = vperm.slane %v11550_v56, 2  ;;  %v3394_v53 = vmul.f32 1.442695, %v3319_v15 }
 0x8ad   : > { %v7720_v49 = vpop.eup %7719  ;;  %7731 = vpow2.f32 %v3388_v12  ;;  %v3398_v59 = vmul.f32 1.442695, %v3321_v25  ;;  %v15893_v25 = vld [vmem:[#allocation137_spill] sm:$0xff] }
 0x8ae   : > { %v7722_v10 = vpop.eup %7721  ;;  %7733 = vpow2.f32 %v3392_v47  ;;  %v3326_v18 = vsub.f32 %v11251_v17, %v11579_v21  ;;  %v3329_v17 = vsub.f32 %v11259_v4, %v11579_v21  ;;  %v11594_v47 = vperm.slane %v11550_v56, 3 }
 0x8af   : > { %v7724_v16 = vpop.eup %7723  ;;  %7735 = vpow2.f32 %v3402_v19  ;;  %v3330_v19 = vsub.f32 %v11241_v42, %v11579_v21  ;;  %v15894_v42 = vld [vmem:[#allocation133_spill] sm:$0xff] }
 0x8b0   : > { %v7726_v61 = vpop.eup %7725  ;;  %7737 = vpow2.f32 %v3394_v53  ;;  %v3408_v35 = vmul.f32 1.442695, %v3326_v18  ;;  %v3332_v4 = vsub.f32 %v11269_v52, %v11594_v47  ;;  %v3335_v52 = vsub.f32 %v11277_v43, %v11594_v47 }
 0x8b1   : > { %v7728_v27 = vpop.eup %7727  ;;  %7739 = vpow2.f32 %v3398_v59  ;;  %v3338_v43 = vsub.f32 %v11287_v34, %v11594_v47 }
 0x8b2   : > { %3583 = vperm.xlu1 %7572, %v7718_v14   ;;  %v7730_v55 = vpop.eup %7729  ;;  %v15890_v14 = vld [vmem:[#allocation195_spill] sm:$0xff]  ;;  %7741 = vpow2.f32 %v3408_v35  ;;  %v3420_v53 = vmul.f32 1.442695, %v3332_v4 }
 0x8b3   : > { %3574 = vperm.xlu0 %7574, %v7720_v49   ;;  %v7732_v7 = vpop.eup %7731  ;;  %v3322_v31 = vsub.f32 %v15890_v14, %v11560_v1  ;;  %v15891_v49 = vld [vmem:[#allocation123_spill] sm:$0xff]  ;;  %v15892_v1 = vld [vmem:[#allocation132_spill] sm:$0xff]  ;;  %v3331_v14 = vsub.f32 %v11245_v26, %v11579_v21 }
 0x8b4   : > { %3577 = vperm.xlu2 %7573, %v7722_v10   ;;  %v7734_v62 = vpop.eup %7733  ;;  %v3324_v10 = vsub.f32 %v15891_v49, %v11579_v21  ;;  %v3325_v12 = vsub.f32 %v15892_v1, %v11579_v21  ;;  %v3426_v49 = vmul.f32 1.442695, %v3335_v52  ;;  %v15895_v26 = vld [vmem:[#allocation144_spill] sm:$0xff]  ;;  %v15898_v52 = vld [vmem:[#allocation173_spill] sm:$0xff] }
 0x8b5   : > { %v3400_v48 = vmul.f32 1.442695, %v3322_v31  ;;  %v7736_v6 = vpop.eup %7735  ;;  %v3333_v31 = vsub.f32 %v15894_v42, %v11594_v47 }
 0x8b6   : > { %v3404_v24 = vmul.f32 1.442695, %v3324_v10  ;;  %v7738_v11 = vpop.eup %7737  ;;  %v3418_v10 = vmul.f32 1.442695, %v3331_v14 }
 0x8b7   : > { %v7740_v37 = vpop.eup %7739  ;;  %7743 = vpow2.f32 %v3400_v48  ;;  %v3422_v48 = vmul.f32 1.442695, %v3333_v31  ;;  %v11636_v31 = vperm.slane %v11550_v56, 5 }
 0x8b8   : > { %7745 = vpow2.f32 %v3404_v24  ;;  %v7742_v28 = vpop.eup %7741 }
 0x8ba   : > { %3592 = vperm.xlu1 %7572, %v7724_v16   ;;  %v3327_v16 = vsub.f32 %v11233_v2, %v11579_v21  ;;  %v3328_v2 = vsub.f32 %v15893_v25, %v11579_v21  ;;  %v3334_v21 = vsub.f32 %v15895_v26, %v11594_v47 }
 0x8bb   : > { %3580 = vperm.xlu0 %7574, %v7726_v61   ;;  %v3414_v61 = vmul.f32 1.442695, %v3329_v17  ;;  %v3432_v17 = vmul.f32 1.442695, %v3338_v43  ;;  %v15899_v43 = vld [vmem:[#allocation211_spill] sm:$0xff] }
 0x8bc   : > { %3586 = vperm.xlu2 %7573, %v7728_v27   ;;  %v3406_v27 = vmul.f32 1.442695, %v3325_v12  ;;  %v3410_v22 = vmul.f32 1.442695, %v3327_v16  ;;  %v3424_v1 = vmul.f32 1.442695, %v3334_v21  ;;  %v3348_v26 = vsub.f32 %v15899_v43, %v11636_v31 }
 0x8bd   : > { %v7744_v15 = vpop.eup %7743  ;;  %7747 = vpow2.f32 %v3414_v61 }
 0x8be   : > { %v7746_v44 = vpop.eup %7745  ;;  %7749 = vpow2.f32 %v3406_v27 }
 0x8bf   : > { %7751 = vpow2.f32 %v3410_v22 }
 0x8c0   : > { %7753 = vpow2.f32 %v3420_v53 }
 0x8c2   : > { %3601 = vperm.xlu1 %7572, %v7730_v55   ;;  %v3412_v55 = vmul.f32 1.442695, %v3328_v2 }
 0x8c3   : > { %3589 = vperm.xlu0 %7574, %v7732_v7   ;;  %v7748_v59 = vpop.eup %7747  ;;  %v3416_v7 = vmul.f32 1.442695, %v3330_v19 }
 0x8c4   : > { %3595 = vperm.xlu2 %7573, %v7734_v62   ;;  %v7750_v62 = vpop.eup %7749  ;;  %7755 = vpow2.f32 %v3412_v55 }
 0x8c5   : > { %v7752_v18 = vpop.eup %7751  ;;  %7757 = vpow2.f32 %v3416_v7 }
 0x8c6   : > { %v7754_v35 = vpop.eup %7753  ;;  %7759 = vpow2.f32 %v3426_v49 }
 0x8c7   : > { %7761 = vpow2.f32 %v3418_v10 }
 0x8c8   : > { %7763 = vpow2.f32 %v3422_v48 }
 0x8c9   : > { %7765 = vpow2.f32 %v3432_v17 }
 0x8ca   : > { %3610 = vperm.xlu1 %7572, %v7736_v6   ;;  %v7756_v6 = vpop.eup %7755  ;;  %7767 = vpow2.f32 %v3424_v1 }
 0x8cb   : > { %3598 = vperm.xlu0 %7574, %v7738_v11   ;;  %v7758_v24 = vpop.eup %7757  ;;  %v3336_v11 = vsub.f32 %v11253_v60, %v11594_v47  ;;  %v3337_v60 = vsub.f32 %v11255_v29, %v11594_v47  ;;  %v15896_v29 = vld [vmem:[#allocation166_spill] sm:$0xff] }
 0x8cc   : > { %3604 = vperm.xlu2 %7573, %v7740_v37   ;;  %v11615_v37 = vperm.slane %v11550_v56, 4  ;;  %v7760_v12 = vpop.eup %7759 }
 0x8cd   : > { %v3428_v16 = vmul.f32 1.442695, %v3336_v11  ;;  %v7762_v61 = vpop.eup %7761 }
 0x8ce   : > { %v7764_v27 = vpop.eup %7763  ;;  %v3341_v34 = vsub.f32 %v11295_v54, %v11615_v37  ;;  %v3344_v54 = vsub.f32 %v11299_v40, %v11615_v37  ;;  %v3340_v19 = vsub.f32 %v15896_v29, %v11615_v37  ;;  %v3347_v40 = vsub.f32 %v15872_v51, %v11615_v37 }
 0x8cf   : > { %7769 = vpow2.f32 %v3428_v16  ;;  %v3343_v14 = vsub.f32 %v15898_v52, %v11615_v37  ;;  %v3345_v42 = vsub.f32 %v11275_v41, %v11615_v37  ;;  %v3350_v51 = vsub.f32 %v11312_v63, %v11636_v31 }
 0x8d0   : > { %v3438_v22 = vmul.f32 1.442695, %v3341_v34  ;;  %v3444_v53 = vmul.f32 1.442695, %v3344_v54  ;;  %v3436_v55 = vmul.f32 1.442695, %v3340_v19  ;;  %v3346_v41 = vsub.f32 %v11279_v13, %v11615_v37 }
 0x8d1   : > { %v3450_v49 = vmul.f32 1.442695, %v3347_v40  ;;  %v3442_v10 = vmul.f32 1.442695, %v3343_v14  ;;  %v3446_v48 = vmul.f32 1.442695, %v3345_v42  ;;  %v3353_v63 = vsub.f32 %v15870_v5, %v11636_v31 }
 0x8d2   : > { %3619 = vperm.xlu1 %7572, %v7742_v28   ;;  %v3339_v28 = vsub.f32 %v15869_v23, %v11594_v47  ;;  %7771 = vpow2.f32 %v3438_v22  ;;  %v15897_v23 = vld [vmem:[#allocation174_spill] sm:$0xff]  ;;  %v3456_v11 = vmul.f32 1.442695, %v3350_v51  ;;  %v3448_v17 = vmul.f32 1.442695, %v3346_v41  ;;  %v15900_v13 = vld [vmem:[#allocation171_spill] sm:$0xff] }
 0x8d3   : > { %3607 = vperm.xlu0 %7574, %v7744_v15   ;;  %v3430_v15 = vmul.f32 1.442695, %v3337_v60  ;;  %v3342_v47 = vsub.f32 %v15897_v23, %v11615_v37  ;;  %v3349_v37 = vsub.f32 %v15900_v13, %v11636_v31  ;;  %v11655_v60 = vperm.slane %v11550_v56, 6  ;;  %v15904_v51 = vld [vmem:[#allocation208_spill] sm:$0xff] }
 0x8d4   : > { %3613 = vperm.xlu2 %7573, %v7746_v44   ;;  %v7766_v44 = vpop.eup %7765  ;;  %v3434_v4 = vmul.f32 1.442695, %v3339_v28  ;;  %v3462_v28 = vmul.f32 1.442695, %v3353_v63  ;;  %v3354_v54 = vsub.f32 %v15868_v50, %v11636_v31  ;;  %v3355_v50 = vsub.f32 %v15875_v33, %v11636_v31 }
 0x8d5   : > { %v7768_v25 = vpop.eup %7767  ;;  %7773 = vpow2.f32 %v3430_v15  ;;  %v3440_v7 = vmul.f32 1.442695, %v3342_v47  ;;  %v3454_v22 = vmul.f32 1.442695, %v3349_v37  ;;  %v3362_v33 = vsub.f32 %v11339_v45, %v11655_v60  ;;  %v15906_v37 = vld [vmem:[#allocation198_spill] sm:$0xff] }
 0x8d6   : > { %v7770_v2 = vpop.eup %7769  ;;  %7775 = vpow2.f32 %v3434_v4  ;;  %v3466_v42 = vmul.f32 1.442695, %v3355_v50  ;;  %v3360_v41 = vsub.f32 %v15904_v51, %v11655_v60 }
 0x8d7   : > { %7777 = vpow2.f32 %v3444_v53  ;;  %v3464_v53 = vmul.f32 1.442695, %v3354_v54 }
 0x8d8   : > { %7779 = vpow2.f32 %v3436_v55 }
 0x8d9   : > { %7781 = vpow2.f32 %v3440_v7  ;;  %v3359_v7 = vsub.f32 %v11322_v38, %v11655_v60 }
 0x8da   : > { %3628 = vperm.xlu1 %7572, %v7748_v59   ;;  %v7772_v59 = vpop.eup %7771  ;;  %7783 = vpow2.f32 %v3450_v49 }
 0x8db   : > { %3616 = vperm.xlu0 %7574, %v7750_v62   ;;  %v7774_v62 = vpop.eup %7773  ;;  %7785 = vpow2.f32 %v3442_v10  ;;  %v3474_v14 = vmul.f32 1.442695, %v3359_v7 }
 0x8dc   : > { %3622 = vperm.xlu2 %7573, %v7752_v18   ;;  %v7776_v18 = vpop.eup %7775  ;;  %7787 = vpow2.f32 %v3446_v48  ;;  %v15903_v48 = vld [vmem:[#allocation183_spill] sm:$0xff] }
 0x8dd   : > { %7789 = vpow2.f32 %v3456_v11  ;;  %v3480_v11 = vmul.f32 1.442695, %v3362_v33 }
 0x8de   : > { %7791 = vpow2.f32 %v3448_v17 }
 0x8e2   : > { %3637 = vperm.xlu1 %7572, %v7754_v35   ;;  %v7778_v35 = vpop.eup %7777 }
 0x8e3   : > { %3625 = vperm.xlu0 %7574, %v7756_v6   ;;  %v7780_v6 = vpop.eup %7779 }
 0x8e4   : > { %3631 = vperm.xlu2 %7573, %v7758_v24   ;;  %v7782_v24 = vpop.eup %7781 }
 0x8e5   : > { %v7784_v1 = vpop.eup %7783 }
 0x8e6   : > { %v7786_v16 = vpop.eup %7785 }
 0x8ea   : > { %3646 = vperm.xlu1 %7572, %v7760_v12   ;;  %v3452_v12 = vmul.f32 1.442695, %v3348_v26  ;;  %v11690_v26 = vperm.slane %v11550_v56, 7 }
 0x8eb   : > { %3634 = vperm.xlu0 %7574, %v7762_v61   ;;  %v7788_v61 = vpop.eup %7787 }
 0x8ec   : > { %3640 = vperm.xlu2 %7573, %v7764_v27   ;;  %7793 = vpow2.f32 %v3452_v12  ;;  %v3351_v27 = vsub.f32 %v11293_v30, %v11636_v31  ;;  %v7790_v15 = vpop.eup %7789  ;;  %v3352_v30 = vsub.f32 %v11289_v0, %v11636_v31  ;;  %v3368_v54 = vsub.f32 %v11460_v3, %v11690_v26 }
 0x8ed   : > { %v7792_v4 = vpop.eup %7791  ;;  %7795 = vpow2.f32 %v3462_v28 }
 0x8ee   : > { %7797 = vpow2.f32 %v3454_v22  ;;  %v3460_v23 = vmul.f32 1.442695, %v3352_v30  ;;  %v3363_v22 = vsub.f32 %v11371_v9, %v11655_v60  ;;  %v15907_v9 = vld [vmem:[#allocation216_spill] sm:$0xff] }
 0x8f2   : > { %3655 = vperm.xlu1 %7572, %v7766_v44   ;;  %v3458_v44 = vmul.f32 1.442695, %v3351_v27  ;;  %v7794_v5 = vpop.eup %7793  ;;  %v3361_v27 = vsub.f32 %v15906_v37, %v11655_v60 }
 0x8f3   : > { %3643 = vperm.xlu0 %7574, %v7768_v25   ;;  %v15901_v25 = vld [vmem:[#allocation202_spill] sm:$0xff]  ;;  %v7796_v47 = vpop.eup %7795 }
 0x8f4   : > { %3649 = vperm.xlu2 %7573, %v7770_v2   ;;  %v3356_v2 = vsub.f32 %v15901_v25, %v11655_v60  ;;  %7799 = vpow2.f32 %v3458_v44  ;;  %v7798_v55 = vpop.eup %7797  ;;  %v3482_v25 = vmul.f32 1.442695, %v3363_v22 }
 0x8f6   : > { %v3468_v19 = vmul.f32 1.442695, %v3356_v2 }
 0x8f8   : > { %7801 = vpow2.f32 %v3468_v19 }
 0x8f9   : > { %7803 = vpow2.f32 %v3460_v23 }
 0x8fa   : > { %3664 = vperm.xlu1 %7572, %v7772_v59   ;;  %v7800_v59 = vpop.eup %7799  ;;  %7805 = vpow2.f32 %v3464_v53 }
 0x8fb   : > { %3652 = vperm.xlu0 %7574, %v7774_v62   ;;  %7807 = vpow2.f32 %v3474_v14  ;;  %v3371_v14 = vsub.f32 %v11524_v32, %v11690_v26 }
 0x8fc   : > { %3658 = vperm.xlu2 %7573, %v7776_v18   ;;  %v15902_v18 = vld [vmem:[#allocation203_spill] sm:$0xff]  ;;  %7809 = vpow2.f32 %v3466_v42 }
 0x8fd   : > { %v3357_v40 = vsub.f32 %v15902_v18, %v11655_v60 }
 0x8fe   : > { %v7802_v49 = vpop.eup %7801 }
 0x8ff   : > { %v3470_v10 = vmul.f32 1.442695, %v3357_v40  ;;  %v7804_v38 = vpop.eup %7803 }
 0x901   : > { %7811 = vpow2.f32 %v3470_v10 }
 0x902   : > { %3673 = vperm.xlu1 %7572, %v7778_v35   ;;  %v7806_v35 = vpop.eup %7805  ;;  %7813 = vpow2.f32 %v3480_v11 }
 0x903   : > { %3661 = vperm.xlu0 %7574, %v7780_v6   ;;  %v3358_v6 = vsub.f32 %v15903_v48, %v11655_v60  ;;  %v7808_v17 = vpop.eup %7807  ;;  %v3364_v60 = vsub.f32 %v15907_v9, %v11690_v26  ;;  %v3498_v48 = vmul.f32 1.442695, %v3371_v14 }
 0x904   : > { %3667 = vperm.xlu2 %7573, %v7782_v24   ;;  %v7810_v12 = vpop.eup %7809 }
 0x905   : > { %v3472_v45 = vmul.f32 1.442695, %v3358_v6  ;;  %v3484_v7 = vmul.f32 1.442695, %v3364_v60 }
 0x906   : > { %v11644_v21 = vpop.permute.xlu2 %3565 }
 0x907   : > { %7815 = vpow2.f32 %v3472_v45 }
 0x90a   : > { %3682 = vperm.xlu1 %7572, %v7784_v1   ;;  %v3476_v1 = vmul.f32 1.442695, %v3360_v41 }
 0x90b   : > { %3670 = vperm.xlu0 %7574, %v7786_v16   ;;  %v7812_v16 = vpop.eup %7811 }
 0x90c   : > { %3676 = vperm.xlu2 %7573, %v7788_v61   ;;  %v15905_v61 = vld [vmem:[#allocation226_spill] sm:$0xff]  ;;  %7817 = vpow2.f32 %v3476_v1 }
 0x90d   : > { %v3365_v63 = vsub.f32 %v15905_v61, %v11690_v26 }
 0x90e   : > { %v11652_v34 = vpop.permute.xlu2 %3577 }
 0x90f   : > { %v3486_v44 = vmul.f32 1.442695, %v3365_v63 }
 0x911   : > { %7819 = vpow2.f32 %v3486_v44 }
 0x912   : > { %3691 = vperm.xlu1 %7572, %v7790_v15  }
 0x913   : > { %3679 = vperm.xlu0 %7574, %v7792_v4   ;;  %v3478_v4 = vmul.f32 1.442695, %v3361_v27 }
 0x914   : > { %3685 = vperm.xlu2 %7573, %v7794_v5   ;;  %v7814_v5 = vpop.eup %7813 }
 0x915   : > { %v7816_v2 = vpop.eup %7815  ;;  %7821 = vpow2.f32 %v3478_v4 }
 0x916   : > { %v11663_v29 = vpop.permute.xlu2 %3586  ;;  %v7818_v30 = vpop.eup %7817  ;;  %7823 = vpow2.f32 %v3482_v25  ;;  %v15911_v25 = vld [vmem:[#allocation12_spill] sm:$0xff] }
 0x917   : > { %v7820_v50 = vpop.eup %7819 }
 0x91a   : > { %3700 = vperm.xlu1 %7572, %v7796_v47   ;;  %v15908_v47 = vld [vmem:[#allocation213_spill] sm:$0xff] }
 0x91b   : > { %3688 = vperm.xlu0 %7574, %v7798_v55   ;;  %v3366_v53 = vsub.f32 %v15908_v47, %v11690_v26  ;;  %v7822_v3 = vpop.eup %7821 }
 0x91c   : > { %3694 = vperm.xlu2 %7573, %v7800_v59   ;;  %v11667_v0 = vpop.permute.xlu1 %3571  ;;  %v3492_v59 = vmul.f32 1.442695, %v3368_v54  ;;  %v7824_v40 = vpop.eup %7823  ;;  %v15912_v54 = vld [vmem:[#allocation16_spill] sm:$0xff] }
 0x91d   : > { %v11671_v62 = vpop.permute.xlu0 %3568  ;;  %v3488_v18 = vmul.f32 1.442695, %v3366_v53  ;;  %v15913_v53 = vld [vmem:[#allocation21_spill] sm:$0xff] }
 0x91e   : > { %v11675_v52 = vpop.permute.xlu2 %3595  ;;  %7825 = vpow2.f32 %v3492_v59  ;;  %v3955_v59 = vmul.f32 %v11671_v62, %v15913_v53  ;;  %v15927_v53 = vld [vmem:[#allocation15_spill] sm:$0xff] }
 0x91f   : > { %7827 = vpow2.f32 %v3484_v7  ;;  %v15914_v7 = vld [vmem:[#allocation34_spill] sm:$0xff] }
 0x920   : > { %7829 = vpow2.f32 %v3488_v18  ;;  %v15915_v18 = vld [vmem:[#allocation41_spill] sm:$0xff] }
 0x921   : > { %7831 = vpow2.f32 %v3498_v48 }
 0x922   : > { %3709 = vperm.xlu1 %7572, %v7802_v49   ;;  %v15909_v49 = vld [vmem:[#allocation217_spill] sm:$0xff] }
 0x923   : > { %3697 = vperm.xlu0 %7574, %v7804_v38   ;;  %v3367_v10 = vsub.f32 %v15909_v49, %v11690_v26  ;;  %v15916_v49 = vld [vmem:[#allocation27_spill] sm:$0xff] }
 0x924   : > { %3703 = vperm.xlu2 %7573, %v7806_v35   ;;  %v11679_v31 = vpop.permute.xlu1 %3583  ;;  %v3369_v35 = vsub.f32 %v11510_v57, %v11690_v26  ;;  %v7826_v51 = vpop.eup %7825 }
 0x925   : > { %v11683_v24 = vpop.permute.xlu0 %3574  ;;  %v3490_v6 = vmul.f32 1.442695, %v3367_v10  ;;  %v7828_v32 = vpop.eup %7827  ;;  %v3956_v10 = vmul.f32 %v11667_v0, %v15916_v49  ;;  %v15924_v49 = vld [vmem:[#allocation95_spill] sm:$0xff] }
 0x926   : > { %v11687_v43 = vpop.permute.xlu2 %3604  ;;  %v3494_v41 = vmul.f32 1.442695, %v3369_v35  ;;  %v7830_v11 = vpop.eup %7829  ;;  %v15917_v35 = vld [vmem:[#allocation29_spill] sm:$0xff] }
 0x927   : > { %7833 = vpow2.f32 %v3490_v6  ;;  %v3957_v48 = vmul.f32 %v11683_v24, %v15917_v35 }
 0x928   : > { %7835 = vpow2.f32 %v3494_v41  ;;  %v15918_v41 = vld [vmem:[#allocation78_spill] sm:$0xff] }
 0x92a   : > { %3718 = vperm.xlu1 %7572, %v7808_v17   ;;  %v3370_v17 = vsub.f32 %v11532_v20, %v11690_v26  ;;  %v15910_v26 = vld [vmem:[#allocation45_spill] sm:$0xff] }
 0x92b   : > { %3706 = vperm.xlu0 %7574, %v7810_v12  }
 0x92c   : > { %3712 = vperm.xlu2 %7573, %v7812_v16   ;;  %v11694_v13 = vpop.permute.xlu1 %3592  ;;  %v3496_v12 = vmul.f32 1.442695, %v3370_v17  ;;  %v7832_v16 = vpop.eup %7831  ;;  %v15920_v17 = vld [vmem:[#allocation85_spill] sm:$0xff] }
 0x92d   : > { %v11698_v28 = vpop.permute.xlu0 %3580  ;;  %v7834_v61 = vpop.eup %7833 }
 0x92e   : > { %v11702_v15 = vpop.permute.xlu2 %3613  ;;  %v7836_v63 = vpop.eup %7835  ;;  %7837 = vpow2.f32 %v3496_v12  ;;  %v3963_v12 = vmul.f32 %v11694_v13, %v15920_v17 }
 0x932   : > { %3727 = vperm.xlu1 %7572, %v7814_v5  }
 0x933   : > { %3715 = vperm.xlu0 %7574, %v7816_v2  }
 0x934   : > { %3721 = vperm.xlu2 %7573, %v7818_v30   ;;  %v11706_v19 = vpop.permute.xlu1 %3601  ;;  %v7838_v20 = vpop.eup %7837 }
 0x935   : > { %v11710_v23 = vpop.permute.xlu0 %3589 }
 0x936   : > { %v11714_v55 = vpop.permute.xlu2 %3622 }
 0x93a   : > { %3736 = vperm.xlu1 %7572, %v7820_v50   ;;  %v3954_v50 = vmul.f32 %v11644_v21, %v15914_v7  ;;  %v15925_v7 = vld [vmem:[#allocation107_spill] sm:$0xff] }
 0x93b   : > { %3724 = vperm.xlu0 %7574, %v7822_v3   ;;  %v4020_v3 = vsel %vm4018_vm0, %v3955_v59, 0.0  ;;  %v15921_v59 = vld [vmem:[#allocation33_spill] sm:$0xff] }
 0x93c   : > { %3730 = vperm.xlu2 %7573, %v7824_v40   ;;  %v11718_v42 = vpop.permute.xlu1 %3610  ;;  %v4019_v14 = vsel %vm4018_vm0, %v3954_v50, 0.0  ;;  %v15922_v50 = vld [vmem:[#allocation51_spill] sm:$0xff] }
 0x93d   : > { %v11722_v38 = vpop.permute.xlu0 %3598 }
 0x93e   : > { %v11726_v33 = vpop.permute.xlu2 %3631 }
 0x942   : > { %3745 = vperm.xlu1 %7572, %v7826_v51   ;;  %v4021_v51 = vadd.f32 %v4020_v3, %v4019_v14  ;;  %v3958_v3 = vmul.f32 %v11652_v34, %v15922_v50  ;;  %v15923_v14 = vld [vmem:[#allocation57_spill] sm:$0xff] }
 0x943   : > { %3733 = vperm.xlu0 %7574, %v7828_v32   ;;  %v3962_v32 = vmul.f32 %v11710_v23, %v15918_v41  ;;  %v3959_v35 = vmul.f32 %v11698_v28, %v15923_v14  ;;  %v3964_v41 = vmul.f32 %v11675_v52, %v15924_v49 }
 0x944   : > { %3739 = vperm.xlu2 %7573, %v7830_v11   ;;  %v11728_v45 = vpop.permute.xlu1 %3619 }
 0x945   : > { %v11732_v1 = vpop.permute.xlu0 %3607  ;;  %v4028_v50 = vsel %vm4018_vm0, %v3959_v35, 0.0  ;;  %v4043_v49 = vsel %vm4018_vm0, %v3964_v41, 0.0 }
 0x946   : > { %v11734_v57 = vpop.permute.xlu2 %3640 }
 0x94a   : > { %3754 = vperm.xlu1 %7572, %v7832_v16   ;;  %v4022_v16 = vsel %vm4018_vm0, %v3956_v10, 0.0  ;;  %v4041_v10 = vsel %vm4018_vm0, %v3963_v12, 0.0 }
 0x94b   : > { %3742 = vperm.xlu0 %7574, %v7834_v61   ;;  %v4024_v61 = vsel %vm4018_vm0, %v3957_v48, 0.0  ;;  %v3965_v48 = vmul.f32 %v11722_v38, %v15925_v7  ;;  %v15928_v7 = vld [vmem:[#allocation67_spill] sm:$0xff] }
 0x94c   : > { %3748 = vperm.xlu2 %7573, %v7836_v63   ;;  %v11736_v37 = vpop.permute.xlu1 %3628  ;;  %v4023_v63 = vadd.f32 %v4022_v16, %v4021_v51 }
 0x94d   : > { %v11738_v27 = vpop.permute.xlu0 %3616  ;;  %v4045_v12 = vsel %vm4018_vm0, %v3965_v48, 0.0 }
 0x94e   : > { %v11740_v22 = vpop.permute.xlu2 %3649  ;;  %v4025_v17 = vadd.f32 %v4024_v61, %v4023_v63  ;;  %v3971_v14 = vmul.f32 %v11738_v27, %v15927_v53  ;;  %v15931_v53 = vld [vmem:[#allocation58_spill] sm:$0xff] }
 0x952   : > { %4209 = vrot.lane.b32.xlu1 %v15910_v26, %s8248_s22  ;;  %v15933_v26 = vld [vmem:[#allocation69_spill] sm:$0xff] }
 0x953   : > { %3751 = vperm.xlu0 %7574, %v7838_v20   ;;  %v4040_v20 = vsel %vm4018_vm0, %v3962_v32, 0.0 }
 0x954   : > { %v11744_v44 = vpop.permute.xlu1 %3637  ;;  %v4042_v32 = vadd.f32 %v4041_v10, %v4040_v20  ;;  %v15929_v20 = vld [vmem:[#allocation39_spill] sm:$0xff] }
 0x955   : > { %v11746_v4 = vpop.permute.xlu0 %3625  ;;  %v3970_v10 = vmul.f32 %v11702_v15, %v15929_v20  ;;  %v3757_v20 = vperm.slane %v11671_v62, %v15934_v39 }
 0x956   : > { %v11748_v5 = vpop.permute.xlu2 %3658 }
 0x95a   : > { %4215 = vrot.lane.b32.xlu1 %v15911_v25, %s8248_s22  ;;  %v15930_v25 = vld [vmem:[#allocation111_spill] sm:$0xff] }
 0x95b   : > { %v3966_v35 = vmul.f32 %v11706_v19, %v15930_v25  ;;  %v15939_v25 = vld [vmem:[#allocation170_spill] sm:$0xff] }
 0x95c   : > { %v11752_v2 = vpop.permute.xlu1 %3646  ;;  %v3968_v62 = vmul.f32 %v11732_v1, %v15939_v25  ;;  %v15943_v25 = vld [vmem:[#allocation53_spill] sm:$0xff] }
 0x95d   : > { %v11754_v30 = vpop.permute.xlu0 %3634 }
 0x95e   : > { %v11758_v9 = vpop.permute.xlu2 %3667 }
 0x962   : > { %4217 = vrot.lane.b32.xlu1 %v15912_v54, %s8248_s22  ;;  %v4044_v54 = vadd.f32 %v4043_v49, %v4042_v32  ;;  %v15936_v32 = vld [vmem:[#allocation119_spill] sm:$0xff] }
 0x964   : > { %v11760_v60 = vpop.permute.xlu1 %3655  ;;  %v4046_v41 = vadd.f32 %v4045_v12, %v4044_v54  ;;  %v4061_v54 = vsel %vm4018_vm0, %v3970_v10, 0.0  ;;  %v15937_v12 = vld [vmem:[#allocation14_spill] sm:$0xff] }
 0x965   : > { %v11762_v47 = vpop.permute.xlu0 %3643 }
 0x966   : > { %v11782_v11 = vpop.permute.xlu2 %3676 }
 0x967   : > { %15919 = vst [vmem:[#allocation233_spill] sm:$0xff] %v11782_v11  ;;  %v15941_v11 = vld [vmem:[#allocation228_spill] sm:$0xff] }
 0x96a   : > { %4219 = vrot.lane.b32.xlu1 %v15915_v18, %s8248_s22  ;;  %v3960_v18 = vmul.f32 %v11679_v31, %v15928_v7  ;;  %v3961_v7 = vmul.f32 %v11663_v29, %v15933_v26  ;;  %v4047_v26 = vsel %vm4018_vm0, %v3966_v35, 0.0 }
 0x96c   : > { %v11771_v40 = vpop.permute.xlu1 %3664 }
 0x96d   : > { %v11778_v6 = vpop.permute.xlu0 %3652 }
 0x96e   : > { %v11810_v63 = vpop.permute.xlu2 %3685 }
 0x972   : > { %4221 = vrot.lane.b32.xlu1 %v15921_v59, %s8248_s22  ;;  %v4026_v59 = vsel %vm4018_vm0, %v3958_v3, 0.0 }
 0x973   : > { %v4027_v61 = vadd.f32 %v4026_v59, %v4025_v17  ;;  %v4062_v17 = vsel %vm4018_vm0, %v3971_v14, 0.0  ;;  %v15932_v59 = vld [vmem:[#allocation222_spill] sm:$0xff]  ;;  %v3972_v14 = vmul.f32 %v11728_v45, %v15937_v12  ;;  %v3761_v12 = vperm.slane %v11683_v24, %v15941_v11  ;;  %v15944_v24 = vld [vmem:[#allocation68_spill] sm:$0xff] }
 0x974   : > { %v11800_v51 = vpop.permute.xlu1 %3673  ;;  %v3756_v48 = vperm.slane %v11644_v21, %v15932_v59  ;;  %v4063_v56 = vadd.f32 %v4062_v17, %v4061_v54  ;;  %v3974_v17 = vmul.f32 %v11746_v4, %v15943_v25 }
 0x975   : > { %15926 = vst [vmem:[#allocation131_spill] sm:$0xff] %v11800_v51  ;;  %v11802_v16 = vpop.permute.xlu0 %3661  ;;  %v4029_v3 = vadd.f32 %v4028_v50, %v4027_v61  ;;  %v4030_v50 = vsel %vm4018_vm0, %v3960_v18, 0.0  ;;  %v3967_v61 = vmul.f32 %v11687_v43, %v15936_v32  ;;  %v4048_v51 = vadd.f32 %v4047_v26, %v4046_v41 }
 0x976   : > { %v4032_v32 = vsel %vm4018_vm0, %v3961_v7, 0.0  ;;  %v3758_v10 = vsel %vm1574_vm10, %v3757_v20, %v3756_v48  ;;  %v4051_v26 = vsel %vm4018_vm0, %v3968_v62, 0.0  ;;  %v11855_v20 = vpop.permute.xlu2 %3694  ;;  %v3765_v62 = vperm.slane %v11698_v28, %v10055_v36 }
 0x977   : > { %v4031_v21 = vadd.f32 %v4030_v50, %v4029_v3  ;;  %v15942_v3 = vld [vmem:[#allocation35_spill] sm:$0xff]  ;;  %v4064_v50 = vsel %vm4018_vm0, %v3972_v14, 0.0 }
 0x978   : > { %v3973_v35 = vmul.f32 %v11714_v55, %v15942_v3  ;;  %v4065_v7 = vadd.f32 %v4064_v50, %v4063_v56 }
 0x979   : > { %v4033_v54 = vadd.f32 %v4032_v32, %v4031_v21  ;;  %v3772_v32 = vperm.slane %v11694_v13, %v15934_v39  ;;  %v3776_v13 = vperm.slane %v11722_v38, %v15941_v11 }
 0x97a   : > { %4225 = vrot.lane.b32.xlu1 %v15931_v53, %s8248_s22  ;;  %v4066_v50 = vsel %vm4018_vm0, %v3973_v35, 0.0 }
 0x97c   : > { %v11827_v49 = vpop.permute.xlu1 %3682 }
 0x97d   : > { %15935 = vst [vmem:[#allocation220_spill] sm:$0xff] %v11827_v49  ;;  %v11835_v53 = vpop.permute.xlu0 %3670  ;;  %v15940_v49 = vld [vmem:[#allocation225_spill] sm:$0xff] }
 0x97e   : > { %15938 = vst [vmem:[#allocation196_spill] sm:$0xff] %v11835_v53  ;;  %v3759_v18 = vperm.slane %v11667_v0, %v15940_v49  ;;  %v4049_v53 = vsel %vm4018_vm0, %v3967_v61, 0.0  ;;  %v3771_v0 = vperm.slane %v11710_v23, %v15932_v59  ;;  %v3763_v61 = vperm.slane %v11652_v34, %v15714_v58  ;;  %v15945_v23 = vld [vmem:[#allocation149_spill] sm:$0xff] }
 0x97f   : > { %v4050_v48 = vadd.f32 %v4049_v53, %v4048_v51  ;;  %v3969_v21 = vmul.f32 %v11718_v42, %v15945_v23  ;;  %v4068_v53 = vsel %vm4018_vm0, %v3974_v17, 0.0  ;;  %v4034_v34 = vrot.slane %v4033_v54, 4  ;;  %v15946_v23 = vld [vmem:[#allocation47_spill] sm:$0xff] }
 0x980   : > { %v3760_v41 = vsel %vm1578_vm11, %v3759_v18, %v3758_v10  ;;  %v4067_v10 = vadd.f32 %v4066_v50, %v4065_v7  ;;  %v3975_v28 = vmul.f32 %v11736_v37, %v15946_v23  ;;  %v15948_v23 = vld [vmem:[#allocation63_spill] sm:$0xff] }
 0x981   : > { %v3762_v14 = vsel %vm1582_vm12, %v3761_v12, %v3760_v41  ;;  %v4052_v18 = vadd.f32 %v4051_v26, %v4050_v48  ;;  %v3773_v12 = vsel %vm1574_vm10, %v3772_v32, %v3771_v0  ;;  %v3774_v41 = vperm.slane %v11675_v52, %v15940_v49  ;;  %v15947_v32 = vld [vmem:[#allocation77_spill] sm:$0xff] }
 0x982   : > { %4227 = vrot.lane.b32.xlu1 %v15944_v24, %s8248_s22  ;;  %v3764_v35 = vsel %vm1586_vm13, %v3763_v61, %v3762_v14  ;;  %v4053_v26 = vsel %vm4018_vm0, %v3969_v21, 0.0  ;;  %v4069_v17 = vadd.f32 %v4068_v53, %v4067_v10  ;;  %v3978_v38 = vmul.f32 %v11744_v44, %v15947_v32  ;;  %v15949_v14 = vld [vmem:[#allocation80_spill] sm:$0xff]  ;;  %v15950_v21 = vld [vmem:[#allocation86_spill] sm:$0xff]  ;;  %v15951_v53 = vld [vmem:[#allocation73_spill] sm:$0xff]  ;;  %v11906_v10 = vpop.permute.xlu2 %3703 }
 0x983   : > { %v3766_v48 = vsel %vm1590_vm14, %v3765_v62, %v3764_v35  ;;  %v3775_v25 = vsel %vm1578_vm11, %v3774_v41, %v3773_v12  ;;  %v4054_v0 = vadd.f32 %v4053_v26, %v4052_v18  ;;  %v4035_v7 = vadd.f32 %v4034_v34, %v4033_v54  ;;  %v15952_v54 = vld [vmem:[#allocation97_spill] sm:$0xff] }
 0x984   : > { %v11867_v56 = vpop.permute.xlu1 %3691  ;;  %v3778_v52 = vperm.slane %v11706_v19, %v15714_v58  ;;  %v3777_v50 = vsel %vm1582_vm12, %v3776_v13, %v3775_v25  ;;  %v3976_v61 = vmul.f32 %v11726_v33, %v15948_v23  ;;  %v3979_v62 = vmul.f32 %v11734_v57, %v15950_v21  ;;  %v15953_v23 = vld [vmem:[#allocation101_spill] sm:$0xff] }
 0x985   : > { %v11873_v51 = vpop.permute.xlu0 %3679  ;;  %v4070_v18 = vsel %vm4018_vm0, %v3975_v28, 0.0  ;;  %v3977_v12 = vmul.f32 %v11754_v30, %v15951_v53  ;;  %v3980_v34 = vmul.f32 %v11762_v47, %v15952_v54  ;;  %v3767_v19 = vperm.slane %v11679_v31, %v10101_v8 }
 0x986   : > { %v3787_v25 = vperm.slane %v11738_v27, %v15934_v39  ;;  %v4071_v13 = vadd.f32 %v4070_v18, %v4069_v17  ;;  %v3779_v35 = vsel %vm1586_vm13, %v3778_v52, %v3777_v50  ;;  %v3782_v28 = vperm.slane %v11732_v1, %v10101_v8 }
 0x987   : > { %v4055_v26 = vrot.slane %v4054_v0, 4  ;;  %v4082_v53 = vsel %vm4018_vm0, %v3978_v38, 0.0  ;;  %v3780_v31 = vperm.slane %v11687_v43, %v10055_v36  ;;  %v3768_v27 = vsel %vm1594_vm15, %v3767_v19, %v3766_v48 }
 0x988   : > { %v4036_v17 = vrot.slane %v4035_v7, 2  ;;  %v3786_v18 = vperm.slane %v11702_v15, %v15932_v59  ;;  %v4072_v32 = vsel %vm4018_vm0, %v3976_v61, 0.0  ;;  %v4083_v52 = vsel %vm4018_vm0, %v3979_v62, 0.0 }
 0x989   : > { %v4074_v1 = vsel %vm4018_vm0, %v3977_v12, 0.0  ;;  %v4085_v50 = vsel %vm4018_vm0, %v3980_v34, 0.0  ;;  %v3781_v38 = vsel %vm1590_vm14, %v3780_v31, %v3779_v35  ;;  %v4073_v43 = vadd.f32 %v4072_v32, %v4071_v13  ;;  %v15957_v31 = vld [vmem:[#allocation134_spill] sm:$0xff] }
 0x98a   : > { %4231 = vrot.lane.b32.xlu1 %v15949_v14, %s8248_s22  ;;  %v3788_v21 = vsel %vm1574_vm10, %v3787_v25, %v3786_v18  ;;  %v4084_v14 = vadd.f32 %v4083_v52, %v4082_v53  ;;  %v3789_v48 = vperm.slane %v11728_v45, %v15940_v49  ;;  %v3783_v19 = vsel %vm1594_vm15, %v3782_v28, %v3781_v38  ;;  %v15954_v53 = vld [vmem:[#allocation96_spill] sm:$0xff]  ;;  %v15956_v28 = vld [vmem:[#allocation113_spill] sm:$0xff]  ;;  %v11959_v52 = vpop.permute.xlu2 %3712 }
 0x98b   : > { %v4056_v15 = vadd.f32 %v4055_v26, %v4054_v0  ;;  %v3981_v61 = vmul.f32 %v11752_v2, %v15953_v23  ;;  %v3769_v62 = vperm.slane %v11663_v29, %v10106_v46  ;;  %v3784_v12 = vperm.slane %v11718_v42, %v10106_v46 }
 0x98c   : > { %v11908_v41 = vpop.permute.xlu1 %3700  ;;  %v4075_v34 = vadd.f32 %v4074_v1, %v4073_v43  ;;  %v4086_v35 = vadd.f32 %v4085_v50, %v4084_v14  ;;  %v3790_v32 = vsel %vm1578_vm11, %v3789_v48, %v3788_v21  ;;  %v3793_v45 = vperm.slane %v11746_v4, %v15714_v58 }
 0x98d   : > { %v11914_v54 = vpop.permute.xlu0 %3688  ;;  %v3770_v0 = vsel %vm15878_vm1, %v3769_v62, %v3768_v27  ;;  %v11942_v25 = vadd.f32 %v4036_v17, %v4035_v7  ;;  %v3791_v29 = vperm.slane %v11714_v55, %v15941_v11  ;;  %v3785_v13 = vsel %vm15955_vm9, %v3784_v12, %v3783_v19  ;;  %v15958_v19 = vld [vmem:[#allocation157_spill] sm:$0xff]  ;;  %vm15983_vm9 = vmmov %vm15878_vm1 }
 0x98e   : > { %v4057_v14 = vrot.slane %v4056_v15, 2  ;;  %v3982_v26 = vmul.f32 %v11740_v22, %v15956_v28  ;;  %v4087_v21 = vsel %vm4018_vm0, %v3981_v61, 0.0  ;;  %v3983_v4 = vmul.f32 %v11778_v6, %v15957_v31  ;;  %v15975_v28 = vld [vmem:[#allocation131_spill] sm:$0xff] }
 0x98f   : > { %v3797_v7 = vperm.slane %v11726_v33, %v10101_v8  ;;  %v3792_v55 = vsel %vm1582_vm12, %v3791_v29, %v3790_v32  ;;  %v4076_v27 = vrot.slane %v4075_v34, 4  ;;  %v4088_v17 = vadd.f32 %v4087_v21, %v4086_v35  ;;  %v15959_v35 = vld [vmem:[#allocation25_spill] sm:$0xff]  ;;  %v15960_v29 = vld [vmem:[#allocation120_spill] sm:$0xff] }
 0x990   : > { %v3802_v1 = vperm.slane %v11734_v57, %v15934_v39  ;;  %v3801_v50 = vperm.slane %v11744_v44, %v15932_v59  ;;  %v3794_v38 = vsel %vm1586_vm13, %v3793_v45, %v3792_v55  ;;  %v3876_v43 = vsel %vm618_vm2, %v3785_v13, %v3770_v0  ;;  %v15961_v13 = vld [vmem:[#allocation124_spill] sm:$0xff] }
 0x991   : > { %v3795_v48 = vperm.slane %v11736_v37, %v10055_v36  ;;  %v3808_v33 = vperm.slane %v11740_v22, %v15714_v58  ;;  %v3985_v61 = vmul.f32 %v11748_v5, %v15958_v19  ;;  %v3804_v62 = vperm.slane %v11762_v47, %v15940_v49  ;;  %v15963_v55 = vld [vmem:[#allocation88_spill] sm:$0xff] }
 0x992   : > { %4235 = vrot.lane.b32.xlu1 %v15954_v53, %s8248_s22  ;;  %v11975_v57 = vadd.f32 %v4057_v14, %v4056_v15  ;;  %v4089_v44 = vsel %vm4018_vm0, %v3982_v26, 0.0  ;;  %v4091_v12 = vsel %vm4018_vm0, %v3983_v4, 0.0  ;;  %v3986_v32 = vmul.f32 %v11802_v16, %v15959_v35  ;;  %v15962_v26 = vld [vmem:[#allocation13_spill] sm:$0xff] }
 0x993   : > { %v3796_v37 = vsel %vm1590_vm14, %v3795_v48, %v3794_v38  ;;  %v3799_v22 = vperm.slane %v11754_v30, %v10106_v46  ;;  %v4077_v45 = vadd.f32 %v4076_v27, %v4075_v34  ;;  %v4090_v0 = vadd.f32 %v4089_v44, %v4088_v17  ;;  %v15964_v38 = vld [vmem:[#allocation43_spill] sm:$0xff] }
 0x994   : > { %v11947_v42 = vpop.permute.xlu1 %3709  ;;  %v3803_v47 = vsel %vm1574_vm10, %v3802_v1, %v3801_v50  ;;  %v3984_v14 = vmul.f32 %v11760_v60, %v15961_v13  ;;  %v3987_v21 = vmul.f32 %v11771_v40, %v15962_v26  ;;  %v4095_v4 = vsel %vm4018_vm0, %v3985_v61, 0.0  ;;  %v15974_v26 = vld [vmem:[#allocation38_spill] sm:$0xff]  ;;  %v15976_v13 = vld [vmem:[#allocation103_spill] sm:$0xff] }
 0x995   : > { %v11954_v18 = vpop.permute.xlu0 %3697  ;;  %v3805_v30 = vsel %vm1578_vm11, %v3804_v62, %v3803_v47  ;;  %v4092_v34 = vadd.f32 %v4091_v12, %v4090_v0  ;;  %v3995_v27 = vmul.f32 %v11914_v54, %v15963_v55  ;;  %v3806_v1 = vperm.slane %v11752_v2, %v15941_v11  ;;  %v15965_v0 = vld [vmem:[#allocation83_spill] sm:$0xff]  ;;  %v15967_v55 = vld [vmem:[#allocation196_spill] sm:$0xff]  ;;  %v12020_v12 = vpop.permute.xlu2 %3721 }
 0x996   : > { %v3798_v50 = vsel %vm1594_vm15, %v3797_v7, %v3796_v37  ;;  %v3988_v48 = vmul.f32 %v11758_v9, %v15964_v38  ;;  %v4103_v44 = vsel %vm4018_vm0, %v3986_v32, 0.0  ;;  %v4078_v62 = vrot.slane %v4077_v45, 2 }
 0x997   : > { %v3800_v61 = vsel %vm15878_vm1, %v3799_v22, %v3798_v50  ;;  %v3994_v47 = vmul.f32 %v11810_v63, %v15965_v0  ;;  %v4093_v2 = vsel %vm4018_vm0, %v3984_v14, 0.0  ;;  %v3807_v7 = vsel %vm1582_vm12, %v3806_v1, %v3805_v30  ;;  %v15968_v30 = vld [vmem:[#allocation177_spill] sm:$0xff] }
 0x998   : > { %v4104_v37 = vsel %vm4018_vm0, %v3987_v21, 0.0  ;;  %v3810_v19 = vperm.slane %v11778_v6, %v10055_v36  ;;  %v4094_v22 = vadd.f32 %v4093_v2, %v4092_v34  ;;  %v4125_v38 = vsel %vm4018_vm0, %v3995_v27, 0.0  ;;  %v15970_v34 = vld [vmem:[#allocation54_spill] sm:$0xff]  ;;  %v15971_v2 = vld [vmem:[#allocation99_spill] sm:$0xff] }
 0x999   : > { %v4105_v50 = vadd.f32 %v4104_v37, %v4103_v44  ;;  %v12023_v0 = vsel %vm621_vm3, %v3800_v61, %v3876_v43  ;;  %v4106_v14 = vsel %vm4018_vm0, %v3988_v48, 0.0  ;;  %v3812_v21 = vperm.slane %v11760_v60, %v10101_v8  ;;  %v15972_v61 = vld [vmem:[#allocation17_spill] sm:$0xff]  ;;  %v15973_v37 = vld [vmem:[#allocation20_spill] sm:$0xff] }
 0x99a   : > { %4241 = vrot.lane.b32.xlu1 %v15960_v29, %s8248_s22  ;;  %v15966_v29 = vld [vmem:[#allocation26_spill] sm:$0xff]  ;;  %v4002_v1 = vmul.f32 %v11947_v42, %v15968_v30  ;;  %v4124_v27 = vsel %vm4018_vm0, %v3994_v47, 0.0  ;;  %v3996_v43 = vmul.f32 %v11867_v56, %v15971_v2  ;;  %v3809_v48 = vsel %vm1586_vm13, %v3808_v33, %v3807_v7 }
 0x99b   : > { %v3989_v32 = vmul.f32 %v15967_v55, %v15966_v29  ;;  %v15969_v29 = vld [vmem:[#allocation233_spill] sm:$0xff]  ;;  %v4003_v30 = vmul.f32 %v11959_v52, %v15973_v37  ;;  %v4126_v31 = vadd.f32 %v4125_v38, %v4124_v27  ;;  %v12043_v6 = vadd.f32 %v4078_v62, %v4077_v45 }
 0x99c   : > { %v11997_v17 = vpop.permute.xlu1 %3718  ;;  %v3991_v44 = vmul.f32 %v15969_v29, %v15970_v34  ;;  %v3811_v34 = vsel %vm1590_vm14, %v3810_v19, %v3809_v48  ;;  %v4096_v35 = vadd.f32 %v4095_v4, %v4094_v22  ;;  %v4107_v47 = vadd.f32 %v4106_v14, %v4105_v50  ;;  %v15977_v4 = vld [vmem:[#allocation116_spill] sm:$0xff]  ;;  %v15978_v22 = vld [vmem:[#allocation19_spill] sm:$0xff]  ;;  %v15979_v37 = vld [vmem:[#allocation65_spill] sm:$0xff] }
 0x99d   : > { %v12005_v15 = vpop.permute.xlu0 %3706  ;;  %v4108_v60 = vsel %vm4018_vm0, %v3989_v32, 0.0  ;;  %v3990_v2 = vmul.f32 %v15975_v28, %v15974_v26  ;;  %v3997_v33 = vmul.f32 %v11855_v20, %v15976_v13  ;;  %v4145_v7 = vsel %vm4018_vm0, %v4002_v1, 0.0 }
 0x99e   : > { %v4109_v45 = vadd.f32 %v4108_v60, %v4107_v47  ;;  %v4127_v19 = vsel %vm4018_vm0, %v3996_v43, 0.0  ;;  %v3998_v62 = vmul.f32 %v11954_v18, %v15977_v4  ;;  %v3817_v14 = vperm.slane %v11771_v40, %v15934_v39 }
 0x99f   : > { %v4146_v1 = vsel %vm4018_vm0, %v4003_v30, 0.0  ;;  %v4128_v27 = vadd.f32 %v4127_v19, %v4126_v31  ;;  %v3813_v48 = vsel %vm1594_vm15, %v3812_v21, %v3811_v34  ;;  %v4097_v13 = vrot.slane %v4096_v35, 4  ;;  %v12076_v21 = vpop.permute.xlu2 %3730 }
 0x9a0   : > { %v4147_v60 = vadd.f32 %v4146_v1, %v4145_v7  ;;  %v4110_v47 = vsel %vm4018_vm0, %v3990_v2, 0.0  ;;  %v4129_v40 = vsel %vm4018_vm0, %v3997_v33, 0.0  ;;  %v4131_v31 = vsel %vm4018_vm0, %v3998_v62, 0.0  ;;  %v15981_v7 = vld [vmem:[#allocation24_spill] sm:$0xff] }
 0x9a1   : > { %v4111_v30 = vadd.f32 %v4110_v47, %v4109_v45  ;;  %v15982_v2 = vperm.slane %v11748_v5, %v10106_v46  ;;  %v3831_v19 = vperm.slane %v11810_v63, %v15932_v59  ;;  %v3821_v33 = vperm.slane %v15967_v55, %v15941_v11  ;;  %v15988_v63 = vld [vmem:[#allocation49_spill] sm:$0xff] }
 0x9a2   : > { %4247 = vrot.lane.b32.xlu1 %v15972_v61, %s8248_s22  ;;  %v3816_v61 = vperm.slane %v11802_v16, %v15932_v59  ;;  %v4112_v16 = vsel %vm4018_vm0, %v3991_v44, 0.0  ;;  %v15980_v44 = vld [vmem:[#allocation32_spill] sm:$0xff]  ;;  %v4130_v45 = vadd.f32 %v4129_v40, %v4128_v27  ;;  %v12090_v62 = vadd.f32 %v4097_v13, %v4096_v35  ;;  %v15989_v27 = vld [vmem:[#allocation135_spill] sm:$0xff] }
 0x9a3   : > { %v4005_v26 = vmul.f32 %v11997_v17, %v15980_v44  ;;  %v4000_v40 = vmul.f32 %v11906_v10, %v15989_v27  ;;  %v15990_v44 = vld [vmem:[#allocation61_spill] sm:$0xff] }
 0x9a4   : > { %v12053_v32 = vpop.permute.xlu1 %3727  ;;  %v3818_v4 = vsel %vm1574_vm10, %v3817_v14, %v3816_v61  ;;  %v12084_v61 = vsel %vm15983_vm9, %v15982_v2, %v3813_v48  ;;  %v15985_v14 = vld [vmem:[#allocation220_spill] sm:$0xff]  ;;  %v4006_v2 = vmul.f32 %v12020_v12, %v15988_v63  ;;  %v4132_v55 = vadd.f32 %v4131_v31, %v4130_v45  ;;  %vm16005_vm9 = vmmov %vm15878_vm1 }
 0x9a5   : > { %v12055_v38 = vpop.permute.xlu0 %3715  ;;  %v4150_v35 = vsel %vm4018_vm0, %v4005_v26, 0.0  ;;  %v3832_v26 = vperm.slane %v11914_v54, %v15934_v39  ;;  %v4135_v27 = vsel %vm4018_vm0, %v4000_v40, 0.0 }
 0x9a6   : > { %v4004_v50 = vmul.f32 %v12055_v38, %v15978_v22  ;;  %v3992_v22 = vmul.f32 %v11873_v51, %v15979_v37 }
 0x9a8   : > { %v4148_v43 = vsel %vm4018_vm0, %v4004_v50, 0.0  ;;  %v15984_v50 = vld [vmem:[#allocation75_spill] sm:$0xff]  ;;  %v4114_v47 = vsel %vm4018_vm0, %v3992_v22, 0.0  ;;  %v3836_v22 = vperm.slane %v11855_v20, %v15941_v11  ;;  %v4152_v20 = vsel %vm4018_vm0, %v4006_v2, 0.0 }
 0x9a9   : > { %v4149_v34 = vadd.f32 %v4148_v43, %v4147_v60  ;;  %v3993_v1 = vmul.f32 %v15985_v14, %v15984_v50  ;;  %v15986_v60 = vperm.slane %v11758_v9, %v15940_v49  ;;  %v15987_v43 = vld [vmem:[#allocation136_spill] sm:$0xff]  ;;  %v3833_v2 = vsel %vm1574_vm10, %v3832_v26, %v3831_v19 }
 0x9aa   : > { %4253 = vrot.lane.b32.xlu1 %v15981_v7, %s8248_s22  ;;  %v3999_v48 = vmul.f32 %v11908_v41, %v15987_v43  ;;  %v4113_v7 = vadd.f32 %v4112_v16, %v4111_v30  ;;  %v3849_v26 = vperm.slane %v12055_v38, %v15940_v49 }
 0x9ab   : > { %v3820_v5 = vsel %vm1578_vm11, %v15986_v60, %v3818_v4  ;;  %v4151_v9 = vadd.f32 %v4150_v35, %v4149_v34  ;;  %v3823_v60 = vperm.slane %v15975_v28, %v15714_v58  ;;  %v15991_v34 = vld [vmem:[#allocation191_spill] sm:$0xff]  ;;  %v4116_v54 = vsel %vm4018_vm0, %v3993_v1, 0.0 }
 0x9ac   : > { %v3822_v31 = vsel %vm1582_vm12, %v3821_v33, %v3820_v5  ;;  %v12117_v45 = vpop.permute.xlu1 %3736  ;;  %v4115_v16 = vadd.f32 %v4114_v47, %v4113_v7  ;;  %v4133_v30 = vsel %vm4018_vm0, %v3999_v48, 0.0  ;;  %v4001_v35 = vmul.f32 %v12005_v15, %v15991_v34  ;;  %v15992_v48 = vld [vmem:[#allocation64_spill] sm:$0xff] }
 0x9ad   : > { %v12104_v13 = vpop.permute.xlu0 %3724  ;;  %v3824_v5 = vsel %vm1586_vm13, %v3823_v60, %v3822_v31  ;;  %v4153_v7 = vadd.f32 %v4152_v20, %v4151_v9  ;;  %v3834_v47 = vperm.slane %v11867_v56, %v15940_v49  ;;  %v3827_v28 = vperm.slane %v11873_v51, %v10101_v8  ;;  %v3740_v9 = vpop.permute.xlu2 %3739 }
 0x9ae   : > { %v4007_v4 = vmul.f32 %v12104_v13, %v15990_v44  ;;  %v4134_v44 = vadd.f32 %v4133_v30, %v4132_v55  ;;  %v15993_v55 = vld [vmem:[#allocation59_spill] sm:$0xff]  ;;  %v4117_v1 = vadd.f32 %v4116_v54, %v4115_v16  ;;  %v3846_v60 = vperm.slane %v11947_v42, %v15932_v59  ;;  %v15996_v54 = vld [vmem:[#allocation81_spill] sm:$0xff] }
 0x9af   : > { %v4137_v40 = vsel %vm4018_vm0, %v4001_v35, 0.0  ;;  %v15994_v30 = vperm.slane %v15969_v29, %v10055_v36  ;;  %v3847_v51 = vperm.slane %v11959_v52, %v15934_v39  ;;  %v3835_v20 = vsel %vm1578_vm11, %v3834_v47, %v3833_v2  ;;  %v15995_v35 = vld [vmem:[#allocation90_spill] sm:$0xff] }
 0x9b0   : > { %v4154_v33 = vsel %vm4018_vm0, %v4007_v4, 0.0  ;;  %v4008_v4 = vmul.f32 %v12053_v32, %v15993_v55  ;;  %v4136_v19 = vadd.f32 %v4135_v27, %v4134_v44  ;;  %v3838_v42 = vperm.slane %v11954_v18, %v15714_v58 }
 0x9b1   : > { %v4155_v31 = vadd.f32 %v4154_v33, %v4153_v7  ;;  %v3826_v56 = vsel %vm1590_vm14, %v15994_v30, %v3824_v5  ;;  %v4011_v33 = vmul.f32 %v12117_v45, %v15995_v35  ;;  %v15997_v7 = vld [vmem:[#allocation71_spill] sm:$0xff]  ;;  %v4118_v38 = vrot.slane %v4117_v1, 4 }
 0x9b2   : > { %4259 = vrot.lane.b32.xlu1 %v15992_v48, %s8248_s22  ;;  %v3828_v5 = vsel %vm1594_vm15, %v3827_v28, %v3826_v56  ;;  %v4009_v52 = vmul.f32 %v12076_v21, %v15997_v7  ;;  %v4138_v44 = vadd.f32 %v4137_v40, %v4136_v19  ;;  %v4156_v27 = vsel %vm4018_vm0, %v4008_v4, 0.0  ;;  %v15998_v19 = vld [vmem:[#allocation91_spill] sm:$0xff] }
 0x9b3   : > { %v3848_v30 = vsel %vm1574_vm10, %v3847_v51, %v3846_v60  ;;  %v4157_v47 = vadd.f32 %v4156_v27, %v4155_v31  ;;  %v3840_v18 = vperm.slane %v11908_v41, %v10055_v36  ;;  %v3837_v48 = vsel %vm1582_vm12, %v3836_v22, %v3835_v20  ;;  %v15999_v51 = vld [vmem:[#allocation89_spill] sm:$0xff] }
 0x9b4   : > { %v3850_v35 = vsel %vm1578_vm11, %v3849_v26, %v3848_v30  ;;  %v3746_v28 = vpop.permute.xlu1 %3745  ;;  %v3839_v40 = vsel %vm1586_vm13, %v3838_v42, %v3837_v48  ;;  %v3851_v4 = vperm.slane %v11997_v17, %v15941_v11  ;;  %v4012_v60 = vmul.f32 %v3740_v9, %v15998_v19 }
 0x9b5   : > { %v3734_v16 = vpop.permute.xlu0 %3733  ;;  %v4167_v31 = vsel %vm4018_vm0, %v4011_v33, 0.0  ;;  %v4158_v41 = vsel %vm4018_vm0, %v4009_v52, 0.0  ;;  %v4139_v22 = vrot.slane %v4138_v44, 4  ;;  %v3862_v26 = vperm.slane %v12117_v45, %v15934_v39 }
 0x9b6   : > { %v4010_v29 = vmul.f32 %v3734_v16, %v15996_v54  ;;  %v3861_v56 = vperm.slane %v3734_v16, %v15932_v59  ;;  %v4119_v16 = vadd.f32 %v4118_v38, %v4117_v1  ;;  %v3852_v48 = vsel %vm1582_vm12, %v3851_v4, %v3850_v35  ;;  %v16000_v1 = vld [vmem:[#allocation109_spill] sm:$0xff]  ;;  %v16001_v4 = vld [vmem:[#allocation104_spill] sm:$0xff] }
 0x9b7   : > { %v3855_v17 = vperm.slane %v12104_v13, %v10055_v36  ;;  %v4159_v42 = vadd.f32 %v4158_v41, %v4157_v47  ;;  %v3853_v33 = vperm.slane %v12020_v12, %v15714_v58  ;;  %v3864_v27 = vperm.slane %v3740_v9, %v15940_v49 }
 0x9b8   : > { %v4166_v2 = vsel %vm4018_vm0, %v4010_v29, 0.0  ;;  %v3841_v29 = vsel %vm1590_vm14, %v3840_v18, %v3839_v40  ;;  %v3863_v52 = vsel %vm1574_vm10, %v3862_v26, %v3861_v56  ;;  %v4169_v45 = vsel %vm4018_vm0, %v4012_v60, 0.0  ;;  %v16002_v26 = vld [vmem:[#allocation115_spill] sm:$0xff] }
 0x9b9   : > { %v4168_v20 = vadd.f32 %v4167_v31, %v4166_v2  ;;  %v3749_v2 = vpop.permute.xlu2 %3748  ;;  %v4014_v38 = vmul.f32 %v3746_v28, %v16000_v1  ;;  %v3844_v47 = vperm.slane %v12005_v15, %v10106_v46  ;;  %v4140_v12 = vadd.f32 %v4139_v22, %v4138_v44 }
 0x9ba   : > { %4265 = vrot.lane.b32.xlu1 %v15999_v51, %s8248_s22  ;;  %v3854_v18 = vsel %vm1586_vm13, %v3853_v33, %v3852_v48  ;;  %v4160_v56 = vrot.slane %v4159_v42, 4  ;;  %v3865_v31 = vsel %vm1578_vm11, %v3864_v27, %v3863_v52  ;;  %v3857_v41 = vperm.slane %v12053_v32, %v10101_v8 }
 0x9bb   : > { %v4170_v40 = vadd.f32 %v4169_v45, %v4168_v20  ;;  %v3856_v9 = vsel %vm1590_vm14, %v3855_v17, %v3854_v18  ;;  %v4015_v51 = vmul.f32 %v3749_v2, %v16002_v26  ;;  %v3842_v15 = vperm.slane %v11906_v10, %v10101_v8  ;;  %v16004_v17 = vld [vmem:[#allocation114_spill] sm:$0xff] }
 0x9bc   : > { %v16003_v44 = vperm.slane %v15985_v14, %v10106_v46  ;;  %v3868_v20 = vperm.slane %v3746_v28, %v15714_v58  ;;  %v4173_v48 = vsel %vm4018_vm0, %v4014_v38, 0.0  ;;  %v4120_v32 = vrot.slane %v4119_v16, 2  ;;  %v3755_v27 = vpop.permute.xlu1 %3754 }
 0x9bd   : > { %v3743_v30 = vpop.permute.xlu0 %3742  ;;  %v3859_v33 = vperm.slane %v12076_v21, %v10106_v46  ;;  %v3858_v10 = vsel %vm1594_vm15, %v3857_v41, %v3856_v9  ;;  %v3843_v45 = vsel %vm1594_vm15, %v3842_v15, %v3841_v29  ;;  %v4161_v14 = vadd.f32 %v4160_v56, %v4159_v42  ;;  %v16007_v29 = vld [vmem:[#allocation158_spill] sm:$0xff] }
 0x9be   : > { %v3866_v35 = vperm.slane %v3743_v30, %v15941_v11  ;;  %v4013_v13 = vmul.f32 %v3743_v30, %v16001_v4  ;;  %v3830_v22 = vsel %vm15878_vm1, %v16003_v44, %v3828_v5  ;;  %v3878_v28 = vsel %vm624_vm4, %v12084_v61, %v12023_v0 }
 0x9bf   : > { %v3845_v38 = vsel %vm16005_vm9, %v3844_v47, %v3843_v45  ;;  %v4175_v21 = vsel %vm4018_vm0, %v4015_v51, 0.0  ;;  %v3860_v56 = vsel %vm15878_vm1, %v3859_v33, %v3858_v10  ;;  %v3879_v61 = vsel %vm627_vm5, %v3830_v22, %v3878_v28  ;;  %vm16009_vm9 = vmmov %vm15878_vm1  ;;  %v16010_v22 = vld [vmem:[#allocation161_spill] sm:$0xff] }
 0x9c0   : > { %v4171_v60 = vsel %vm4018_vm0, %v4013_v13, 0.0  ;;  %v3867_v30 = vsel %vm1582_vm12, %v3866_v35, %v3865_v31  ;;  %v4141_v35 = vrot.slane %v4140_v12, 2  ;;  %v3870_v13 = vperm.slane %v3749_v2, %v10055_v36 }
 0x9c1   : > { %v4172_v1 = vadd.f32 %v4171_v60, %v4170_v40  ;;  %v3869_v5 = vsel %vm1586_vm13, %v3868_v20, %v3867_v30  ;;  %v3874_v31 = vperm.slane %v3755_v27, %v10106_v46  ;;  %v3880_v47 = vsel %vm630_vm6, %v3845_v38, %v3879_v61 }
 0x9c2   : > { %4271 = vrot.lane.b32.xlu1 %v16004_v17, %s8248_s22  ;;  %v3871_v0 = vsel %vm1590_vm14, %v3870_v13, %v3869_v5  ;;  %v4162_v41 = vrot.slane %v4161_v14, 2  ;;  %v16008_v30 = vrot.slane %v12090_v62, 2  ;;  %v4121_v33 = vadd.f32 %v4120_v32, %v4119_v16  ;;  %v16057_v17 = vld [vmem:[#allocation82_spill] sm:$0xff] }
 0x9c3   : > { %v4174_v52 = vadd.f32 %v4173_v48, %v4172_v1  ;;  %v16006_v1 = vld [vmem:[#allocation145_spill] sm:$0xff]  ;;  %v3881_v48 = vsel %vm15194_vm7, %v3860_v56, %v3880_v47  ;;  %v4059_v10 = vrot.slane %v11975_v57, 1  ;;  %v4142_v45 = vadd.f32 %v4141_v35, %v4140_v12 }
 0x9c4   : > { %v4017_v40 = vmul.f32 %v3755_v27, %v16006_v1  ;;  %v4100_v15 = vadd.f32 %v16008_v30, %v12090_v62  ;;  %vm16011_vm1 = vcmask 523264   ;;  %v4080_v62 = vrot.slane %v12043_v6, 1 }
 0x9c5   : > { %v3752_v18 = vpop.permute.xlu0 %3751  ;;  %v4176_v60 = vadd.f32 %v4175_v21, %v4174_v52  ;;  %v4163_v38 = vadd.f32 %v4162_v41, %v4161_v14  ;;  %v4038_v13 = vrot.slane %v11942_v25, 1  ;;  %v4122_v21 = vrot.slane %v4121_v33, 1 }
 0x9c6   : > { %v3872_v9 = vperm.slane %v3752_v18, %v10101_v8  ;;  %v4016_v42 = vmul.f32 %v3752_v18, %v16007_v29  ;;  %v4179_v27 = vsel %vm4018_vm0, %v4017_v40, 0.0  ;;  %v4101_v16 = vrot.slane %v4100_v15, 1 }
 0x9c7   : > { %v4060_v18 = vadd.f32 %v4059_v10, %v11975_v57  ;;  %v4143_v40 = vrot.slane %v4142_v45, 1  ;;  %v4164_v56 = vrot.slane %v4163_v38, 1  ;;  %v4039_v12 = vadd.f32 %v4038_v13, %v11942_v25  ;;  %v16018_v10 = vld [vmem:[#allocation140_spill] sm:$0xff] }
 0x9c8   : > { %v4177_v2 = vsel %vm4018_vm0, %v4016_v42, 0.0  ;;  %v3873_v51 = vsel %vm1594_vm15, %v3872_v9, %v3871_v0  ;;  %v4081_v42 = vadd.f32 %v4080_v62, %v12043_v6  ;;  %v4102_v35 = vadd.f32 %v4101_v16, %v4100_v15  ;;  %v16012_v0 = vld [vmem:[#allocation22_spill] sm:$0xff]  ;;  %v4210_v62 = vpop.permute.xlu1 %4209 }
 0x9c9   : > { %v4178_v44 = vadd.f32 %v4177_v2, %v4176_v60  ;;  %v3875_v20 = vsel %vm16009_vm9, %v3874_v31, %v3873_v51  ;;  %v4123_v60 = vadd.f32 %v4122_v21, %v4121_v33  ;;  %v4144_v14 = vadd.f32 %v4143_v40, %v4142_v45  ;;  %v16015_v33 = vld [vmem:[#allocation52_spill] sm:$0xff]  ;;  %v16024_v16 = vld [vmem:[#allocation30_spill] sm:$0xff]  ;;  %v16026_v21 = vld [vmem:[#allocation55_spill] sm:$0xff] }
 0x9ca   : > { %4277 = vrot.lane.b32.xlu1 %v16010_v22, %s8248_s22  ;;  %v3882_v52 = vsel %vm15193_vm8, %v3875_v20, %v3881_v48  ;;  %v4195_v2 = vsel %vm618_vm2, %v4060_v18, %v4039_v12  ;;  %v4165_v51 = vadd.f32 %v4164_v56, %v4163_v38  ;;  %v16013_v20 = vld [vmem:[#allocation56_spill] sm:$0xff]  ;;  %v16022_v38 = vld [vmem:[#allocation50_spill] sm:$0xff]  ;;  %vm16023_vm0 = vcmask 130048  }
 0x9cb   : > { %v4180_v5 = vadd.f32 %v4179_v27, %v4178_v44  ;;  %v3884_v28 = vsel %vm16011_vm1, %v3882_v52, 0.0  ;;  %v4196_v57 = vsel %vm621_vm3, %v4081_v42, %v4195_v2  ;;  %v16014_v48 = vld [vmem:[#allocation84_spill] sm:$0xff]  ;;  %v16016_v27 = vld [vmem:[#allocation105_spill] sm:$0xff]  ;;  %v16017_v52 = vld [vmem:[#allocation87_spill] sm:$0xff]  ;;  %v4212_v13 = vsel %vm16023_vm0, %v4210_v62, 0.0 }
 0x9cc   : > { %3885 = vadd.xlane.f32.xlu2 %v3884_v28  ;;  %v4197_v41 = vsel %vm624_vm4, %v4102_v35, %v4196_v57  ;;  %v16019_v45 = vld [vmem:[#allocation108_spill] sm:$0xff]  ;;  %v16027_v18 = vld [vmem:[#allocation94_spill] sm:$0xff]  ;;  %v16030_v42 = vld [vmem:[#allocation117_spill] sm:$0xff] }
 0x9cd   : > { %v4181_v32 = vrot.slane %v4180_v5, 4  ;;  %v4198_v6 = vsel %vm627_vm5, %v4123_v60, %v4197_v41  ;;  %v16021_v28 = vld [vmem:[#allocation172_spill] sm:$0xff]  ;;  %v16028_v40 = vld [vmem:[#allocation74_spill] sm:$0xff]  ;;  %v16037_v57 = vld [vmem:[#allocation37_spill] sm:$0xff] }
 0x9ce   : > { %v4199_v25 = vsel %vm630_vm6, %v4144_v14, %v4198_v6  ;;  %v16031_v12 = vld [vmem:[#allocation98_spill] sm:$0xff]  ;;  %v16032_v35 = vld [vmem:[#allocation112_spill] sm:$0xff]  ;;  %v16042_v62 = vld [vmem:[#allocation79_spill] sm:$0xff] }
 0x9cf   : > { %v4182_v9 = vadd.f32 %v4181_v32, %v4180_v5  ;;  %v4200_v15 = vsel %vm15194_vm7, %v4165_v51, %v4199_v25  ;;  %v16020_v5 = vld [vmem:[#allocation42_spill] sm:$0xff]  ;;  %v16025_v32 = vld [vmem:[#allocation72_spill] sm:$0xff]  ;;  %vm16043_vm9 = vmmov %vm16023_vm0 }
 0x9d0   : > { %v4216_v56 = vpop.permute.xlu1 %4215  ;;  %v16034_v14 = vld [vmem:[#allocation152_spill] sm:$0xff]  ;;  %v16039_v41 = vld [vmem:[#allocation218_spill] sm:$0xff]  ;;  %vm16047_vm1 = vmmov %vm16023_vm0  ;;  %vm4207_vm0 = vcmask 261248  }
 0x9d1   : > { %v4183_v31 = vrot.slane %v4182_v9, 2  ;;  %v16036_v51 = vld [vmem:[#allocation28_spill] sm:$0xff] }
 0x9d2   : > { %4283 = vrot.lane.b32.xlu1 %v16012_v0, %s8248_s22 }
 0x9d3   : > { %v4184_v61 = vadd.f32 %v4183_v31, %v4182_v9  ;;  %v16029_v9 = vld [vmem:[#allocation70_spill] sm:$0xff]  ;;  %v16033_v31 = vld [vmem:[#allocation139_spill] sm:$0xff] }
 0x9d5   : > { %v4185_v47 = vrot.slane %v4184_v61, 1 }
 0x9d7   : > { %v4186_v30 = vadd.f32 %v4185_v47, %v4184_v61  ;;  %v16035_v61 = vld [vmem:[#allocation40_spill] sm:$0xff]  ;;  %v16038_v47 = vld [vmem:[#allocation227_spill] sm:$0xff] }
 0x9d8   : > { %v12297_v60 = vpop.permute.xlu1 %4217  ;;  %v3288_v6 = vsub.f32 %v16039_v41, %v16038_v47  ;;  %v16044_v47 = vld [vmem:[#allocation92_spill] sm:$0xff]  ;;  %v16045_v41 = vld [vmem:[#allocation102_spill] sm:$0xff] }
 0x9d9   : > { %v4201_v44 = vsel %vm15193_vm8, %v4186_v30, %v4200_v15  ;;  %v16040_v30 = vld [vmem:[#allocation48_spill] sm:$0xff] }
 0x9da   : > { %4202 = vrot.lane.b32.xlu0 %v4201_v44, %s8244_s30  ;;  %4289 = vrot.lane.b32.xlu1 %v16013_v20, %s8248_s22  ;;  %v3289_v25 = vmul.f32 1.442695, %v3288_v6  ;;  %v16041_v44 = vld [vmem:[#allocation66_spill] sm:$0xff]  ;;  %v16046_v6 = vld [vmem:[#allocation189_spill] sm:$0xff] }
 0x9dc   : > { %7839 = vpow2.f32 %v3289_v25 }
 0x9e0   : > { %v12303_v2 = vpop.permute.xlu1 %4219 }
 0x9e2   : > { %4295 = vrot.lane.b32.xlu1 %v16014_v48, %s8248_s22 }
 0x9e4   : > { %4223 = vrot.lane.b32.xlu2 %v16015_v33, %s8248_s22 }
 0x9e8   : > { %v4222_v15 = vpop.permute.xlu1 %4221 }
 0x9ea   : > { %4301 = vrot.lane.b32.xlu1 %v16016_v27, %s8248_s22  ;;  %v16048_v27 = vld [vmem:[#allocation118_spill] sm:$0xff] }
 0x9ec   : > { %4233 = vrot.lane.b32.xlu2 %v16017_v52, %s8248_s22 }
 0x9f2   : > { %4307 = vrot.lane.b32.xlu1 %v16018_v10, %s8248_s22 }
 0x9f4   : > { %4237 = vrot.lane.b32.xlu2 %v16019_v45, %s8248_s22 }
 0x9fa   : > { %4313 = vrot.lane.b32.xlu1 %v16020_v5, %s8248_s22  ;;  %v4416_v5 = vsel %vm16047_vm1, %v4222_v15, 0.0 }
 0x9fc   : > { %4243 = vrot.lane.b32.xlu2 %v16021_v28, %s8248_s22 }
 0xa02   : > { %4319 = vrot.lane.b32.xlu1 %v16022_v38, %s8248_s22 }
 0xa04   : > { %4213 = vadd.xlane.f32.xlu0 %v4212_v13  ;;  %4249 = vrot.lane.b32.xlu2 %v16024_v16, %s8248_s22 }
 0xa0a   : > { %4325 = vrot.lane.b32.xlu1 %v16025_v32, %s8248_s22  ;;  %v12318_v32 = vpop.permute.xlu1 %4225 }
 0xa0c   : > { %4255 = vrot.lane.b32.xlu2 %v16026_v21, %s8248_s22 }
 0xa12   : > { %4331 = vrot.lane.b32.xlu1 %v16027_v18, %s8248_s22  ;;  %v4407_v18 = vsel %vm16043_vm9, %v4216_v56, 0.0  ;;  %vm16050_vm9 = vmmov %vm16047_vm1 }
 0xa14   : > { %4261 = vrot.lane.b32.xlu2 %v16028_v40, %s8248_s22  ;;  %v16065_v40 = vld [vmem:[#allocation60_spill] sm:$0xff] }
 0xa18   : > { %4229 = vrot.lane.b32.xlu0 %v16029_v9, %s8248_s22 }
 0xa1a   : > { %4337 = vrot.lane.b32.xlu1 %v16030_v42, %s8248_s22  ;;  %v7840_v42 = vpop.eup %7839 }
 0xa1b   : > { %v3889_v25 = vmul.f32 %v7840_v42, %v16046_v6 }
 0xa1c   : > { %4267 = vrot.lane.b32.xlu2 %v16031_v12, %s8248_s22 }
 0xa20   : > { %4239 = vrot.lane.b32.xlu0 %v16032_v35, %s8248_s22 }
 0xa24   : > { %4273 = vrot.lane.b32.xlu2 %v16033_v31, %s8248_s22 }
 0xa28   : > { %4245 = vrot.lane.b32.xlu0 %v16034_v14, %s8248_s22 }
 0xa2c   : > { %4279 = vrot.lane.b32.xlu2 %v16035_v61, %s8248_s22 }
 0xa30   : > { %4251 = vrot.lane.b32.xlu0 %v16036_v51, %s8248_s22 }
 0xa34   : > { %4285 = vrot.lane.b32.xlu2 %v16037_v57, %s8248_s22 }
 0xa38   : > { %4257 = vrot.lane.b32.xlu0 %v16040_v30, %s8248_s22 }
 0xa3c   : > { %4291 = vrot.lane.b32.xlu2 %v16041_v44, %s8248_s22 }
 0xa3f   : > { %v3886_v13 = vpop.xlane.xlu2 %3885 }
 0xa40   : > { %4263 = vrot.lane.b32.xlu0 %v16042_v62, %s8248_s22  ;;  %v3887_v38 = vadd.f32 %v7840_v42, %v3886_v13  ;;  %v4228_v13 = vpop.permute.xlu1 %4227  ;;  %v16051_v42 = vld [vmem:[#allocation193_spill] sm:$0xff] }
 0xa42   : > { %7841 = vrcp.f32 %v3887_v38  ;;  %v16049_v38 = vld [vmem:[#allocation126_spill] sm:$0xff] }
 0xa44   : > { %4297 = vrot.lane.b32.xlu2 %v16044_v47, %s8248_s22  ;;  %4408 = vadd.xlane.f32.xlu1 %v4407_v18  ;;  %v4425_v18 = vsel %vm16050_vm9, %v4228_v13, 0.0  ;;  %v16061_v47 = vld [vmem:[#allocation162_spill] sm:$0xff] }
 0xa47   : > { %v4224_v20 = vpop.permute.xlu2 %4223 }
 0xa48   : > { %4269 = vrot.lane.b32.xlu0 %v16045_v41, %s8248_s22  ;;  %v7842_v48 = vpop.eup %7841  ;;  %v12333_v15 = vpop.permute.xlu1 %4231 }
 0xa4c   : > { %v4203_v10 = vpop.permute.xlu0 %4202  ;;  %4303 = vrot.lane.b32.xlu2 %v16048_v27, %s8248_s22  ;;  %4417 = vadd.xlane.f32.xlu1 %v4416_v5 }
 0xa4d   : > { %v4205_v56 = vadd.f32 %v4203_v10, %v3889_v25  ;;  %v16052_v10 = vld [vmem:[#allocation18_spill] sm:$0xff] }
 0xa4f   : > { %v4206_v0 = vmul.f32 %v7842_v48, %v4205_v56  ;;  %v4234_v22 = vpop.permute.xlu2 %4233  ;;  %v16053_v48 = vld [vmem:[#allocation23_spill] sm:$0xff]  ;;  %v16055_v56 = vld [vmem:[#allocation62_spill] sm:$0xff] }
 0xa50   : > { %4275 = vrot.lane.b32.xlu0 %v16049_v38, %s8248_s22  ;;  %v4434_v5 = vsel %vm16047_vm1, %v4234_v22, 0.0  ;;  %v4236_v25 = vpop.permute.xlu1 %4235  ;;  %v16058_v22 = vld [vmem:[#allocation100_spill] sm:$0xff] }
 0xa51   : > { %4208 = vst.msk [vmem:[#allocation2] sm:$0xff] %vm4207_vm0, %v4206_v0  ;;  %v16054_v0 = vld [vmem:[#allocation36_spill] sm:$0xff]  ;;  %vm16066_vm0 = vmmov %vm16047_vm1 }
 0xa52   : > { %vm16068_vm9 = vmmov %vm16066_vm0 }
 0xa53   : > { %vm16070_vm1 = vmmov %vm16066_vm0 }
 0xa54   : > { %4309 = vrot.lane.b32.xlu2 %v16051_v42, %s8248_s22  ;;  %4426 = vadd.xlane.f32.xlu1 %v4425_v18  ;;  %v16056_v18 = vld [vmem:[#allocation76_spill] sm:$0xff]  ;;  %vm16073_vm8 = vmmov %vm16066_vm0 }
 0xa55   : > { %vm16075_vm7 = vmmov %vm16066_vm0 }
 0xa57   : > { %v12344_v13 = vpop.permute.xlu2 %4237 }
 0xa58   : > { %4281 = vrot.lane.b32.xlu0 %v16052_v10, %s8248_s22  ;;  %v4242_v42 = vpop.permute.xlu1 %4241 }
 0xa5c   : > { %4315 = vrot.lane.b32.xlu2 %v16053_v48, %s8248_s22  ;;  %4435 = vadd.xlane.f32.xlu1 %v4434_v5  ;;  %v16059_v48 = vld [vmem:[#allocation106_spill] sm:$0xff] }
 0xa5f   : > { %v12352_v5 = vpop.permute.xlu2 %4243 }
 0xa60   : > { %4287 = vrot.lane.b32.xlu0 %v16054_v0, %s8248_s22  ;;  %v4248_v6 = vpop.permute.xlu1 %4247 }
 0xa64   : > { %4321 = vrot.lane.b32.xlu2 %v16055_v56, %s8248_s22  ;;  %v16060_v56 = vld [vmem:[#allocation141_spill] sm:$0xff] }
 0xa67   : > { %v12358_v27 = vpop.permute.xlu2 %4249 }
 0xa68   : > { %4293 = vrot.lane.b32.xlu0 %v16056_v18, %s8248_s22  ;;  %v12362_v44 = vpop.permute.xlu1 %4253 }
 0xa6c   : > { %4327 = vrot.lane.b32.xlu2 %v16057_v17, %s8248_s22  ;;  %v16062_v17 = vld [vmem:[#allocation179_spill] sm:$0xff] }
 0xa6f   : > { %v12368_v61 = vpop.permute.xlu2 %4255 }
 0xa70   : > { %4299 = vrot.lane.b32.xlu0 %v16058_v22, %s8248_s22  ;;  %v12372_v31 = vpop.permute.xlu1 %4259  ;;  %v16069_v22 = vld [vmem:[#allocation110_spill] sm:$0xff] }
 0xa74   : > { %4333 = vrot.lane.b32.xlu2 %v16059_v48, %s8248_s22  ;;  %v16064_v48 = vld [vmem:[#allocation44_spill] sm:$0xff] }
 0xa77   : > { %v12366_v57 = vpop.xlane.xlu0 %4213  ;;  %v12374_v12 = vpop.permute.xlu2 %4261 }
 0xa78   : > { %4305 = vrot.lane.b32.xlu0 %v16060_v56, %s8248_s22  ;;  %16063 = vst [vmem:[#allocation163_spill] sm:$0xff] %v12366_v57  ;;  %v12379_v16 = vpop.permute.xlu1 %4265 }
 0xa7c   : > { %4339 = vrot.lane.b32.xlu2 %v16061_v47, %s8248_s22 }
 0xa7f   : > { %v12383_v28 = vpop.permute.xlu2 %4267 }
 0xa80   : > { %4311 = vrot.lane.b32.xlu0 %v16062_v17, %s8248_s22  ;;  %v16067_v17 = vld [vmem:[#allocation93_spill] sm:$0xff]  ;;  %v12386_v45 = vpop.permute.xlu1 %4271 }
 0xa87   : > { %v12391_v52 = vpop.permute.xlu2 %4273 }
 0xa88   : > { %4317 = vrot.lane.b32.xlu0 %v16064_v48, %s8248_s22 }
 0xa8a   : > { %v4230_v9 = vpop.permute.xlu0 %4229 }
 0xa90   : > { %4323 = vrot.lane.b32.xlu0 %v16065_v40, %s8248_s22 }
 0xa92   : > { %v4240_v47 = vpop.permute.xlu0 %4239 }
 0xa93   : > { %v4443_v21 = vsel %vm16066_vm0, %v4240_v47, 0.0 }
 0xa94   : > { %4444 = vadd.xlane.f32.xlu1 %v4443_v21  ;;  %v4410_v21 = vsel %vm16066_vm0, %v12297_v60, 0.0 }
 0xa98   : > { %4329 = vrot.lane.b32.xlu0 %v16067_v17, %s8248_s22  ;;  %v12395_v17 = vpop.permute.xlu1 %4277 }
 0xa9a   : > { %v4246_v48 = vpop.permute.xlu0 %4245 }
 0xa9b   : > { %v4452_v56 = vsel %vm16068_vm9, %v4246_v48, 0.0  ;;  %v16071_v48 = vld [vmem:[#allocation150_spill] sm:$0xff]  ;;  %vm16072_vm9 = vmmov %vm16066_vm0 }
 0xa9c   : > { %4453 = vadd.xlane.f32.xlu1 %v4452_v56 }
 0xaa0   : > { %4335 = vrot.lane.b32.xlu0 %v16069_v22, %s8248_s22  ;;  %v4419_v22 = vsel %vm16073_vm8, %v4224_v20, 0.0  ;;  %v12403_v0 = vpop.permute.xlu1 %4283  ;;  %vm16076_vm8 = vmmov %vm16066_vm0 }
 0xaa1   : > { %v4437_v20 = vsel %vm16076_vm8, %v4236_v25, 0.0  ;;  %vm16080_vm8 = vmmov %vm16066_vm0 }
 0xaa2   : > { %v4252_v40 = vpop.permute.xlu0 %4251 }
 0xaa3   : > { %v4461_v47 = vsel %vm16070_vm1, %v4252_v40, 0.0  ;;  %v12401_v40 = vpop.permute.xlu2 %4279  ;;  %vm16074_vm1 = vmmov %vm16066_vm0 }
 0xaa4   : > { %4462 = vadd.xlane.f32.xlu1 %v4461_v47 }
 0xaa5   : > { %4411 = vadd.xlane.f32.xlu2 %v4410_v21  ;;  %v4428_v21 = vsel %vm16066_vm0, %v4230_v9, 0.0 }
 0xaa8   : > { %4341 = vrot.lane.b32.xlu0 %v16071_v48, %s8248_s22  ;;  %s7275_s22 = sshll.u32 %s7271_s17, 4  ;;  %s7276_s22 = int_to_ptr.hbm [resolvable:$true] %s7275_s22 }
 0xaa9   : > { %s8181_s28 = sshra.s32 %s7276_s22, 4  ;;  %s8182_s28 = int_to_ptr.hbm [resolvable:$true] %s8181_s28 }
 0xaaa   : > { %v4258_v56 = vpop.permute.xlu0 %4257  ;;  %s8183_s29 = scalar_lea.hbm %s8182_s28, 8  ;;  %p8188_p11 = scmp.lt.s32.totalorder %s8182_s28, %s14782_s7 }
 0xaab   : > { %v4470_v18 = vsel %vm16072_vm9, %v4258_v56, 0.0  ;;  %v12407_v10 = vpop.permute.xlu2 %4285  ;;  %vm16077_vm9 = vmmov %vm16066_vm0  ;;  %p8184_p1 = scmp.ne.s32.totalorder %s8182_s28, %s8183_s29 }
 0xaac   : > { %4471 = vadd.xlane.f32.xlu1 %v4470_v18  ;;  %v12410_v18 = vpop.permute.xlu1 %4289 }
 0xaad   : > { %4420 = vadd.xlane.f32.xlu2 %v4419_v22  ;;  %p8185_p4 = pnand %p8184_p1, %p8357_p7 }
 0xaaf   : > { %p8186_p8 = pneg %p8185_p4 }
 0xab2   : > { %v4264_v47 = vpop.permute.xlu0 %4263 }
 0xab3   : > { %v4479_v60 = vsel %vm16074_vm1, %v4264_v47, 0.0  ;;  %v12413_v22 = vpop.permute.xlu2 %4291  ;;  %vm16078_vm1 = vmmov %vm16066_vm0 }
 0xab4   : > { %4480 = vadd.xlane.f32.xlu1 %v4479_v60  ;;  %v4446_v9 = vsel %vm16078_vm1, %v4242_v42, 0.0  ;;  %v12417_v60 = vpop.permute.xlu1 %4295  ;;  %vm16082_vm1 = vmmov %vm16066_vm0 }
 0xab5   : > { %4429 = vadd.xlane.f32.xlu2 %v4428_v21 }
 0xaba   : > { %v4270_v48 = vpop.permute.xlu0 %4269 }
 0xabb   : > { %v4488_v56 = vsel %vm16075_vm7, %v4270_v48, 0.0  ;;  %v12420_v1 = vpop.permute.xlu2 %4297  ;;  %vm16079_vm7 = vmmov %vm16066_vm0 }
 0xabc   : > { %4489 = vadd.xlane.f32.xlu1 %v4488_v56  ;;  %v4455_v25 = vsel %vm16079_vm7, %v4248_v6, 0.0  ;;  %v12423_v56 = vpop.permute.xlu1 %4301  ;;  %v4422_v6 = vsel %vm16066_vm0, %v12318_v32, 0.0  ;;  %vm16083_vm7 = vmmov %vm16066_vm0 }
 0xabd   : > { %4438 = vadd.xlane.f32.xlu2 %v4437_v20 }
 0xac2   : > { %v4276_v38 = vpop.permute.xlu0 %4275 }
 0xac3   : > { %v4497_v47 = vsel %vm16077_vm9, %v4276_v38, 0.0  ;;  %v4413_v38 = vsel %vm16080_vm8, %v12303_v2, 0.0  ;;  %vm16081_vm9 = vmmov %vm16066_vm0 }
 0xac4   : > { %4498 = vadd.xlane.f32.xlu1 %v4497_v47  ;;  %v4464_v47 = vsel %vm16082_vm1, %v12362_v44, 0.0  ;;  %vm16084_vm8 = vmmov %vm16066_vm0 }
 0xac5   : > { %4447 = vadd.xlane.f32.xlu2 %v4446_v9  ;;  %v12430_v9 = vpop.permute.xlu2 %4303  ;;  %vm16086_vm1 = vmmov %vm16066_vm0 }
 0xaca   : > { %v4282_v21 = vpop.permute.xlu0 %4281 }
 0xacb   : > { %v4506_v48 = vsel %vm16066_vm0, %v4282_v21, 0.0  ;;  %v12434_v21 = vpop.permute.xlu1 %4307 }
 0xacc   : > { %4507 = vadd.xlane.f32.xlu1 %v4506_v48 }
 0xacd   : > { %4456 = vadd.xlane.f32.xlu2 %v4455_v25  ;;  %v4473_v25 = vsel %vm16084_vm8, %v12372_v31, 0.0  ;;  %vm16088_vm8 = vmmov %vm16066_vm0 }
 0xad2   : > { %4414 = vadd.xlane.f32.xlu0 %v4413_v38  ;;  %v4288_v20 = vpop.permute.xlu0 %4287  ;;  %v12439_v38 = vpop.permute.xlu2 %4309 }
 0xad3   : > { %v4515_v42 = vsel %vm16081_vm9, %v4288_v20, 0.0  ;;  %vm16085_vm9 = vmmov %vm16066_vm0 }
 0xad4   : > { %4516 = vadd.xlane.f32.xlu1 %v4515_v42  ;;  %v4431_v44 = vsel %vm16085_vm9, %v12333_v15, 0.0  ;;  %v12444_v42 = vpop.permute.xlu1 %4313  ;;  %vm16089_vm9 = vmmov %vm16066_vm0 }
 0xad5   : > { %4465 = vadd.xlane.f32.xlu2 %v4464_v47  ;;  %v4482_v47 = vsel %vm16066_vm0, %v12379_v16, 0.0 }
 0xada   : > { %4423 = vadd.xlane.f32.xlu0 %v4422_v6  ;;  %v4294_v48 = vpop.permute.xlu0 %4293  ;;  %v12450_v6 = vpop.permute.xlu2 %4315 }
 0xadb   : > { %v4524_v2 = vsel %vm16083_vm7, %v4294_v48, 0.0  ;;  %vm16087_vm7 = vmmov %vm16066_vm0 }
 0xadc   : > { %4525 = vadd.xlane.f32.xlu1 %v4524_v2  ;;  %v4440_v31 = vsel %vm16087_vm7, %v12344_v13, 0.0  ;;  %v4491_v2 = vsel %vm16089_vm9, %v12386_v45, 0.0  ;;  %vm16091_vm7 = vmmov %vm16066_vm0 }
 0xadd   : > { %4474 = vadd.xlane.f32.xlu2 %v4473_v25  ;;  %v4320_v25 = vpop.permute.xlu1 %4319  ;;  %vm16093_vm9 = vmmov %vm16066_vm0 }
 0xae2   : > { %4432 = vadd.xlane.f32.xlu0 %v4431_v44  ;;  %v4300_v20 = vpop.permute.xlu0 %4299  ;;  %v12458_v13 = vpop.permute.xlu2 %4321 }
 0xae3   : > { %v4533_v32 = vsel %vm16086_vm1, %v4300_v20, 0.0  ;;  %vm16090_vm1 = vmmov %vm16066_vm0 }
 0xae4   : > { %4534 = vadd.xlane.f32.xlu1 %v4533_v32  ;;  %v4449_v44 = vsel %vm16090_vm1, %v12352_v5, 0.0  ;;  %v4500_v32 = vsel %vm16091_vm7, %v12395_v17, 0.0  ;;  %vm16094_vm1 = vmmov %vm16066_vm0 }
 0xae5   : > { %4483 = vadd.xlane.f32.xlu2 %v4482_v47  ;;  %v4326_v47 = vpop.permute.xlu1 %4325  ;;  %v4509_v5 = vsel %vm16094_vm1, %v12403_v0, 0.0  ;;  %vm16095_vm7 = vmmov %vm16066_vm0 }
 0xae6   : > { %vm16098_vm1 = vmmov %vm16066_vm0 }
 0xaea   : > { %v4306_v48 = vpop.permute.xlu0 %4305  ;;  %4441 = vadd.xlane.f32.xlu0 %v4440_v31 }
 0xaeb   : > { %v4542_v15 = vsel %vm16088_vm8, %v4306_v48, 0.0  ;;  %vm16092_vm8 = vmmov %vm16066_vm0 }
 0xaec   : > { %4543 = vadd.xlane.f32.xlu1 %v4542_v15  ;;  %v4458_v45 = vsel %vm16092_vm8, %v12358_v27, 0.0  ;;  %v12467_v15 = vpop.permute.xlu2 %4327  ;;  %vm16096_vm8 = vmmov %vm16066_vm0 }
 0xaed   : > { %4492 = vadd.xlane.f32.xlu2 %v4491_v2  ;;  %v4467_v2 = vsel %vm16066_vm0, %v12368_v61, 0.0  ;;  %v4332_v17 = vpop.permute.xlu1 %4331  ;;  %v4518_v27 = vsel %vm16096_vm8, %v12410_v18, 0.0  ;;  %vm16100_vm8 = vmmov %vm16066_vm0 }
 0xaf2   : > { %v4312_v16 = vpop.permute.xlu0 %4311  ;;  %4450 = vadd.xlane.f32.xlu0 %v4449_v44 }
 0xaf3   : > { %v4551_v20 = vsel %vm16066_vm0, %v4312_v16, 0.0 }
 0xaf4   : > { %4552 = vadd.xlane.f32.xlu1 %v4551_v20  ;;  %v12474_v20 = vpop.permute.xlu2 %4333 }
 0xaf5   : > { %4501 = vadd.xlane.f32.xlu2 %v4500_v32  ;;  %v4338_v61 = vpop.permute.xlu1 %4337 }
 0xafa   : > { %v4318_v31 = vpop.permute.xlu0 %4317  ;;  %4459 = vadd.xlane.f32.xlu0 %v4458_v45 }
 0xafb   : > { %v4560_v48 = vsel %vm16093_vm9, %v4318_v31, 0.0  ;;  %vm16097_vm9 = vmmov %vm16066_vm0  ;;  %v4527_v31 = vsel %vm16066_vm0, %v12417_v60, 0.0 }
 0xafc   : > { %4561 = vadd.xlane.f32.xlu1 %v4560_v48  ;;  %v4476_v0 = vsel %vm16097_vm9, %v12374_v12, 0.0  ;;  %v12483_v18 = vpop.permute.xlu2 %4339  ;;  %vm16102_vm9 = vmmov %vm16066_vm0 }
 0xafd   : > { %4510 = vadd.xlane.f32.xlu2 %v4509_v5  ;;  %v12486_v12 = vpop.xlane.xlu1 %4408 }
 0xafe   : > { %16101 = vst [vmem:[#allocation125_spill] sm:$0xff] %v12486_v12  ;;  %v4663_v33 = vperm.slane %v12486_v12, %v15932_v59 }
 0xb02   : > { %v4324_v44 = vpop.permute.xlu0 %4323  ;;  %4468 = vadd.xlane.f32.xlu0 %v4467_v2 }
 0xb03   : > { %v4569_v16 = vsel %vm16095_vm7, %v4324_v44, 0.0  ;;  %vm16099_vm7 = vmmov %vm16066_vm0  ;;  %v4536_v44 = vsel %vm16102_vm9, %v12423_v56, 0.0 }
 0xb04   : > { %4570 = vadd.xlane.f32.xlu1 %v4569_v16  ;;  %v4485_v48 = vsel %vm16099_vm7, %v12383_v28, 0.0  ;;  %vm16105_vm7 = vmmov %vm16066_vm0 }
 0xb05   : > { %4519 = vadd.xlane.f32.xlu2 %v4518_v27  ;;  %vm16108_vm9 = vmmov %vm16066_vm0 }
 0xb0a   : > { %v4330_v32 = vpop.permute.xlu0 %4329  ;;  %4477 = vadd.xlane.f32.xlu0 %v4476_v0  ;;  %v4545_v0 = vsel %vm16105_vm7, %v12434_v21, 0.0  ;;  %v4563_v21 = vsel %vm16066_vm0, %v4320_v25, 0.0  ;;  %vm16110_vm7 = vmmov %vm16066_vm0 }
 0xb0b   : > { %v4578_v45 = vsel %vm16098_vm1, %v4330_v32, 0.0  ;;  %vm16103_vm1 = vmmov %vm16066_vm0  ;;  %v12497_v32 = vpop.xlane.xlu1 %4417 }
 0xb0c   : > { %4579 = vadd.xlane.f32.xlu1 %v4578_v45  ;;  %v4494_v60 = vsel %vm16103_vm1, %v12391_v52, 0.0  ;;  %v4554_v52 = vsel %vm16108_vm9, %v12444_v42, 0.0  ;;  %vm16109_vm1 = vmmov %vm16066_vm0 }
 0xb0d   : > { %4528 = vadd.xlane.f32.xlu2 %v4527_v31  ;;  %vm16114_vm9 = vmmov %vm16066_vm0 }
 0xb12   : > { %v4336_v5 = vpop.permute.xlu0 %4335  ;;  %4486 = vadd.xlane.f32.xlu0 %v4485_v48  ;;  %v4512_v48 = vsel %vm16109_vm1, %v12407_v10, 0.0  ;;  %v4530_v10 = vsel %vm16114_vm9, %v12420_v1, 0.0  ;;  %vm16116_vm1 = vmmov %vm16066_vm0 }
 0xb13   : > { %v4587_v2 = vsel %vm16100_vm8, %v4336_v5, 0.0  ;;  %vm16106_vm8 = vmmov %vm16066_vm0  ;;  %v12505_v31 = vpop.xlane.xlu1 %4426  ;;  %v4581_v25 = vsel %vm16116_vm1, %v4332_v17, 0.0 }
 0xb14   : > { %4588 = vadd.xlane.f32.xlu1 %v4587_v2  ;;  %v4503_v56 = vsel %vm16106_vm8, %v12401_v40, 0.0  ;;  %v4521_v40 = vsel %vm16110_vm7, %v12413_v22, 0.0  ;;  %vm16112_vm8 = vmmov %vm16066_vm0  ;;  %v4539_v22 = vsel %vm16066_vm0, %v12430_v9, 0.0 }
 0xb15   : > { %4537 = vadd.xlane.f32.xlu2 %v4536_v44  ;;  %v4572_v42 = vsel %vm16112_vm8, %v4326_v47, 0.0  ;;  %vm16118_vm7 = vmmov %vm16066_vm0 }
 0xb16   : > { %v4590_v47 = vsel %vm16118_vm7, %v4338_v61, 0.0  ;;  %vm16120_vm8 = vmmov %vm16066_vm0 }
 0xb17   : > { %v4548_v1 = vsel %vm16120_vm8, %v12439_v38, 0.0  ;;  %vm16122_vm9 = vmmov %vm16066_vm0 }
 0xb18   : > { %v12492_v16 = vpop.xlane.xlu2 %4411  ;;  %v4557_v9 = vsel %vm16122_vm9, %v12450_v6, 0.0  ;;  %vm16125_vm1 = vmmov %vm16066_vm0  ;;  %vm16151_vm9 = vcmask 523712  }
 0xb19   : > { %16104 = vst [vmem:[#allocation154_spill] sm:$0xff] %v12492_v16  ;;  %v4566_v38 = vsel %vm16125_vm1, %v12458_v13, 0.0  ;;  %vm16129_vm7 = vmmov %vm16066_vm0  ;;  %v4664_v53 = vperm.slane %v12492_v16, %v15934_v39 }
 0xb1a   : > { %v4342_v27 = vpop.permute.xlu0 %4341  ;;  %4495 = vadd.xlane.f32.xlu0 %v4494_v60  ;;  %vm16133_vm8 = vmmov %vm16066_vm0 }
 0xb1b   : > { %v4596_v28 = vsel %vm16066_vm0, %v4342_v27, 0.0  ;;  %v12514_v2 = vpop.xlane.xlu1 %4435  ;;  %vm16159_vm1 = vmmov %vm16151_vm9 }
 0xb1c   : > { %4597 = vadd.xlane.f32.xlu1 %v4596_v28  ;;  %16111 = vst [vmem:[#allocation147_spill] sm:$0xff] %v12514_v2  ;;  %v4679_v16 = vperm.slane %v12514_v2, %v15934_v39 }
 0xb1d   : > { %4546 = vadd.xlane.f32.xlu2 %v4545_v0 }
 0xb20   : > { %v12501_v45 = vpop.xlane.xlu2 %4420 }
 0xb21   : > { %16107 = vst [vmem:[#allocation205_spill] sm:$0xff] %v12501_v45 }
 0xb22   : > { %4504 = vadd.xlane.f32.xlu0 %v4503_v56 }
 0xb23   : > { %v12521_v60 = vpop.xlane.xlu1 %4444 }
 0xb24   : > { %16115 = vst [vmem:[#allocation176_spill] sm:$0xff] %v12521_v60 }
 0xb25   : > { %4555 = vadd.xlane.f32.xlu2 %v4554_v52 }
 0xb28   : > { %v12510_v5 = vpop.xlane.xlu2 %4429 }
 0xb2a   : > { %4513 = vadd.xlane.f32.xlu0 %v4512_v48 }
 0xb2b   : > { %v12528_v28 = vpop.xlane.xlu1 %4453 }
 0xb2c   : > { %16117 = vst [vmem:[#allocation156_spill] sm:$0xff] %v12528_v28 }
 0xb2d   : > { %4564 = vadd.xlane.f32.xlu2 %v4563_v21 }
 0xb30   : > { %v12517_v44 = vpop.xlane.xlu2 %4438 }
 0xb31   : > { %16113 = vst [vmem:[#allocation201_spill] sm:$0xff] %v12517_v44 }
 0xb32   : > { %4522 = vadd.xlane.f32.xlu0 %v4521_v40 }
 0xb33   : > { %v12539_v52 = vpop.xlane.xlu1 %4462 }
 0xb34   : > { %16121 = vst [vmem:[#allocation184_spill] sm:$0xff] %v12539_v52 }
 0xb35   : > { %4573 = vadd.xlane.f32.xlu2 %v4572_v42 }
 0xb38   : > { %v12526_v27 = vpop.xlane.xlu2 %4447 }
 0xb3a   : > { %4531 = vadd.xlane.f32.xlu0 %v4530_v10  ;;  %v4575_v10 = vsel %vm16066_vm0, %v12467_v15, 0.0  ;;  %vm16160_vm0 = vmmov %vm16159_vm1 }
 0xb3b   : > { %v12547_v21 = vpop.xlane.xlu1 %4471 }
 0xb3c   : > { %16124 = vst [vmem:[#allocation128_spill] sm:$0xff] %v12547_v21 }
 0xb3d   : > { %4582 = vadd.xlane.f32.xlu2 %v4581_v25 }
 0xb40   : > { %v12535_v56 = vpop.xlane.xlu2 %4456 }
 0xb42   : > { %4540 = vadd.xlane.f32.xlu0 %v4539_v22  ;;  %v4584_v22 = vsel %vm16129_vm7, %v12474_v20, 0.0  ;;  %vm16162_vm7 = vmmov %vm16160_vm0 }
 0xb43   : > { %v12557_v25 = vpop.xlane.xlu1 %4480 }
 0xb44   : > { %16128 = vst [vmem:[#allocation160_spill] sm:$0xff] %v12557_v25 }
 0xb45   : > { %v12531_v0 = vpop.xlane.xlu0 %4414  ;;  %4591 = vadd.xlane.f32.xlu2 %v4590_v47 }
 0xb46   : > { %16119 = vst [vmem:[#allocation230_spill] sm:$0xff] %v12531_v0  ;;  %v4666_v24 = vperm.slane %v12531_v0, %v15940_v49  ;;  %v4668_v0 = vperm.slane %v12497_v32, %v15941_v11 }
 0xb48   : > { %v12545_v61 = vpop.xlane.xlu2 %4465 }
 0xb4a   : > { %4549 = vadd.xlane.f32.xlu0 %v4548_v1 }
 0xb4b   : > { %v12565_v13 = vpop.xlane.xlu1 %4489 }
 0xb4c   : > { %16131 = vst [vmem:[#allocation130_spill] sm:$0xff] %v12565_v13 }
 0xb4d   : > { %v12537_v17 = vpop.xlane.xlu0 %4423 }
 0xb50   : > { %v12553_v42 = vpop.xlane.xlu2 %4474 }
 0xb51   : > { %16127 = vst [vmem:[#allocation127_spill] sm:$0xff] %v12553_v42 }
 0xb52   : > { %4558 = vadd.xlane.f32.xlu0 %v4557_v9  ;;  %v4593_v9 = vsel %vm16133_vm8, %v12483_v18, 0.0  ;;  %vm16164_vm8 = vmmov %vm16160_vm0 }
 0xb55   : > { %v12543_v48 = vpop.xlane.xlu0 %4432 }
 0xb56   : > { %16123 = vst [vmem:[#allocation142_spill] sm:$0xff] %v12543_v48 }
 0xb58   : > { %v12563_v47 = vpop.xlane.xlu2 %4483 }
 0xb59   : > { %16130 = vst [vmem:[#allocation188_spill] sm:$0xff] %v12563_v47 }
 0xb5a   : > { %4567 = vadd.xlane.f32.xlu0 %v4566_v38 }
 0xb5d   : > { %v12551_v40 = vpop.xlane.xlu0 %4441 }
 0xb5e   : > { %16126 = vst [vmem:[#allocation199_spill] sm:$0xff] %v12551_v40  ;;  %v4683_v12 = vperm.slane %v12551_v40, %v15941_v11 }
 0xb60   : > { %v12571_v15 = vpop.xlane.xlu2 %4492 }
 0xb62   : > { %4576 = vadd.xlane.f32.xlu0 %v4575_v10  ;;  %v12575_v10 = vpop.xlane.xlu1 %4498 }
 0xb65   : > { %v12559_v6 = vpop.xlane.xlu0 %4450 }
 0xb68   : > { %v12579_v20 = vpop.xlane.xlu2 %4501 }
 0xb69   : > { %16135 = vst [vmem:[#allocation206_spill] sm:$0xff] %v12579_v20 }
 0xb6a   : > { %4585 = vadd.xlane.f32.xlu0 %v4584_v22  ;;  %v12581_v29 = vpop.xlane.xlu1 %4507 }
 0xb6b   : > { %16136 = vst [vmem:[#allocation180_spill] sm:$0xff] %v12581_v29 }
 0xb6d   : > { %v12567_v1 = vpop.xlane.xlu0 %4459 }
 0xb6e   : > { %16132 = vst [vmem:[#allocation167_spill] sm:$0xff] %v12567_v1 }
 0xb70   : > { %v12585_v41 = vpop.xlane.xlu2 %4510 }
 0xb72   : > { %4594 = vadd.xlane.f32.xlu0 %v4593_v9  ;;  %v12587_v19 = vpop.xlane.xlu1 %4516 }
 0xb73   : > { %16138 = vst [vmem:[#allocation155_spill] sm:$0xff] %v12587_v19 }
 0xb75   : > { %v12573_v38 = vpop.xlane.xlu0 %4468 }
 0xb78   : > { %v12591_v9 = vpop.xlane.xlu2 %4519 }
 0xb7a   : > { %v12593_v4 = vpop.xlane.xlu1 %4525 }
 0xb7d   : > { %v12577_v26 = vpop.xlane.xlu0 %4477 }
 0xb7e   : > { %16134 = vst [vmem:[#allocation159_spill] sm:$0xff] %v12577_v26 }
 0xb80   : > { %v12597_v54 = vpop.xlane.xlu2 %4528 }
 0xb81   : > { %16140 = vst [vmem:[#allocation165_spill] sm:$0xff] %v12597_v54 }
 0xb82   : > { %v12601_v34 = vpop.xlane.xlu1 %4534 }
 0xb83   : > { %16141 = vst [vmem:[#allocation192_spill] sm:$0xff] %v12601_v34 }
 0xb85   : > { %v12583_v22 = vpop.xlane.xlu0 %4486 }
 0xb86   : > { %16137 = vst [vmem:[#allocation181_spill] sm:$0xff] %v12583_v22 }
 0xb88   : > { %v12605_v30 = vpop.xlane.xlu2 %4537 }
 0xb8a   : > { %v12607_v63 = vpop.xlane.xlu1 %4543 }
 0xb8d   : > { %v12589_v18 = vpop.xlane.xlu0 %4495 }
 0xb90   : > { %v12611_v43 = vpop.xlane.xlu2 %4546 }
 0xb91   : > { %16144 = vst [vmem:[#allocation182_spill] sm:$0xff] %v12611_v43  ;;  %v4678_v43 = vperm.slane %v12543_v48, %v15932_v59  ;;  %v4674_v48 = vperm.slane %v12505_v31, %v10101_v8 }
 0xb92   : > { %v12613_v51 = vpop.xlane.xlu1 %4552 }
 0xb93   : > { %16145 = vst [vmem:[#allocation169_spill] sm:$0xff] %v12613_v51 }
 0xb95   : > { %v12595_v62 = vpop.xlane.xlu0 %4504 }
 0xb96   : > { %16139 = vst [vmem:[#allocation121_spill] sm:$0xff] %v12595_v62 }
 0xb98   : > { %v12617_v50 = vpop.xlane.xlu2 %4555 }
 0xb99   : > { %16146 = vst [vmem:[#allocation232_spill] sm:$0xff] %v12617_v50 }
 0xb9a   : > { %v12619_v35 = vpop.xlane.xlu1 %4561 }
 0xb9d   : > { %v12599_v7 = vpop.xlane.xlu0 %4513 }
 0xba0   : > { %v12627_v3 = vpop.xlane.xlu2 %4564 }
 0xba2   : > { %v12635_v20 = vpop.xlane.xlu1 %4570 }
 0xba3   : > { %16149 = vst [vmem:[#allocation210_spill] sm:$0xff] %v12635_v20  ;;  %v4681_v20 = vperm.slane %v12517_v44, %v15940_v49  ;;  %v4696_v44 = vperm.slane %v12539_v52, %v15940_v49 }
 0xba5   : > { %v12603_v55 = vpop.xlane.xlu0 %4522 }
 0xba6   : > { %16142 = vst [vmem:[#allocation214_spill] sm:$0xff] %v12603_v55  ;;  %v4680_v55 = vsel %vm1574_vm10, %v4679_v16, %v4678_v43  ;;  %v4670_v43 = vperm.slane %v12501_v45, %v15714_v58  ;;  %v4694_v16 = vperm.slane %v12567_v1, %v15934_v39  ;;  %v4693_v45 = vperm.slane %v12535_v56, %v15932_v59 }
 0xba7   : > { %v4682_v40 = vsel %vm1578_vm11, %v4681_v20, %v4680_v55  ;;  %v4687_v20 = vperm.slane %v12526_v27, %v10055_v36  ;;  %v4698_v55 = vperm.slane %v12545_v61, %v15941_v11 }
 0xba8   : > { %v4684_v52 = vsel %vm1582_vm12, %v4683_v12, %v4682_v40  ;;  %v12676_v2 = vpop.xlane.xlu2 %4573  ;;  %v4709_v12 = vperm.slane %v12563_v47, %v15934_v39  ;;  %v4695_v40 = vsel %vm1574_vm10, %v4694_v16, %v4693_v45  ;;  %v4704_v45 = vperm.slane %v12553_v42, %v10101_v8 }
 0xba9   : > { %v4689_v16 = vperm.slane %v12559_v6, %v10101_v8  ;;  %v4738_v47 = vperm.slane %v12597_v54, %v15932_v59  ;;  %v4754_v42 = vperm.slane %v12617_v50, %v15934_v39 }
 0xbad   : > { %v12609_v37 = vpop.xlane.xlu0 %4531 }
 0xbae   : > { %16143 = vst [vmem:[#allocation138_spill] sm:$0xff] %v12609_v37 }
 0xbb5   : > { %v12615_v14 = vpop.xlane.xlu0 %4540 }
 0xbbd   : > { %v12621_v23 = vpop.xlane.xlu0 %4549 }
 0xbbe   : > { %16147 = vst [vmem:[#allocation175_spill] sm:$0xff] %v12621_v23  ;;  %v4665_v23 = vsel %vm1574_vm10, %v4664_v53, %v4663_v33  ;;  %v4672_v33 = vperm.slane %v12537_v17, %v10055_v36 }
 0xbbf   : > { %v4667_v26 = vsel %vm1578_vm11, %v4666_v24, %v4665_v23  ;;  %v4685_v24 = vperm.slane %v12521_v60, %v15714_v58  ;;  %v4691_v23 = vperm.slane %v12528_v28, %v10106_v46 }
 0xbc0   : > { %v4669_v53 = vsel %vm1582_vm12, %v4668_v0, %v4667_v26  ;;  %v4702_v26 = vperm.slane %v12547_v21, %v10055_v36  ;;  %v4708_v0 = vperm.slane %v12557_v25, %v15932_v59  ;;  %v4713_v21 = vperm.slane %v12565_v13, %v15941_v11 }
 0xbc1   : > { %v4671_v1 = vsel %vm1586_vm13, %v4670_v43, %v4669_v53  ;;  %v4724_v25 = vperm.slane %v12581_v29, %v15934_v39  ;;  %v4730_v53 = vperm.slane %v12587_v19, %v15714_v58  ;;  %v12692_v43 = vpop.xlane.xlu1 %4579  ;;  %v4686_v13 = vsel %vm1586_vm13, %v4685_v24, %v4684_v52 }
 0xbc2   : > { %v4673_v28 = vsel %vm1590_vm14, %v4672_v33, %v4671_v1  ;;  %v4711_v1 = vperm.slane %v12583_v22, %v15940_v49  ;;  %v4723_v33 = vperm.slane %v12595_v62, %v15932_v59  ;;  %v4741_v52 = vperm.slane %v12601_v34, %v15940_v49 }
 0xbc3   : > { %v12702_v19 = vsel %vm1594_vm15, %v4674_v48, %v4673_v28  ;;  %v4697_v24 = vsel %vm1578_vm11, %v4696_v44, %v4695_v40  ;;  %v4700_v62 = vperm.slane %v12573_v38, %v15714_v58  ;;  %v4739_v28 = vperm.slane %v12609_v37, %v15934_v39 }
 0xbc4   : > { %v4710_v48 = vsel %vm1574_vm10, %v4709_v12, %v4708_v0  ;;  %v4688_v29 = vsel %vm1590_vm14, %v4687_v20, %v4686_v13  ;;  %v4725_v44 = vsel %vm1574_vm10, %v4724_v25, %v4723_v33  ;;  %v4728_v40 = vperm.slane %v12599_v7, %v15941_v11 }
 0xbc5   : > { %v12631_v57 = vpop.xlane.xlu0 %4558  ;;  %v4712_v34 = vsel %vm1578_vm11, %v4711_v1, %v4710_v48  ;;  %v4690_v13 = vsel %vm1594_vm15, %v4689_v16, %v4688_v29  ;;  %v4753_v0 = vperm.slane %v12613_v51, %v15932_v59  ;;  %v4726_v20 = vperm.slane %v12585_v41, %v15940_v49 }
 0xbc6   : > { %16148 = vst [vmem:[#allocation221_spill] sm:$0xff] %v12631_v57  ;;  %v4756_v37 = vperm.slane %v12631_v57, %v15940_v49  ;;  %v4699_v12 = vsel %vm1582_vm12, %v4698_v55, %v4697_v24  ;;  %v4747_v25 = vperm.slane %v12607_v63, %v10055_v36  ;;  %v4715_v1 = vperm.slane %v12571_v15, %v15714_v58  ;;  %v12748_v55 = vpop.xlane.xlu2 %4582 }
 0xbc7   : > { %v4701_v33 = vsel %vm1586_vm13, %v4700_v62, %v4699_v12  ;;  %v4740_v48 = vsel %vm1574_vm10, %v4739_v28, %v4738_v47  ;;  %v4714_v29 = vsel %vm1582_vm12, %v4713_v21, %v4712_v34  ;;  %v4717_v16 = vperm.slane %v12589_v18, %v10055_v36  ;;  %16150 = vst [vmem:[#allocation231_spill] sm:$0xff] %v12748_v55 }
 0xbc8   : > { %v4755_v50 = vsel %vm1574_vm10, %v4754_v42, %v4753_v0  ;;  %v4727_v57 = vsel %vm1578_vm11, %v4726_v20, %v4725_v44  ;;  %v4692_v24 = vsel %vm16151_vm9, %v4691_v23, %v4690_v13  ;;  %v4758_v34 = vperm.slane %v12619_v35, %v15941_v11  ;;  %v16152_v0 = vld [vmem:[#allocation214_spill] sm:$0xff]  ;;  %vm16165_vm9 = vmmov %vm16160_vm0 }
 0xbc9   : > { %v4729_v51 = vsel %vm1582_vm12, %v4728_v40, %v4727_v57  ;;  %v4757_v54 = vsel %vm1578_vm11, %v4756_v37, %v4755_v50  ;;  %v4703_v21 = vsel %vm1590_vm14, %v4702_v26, %v4701_v33  ;;  %v12758_v47 = vpop.xlane.xlu1 %4588  ;;  %v4742_v42 = vsel %vm1578_vm11, %v4741_v52, %v4740_v48  ;;  %v16153_v48 = vld [vmem:[#allocation159_spill] sm:$0xff] }
 0xbca   : > { %v4745_v28 = vperm.slane %v12615_v14, %v15714_v58  ;;  %v4732_v57 = vperm.slane %v12591_v9, %v10055_v36  ;;  %v4769_v37 = vperm.slane %v12692_v43, %v15934_v39  ;;  %v4743_v50 = vperm.slane %v12605_v30, %v15941_v11 }
 0xbcb   : > { %v4716_v23 = vsel %vm1586_vm13, %v4715_v1, %v4714_v29  ;;  %v4731_v44 = vsel %vm1586_vm13, %v4730_v53, %v4729_v51  ;;  %v4759_v52 = vsel %vm1582_vm12, %v4758_v34, %v4757_v54  ;;  %v4760_v13 = vperm.slane %v12627_v3, %v15714_v58 }
 0xbcc   : > { %v4718_v26 = vsel %vm1590_vm14, %v4717_v16, %v4716_v23  ;;  %v4734_v20 = vperm.slane %v16152_v0, %v10101_v8  ;;  %v4744_v12 = vsel %vm1582_vm12, %v4743_v50, %v4742_v42  ;;  %v4706_v51 = vperm.slane %v16153_v48, %v10106_v46  ;;  %v16154_v16 = vld [vmem:[#allocation206_spill] sm:$0xff] }
 0xbcd   : > { %v12668_v60 = vpop.xlane.xlu0 %4567  ;;  %v4771_v54 = vperm.slane %v12748_v55, %v15940_v49  ;;  %v4746_v53 = vsel %vm1586_vm13, %v4745_v28, %v4744_v12  ;;  %v4721_v34 = vperm.slane %v16154_v16, %v10106_v46  ;;  %v16155_v42 = vld [vmem:[#allocation210_spill] sm:$0xff]  ;;  %v16156_v23 = vperm.slane %v12575_v10, %v10101_v8  ;;  %v16157_v55 = vld [vmem:[#allocation175_spill] sm:$0xff] }
 0xbce   : > { %v4762_v40 = vperm.slane %v12668_v60, %v10055_v36  ;;  %v4764_v50 = vperm.slane %v16155_v42, %v10101_v8  ;;  %v4733_v28 = vsel %vm1590_vm14, %v4732_v57, %v4731_v44  ;;  %v4748_v39 = vsel %vm1590_vm14, %v4747_v25, %v4746_v53  ;;  %v12818_v25 = vpop.xlane.xlu2 %4591 }
 0xbcf   : > { %v4720_v49 = vsel %vm1594_vm15, %v16156_v23, %v4718_v26  ;;  %v4775_v44 = vperm.slane %v12758_v47, %v15714_v58  ;;  %v4766_v53 = vperm.slane %v12676_v2, %v10106_v46 }
 0xbd5   : > { %v12729_v22 = vpop.xlane.xlu0 %4576 }
 0xbd6   : > { %v4768_v62 = vperm.slane %v12729_v22, %v15932_v59  ;;  %v4735_v59 = vsel %vm1594_vm15, %v4734_v20, %v4733_v28 }
 0xbd8   : > { %v4770_v33 = vsel %vm1574_vm10, %v4769_v37, %v4768_v62  ;;  %v4705_v62 = vsel %vm1594_vm15, %v4704_v45, %v4703_v21  ;;  %v4761_v37 = vsel %vm1586_vm13, %v4760_v13, %v4759_v52  ;;  %v4751_v45 = vperm.slane %v16157_v55, %v10106_v46 }
 0xbd9   : > { %v4763_v12 = vsel %vm1590_vm14, %v4762_v40, %v4761_v37  ;;  %v16158_v52 = vperm.slane %v12510_v5, %v10106_v46  ;;  %v4707_v57 = vsel %vm16160_vm0, %v4706_v51, %v4705_v62  ;;  %v16161_v40 = vld [vmem:[#allocation182_spill] sm:$0xff] }
 0xbda   : > { %v4749_v13 = vperm.slane %v16161_v40, %v10101_v8 }
 0xbdb   : > { %v4677_v26 = vsel %vm16159_vm1, %v16158_v52, %v12702_v19  ;;  %v16163_v19 = vperm.slane %v12593_v4, %v10106_v46  ;;  %vm16166_vm1 = vmmov %vm16160_vm0 }
 0xbdc   : > { %v4783_v20 = vsel %vm618_vm2, %v4692_v24, %v4677_v26 }
 0xbdd   : > { %v12781_v1 = vpop.xlane.xlu0 %4585  ;;  %v4737_v51 = vsel %vm16164_vm8, %v16163_v19, %v4735_v59  ;;  %v4784_v24 = vsel %vm621_vm3, %v4707_v57, %v4783_v20  ;;  %vm16168_vm8 = vcmask 1047559   ;;  %v16170_v20 = vld [vmem:[#allocation163_spill] sm:$0xff]  ;;  %v16172_v19 = vld [vmem:[#allocation230_spill] sm:$0xff] }
 0xbde   : > { %v4773_v29 = vperm.slane %v12781_v1, %v15941_v11  ;;  %v4772_v11 = vsel %vm1578_vm11, %v4771_v54, %v4770_v33  ;;  %v4765_v33 = vsel %vm1594_vm15, %v4764_v50, %v4763_v12  ;;  %v12823_v54 = vpop.xlane.xlu1 %4597 }
 0xbdf   : > { %v4767_v59 = vsel %vm16166_vm1, %v4766_v53, %v4765_v33  ;;  %v16173_v53 = vld [vmem:[#allocation154_spill] sm:$0xff]  ;;  %vm5525_vm1 = vcmask 917248  }
 0xbe0   : > { %v4774_v21 = vsel %vm1582_vm12, %v4773_v29, %v4772_v11  ;;  %v4722_v11 = vsel %vm16162_vm7, %v4721_v34, %v4720_v49  ;;  %v4750_v29 = vsel %vm1594_vm15, %v4749_v13, %v4748_v39  ;;  %v4777_v49 = vperm.slane %v12818_v25, %v10055_v36 }
 0xbe1   : > { %v4776_v62 = vsel %vm1586_vm13, %v4775_v44, %v4774_v21  ;;  %v4752_v34 = vsel %vm16165_vm9, %v4751_v45, %v4750_v29  ;;  %v4785_v23 = vsel %vm624_vm4, %v4722_v11, %v4784_v24  ;;  %v4781_v39 = vperm.slane %v12823_v54, %v10106_v46 }
 0xbe2   : > { %v4778_v28 = vsel %vm1590_vm14, %v4777_v49, %v4776_v62  ;;  %v4786_v12 = vsel %vm627_vm5, %v4737_v51, %v4785_v23  ;;  %vm16167_vm7 = vcmask 1046534   ;;  %vm16169_vm9 = vcmask 523264   ;;  %v16174_v62 = vld [vmem:[#allocation125_spill] sm:$0xff] }
 0xbe3   : > { %v4787_v45 = vsel %vm630_vm6, %v4752_v34, %v4786_v12 }
 0xbe4   : > { %v4788_v26 = vsel %vm16167_vm7, %v4767_v59, %v4787_v45  ;;  %vm16250_vm7 = vmmov %vm16160_vm0 }
 0xbe5   : > { %v12837_v50 = vpop.xlane.xlu0 %4594 }
 0xbe6   : > { %v4779_v37 = vperm.slane %v12837_v50, %v10101_v8 }
 0xbe8   : > { %v4780_v21 = vsel %vm1594_vm15, %v4779_v37, %v4778_v28 }
 0xbe9   : > { %v4782_v52 = vsel %vm16160_vm0, %v4781_v39, %v4780_v21 }
 0xbea   : > { %v4789_v57 = vsel %vm16168_vm8, %v4782_v52, %v4788_v26  ;;  %vm16258_vm8 = vmmov %vm16160_vm0 }
 0xbeb   : > { %v4791_v44 = vsel %vm16169_vm9, %v4789_v57, -inf  ;;  %vm16284_vm9 = vmmov %vm16160_vm0 }
 0xbec   : > { %4792 = vmax.xlane.f32.xlu2 %v4791_v44 }
 0xc5f   : > { %v4793_v13 = vpop.xlane.xlu2 %4792 }
 0xc60   : > { %v12854_v11 = vmax.f32 %v4793_v13, %v16170_v20  ;;  %v16177_v13 = vld [vmem:[#allocation205_spill] sm:$0xff] }
 0xc62   : > { %16171 = vst [vmem:[#allocation229_spill] sm:$0xff] %v12854_v11  ;;  %v4799_v33 = vperm.slane %v12854_v11, 0  ;;  %v12864_v28 = vperm.slane %v12854_v11, 1 }
 0xc64   : > { %v4817_v51 = vsub.f32 %v16172_v19, %v4799_v33  ;;  %v4816_v29 = vsub.f32 %v16173_v53, %v4799_v33  ;;  %v4815_v24 = vsub.f32 %v16174_v62, %v4799_v33  ;;  %v4821_v59 = vsub.f32 %v12505_v31, %v4799_v33  ;;  %v16175_v31 = vld [vmem:[#allocation147_spill] sm:$0xff] }
 0xc65   : > { %v4820_v23 = vsub.f32 %v12537_v17, %v4799_v33  ;;  %v4818_v39 = vsub.f32 %v12497_v32, %v4799_v33  ;;  %v4824_v44 = vsub.f32 %v16175_v31, %v12864_v28  ;;  %v16176_v17 = vld [vmem:[#allocation142_spill] sm:$0xff]  ;;  %v4819_v19 = vsub.f32 %v16177_v13, %v4799_v33  ;;  %v16180_v31 = vld [vmem:[#allocation156_spill] sm:$0xff] }
 0xc66   : > { %v4883_v49 = vmul.f32 1.442695, %v4817_v51  ;;  %v4881_v34 = vmul.f32 1.442695, %v4816_v29  ;;  %v4879_v37 = vmul.f32 1.442695, %v4815_v24  ;;  %v4823_v32 = vsub.f32 %v16176_v17, %v12864_v28 }
 0xc67   : > { %v4891_v12 = vmul.f32 1.442695, %v4821_v59  ;;  %v4889_v21 = vmul.f32 1.442695, %v4820_v23  ;;  %v4885_v52 = vmul.f32 1.442695, %v4818_v39  ;;  %v4822_v39 = vsub.f32 %v12510_v5, %v4799_v33 }
 0xc68   : > { %7843 = vpow2.f32 %v4883_v49  ;;  %v4897_v51 = vmul.f32 1.442695, %v4824_v44  ;;  %v4895_v53 = vmul.f32 1.442695, %v4823_v32  ;;  %v4887_v62 = vmul.f32 1.442695, %v4819_v19 }
 0xc69   : > { %7845 = vpow2.f32 %v4881_v34  ;;  %v16178_v34 = vld [vmem:[#allocation176_spill] sm:$0xff]  ;;  %v16179_v59 = vld [vmem:[#allocation199_spill] sm:$0xff]  ;;  %v4830_v44 = vsub.f32 %v16180_v31, %v12864_v28  ;;  %v4829_v17 = vsub.f32 %v12559_v6, %v12864_v28  ;;  %v16181_v5 = vld [vmem:[#allocation201_spill] sm:$0xff]  ;;  %v12883_v32 = vperm.slane %v12854_v11, 2 }
 0xc6a   : > { %7847 = vpow2.f32 %v4879_v37  ;;  %v4827_v37 = vsub.f32 %v16178_v34, %v12864_v28  ;;  %v4826_v23 = vsub.f32 %v16179_v59, %v12864_v28  ;;  %v4825_v33 = vsub.f32 %v16181_v5, %v12864_v28  ;;  %v16183_v6 = vld [vmem:[#allocation167_spill] sm:$0xff] }
 0xc6b   : > { %7849 = vpow2.f32 %v4891_v12  ;;  %v4909_v13 = vmul.f32 1.442695, %v4830_v44  ;;  %v4907_v19 = vmul.f32 1.442695, %v4829_v17  ;;  %v4832_v34 = vsub.f32 %v16183_v6, %v12883_v32 }
 0xc6c   : > { %7851 = vpow2.f32 %v4889_v21  ;;  %v4903_v12 = vmul.f32 1.442695, %v4827_v37  ;;  %v4901_v21 = vmul.f32 1.442695, %v4826_v23  ;;  %v4828_v37 = vsub.f32 %v12526_v27, %v12864_v28 }
 0xc6d   : > { %7853 = vpow2.f32 %v4885_v52  ;;  %v4893_v52 = vmul.f32 1.442695, %v4822_v39  ;;  %v4913_v23 = vmul.f32 1.442695, %v4832_v34  ;;  %v4831_v27 = vsub.f32 %v12535_v56, %v12883_v32  ;;  %v16186_v34 = vld [vmem:[#allocation130_spill] sm:$0xff] }
 0xc6e   : > { %v7844_v45 = vpop.eup %7843  ;;  %7855 = vpow2.f32 %v4897_v51  ;;  %v12898_v28 = vperm.slane %v12854_v11, 3  ;;  %v4838_v56 = vsub.f32 %v16153_v48, %v12883_v32  ;;  %v16187_v48 = vld [vmem:[#allocation181_spill] sm:$0xff] }
 0xc6f   : > { %v7846_v26 = vpop.eup %7845  ;;  %5078 = vperm.xlu2 %7573, %v7844_v45   ;;  %7857 = vpow2.f32 %v4895_v53  ;;  %v4899_v53 = vmul.f32 1.442695, %v4825_v33  ;;  %v4911_v5 = vmul.f32 1.442695, %v4831_v27 }
 0xc70   : > { %v7848_v57 = vpop.eup %7847  ;;  %5075 = vperm.xlu1 %7572, %v7846_v26   ;;  %7859 = vpow2.f32 %v4887_v62  ;;  %v4844_v27 = vsub.f32 %v12589_v18, %v12898_v28  ;;  %v16191_v18 = vld [vmem:[#allocation121_spill] sm:$0xff] }
 0xc71   : > { %5072 = vperm.xlu0 %7574, %v7848_v57   ;;  %v7850_v29 = vpop.eup %7849  ;;  %7861 = vpow2.f32 %v4903_v12  ;;  %v4905_v12 = vmul.f32 1.442695, %v4828_v37  ;;  %v4842_v37 = vsub.f32 %v16186_v34, %v12898_v28 }
 0xc72   : > { %v7852_v24 = vpop.eup %7851  ;;  %7863 = vpow2.f32 %v4901_v21 }
 0xc73   : > { %v7854_v49 = vpop.eup %7853  ;;  %7865 = vpow2.f32 %v4893_v52  ;;  %v16184_v52 = vld [vmem:[#allocation128_spill] sm:$0xff] }
 0xc74   : > { %v7856_v45 = vpop.eup %7855  ;;  %7867 = vpow2.f32 %v4909_v13 }
 0xc75   : > { %v7858_v26 = vpop.eup %7857  ;;  %7869 = vpow2.f32 %v4907_v19  ;;  %v16185_v19 = vld [vmem:[#allocation160_spill] sm:$0xff] }
 0xc76   : > { %v7860_v57 = vpop.eup %7859  ;;  %7871 = vpow2.f32 %v4899_v53 }
 0xc77   : > { %5090 = vperm.xlu2 %7573, %v7850_v29   ;;  %v7862_v51 = vpop.eup %7861 }
 0xc78   : > { %5087 = vperm.xlu1 %7572, %v7852_v24   ;;  %v7864_v29 = vpop.eup %7863  ;;  %v16182_v24 = vld [vmem:[#allocation184_spill] sm:$0xff] }
 0xc79   : > { %5081 = vperm.xlu0 %7574, %v7854_v49   ;;  %v7866_v62 = vpop.eup %7865  ;;  %v4833_v49 = vsub.f32 %v16182_v24, %v12883_v32 }
 0xc7a   : > { %v7868_v39 = vpop.eup %7867 }
 0xc7b   : > { %v4915_v59 = vmul.f32 1.442695, %v4833_v49  ;;  %v7870_v21 = vpop.eup %7869 }
 0xc7d   : > { %7873 = vpow2.f32 %v4915_v59  ;;  %v4841_v59 = vsub.f32 %v16187_v48, %v12898_v28 }
 0xc7e   : > { %7875 = vpow2.f32 %v4913_v23 }
 0xc7f   : > { %5099 = vperm.xlu2 %7573, %v7856_v45   ;;  %v7872_v45 = vpop.eup %7871  ;;  %7877 = vpow2.f32 %v4905_v12  ;;  %v4931_v12 = vmul.f32 1.442695, %v4841_v59 }
 0xc80   : > { %5096 = vperm.xlu1 %7572, %v7858_v26   ;;  %v4836_v26 = vsub.f32 %v16184_v52, %v12883_v32 }
 0xc81   : > { %5084 = vperm.xlu0 %7574, %v7860_v57   ;;  %v4835_v57 = vsub.f32 %v12573_v38, %v12883_v32  ;;  %v4834_v38 = vsub.f32 %v12545_v61, %v12883_v32  ;;  %v16188_v61 = vld [vmem:[#allocation127_spill] sm:$0xff] }
 0xc82   : > { %v4921_v31 = vmul.f32 1.442695, %v4836_v26  ;;  %v4837_v23 = vsub.f32 %v16188_v61, %v12883_v32  ;;  %v16189_v32 = vld [vmem:[#allocation188_spill] sm:$0xff] }
 0xc83   : > { %v4919_v44 = vmul.f32 1.442695, %v4835_v57  ;;  %v7874_v17 = vpop.eup %7873  ;;  %v4917_v24 = vmul.f32 1.442695, %v4834_v38  ;;  %v4845_v57 = vsub.f32 %v12575_v10, %v12898_v28  ;;  %v16190_v10 = vld [vmem:[#allocation180_spill] sm:$0xff] }
 0xc84   : > { %v7876_v33 = vpop.eup %7875  ;;  %7879 = vpow2.f32 %v4921_v31  ;;  %v4840_v31 = vsub.f32 %v16189_v32, %v12898_v28 }
 0xc85   : > { %v7878_v13 = vpop.eup %7877  ;;  %7881 = vpow2.f32 %v4919_v44  ;;  %v12919_v44 = vperm.slane %v12854_v11, 4 }
 0xc86   : > { %7883 = vpow2.f32 %v4911_v5  ;;  %v4937_v5 = vmul.f32 1.442695, %v4844_v27 }
 0xc87   : > { %5108 = vperm.xlu2 %7573, %v7862_v51   ;;  %v4839_v51 = vsub.f32 %v16185_v19, %v12898_v28  ;;  %v4847_v38 = vsub.f32 %v16191_v18, %v12919_v44  ;;  %v4850_v59 = vsub.f32 %v12599_v7, %v12919_v44  ;;  %v4853_v7 = vsub.f32 %v16152_v0, %v12919_v44 }
 0xc88   : > { %5105 = vperm.xlu1 %7572, %v7864_v29   ;;  %v4925_v29 = vmul.f32 1.442695, %v4838_v56  ;;  %v4848_v56 = vsub.f32 %v16190_v10, %v12919_v44 }
 0xc89   : > { %5093 = vperm.xlu0 %7574, %v7866_v62   ;;  %v4927_v53 = vmul.f32 1.442695, %v4839_v51 }
 0xc8a   : > { %v7880_v62 = vpop.eup %7879 }
 0xc8b   : > { %v7882_v49 = vpop.eup %7881  ;;  %7885 = vpow2.f32 %v4927_v53  ;;  %v4843_v53 = vsub.f32 %v12571_v15, %v12898_v28  ;;  %v4846_v15 = vsub.f32 %v16154_v16, %v12898_v28  ;;  %v4849_v16 = vsub.f32 %v12585_v41, %v12919_v44  ;;  %v16194_v41 = vld [vmem:[#allocation138_spill] sm:$0xff] }
 0xc8c   : > { %v7884_v6 = vpop.eup %7883  ;;  %7887 = vpow2.f32 %v4925_v29  ;;  %v4945_v29 = vmul.f32 1.442695, %v4848_v56  ;;  %v12940_v28 = vperm.slane %v12854_v11, 5 }
 0xc8d   : > { %7889 = vpow2.f32 %v4917_v24  ;;  %v4947_v32 = vmul.f32 1.442695, %v4849_v16 }
 0xc8f   : > { %5117 = vperm.xlu2 %7573, %v7868_v39   ;;  %v4933_v39 = vmul.f32 1.442695, %v4842_v37  ;;  %v16192_v37 = vld [vmem:[#allocation155_spill] sm:$0xff] }
 0xc90   : > { %5114 = vperm.xlu1 %7572, %v7870_v21   ;;  %v4851_v48 = vsub.f32 %v16192_v37, %v12919_v44 }
 0xc91   : > { %5102 = vperm.xlu0 %7574, %v7872_v45   ;;  %v7886_v21 = vpop.eup %7885  ;;  %v4923_v45 = vmul.f32 1.442695, %v4837_v23  ;;  %7891 = vpow2.f32 %v4933_v39  ;;  %v4949_v23 = vmul.f32 1.442695, %v4850_v59  ;;  %v16196_v59 = vld [vmem:[#allocation169_spill] sm:$0xff] }
 0xc92   : > { %v7888_v52 = vpop.eup %7887  ;;  %7893 = vpow2.f32 %v4931_v12  ;;  %v4951_v61 = vmul.f32 1.442695, %v4851_v48  ;;  %v4941_v12 = vmul.f32 1.442695, %v4846_v15 }
 0xc93   : > { %v7890_v26 = vpop.eup %7889  ;;  %7895 = vpow2.f32 %v4923_v45 }
 0xc97   : > { %5126 = vperm.xlu2 %7573, %v7874_v17   ;;  %v4939_v17 = vmul.f32 1.442695, %v4845_v57  ;;  %v4955_v57 = vmul.f32 1.442695, %v4853_v7 }
 0xc98   : > { %5123 = vperm.xlu1 %7572, %v7876_v33   ;;  %v7892_v33 = vpop.eup %7891 }
 0xc99   : > { %5111 = vperm.xlu0 %7574, %v7878_v13   ;;  %v4929_v13 = vmul.f32 1.442695, %v4840_v31  ;;  %v7894_v19 = vpop.eup %7893  ;;  %7897 = vpow2.f32 %v4939_v17 }
 0xc9a   : > { %v7896_v51 = vpop.eup %7895  ;;  %7899 = vpow2.f32 %v4937_v5 }
 0xc9b   : > { %7901 = vpow2.f32 %v4929_v13  ;;  %v4852_v13 = vsub.f32 %v12591_v9, %v12919_v44  ;;  %v16195_v9 = vld [vmem:[#allocation165_spill] sm:$0xff] }
 0xc9c   : > { %7903 = vpow2.f32 %v4945_v29 }
 0xc9d   : > { %v4953_v56 = vmul.f32 1.442695, %v4852_v13 }
 0xc9f   : > { %5135 = vperm.xlu2 %7573, %v7880_v62   ;;  %v4943_v62 = vmul.f32 1.442695, %v4847_v38  ;;  %v7898_v24 = vpop.eup %7897 }
 0xca0   : > { %5132 = vperm.xlu1 %7572, %v7882_v49   ;;  %v4935_v49 = vmul.f32 1.442695, %v4843_v53  ;;  %v4860_v53 = vsub.f32 %v12607_v63, %v12940_v28 }
 0xca1   : > { %5120 = vperm.xlu0 %7574, %v7884_v6   ;;  %v7900_v6 = vpop.eup %7899  ;;  %7905 = vpow2.f32 %v4943_v62  ;;  %v4859_v62 = vsub.f32 %v12615_v14, %v12940_v28 }
 0xca2   : > { %v7902_v34 = vpop.eup %7901  ;;  %7907 = vpow2.f32 %v4935_v49  ;;  %v4969_v49 = vmul.f32 1.442695, %v4860_v53 }
 0xca3   : > { %v7904_v39 = vpop.eup %7903  ;;  %7909 = vpow2.f32 %v4951_v61  ;;  %v4862_v61 = vsub.f32 %v16157_v55, %v12940_v28  ;;  %v16197_v55 = vld [vmem:[#allocation221_spill] sm:$0xff] }
 0xca4   : > { %7911 = vpow2.f32 %v4949_v23  ;;  %v4858_v23 = vsub.f32 %v12605_v30, %v12940_v28 }
 0xca5   : > { %7913 = vpow2.f32 %v4941_v12  ;;  %v4973_v12 = vmul.f32 1.442695, %v4862_v61 }
 0xca7   : > { %5144 = vperm.xlu2 %7573, %v7886_v21   ;;  %v7906_v21 = vpop.eup %7905 }
 0xca8   : > { %5141 = vperm.xlu1 %7572, %v7888_v52   ;;  %v7908_v45 = vpop.eup %7907  ;;  %v4854_v52 = vsub.f32 %v12593_v4, %v12919_v44  ;;  %v16193_v4 = vld [vmem:[#allocation192_spill] sm:$0xff]  ;;  %v4855_v44 = vsub.f32 %v16195_v9, %v12940_v28 }
 0xca9   : > { %5129 = vperm.xlu0 %7574, %v7890_v26   ;;  %v7910_v27 = vpop.eup %7909  ;;  %v4857_v5 = vsub.f32 %v16193_v4, %v12940_v28 }
 0xcaa   : > { %v4957_v26 = vmul.f32 1.442695, %v4854_v52  ;;  %v7912_v31 = vpop.eup %7911  ;;  %v4959_v37 = vmul.f32 1.442695, %v4855_v44 }
 0xcab   : > { %v7914_v17 = vpop.eup %7913 }
 0xcac   : > { %7915 = vpow2.f32 %v4957_v26 }
 0xcad   : > { %7917 = vpow2.f32 %v4955_v57 }
 0xcae   : > { %7919 = vpow2.f32 %v4947_v32 }
 0xcaf   : > { %5153 = vperm.xlu2 %7573, %v7892_v33   ;;  %v4856_v33 = vsub.f32 %v16194_v41, %v12940_v28 }
 0xcb0   : > { %5150 = vperm.xlu1 %7572, %v7894_v19   ;;  %v4963_v19 = vmul.f32 1.442695, %v4857_v5 }
 0xcb1   : > { %5138 = vperm.xlu0 %7574, %v7896_v51   ;;  %v4961_v51 = vmul.f32 1.442695, %v4856_v33 }
 0xcb2   : > { %v7916_v10 = vpop.eup %7915  ;;  %7921 = vpow2.f32 %v4963_v19  ;;  %v16198_v19 = vld [vmem:[#allocation232_spill] sm:$0xff] }
 0xcb3   : > { %v7918_v18 = vpop.eup %7917  ;;  %7923 = vpow2.f32 %v4961_v51 }
 0xcb4   : > { %v7920_v38 = vpop.eup %7919  ;;  %7925 = vpow2.f32 %v4953_v56  ;;  %v12994_v56 = vperm.slane %v12854_v11, 7 }
 0xcb5   : > { %7927 = vpow2.f32 %v4969_v49 }
 0xcb6   : > { %v4871_v49 = vsub.f32 %v12729_v22, %v12994_v56  ;;  %v4875_v22 = vsub.f32 %v12758_v47, %v12994_v56 }
 0xcb7   : > { %5162 = vperm.xlu2 %7573, %v7898_v24   ;;  %v12959_v24 = vperm.slane %v12854_v11, 6 }
 0xcb8   : > { %5159 = vperm.xlu1 %7572, %v7900_v6   ;;  %v4967_v6 = vmul.f32 1.442695, %v4859_v62 }
 0xcb9   : > { %5147 = vperm.xlu0 %7574, %v7902_v34   ;;  %v7922_v34 = vpop.eup %7921  ;;  %v4863_v15 = vsub.f32 %v16196_v59, %v12959_v24  ;;  %v4866_v16 = vsub.f32 %v12619_v35, %v12959_v24  ;;  %v4865_v57 = vsub.f32 %v16197_v55, %v12959_v24  ;;  %v4869_v33 = vsub.f32 %v16155_v42, %v12959_v24 }
 0xcba   : > { %v7924_v48 = vpop.eup %7923  ;;  %7929 = vpow2.f32 %v4967_v6  ;;  %v4864_v51 = vsub.f32 %v16198_v19, %v12959_v24 }
 0xcbb   : > { %v7926_v63 = vpop.eup %7925  ;;  %7931 = vpow2.f32 %v4959_v37 }
 0xcbc   : > { %v4977_v53 = vmul.f32 1.442695, %v4864_v51 }
 0xcbf   : > { %5171 = vperm.xlu2 %7573, %v7904_v39   ;;  %v4975_v39 = vmul.f32 1.442695, %v4863_v15 }
 0xcc0   : > { %5168 = vperm.xlu1 %7572, %v7906_v21   ;;  %v7928_v21 = vpop.eup %7927 }
 0xcc1   : > { %5156 = vperm.xlu0 %7574, %v7908_v45   ;;  %v4965_v45 = vmul.f32 1.442695, %v4858_v23  ;;  %v7930_v52 = vpop.eup %7929  ;;  %7933 = vpow2.f32 %v4975_v39  ;;  %v4874_v23 = vsub.f32 %v12781_v1, %v12994_v56  ;;  %v4870_v39 = vsub.f32 %v12676_v2, %v12959_v24 }
 0xcc2   : > { %v7932_v7 = vpop.eup %7931  ;;  %7935 = vpow2.f32 %v4973_v12  ;;  %v4878_v1 = vsub.f32 %v12823_v54, %v12994_v56  ;;  %v4877_v2 = vsub.f32 %v12837_v50, %v12994_v56 }
 0xcc3   : > { %7937 = vpow2.f32 %v4965_v45  ;;  %v4999_v45 = vmul.f32 1.442695, %v4875_v22 }
 0xcc7   : > { %5180 = vperm.xlu2 %7573, %v7910_v27   ;;  %v4861_v27 = vsub.f32 %v16161_v40, %v12940_v28  ;;  %v7934_v4 = vpop.eup %7933  ;;  %v4868_v40 = vsub.f32 %v12668_v60, %v12959_v24  ;;  %v4872_v60 = vsub.f32 %v12692_v43, %v12994_v56 }
 0xcc8   : > { %5177 = vperm.xlu1 %7572, %v7912_v31   ;;  %v4981_v31 = vmul.f32 1.442695, %v4866_v16  ;;  %v7936_v35 = vpop.eup %7935  ;;  %v4989_v16 = vmul.f32 1.442695, %v4870_v39  ;;  %v16203_v39 = vld [vmem:[#allocation41_spill] sm:$0xff] }
 0xcc9   : > { %5165 = vperm.xlu0 %7574, %v7914_v17   ;;  %v12944_v0 = vpop.permute.xlu2 %5078  ;;  %v4979_v17 = vmul.f32 1.442695, %v4865_v57  ;;  %v4971_v5 = vmul.f32 1.442695, %v4861_v27  ;;  %v7938_v41 = vpop.eup %7937  ;;  %v4985_v42 = vmul.f32 1.442695, %v4868_v40  ;;  %v4876_v40 = vsub.f32 %v12818_v25, %v12994_v56 }
 0xcca   : > { %7939 = vpow2.f32 %v4981_v31  ;;  %v16199_v57 = vld [vmem:[#allocation231_spill] sm:$0xff] }
 0xccb   : > { %7941 = vpow2.f32 %v4979_v17  ;;  %v4873_v27 = vsub.f32 %v16199_v57, %v12994_v56  ;;  %v5005_v17 = vmul.f32 1.442695, %v4878_v1  ;;  %v16206_v1 = vld [vmem:[#allocation78_spill] sm:$0xff] }
 0xccc   : > { %7943 = vpow2.f32 %v4971_v5  ;;  %v5003_v5 = vmul.f32 1.442695, %v4877_v2 }
 0xccf   : > { %5189 = vperm.xlu2 %7573, %v7916_v10  }
 0xcd0   : > { %5186 = vperm.xlu1 %7572, %v7918_v18   ;;  %v4987_v18 = vmul.f32 1.442695, %v4869_v33 }
 0xcd1   : > { %5174 = vperm.xlu0 %7574, %v7920_v38   ;;  %v12952_v29 = vpop.permute.xlu2 %5090  ;;  %v7940_v38 = vpop.eup %7939 }
 0xcd2   : > { %v7942_v62 = vpop.eup %7941  ;;  %7945 = vpow2.f32 %v4987_v18  ;;  %v5001_v18 = vmul.f32 1.442695, %v4876_v40 }
 0xcd3   : > { %v7944_v9 = vpop.eup %7943  ;;  %7947 = vpow2.f32 %v4985_v42 }
 0xcd4   : > { %7949 = vpow2.f32 %v4977_v53 }
 0xcd7   : > { %5198 = vperm.xlu2 %7573, %v7922_v34   ;;  %v4867_v34 = vsub.f32 %v12627_v3, %v12959_v24 }
 0xcd8   : > { %5195 = vperm.xlu1 %7572, %v7924_v48   ;;  %v4993_v48 = vmul.f32 1.442695, %v4872_v60  ;;  %v7946_v59 = vpop.eup %7945  ;;  %v16200_v60 = vld [vmem:[#allocation45_spill] sm:$0xff] }
 0xcd9   : > { %5183 = vperm.xlu0 %7574, %v7926_v63   ;;  %v12963_v14 = vpop.permute.xlu2 %5099  ;;  %v4991_v63 = vmul.f32 1.442695, %v4871_v49  ;;  %v4983_v15 = vmul.f32 1.442695, %v4867_v34  ;;  %v7948_v43 = vpop.eup %7947 }
 0xcda   : > { %v7950_v61 = vpop.eup %7949  ;;  %7951 = vpow2.f32 %v4993_v48  ;;  %v16201_v48 = vld [vmem:[#allocation12_spill] sm:$0xff] }
 0xcdb   : > { %7953 = vpow2.f32 %v4991_v63 }
 0xcdc   : > { %7955 = vpow2.f32 %v4983_v15 }
 0xcdd   : > { %7957 = vpow2.f32 %v4999_v45 }
 0xcdf   : > { %5207 = vperm.xlu2 %7573, %v7928_v21  }
 0xce0   : > { %5204 = vperm.xlu1 %7572, %v7930_v52   ;;  %v4997_v52 = vmul.f32 1.442695, %v4874_v23 }
 0xce1   : > { %5192 = vperm.xlu0 %7574, %v7932_v7   ;;  %v12971_v26 = vpop.permute.xlu2 %5108  ;;  %v7952_v7 = vpop.eup %7951 }
 0xce2   : > { %v12975_v30 = vpop.permute.xlu1 %5075  ;;  %v7954_v47 = vpop.eup %7953  ;;  %7959 = vpow2.f32 %v4997_v52 }
 0xce3   : > { %v12979_v32 = vpop.permute.xlu0 %5072  ;;  %v7956_v55 = vpop.eup %7955  ;;  %7961 = vpow2.f32 %v4989_v16 }
 0xce4   : > { %7963 = vpow2.f32 %v5005_v17  ;;  %v16209_v17 = vld [vmem:[#allocation85_spill] sm:$0xff] }
 0xce5   : > { %7965 = vpow2.f32 %v5003_v5  ;;  %v5470_v5 = vmul.f32 %v12963_v14, %v16209_v17 }
 0xce7   : > { %5216 = vperm.xlu2 %7573, %v7934_v4  }
 0xce8   : > { %5213 = vperm.xlu1 %7572, %v7936_v35   ;;  %v7958_v35 = vpop.eup %7957 }
 0xce9   : > { %5201 = vperm.xlu0 %7574, %v7938_v41   ;;  %v12983_v13 = vpop.permute.xlu2 %5117  ;;  %v4995_v41 = vmul.f32 1.442695, %v4873_v27  ;;  %v7960_v54 = vpop.eup %7959  ;;  %v16208_v27 = vld [vmem:[#allocation33_spill] sm:$0xff] }
 0xcea   : > { %v12987_v28 = vpop.permute.xlu1 %5087  ;;  %v7962_v33 = vpop.eup %7961 }
 0xceb   : > { %v12991_v10 = vpop.permute.xlu0 %5081  ;;  %7967 = vpow2.f32 %v4995_v41  ;;  %v7964_v51 = vpop.eup %7963 }
 0xcec   : > { %v7966_v42 = vpop.eup %7965  ;;  %7969 = vpow2.f32 %v5001_v18 }
 0xcef   : > { %5225 = vperm.xlu2 %7573, %v7940_v38  }
 0xcf0   : > { %5222 = vperm.xlu1 %7572, %v7942_v62  }
 0xcf1   : > { %5210 = vperm.xlu0 %7574, %v7944_v9   ;;  %v12998_v44 = vpop.permute.xlu2 %5126  ;;  %v7968_v53 = vpop.eup %7967 }
 0xcf2   : > { %v13002_v6 = vpop.permute.xlu1 %5096  ;;  %v7970_v25 = vpop.eup %7969 }
 0xcf3   : > { %v13006_v37 = vpop.permute.xlu0 %5084  ;;  %v5469_v2 = vmul.f32 %v13002_v6, %v16206_v1  ;;  %v16217_v1 = vld [vmem:[#allocation107_spill] sm:$0xff] }
 0xcf7   : > { %5234 = vperm.xlu2 %7573, %v7946_v59  }
 0xcf8   : > { %5231 = vperm.xlu1 %7572, %v7948_v43   ;;  %v16202_v43 = vld [vmem:[#allocation16_spill] sm:$0xff] }
 0xcf9   : > { %5219 = vperm.xlu0 %7574, %v7950_v61   ;;  %v13016_v12 = vpop.permute.xlu2 %5135 }
 0xcfa   : > { %v13012_v3 = vpop.permute.xlu1 %5105 }
 0xcfb   : > { %v13018_v21 = vpop.permute.xlu0 %5093  ;;  %v5472_v17 = vmul.f32 %v13012_v3, %v16217_v1 }
 0xcff   : > { %5243 = vperm.xlu2 %7573, %v7952_v7   ;;  %v16204_v7 = vld [vmem:[#allocation21_spill] sm:$0xff] }
 0xd00   : > { %5240 = vperm.xlu1 %7572, %v7954_v47   ;;  %v5462_v16 = vmul.f32 %v12975_v30, %v16204_v7  ;;  %v16205_v47 = vld [vmem:[#allocation34_spill] sm:$0xff]  ;;  %v16218_v7 = vld [vmem:[#allocation52_spill] sm:$0xff] }
 0xd01   : > { %5228 = vperm.xlu0 %7574, %v7956_v55   ;;  %v13030_v4 = vpop.permute.xlu2 %5144  ;;  %v5461_v55 = vmul.f32 %v12979_v32, %v16205_v47 }
 0xd02   : > { %v13024_v24 = vpop.permute.xlu1 %5114 }
 0xd03   : > { %v13028_v31 = vpop.permute.xlu0 %5102 }
 0xd07   : > { %5252 = vperm.xlu2 %7573, %v7958_v35   ;;  %v16210_v35 = vld [vmem:[#allocation95_spill] sm:$0xff] }
 0xd08   : > { %5249 = vperm.xlu1 %7572, %v7960_v54   ;;  %v5471_v41 = vmul.f32 %v13028_v31, %v16210_v35  ;;  %v5527_v54 = vsel %vm5525_vm1, %v5462_v16, 0.0  ;;  %v16216_v35 = vld [vmem:[#allocation39_spill] sm:$0xff] }
 0xd09   : > { %5237 = vperm.xlu0 %7574, %v7962_v33   ;;  %v13038_v38 = vpop.permute.xlu2 %5153  ;;  %v5526_v33 = vsel %vm5525_vm1, %v5461_v55, 0.0 }
 0xd0a   : > { %v13032_v50 = vpop.permute.xlu1 %5123 }
 0xd0b   : > { %v13036_v19 = vpop.permute.xlu0 %5111 }
 0xd0f   : > { %5261 = vperm.xlu2 %7573, %v7964_v51   ;;  %v5547_v51 = vsel %vm5525_vm1, %v5469_v2, 0.0 }
 0xd10   : > { %5258 = vperm.xlu1 %7572, %v7966_v42   ;;  %v16213_v42 = vld [vmem:[#allocation27_spill] sm:$0xff] }
 0xd11   : > { %5246 = vperm.xlu0 %7574, %v7968_v53   ;;  %v13046_v56 = vpop.permute.xlu2 %5162  ;;  %v5463_v53 = vmul.f32 %v12944_v0, %v16213_v42 }
 0xd12   : > { %v13040_v62 = vpop.permute.xlu1 %5132 }
 0xd13   : > { %v13042_v9 = vpop.permute.xlu0 %5120 }
 0xd14   : > { %v5477_v2 = vmul.f32 %v13042_v9, %v16216_v35 }
 0xd16   : > { %v5568_v1 = vsel %vm5525_vm1, %v5477_v2, 0.0  ;;  %v16227_v2 = vld [vmem:[#allocation35_spill] sm:$0xff] }
 0xd17   : > { %5716 = vrot.lane.b32.xlu2 %v16200_v60, %s8249_s14  ;;  %v16214_v60 = vld [vmem:[#allocation29_spill] sm:$0xff] }
 0xd19   : > { %5255 = vperm.xlu0 %7574, %v7970_v25   ;;  %v13056_v59 = vpop.permute.xlu2 %5171  ;;  %v5464_v25 = vmul.f32 %v12991_v10, %v16214_v60  ;;  %v5529_v60 = vsel %vm5525_vm1, %v5463_v53, 0.0 }
 0xd1a   : > { %v13048_v49 = vpop.permute.xlu1 %5141 }
 0xd1b   : > { %v13050_v34 = vpop.permute.xlu0 %5129 }
 0xd1c   : > { %v5480_v11 = vmul.f32 %v13050_v34, %v16227_v2 }
 0xd1f   : > { %5722 = vrot.lane.b32.xlu2 %v16201_v48, %s8249_s14  ;;  %v5548_v48 = vsel %vm5525_vm1, %v5470_v5, 0.0  ;;  %v5531_v5 = vsel %vm5525_vm1, %v5464_v25, 0.0 }
 0xd20   : > { %v5549_v16 = vadd.f32 %v5548_v48, %v5547_v51 }
 0xd21   : > { %v13066_v23 = vpop.permute.xlu2 %5180 }
 0xd22   : > { %v13054_v63 = vpop.permute.xlu1 %5150 }
 0xd23   : > { %v13058_v15 = vpop.permute.xlu0 %5138 }
 0xd27   : > { %5724 = vrot.lane.b32.xlu2 %v16202_v43, %s8249_s14  ;;  %v5528_v43 = vadd.f32 %v5527_v54, %v5526_v33  ;;  %v16219_v33 = vld [vmem:[#allocation15_spill] sm:$0xff] }
 0xd29   : > { %v13080_v57 = vpop.permute.xlu2 %5189  ;;  %v5530_v51 = vadd.f32 %v5529_v60, %v5528_v43 }
 0xd2a   : > { %v13062_v61 = vpop.permute.xlu1 %5159  ;;  %16207 = vst [vmem:[#allocation200_spill] sm:$0xff] %v13080_v57  ;;  %v16235_v57 = vld [vmem:[#allocation53_spill] sm:$0xff] }
 0xd2b   : > { %v13064_v22 = vpop.permute.xlu0 %5147  ;;  %v5532_v25 = vadd.f32 %v5531_v5, %v5530_v51 }
 0xd2f   : > { %5726 = vrot.lane.b32.xlu2 %v16203_v39, %s8249_s14  ;;  %v5550_v39 = vsel %vm5525_vm1, %v5471_v41, 0.0  ;;  %v5478_v41 = vmul.f32 %v13032_v50, %v16219_v33  ;;  %v16226_v33 = vld [vmem:[#allocation14_spill] sm:$0xff] }
 0xd30   : > { %v5551_v54 = vadd.f32 %v5550_v39, %v5549_v16  ;;  %v5552_v39 = vsel %vm5525_vm1, %v5472_v17, 0.0  ;;  %v16224_v16 = vld [vmem:[#allocation119_spill] sm:$0xff]  ;;  %v16229_v17 = vld [vmem:[#allocation224_spill] sm:$0xff] }
 0xd31   : > { %v13113_v48 = vpop.permute.xlu2 %5198  ;;  %v5474_v60 = vmul.f32 %v13036_v19, %v16224_v16  ;;  %v5264_v51 = vperm.slane %v12975_v30, %v16229_v17  ;;  %v5573_v30 = vsel %vm5525_vm1, %v5480_v11, 0.0 }
 0xd32   : > { %v13070_v45 = vpop.permute.xlu1 %5168  ;;  %16220 = vst [vmem:[#allocation129_spill] sm:$0xff] %v13113_v48  ;;  %v5553_v20 = vadd.f32 %v5552_v39, %v5551_v54  ;;  %v16231_v39 = vld [vmem:[#allocation68_spill] sm:$0xff] }
 0xd33   : > { %v13072_v52 = vpop.permute.xlu0 %5156 }
 0xd37   : > { %5728 = vrot.lane.b32.xlu2 %v16208_v27, %s8249_s14  ;;  %v16215_v27 = vld [vmem:[#allocation51_spill] sm:$0xff] }
 0xd38   : > { %v5465_v55 = vmul.f32 %v13006_v37, %v16215_v27  ;;  %v16221_v27 = vld [vmem:[#allocation111_spill] sm:$0xff] }
 0xd39   : > { %v5473_v35 = vmul.f32 %v12971_v26, %v16221_v27  ;;  %v5479_v27 = vmul.f32 %v12998_v44, %v16226_v33 }
 0xd3a   : > { %v13090_v40 = vpop.permute.xlu1 %5177  ;;  %v5533_v42 = vsel %vm5525_vm1, %v5465_v55, 0.0  ;;  %v5569_v55 = vsel %vm5525_vm1, %v5478_v41, 0.0  ;;  %v5556_v41 = vsel %vm5525_vm1, %v5474_v60, 0.0 }
 0xd3b   : > { %16211 = vst [vmem:[#allocation219_spill] sm:$0xff] %v13090_v40  ;;  %v13093_v18 = vpop.permute.xlu0 %5165  ;;  %v5570_v48 = vadd.f32 %v5569_v55, %v5568_v1  ;;  %v5554_v16 = vsel %vm5525_vm1, %v5473_v35, 0.0  ;;  %v16230_v40 = vld [vmem:[#allocation222_spill] sm:$0xff]  ;;  %v5571_v1 = vsel %vm5525_vm1, %v5479_v27, 0.0 }
 0xd3c   : > { %16212 = vst [vmem:[#allocation186_spill] sm:$0xff] %v13093_v18  ;;  %v5263_v18 = vperm.slane %v12979_v32, %v16230_v40  ;;  %v5555_v55 = vadd.f32 %v5554_v16, %v5553_v20  ;;  %v16233_v35 = vld [vmem:[#allocation170_spill] sm:$0xff]  ;;  %v16236_v16 = vld [vmem:[#allocation149_spill] sm:$0xff] }
 0xd3d   : > { %v5475_v33 = vmul.f32 %v13024_v24, %v16233_v35  ;;  %v5572_v32 = vadd.f32 %v5571_v1, %v5570_v48  ;;  %v5476_v11 = vmul.f32 %v12983_v13, %v16236_v16  ;;  %v16238_v1 = vld [vmem:[#allocation228_spill] sm:$0xff]  ;;  %v16240_v35 = vld [vmem:[#allocation63_spill] sm:$0xff] }
 0xd3e   : > { %v5557_v60 = vadd.f32 %v5556_v41, %v5555_v55  ;;  %v5265_v20 = vsel %vm1574_vm10, %v5264_v51, %v5263_v18  ;;  %v5278_v41 = vperm.slane %v13002_v6, %v16230_v40  ;;  %v5270_v55 = vperm.slane %v13006_v37, %v15714_v58  ;;  %v16239_v18 = vld [vmem:[#allocation47_spill] sm:$0xff] }
 0xd3f   : > { %5730 = vrot.lane.b32.xlu2 %v16218_v7, %s8249_s14  ;;  %v16223_v7 = vld [vmem:[#allocation57_spill] sm:$0xff]  ;;  %v5482_v51 = vmul.f32 %v13016_v12, %v16239_v18  ;;  %v5483_v37 = vmul.f32 %v13058_v15, %v16240_v35 }
 0xd40   : > { %v5466_v53 = vmul.f32 %v12987_v28, %v16223_v7  ;;  %v16228_v7 = vld [vmem:[#allocation67_spill] sm:$0xff] }
 0xd41   : > { %v5467_v5 = vmul.f32 %v12952_v29, %v16228_v7  ;;  %v16234_v7 = vld [vmem:[#allocation225_spill] sm:$0xff] }
 0xd42   : > { %v13119_v47 = vpop.permute.xlu1 %5186  ;;  %v5535_v54 = vsel %vm5525_vm1, %v5466_v53, 0.0  ;;  %v5266_v53 = vperm.slane %v12944_v0, %v16234_v7  ;;  %v5268_v0 = vperm.slane %v12991_v10, %v16238_v1  ;;  %v5279_v10 = vperm.slane %v12963_v14, %v16229_v17 }
 0xd43   : > { %16222 = vst [vmem:[#allocation122_spill] sm:$0xff] %v13119_v47  ;;  %v13126_v43 = vpop.permute.xlu0 %5174  ;;  %v5534_v47 = vadd.f32 %v5533_v42, %v5532_v25  ;;  %v16232_v42 = vld [vmem:[#allocation69_spill] sm:$0xff]  ;;  %v5537_v27 = vsel %vm5525_vm1, %v5467_v5, 0.0 }
 0xd44   : > { %16225 = vst [vmem:[#allocation168_spill] sm:$0xff] %v13126_v43  ;;  %v5468_v25 = vmul.f32 %v13018_v21, %v16232_v42 }
 0xd45   : > { %v5536_v2 = vadd.f32 %v5535_v54, %v5534_v47  ;;  %v5574_v47 = vadd.f32 %v5573_v30, %v5572_v32  ;;  %v13160_v54 = vpop.permute.xlu2 %5207  ;;  %v5558_v30 = vsel %vm5525_vm1, %v5475_v33, 0.0  ;;  %v5281_v32 = vperm.slane %v13028_v31, %v16234_v7 }
 0xd46   : > { %16237 = vst [vmem:[#allocation215_spill] sm:$0xff] %v13160_v54  ;;  %v5539_v5 = vsel %vm5525_vm1, %v5468_v25, 0.0  ;;  %v5559_v16 = vadd.f32 %v5558_v30, %v5557_v60  ;;  %v5267_v25 = vsel %vm1578_vm11, %v5266_v53, %v5265_v20  ;;  %v5274_v33 = vperm.slane %v12952_v29, %v10101_v8 }
 0xd47   : > { %5734 = vrot.lane.b32.xlu2 %v16231_v39, %s8249_s14  ;;  %v5481_v39 = vmul.f32 %v13040_v62, %v16235_v57  ;;  %v5538_v57 = vadd.f32 %v5537_v27, %v5536_v2  ;;  %v16241_v2 = vld [vmem:[#allocation80_spill] sm:$0xff]  ;;  %v5272_v31 = vperm.slane %v12987_v28, %v10055_v36  ;;  %v5269_v14 = vsel %vm1582_vm12, %v5268_v0, %v5267_v25 }
 0xd48   : > { %v5280_v60 = vsel %vm1574_vm10, %v5279_v10, %v5278_v41  ;;  %v5271_v27 = vsel %vm1586_vm13, %v5270_v55, %v5269_v14  ;;  %v5579_v29 = vsel %vm5525_vm1, %v5483_v37, 0.0  ;;  %v5283_v41 = vperm.slane %v13012_v3, %v16238_v1 }
 0xd49   : > { %v5575_v6 = vsel %vm5525_vm1, %v5481_v39, 0.0  ;;  %v5540_v42 = vadd.f32 %v5539_v5, %v5538_v57  ;;  %v5560_v39 = vsel %vm5525_vm1, %v5476_v11, 0.0  ;;  %v5577_v57 = vsel %vm5525_vm1, %v5482_v51, 0.0  ;;  %v16242_v5 = vld [vmem:[#allocation86_spill] sm:$0xff] }
 0xd4a   : > { %v13154_v43 = vpop.permute.xlu1 %5195  ;;  %v5576_v54 = vadd.f32 %v5575_v6, %v5574_v47  ;;  %v5282_v53 = vsel %vm1578_vm11, %v5281_v32, %v5280_v60  ;;  %v5561_v20 = vadd.f32 %v5560_v39, %v5559_v16  ;;  %v5293_v47 = vperm.slane %v13042_v9, %v16230_v40  ;;  %v16243_v9 = vld [vmem:[#allocation77_spill] sm:$0xff] }
 0xd4b   : > { %v13162_v48 = vpop.permute.xlu0 %5183  ;;  %v5486_v28 = vmul.f32 %v13064_v22, %v16242_v5  ;;  %v5285_v11 = vperm.slane %v12971_v26, %v15714_v58  ;;  %v5541_v55 = vrot.slane %v5540_v42, 4  ;;  %v5273_v16 = vsel %vm1590_vm14, %v5272_v31, %v5271_v27  ;;  %v16244_v6 = vld [vmem:[#allocation73_spill] sm:$0xff]  ;;  %v16273_v5 = vld [vmem:[#allocation103_spill] sm:$0xff] }
 0xd4c   : > { %v5578_v51 = vadd.f32 %v5577_v57, %v5576_v54  ;;  %v5485_v32 = vmul.f32 %v13030_v4, %v16243_v9  ;;  %v5294_v10 = vperm.slane %v13032_v50, %v16229_v17  ;;  %v5484_v37 = vmul.f32 %v13048_v49, %v16244_v6  ;;  %v16245_v57 = vld [vmem:[#allocation96_spill] sm:$0xff] }
 0xd4d   : > { %v5291_v26 = vperm.slane %v12983_v13, %v10106_v46  ;;  %v5284_v3 = vsel %vm1582_vm12, %v5283_v41, %v5282_v53  ;;  %v5287_v54 = vperm.slane %v13036_v19, %v10055_v36  ;;  %v5562_v31 = vrot.slane %v5561_v20, 4 }
 0xd4e   : > { %v5580_v25 = vadd.f32 %v5579_v29, %v5578_v51  ;;  %v5295_v14 = vsel %vm1574_vm10, %v5294_v10, %v5293_v47  ;;  %v5298_v50 = vperm.slane %v13050_v34, %v16238_v1  ;;  %v5590_v60 = vsel %vm5525_vm1, %v5486_v28, 0.0  ;;  %v16246_v29 = vld [vmem:[#allocation97_spill] sm:$0xff] }
 0xd4f   : > { %5738 = vrot.lane.b32.xlu2 %v16241_v2, %s8249_s14  ;;  %v13219_v2 = vpop.permute.xlu2 %5216  ;;  %v5296_v39 = vperm.slane %v12998_v44, %v16234_v7  ;;  %v5275_v13 = vsel %vm1594_vm15, %v5274_v33, %v5273_v16  ;;  %v5276_v27 = vperm.slane %v13018_v21, %v10106_v46  ;;  %v13230_v19 = vadd.f32 %v5541_v55, %v5540_v42  ;;  %v16247_v55 = vld [vmem:[#allocation101_spill] sm:$0xff] }
 0xd50   : > { %v5589_v53 = vsel %vm5525_vm1, %v5485_v32, 0.0  ;;  %v5286_v47 = vsel %vm1586_vm13, %v5285_v11, %v5284_v3  ;;  %v5581_v34 = vsel %vm5525_vm1, %v5484_v37, 0.0  ;;  %v5487_v28 = vmul.f32 %v13054_v63, %v16246_v29 }
 0xd51   : > { %v5288_v44 = vsel %vm1590_vm14, %v5287_v54, %v5286_v47  ;;  %v5297_v33 = vsel %vm1578_vm11, %v5296_v39, %v5295_v14  ;;  %v5582_v41 = vadd.f32 %v5581_v34, %v5580_v25  ;;  %v5591_v21 = vadd.f32 %v5590_v60, %v5589_v53 }
 0xd52   : > { %v13199_v0 = vpop.permute.xlu1 %5204  ;;  %v5289_v42 = vperm.slane %v13024_v24, %v10101_v8  ;;  %v5488_v51 = vmul.f32 %v13038_v38, %v16247_v55  ;;  %v5563_v16 = vadd.f32 %v5562_v31, %v5561_v20  ;;  %v5299_v11 = vsel %vm1582_vm12, %v5298_v50, %v5297_v33  ;;  %v16248_v20 = vld [vmem:[#allocation124_spill] sm:$0xff]  ;;  %v16249_v50 = vld [vmem:[#allocation113_spill] sm:$0xff]  ;;  %v16262_v55 = vld [vmem:[#allocation186_spill] sm:$0xff] }
 0xd53   : > { %v13205_v30 = vpop.permute.xlu0 %5192  ;;  %v5302_v10 = vperm.slane %v13016_v12, %v10055_v36  ;;  %v5277_v37 = vsel %vm16160_vm0, %v5276_v27, %v5275_v13  ;;  %v5308_v3 = vperm.slane %v13030_v4, %v16230_v40  ;;  %v5300_v54 = vperm.slane %v13040_v62, %v15714_v58 }
 0xd54   : > { %v5290_v25 = vsel %vm1594_vm15, %v5289_v42, %v5288_v44  ;;  %v5491_v31 = vmul.f32 %v13046_v56, %v16248_v20  ;;  %v5592_v14 = vsel %vm5525_vm1, %v5487_v28, 0.0  ;;  %v5489_v12 = vmul.f32 %v13072_v52, %v16249_v50  ;;  %v16251_v28 = vld [vmem:[#allocation13_spill] sm:$0xff]  ;;  %v16253_v42 = vld [vmem:[#allocation38_spill] sm:$0xff] }
 0xd55   : > { %v5301_v60 = vsel %vm1586_vm13, %v5300_v54, %v5299_v11  ;;  %v5304_v4 = vperm.slane %v13058_v15, %v10101_v8  ;;  %v5583_v39 = vrot.slane %v5582_v41, 4  ;;  %v5593_v13 = vadd.f32 %v5592_v14, %v5591_v21  ;;  %v16252_v21 = vld [vmem:[#allocation112_spill] sm:$0xff]  ;;  %v16254_v14 = vld [vmem:[#allocation25_spill] sm:$0xff]  ;;  %v16255_v20 = vld [vmem:[#allocation134_spill] sm:$0xff] }
 0xd56   : > { %v5313_v27 = vperm.slane %v13038_v38, %v16238_v1  ;;  %v5564_v53 = vrot.slane %v5563_v16, 2  ;;  %v5292_v47 = vsel %vm16250_vm7, %v5291_v26, %v5290_v25  ;;  %v5494_v44 = vmul.f32 %v13056_v59, %v16251_v28  ;;  %vm16302_vm7 = vmmov %vm16160_vm0 }
 0xd57   : > { %5742 = vrot.lane.b32.xlu2 %v16245_v57, %s8249_s14  ;;  %v5594_v57 = vsel %vm5525_vm1, %v5488_v51, 0.0  ;;  %v5309_v15 = vperm.slane %v13064_v22, %v16229_v17  ;;  %v13277_v33 = vpop.permute.xlu2 %5225  ;;  %v5600_v38 = vsel %vm5525_vm1, %v5491_v31, 0.0  ;;  %v5497_v51 = vmul.f32 %v13066_v23, %v16253_v42 }
 0xd58   : > { %v5303_v26 = vsel %vm1590_vm14, %v5302_v10, %v5301_v60  ;;  %v5596_v11 = vsel %vm5525_vm1, %v5489_v12, 0.0  ;;  %v5584_v25 = vadd.f32 %v5583_v39, %v5582_v41  ;;  %v5493_v22 = vmul.f32 %v13070_v45, %v16254_v14  ;;  %v16256_v39 = vld [vmem:[#allocation43_spill] sm:$0xff] }
 0xd59   : > { %v5305_v54 = vsel %vm1594_vm15, %v5304_v4, %v5303_v26  ;;  %v5595_v62 = vadd.f32 %v5594_v57, %v5593_v13  ;;  %v13289_v34 = vadd.f32 %v5564_v53, %v5563_v16  ;;  %v5306_v31 = vperm.slane %v13048_v49, %v10106_v46  ;;  %v16257_v13 = vld [vmem:[#allocation168_spill] sm:$0xff] }
 0xd5a   : > { %v13246_v32 = vpop.permute.xlu1 %5213  ;;  %v5490_v10 = vmul.f32 %v13062_v61, %v16255_v20  ;;  %v5611_v12 = vsel %vm5525_vm1, %v5494_v44, 0.0  ;;  %v5310_v41 = vsel %vm1574_vm10, %v5309_v15, %v5308_v3  ;;  %v5495_v16 = vmul.f32 %v16257_v13, %v16256_v39  ;;  %v16259_v3 = vld [vmem:[#allocation75_spill] sm:$0xff]  ;;  %v16269_v39 = vld [vmem:[#allocation177_spill] sm:$0xff] }
 0xd5b   : > { %v13255_v24 = vpop.permute.xlu0 %5201  ;;  %v5597_v4 = vadd.f32 %v5596_v11, %v5595_v62  ;;  %v5311_v49 = vperm.slane %v13054_v63, %v16234_v7  ;;  %v5307_v53 = vsel %vm16258_vm8, %v5306_v31, %v5305_v54  ;;  %v5383_v26 = vsel %vm618_vm2, %v5292_v47, %v5277_v37  ;;  %v16260_v62 = vld [vmem:[#allocation200_spill] sm:$0xff]  ;;  %v16261_v63 = vld [vmem:[#allocation157_spill] sm:$0xff]  ;;  %vm16305_vm8 = vmmov %vm16160_vm0 }
 0xd5c   : > { %v5617_v44 = vsel %vm5525_vm1, %v5497_v51, 0.0  ;;  %v5585_v42 = vrot.slane %v5584_v25, 2  ;;  %v5500_v15 = vmul.f32 %v16260_v62, %v16259_v3  ;;  %v5610_v11 = vsel %vm5525_vm1, %v5493_v22, 0.0  ;;  %v16263_v22 = vld [vmem:[#allocation152_spill] sm:$0xff] }
 0xd5d   : > { %v5598_v20 = vsel %vm5525_vm1, %v5490_v10, 0.0  ;;  %v5312_v50 = vsel %vm1578_vm11, %v5311_v49, %v5310_v41  ;;  %v5492_v54 = vmul.f32 %v16262_v55, %v16261_v63  ;;  %v13324_v51 = vsel %vm621_vm3, %v5307_v53, %v5383_v26  ;;  %v16264_v49 = vld [vmem:[#allocation83_spill] sm:$0xff] }
 0xd5e   : > { %v5599_v47 = vadd.f32 %v5598_v20, %v5597_v4  ;;  %v5613_v31 = vsel %vm5525_vm1, %v5495_v16, 0.0  ;;  %v5317_v10 = vperm.slane %v13062_v61, %v10055_v36  ;;  %v5612_v41 = vadd.f32 %v5611_v12, %v5610_v11  ;;  %v16265_v16 = vld [vmem:[#allocation26_spill] sm:$0xff]  ;;  %v16266_v53 = vld [vmem:[#allocation219_spill] sm:$0xff]  ;;  %v16267_v11 = vld [vmem:[#allocation88_spill] sm:$0xff] }
 0xd5f   : > { %5746 = vrot.lane.b32.xlu2 %v16252_v21, %s8249_s14  ;;  %v5324_v21 = vperm.slane %v13056_v59, %v16229_v17  ;;  %v5315_v59 = vperm.slane %v13072_v52, %v15714_v58  ;;  %v5323_v52 = vperm.slane %v13070_v45, %v16230_v40  ;;  %v5501_v3 = vmul.f32 %v13205_v30, %v16264_v49 }
 0xd60   : > { %v13335_v37 = vadd.f32 %v5585_v42, %v5584_v25  ;;  %v13338_v20 = vsel %vm5525_vm1, %v5500_v15, 0.0  ;;  %v5314_v4 = vsel %vm1582_vm12, %v5313_v27, %v5312_v50  ;;  %v5496_v26 = vmul.f32 %v16266_v53, %v16265_v16  ;;  %v16268_v42 = vld [vmem:[#allocation129_spill] sm:$0xff] }
 0xd61   : > { %v5316_v61 = vsel %vm1586_vm13, %v5315_v59, %v5314_v4  ;;  %v5602_v45 = vsel %vm5525_vm1, %v5492_v54, 0.0  ;;  %v5614_v12 = vadd.f32 %v5613_v31, %v5612_v41  ;;  %v5502_v63 = vmul.f32 %v13154_v43, %v16267_v11  ;;  %v16270_v59 = vld [vmem:[#allocation99_spill] sm:$0xff]  ;;  %v16271_v4 = vld [vmem:[#allocation20_spill] sm:$0xff] }
 0xd62   : > { %v13297_v60 = vpop.permute.xlu1 %5222  ;;  %v5601_v15 = vadd.f32 %v5600_v38, %v5599_v47  ;;  %v5509_v50 = vmul.f32 %v13219_v2, %v16269_v39  ;;  %v5326_v27 = vperm.slane %v16257_v13, %v16234_v7  ;;  %v5503_v54 = vmul.f32 %v16268_v42, %v16270_v59  ;;  %v16272_v13 = vld [vmem:[#allocation54_spill] sm:$0xff] }
 0xd63   : > { %v13303_v57 = vpop.permute.xlu0 %5210  ;;  %v5325_v31 = vsel %vm1574_vm10, %v5324_v21, %v5323_v52  ;;  %v5631_v41 = vsel %vm5525_vm1, %v5501_v3, 0.0  ;;  %v5318_v47 = vsel %vm1590_vm14, %v5317_v10, %v5316_v61  ;;  %v5615_v25 = vsel %vm5525_vm1, %v5496_v26, 0.0  ;;  %v16274_v10 = vld [vmem:[#allocation19_spill] sm:$0xff]  ;;  %v16275_v61 = vld [vmem:[#allocation28_spill] sm:$0xff] }
 0xd64   : > { %v5603_v39 = vadd.f32 %v5602_v45, %v5601_v15  ;;  %v5498_v29 = vmul.f32 %v13162_v48, %v16272_v13  ;;  %v5616_v11 = vadd.f32 %v5615_v25, %v5614_v12  ;;  %v5632_v14 = vsel %vm5525_vm1, %v5502_v63, 0.0 }
 0xd65   : > { %v5504_v59 = vmul.f32 %v13255_v24, %v16273_v5  ;;  %v5652_v3 = vsel %vm5525_vm1, %v5509_v50, 0.0  ;;  %v5327_v52 = vsel %vm1578_vm11, %v5326_v27, %v5325_v31  ;;  %v5511_v26 = vmul.f32 %v13297_v60, %v16274_v10  ;;  %v16277_v50 = vld [vmem:[#allocation136_spill] sm:$0xff]  ;;  %v16278_v27 = vld [vmem:[#allocation215_spill] sm:$0xff] }
 0xd66   : > { %v5634_v45 = vsel %vm5525_vm1, %v5503_v54, 0.0  ;;  %v5328_v63 = vperm.slane %v16266_v53, %v16238_v1  ;;  %v16276_v12 = vperm.slane %v13046_v56, %v10101_v8  ;;  %v5321_v31 = vperm.slane %v16262_v55, %v10106_v46  ;;  %v16280_v54 = vld [vmem:[#allocation122_spill] sm:$0xff]  ;;  %v16281_v10 = vld [vmem:[#allocation32_spill] sm:$0xff] }
 0xd67   : > { %5752 = vrot.lane.b32.xlu2 %v16263_v22, %s8249_s14  ;;  %v13343_v22 = vpop.permute.xlu2 %5234  ;;  %v5618_v5 = vadd.f32 %v5617_v44, %v5616_v11  ;;  %v5636_v56 = vsel %vm5525_vm1, %v5504_v59, 0.0  ;;  %v16283_v11 = vld [vmem:[#allocation49_spill] sm:$0xff] }
 0xd68   : > { %v5320_v25 = vsel %vm1594_vm15, %v16276_v12, %v5318_v47  ;;  %v5329_v53 = vsel %vm1582_vm12, %v5328_v63, %v5327_v52  ;;  %v5512_v47 = vmul.f32 %v13277_v33, %v16281_v10  ;;  %v5655_v12 = vsel %vm5525_vm1, %v5511_v26, 0.0 }
 0xd69   : > { %v5322_v10 = vsel %vm16284_vm9, %v5321_v31, %v5320_v25  ;;  %v5338_v25 = vperm.slane %v13205_v30, %v16230_v40  ;;  %v16286_v31 = vld [vmem:[#allocation48_spill] sm:$0xff]  ;;  %vm16308_vm9 = vmmov %vm16160_vm0 }
 0xd6a   : > { %v13355_v16 = vpop.permute.xlu1 %5231  ;;  %v5657_v63 = vsel %vm5525_vm1, %v5512_v47, 0.0 }
 0xd6b   : > { %v13357_v49 = vpop.permute.xlu0 %5219 }
 0xd6c   : > { %v5510_v38 = vmul.f32 %v13357_v49, %v16271_v4  ;;  %v5633_v4 = vadd.f32 %v5632_v14, %v5631_v41  ;;  %v5506_v14 = vmul.f32 %v16278_v27, %v16277_v50  ;;  %v5604_v41 = vrot.slane %v5603_v39, 4 }
 0xd6d   : > { %v5354_v30 = vperm.slane %v13357_v49, %v16229_v17  ;;  %v5343_v49 = vperm.slane %v13255_v24, %v16238_v1  ;;  %v16291_v24 = vld [vmem:[#allocation71_spill] sm:$0xff] }
 0xd6e   : > { %v5653_v21 = vsel %vm5525_vm1, %v5510_v38, 0.0  ;;  %v5619_v38 = vsel %vm5525_vm1, %v5498_v29, 0.0  ;;  %v5635_v55 = vadd.f32 %v5634_v45, %v5633_v4  ;;  %v13414_v26 = vadd.f32 %v5604_v41, %v5603_v39 }
 0xd6f   : > { %5758 = vrot.lane.b32.xlu2 %v16275_v61, %s8249_s14  ;;  %v5654_v15 = vadd.f32 %v5653_v21, %v5652_v3  ;;  %v16279_v61 = vld [vmem:[#allocation65_spill] sm:$0xff]  ;;  %v5332_v21 = vperm.slane %v13162_v48, %v10055_v36  ;;  %v13399_v3 = vpop.permute.xlu2 %5243  ;;  %v5620_v50 = vadd.f32 %v5619_v38, %v5618_v5  ;;  %v5640_v48 = vsel %vm5525_vm1, %v5506_v14, 0.0 }
 0xd70   : > { %v5499_v13 = vmul.f32 %v16280_v54, %v16279_v61  ;;  %v16282_v61 = vld [vmem:[#allocation116_spill] sm:$0xff]  ;;  %v5637_v4 = vadd.f32 %v5636_v56, %v5635_v55  ;;  %v5334_v5 = vperm.slane %v16280_v54, %v10101_v8  ;;  %v16285_v38 = vperm.slane %v13066_v23, %v15714_v58  ;;  %v16287_v54 = vld [vmem:[#allocation135_spill] sm:$0xff] }
 0xd71   : > { %v5505_v52 = vmul.f32 %v13199_v0, %v16282_v61  ;;  %v5656_v44 = vadd.f32 %v5655_v12, %v5654_v15  ;;  %v5507_v23 = vmul.f32 %v13303_v57, %v16287_v54 }
 0xd72   : > { %v13412_v45 = vpop.permute.xlu1 %5240  ;;  %v5621_v15 = vsel %vm5525_vm1, %v5499_v13, 0.0  ;;  %v5331_v12 = vsel %vm1586_vm13, %v16285_v38, %v5329_v53  ;;  %v5339_v53 = vperm.slane %v13154_v43, %v16229_v17  ;;  %v5358_v43 = vperm.slane %v13277_v33, %v16238_v1 }
 0xd73   : > { %v13402_v29 = vpop.permute.xlu0 %5228  ;;  %v5333_v14 = vsel %vm1590_vm14, %v5332_v21, %v5331_v12  ;;  %v5622_v41 = vadd.f32 %v5621_v15, %v5620_v50  ;;  %v5638_v13 = vsel %vm5525_vm1, %v5505_v52, 0.0  ;;  %v5658_v56 = vadd.f32 %v5657_v63, %v5656_v44  ;;  %v16288_v21 = vld [vmem:[#allocation61_spill] sm:$0xff] }
 0xd74   : > { %v5513_v59 = vmul.f32 %v13402_v29, %v16283_v11  ;;  %v5639_v47 = vadd.f32 %v5638_v13, %v5637_v4  ;;  %v5514_v55 = vmul.f32 %v13355_v16, %v16288_v21  ;;  %v5353_v52 = vperm.slane %v13219_v2, %v16230_v40  ;;  %v16290_v2 = vld [vmem:[#allocation191_spill] sm:$0xff] }
 0xd75   : > { %v13449_v63 = vsel %vm1594_vm15, %v5334_v5, %v5333_v14  ;;  %v5340_v4 = vsel %vm1574_vm10, %v5339_v53, %v5338_v25  ;;  %v5508_v12 = vmul.f32 %v13246_v32, %v16290_v2  ;;  %v5642_v33 = vsel %vm5525_vm1, %v5507_v23, 0.0 }
 0xd76   : > { %v5659_v39 = vsel %vm5525_vm1, %v5513_v59, 0.0  ;;  %v13441_v59 = vsel %vm624_vm4, %v5322_v10, %v13324_v51  ;;  %v5624_v51 = vadd.f32 %v13338_v20, %v5622_v41  ;;  %v16289_v10 = vld [vmem:[#allocation59_spill] sm:$0xff]  ;;  %v5641_v5 = vadd.f32 %v5640_v48, %v5639_v47  ;;  %v16294_v47 = vld [vmem:[#allocation90_spill] sm:$0xff] }
 0xd77   : > { %5764 = vrot.lane.b32.xlu2 %v16286_v31, %s8249_s14  ;;  %v5660_v44 = vadd.f32 %v5659_v39, %v5658_v56  ;;  %v5515_v38 = vmul.f32 %v13343_v22, %v16289_v10  ;;  %v13462_v39 = vpop.permute.xlu2 %5252  ;;  %v5661_v14 = vsel %vm5525_vm1, %v5514_v55, 0.0  ;;  %v5355_v25 = vsel %vm1574_vm10, %v5354_v30, %v5353_v52  ;;  %v16293_v56 = vld [vmem:[#allocation81_spill] sm:$0xff] }
 0xd78   : > { %v16292_v20 = vperm.slane %v16268_v42, %v16234_v7  ;;  %v5356_v13 = vperm.slane %v13297_v60, %v16234_v7  ;;  %v5517_v23 = vmul.f32 %v13412_v45, %v16293_v56  ;;  %v5364_v48 = vperm.slane %v13343_v22, %v10101_v8  ;;  %v16295_v42 = vld [vmem:[#allocation79_spill] sm:$0xff] }
 0xd79   : > { %v5662_v53 = vadd.f32 %v5661_v14, %v5660_v44  ;;  %v5518_v55 = vmul.f32 %v13399_v3, %v16294_v47  ;;  %v5643_v52 = vadd.f32 %v5642_v33, %v5641_v5  ;;  %v5663_v60 = vsel %vm5525_vm1, %v5515_v38, 0.0 }
 0xd7a   : > { %v5342_v41 = vsel %vm1578_vm11, %v16292_v20, %v5340_v4  ;;  %v5250_v50 = vpop.permute.xlu1 %5249  ;;  %v5625_v4 = vrot.slane %v5624_v51, 4  ;;  %v5345_v20 = vperm.slane %v13199_v0, %v15714_v58  ;;  %v5357_v44 = vsel %vm1578_vm11, %v5356_v13, %v5355_v25 }
 0xd7b   : > { %v13454_v15 = vpop.permute.xlu0 %5237  ;;  %v5344_v30 = vsel %vm1582_vm12, %v5343_v49, %v5342_v41  ;;  %v5369_v22 = vperm.slane %v13399_v3, %v16229_v17  ;;  %v5644_v14 = vsel %vm5525_vm1, %v5508_v12, 0.0  ;;  %v5360_v49 = vperm.slane %v13402_v29, %v15714_v58  ;;  %v16296_v29 = vld [vmem:[#allocation104_spill] sm:$0xff] }
 0xd7c   : > { %v5516_v31 = vmul.f32 %v13454_v15, %v16291_v24  ;;  %v5346_v5 = vsel %vm1586_vm13, %v5345_v20, %v5344_v30  ;;  %v5368_v38 = vperm.slane %v13412_v45, %v16230_v40  ;;  %v5673_v41 = vsel %vm5525_vm1, %v5517_v23, 0.0  ;;  %v16297_v20 = vld [vmem:[#allocation91_spill] sm:$0xff] }
 0xd7d   : > { %v5664_v0 = vadd.f32 %v5663_v60, %v5662_v53  ;;  %v5674_v25 = vsel %vm5525_vm1, %v5518_v55, 0.0  ;;  %v5349_v3 = vperm.slane %v13303_v57, %v10101_v8  ;;  %v5645_v13 = vadd.f32 %v5644_v14, %v5643_v52  ;;  %v16299_v52 = vld [vmem:[#allocation109_spill] sm:$0xff] }
 0xd7e   : > { %v5665_v33 = vsel %vm5525_vm1, %v5516_v31, 0.0  ;;  %v5359_v12 = vsel %vm1582_vm12, %v5358_v43, %v5357_v44  ;;  %v5520_v24 = vmul.f32 %v5250_v50, %v16296_v29  ;;  %v5626_v45 = vadd.f32 %v5625_v4, %v5624_v51 }
 0xd7f   : > { %5770 = vrot.lane.b32.xlu2 %v16295_v42, %s8249_s14  ;;  %v5666_v31 = vadd.f32 %v5665_v33, %v5664_v0  ;;  %v16298_v23 = vperm.slane %v16278_v27, %v10055_v36  ;;  %v5675_v55 = vadd.f32 %v5674_v25, %v5673_v41  ;;  %v5361_v57 = vsel %vm1586_vm13, %v5360_v49, %v5359_v12  ;;  %v5262_v33 = vpop.permute.xlu2 %5261  ;;  %v16300_v41 = vld [vmem:[#allocation102_spill] sm:$0xff] }
 0xd80   : > { %v5521_v43 = vmul.f32 %v13462_v39, %v16299_v52  ;;  %v5362_v60 = vperm.slane %v13355_v16, %v10055_v36  ;;  %v5370_v44 = vsel %vm1574_vm10, %v5369_v22, %v5368_v38  ;;  %v5646_v4 = vrot.slane %v5645_v13, 4 }
 0xd81   : > { %v5348_v53 = vsel %vm1590_vm14, %v16298_v23, %v5346_v5  ;;  %v5373_v0 = vperm.slane %v5250_v50, %v16238_v1  ;;  %v5678_v16 = vsel %vm5525_vm1, %v5520_v24, 0.0  ;;  %v5667_v25 = vrot.slane %v5666_v31, 4 }
 0xd82   : > { %v5350_v51 = vsel %vm1594_vm15, %v5349_v3, %v5348_v53  ;;  %v5363_v49 = vsel %vm1590_vm14, %v5362_v60, %v5361_v57  ;;  %v5627_v22 = vrot.slane %v5626_v45, 2  ;;  %v5366_v38 = vperm.slane %v13454_v15, %v10106_v46  ;;  %v5259_v3 = vpop.permute.xlu1 %5258 }
 0xd83   : > { %v5247_v42 = vpop.permute.xlu0 %5246  ;;  %v5381_v23 = vperm.slane %v5262_v33, %v10106_v46  ;;  %v5647_v24 = vadd.f32 %v5646_v4, %v5645_v13  ;;  %v5365_v57 = vsel %vm1594_vm15, %v5364_v48, %v5363_v49  ;;  %v5668_v60 = vadd.f32 %v5667_v25, %v5666_v31 }
 0xd84   : > { %v5371_v30 = vperm.slane %v5247_v42, %v16234_v7  ;;  %v5519_v10 = vmul.f32 %v5247_v42, %v16297_v20  ;;  %v5375_v42 = vperm.slane %v13462_v39, %v15714_v58  ;;  %v16303_v39 = vld [vmem:[#allocation158_spill] sm:$0xff]  ;;  %v5379_v13 = vperm.slane %v5259_v3, %v10101_v8 }
 0xd85   : > { %v5648_v49 = vrot.slane %v5647_v24, 2 }
 0xd86   : > { %v5676_v14 = vsel %vm5525_vm1, %v5519_v10, 0.0  ;;  %v5372_v27 = vsel %vm1578_vm11, %v5371_v30, %v5370_v44  ;;  %v5351_v10 = vperm.slane %v13246_v32, %v10106_v46  ;;  %v5680_v30 = vsel %vm5525_vm1, %v5521_v43, 0.0 }
 0xd87   : > { %v5677_v5 = vadd.f32 %v5676_v14, %v5675_v55  ;;  %5776 = vrot.lane.b32.xlu2 %v16300_v41, %s8249_s14  ;;  %v5374_v50 = vsel %vm1582_vm12, %v5373_v0, %v5372_v27  ;;  %v16301_v32 = vperm.slane %v16260_v62, %v10106_v46  ;;  %v5523_v44 = vmul.f32 %v5259_v3, %v16303_v39  ;;  %v16304_v14 = vld [vmem:[#allocation115_spill] sm:$0xff]  ;;  %v16306_v41 = vld [vmem:[#allocation145_spill] sm:$0xff] }
 0xd88   : > { %v5352_v15 = vsel %vm16302_vm7, %v5351_v10, %v5350_v51  ;;  %v5376_v4 = vsel %vm1586_vm13, %v5375_v42, %v5374_v50  ;;  %v5367_v62 = vsel %vm16305_vm8, %v5366_v38, %v5365_v57  ;;  %v5669_v3 = vrot.slane %v5668_v60, 2 }
 0xd89   : > { %v5679_v12 = vadd.f32 %v5678_v16, %v5677_v5  ;;  %v5337_v55 = vsel %vm16160_vm0, %v16301_v32, %v13449_v63  ;;  %v5524_v63 = vmul.f32 %v5262_v33, %v16306_v41  ;;  %v16307_v16 = vld [vmem:[#allocation126_spill] sm:$0xff]  ;;  %v5684_v38 = vsel %vm5525_vm1, %v5523_v44, 0.0 }
 0xd8a   : > { %v5386_v31 = vsel %vm627_vm5, %v5337_v55, %v13441_v59  ;;  %vm16309_vm0 = vcmask 1046534   ;;  %v16310_v42 = vrot.slane %v13230_v19, 2  ;;  %vm16312_vm7 = vcmask 1047559  }
 0xd8b   : > { %v5256_v53 = vpop.permute.xlu0 %5255  ;;  %v5681_v27 = vadd.f32 %v5680_v30, %v5679_v12  ;;  %v5387_v10 = vsel %vm630_vm6, %v5352_v15, %v5386_v31  ;;  %v16311_v30 = vrot.slane %v13414_v26, 2  ;;  %v5628_v55 = vadd.f32 %v5627_v22, %v5626_v45  ;;  %v16314_v45 = vld [vmem:[#allocation18_spill] sm:$0xff] }
 0xd8c   : > { %v5377_v43 = vperm.slane %v5256_v53, %v10055_v36  ;;  %v5522_v5 = vmul.f32 %v5256_v53, %v16304_v14  ;;  %v5388_v12 = vsel %vm16309_vm0, %v5367_v62, %v5387_v10  ;;  %v5544_v59 = vadd.f32 %v16310_v42, %v13230_v19 }
 0xd8d   : > { %v5607_v50 = vadd.f32 %v16311_v30, %v13414_v26  ;;  %v5686_v15 = vsel %vm5525_vm1, %v5524_v63, 0.0  ;;  %vm16313_vm8 = vcmask 523264   ;;  %v5649_v44 = vadd.f32 %v5648_v49, %v5647_v24 }
 0xd8e   : > { %v5378_v51 = vsel %vm1590_vm14, %v5377_v43, %v5376_v4  ;;  %v5682_v48 = vsel %vm5525_vm1, %v5522_v5, 0.0  ;;  %v5587_v5 = vrot.slane %v13335_v37, 1  ;;  %v5670_v19 = vadd.f32 %v5669_v3, %v5668_v60  ;;  %vm16316_vm1 = vmmov %vm16309_vm0 }
 0xd8f   : > { %v5683_v0 = vadd.f32 %v5682_v48, %v5681_v27  ;;  %5782 = vrot.lane.b32.xlu2 %v16307_v16, %s8249_s14  ;;  %v5380_v25 = vsel %vm1594_vm15, %v5379_v13, %v5378_v51  ;;  %v5545_v13 = vrot.slane %v5544_v59, 1  ;;  %v5608_v4 = vrot.slane %v5607_v50, 1 }
 0xd90   : > { %v5382_v33 = vsel %vm16308_vm9, %v5381_v23, %v5380_v25  ;;  %v5566_v23 = vrot.slane %v13289_v34, 1  ;;  %v5629_v26 = vrot.slane %v5628_v55, 1  ;;  %v5650_v22 = vrot.slane %v5649_v44, 1  ;;  %vm16317_vm9 = vmmov %vm16312_vm7 }
 0xd91   : > { %v5685_v53 = vadd.f32 %v5684_v38, %v5683_v0  ;;  %v5389_v32 = vsel %vm16312_vm7, %v5382_v33, %v5388_v12  ;;  %v5588_v51 = vadd.f32 %v5587_v5, %v13335_v37  ;;  %v5671_v48 = vrot.slane %v5670_v19, 1  ;;  %v16315_v12 = vld [vmem:[#allocation36_spill] sm:$0xff] }
 0xd92   : > { %v5391_v57 = vsel %vm16313_vm8, %v5389_v32, 0.0  ;;  %v5567_v62 = vadd.f32 %v5566_v23, %v13289_v34  ;;  %v5546_v24 = vadd.f32 %v5545_v13, %v5544_v59  ;;  %v5609_v31 = vadd.f32 %v5608_v4, %v5607_v50  ;;  %v16318_v50 = vld [vmem:[#allocation58_spill] sm:$0xff]  ;;  %v16320_v32 = vld [vmem:[#allocation87_spill] sm:$0xff]  ;;  %v16324_v23 = vld [vmem:[#allocation172_spill] sm:$0xff] }
 0xd93   : > { %v5687_v43 = vadd.f32 %v5686_v15, %v5685_v53  ;;  %5392 = vadd.xlane.f32.xlu0 %v5391_v57  ;;  %v5630_v0 = vadd.f32 %v5629_v26, %v5628_v55  ;;  %v5651_v16 = vadd.f32 %v5650_v22, %v5649_v44  ;;  %v5672_v10 = vadd.f32 %v5671_v48, %v5670_v19  ;;  %v16319_v53 = vld [vmem:[#allocation76_spill] sm:$0xff]  ;;  %v16323_v57 = vld [vmem:[#allocation141_spill] sm:$0xff]  ;;  %v16325_v44 = vld [vmem:[#allocation179_spill] sm:$0xff]  ;;  %v5717_v19 = vpop.permute.xlu2 %5716 }
 0xd94   : > { %v5702_v25 = vsel %vm618_vm2, %v5567_v62, %v5546_v24  ;;  %v16321_v55 = vld [vmem:[#allocation100_spill] sm:$0xff]  ;;  %vm16328_vm0 = vcmask 130048   ;;  %v16329_v4 = vld [vmem:[#allocation55_spill] sm:$0xff]  ;;  %v16331_v26 = vld [vmem:[#allocation74_spill] sm:$0xff]  ;;  %vm5714_vm8 = vcmask 392448  }
 0xd95   : > { %v5688_v27 = vrot.slane %v5687_v43, 4  ;;  %v5703_v3 = vsel %vm621_vm3, %v5588_v51, %v5702_v25  ;;  %v16322_v15 = vld [vmem:[#allocation108_spill] sm:$0xff]  ;;  %v5719_v13 = vsel %vm16328_vm0, %v5717_v19, 0.0  ;;  %v16332_v62 = vld [vmem:[#allocation93_spill] sm:$0xff]  ;;  %v16334_v22 = vld [vmem:[#allocation110_spill] sm:$0xff] }
 0xd96   : > { %v5704_v38 = vsel %vm624_vm4, %v5609_v31, %v5703_v3  ;;  %v16327_v5 = vld [vmem:[#allocation44_spill] sm:$0xff]  ;;  %v16335_v51 = vld [vmem:[#allocation70_spill] sm:$0xff]  ;;  %v16336_v48 = vld [vmem:[#allocation139_spill] sm:$0xff] }
 0xd97   : > { %5788 = vrot.lane.b32.xlu2 %v16314_v45, %s8249_s14  ;;  %v5689_v63 = vadd.f32 %v5688_v27, %v5687_v43  ;;  %v5705_v33 = vsel %vm627_vm5, %v5630_v0, %v5704_v38  ;;  %v16326_v43 = vld [vmem:[#allocation30_spill] sm:$0xff]  ;;  %v16330_v27 = vld [vmem:[#allocation60_spill] sm:$0xff]  ;;  %v16341_v25 = vld [vmem:[#allocation37_spill] sm:$0xff] }
 0xd98   : > { %v5706_v42 = vsel %vm630_vm6, %v5651_v16, %v5705_v33  ;;  %v16333_v45 = vld [vmem:[#allocation98_spill] sm:$0xff]  ;;  %v16339_v0 = vld [vmem:[#allocation40_spill] sm:$0xff]  ;;  %v16340_v16 = vld [vmem:[#allocation17_spill] sm:$0xff] }
 0xd99   : > { %v5690_v49 = vrot.slane %v5689_v63, 2  ;;  %v5707_v59 = vsel %vm16316_vm1, %v5672_v10, %v5706_v42  ;;  %v16337_v24 = vld [vmem:[#allocation150_spill] sm:$0xff]  ;;  %v16342_v10 = vld [vmem:[#allocation24_spill] sm:$0xff]  ;;  %v16343_v3 = vld [vmem:[#allocation229_spill] sm:$0xff] }
 0xd9a   : > { %v16345_v33 = vld [vmem:[#allocation66_spill] sm:$0xff]  ;;  %v16346_v42 = vld [vmem:[#allocation64_spill] sm:$0xff]  ;;  %vm16350_vm7 = vmmov %vm16328_vm0 }
 0xd9b   : > { %v5691_v60 = vadd.f32 %v5690_v49, %v5689_v63  ;;  %v13614_v63 = vpop.permute.xlu2 %5722  ;;  %v16338_v49 = vld [vmem:[#allocation120_spill] sm:$0xff]  ;;  %vm16354_vm1 = vmmov %vm16328_vm0 }
 0xd9d   : > { %v5692_v34 = vrot.slane %v5691_v60, 1 }
 0xd9f   : > { %5794 = vrot.lane.b32.xlu2 %v16315_v12, %s8249_s14  ;;  %v5693_v37 = vadd.f32 %v5692_v34, %v5691_v60  ;;  %v16344_v34 = vld [vmem:[#allocation163_spill] sm:$0xff] }
 0xda0   : > { %v4795_v38 = vsub.f32 %v16344_v34, %v16343_v3  ;;  %v16360_v3 = vld [vmem:[#allocation56_spill] sm:$0xff]  ;;  %v16361_v34 = vld [vmem:[#allocation82_spill] sm:$0xff] }
 0xda1   : > { %v5708_v30 = vsel %vm16317_vm9, %v5693_v37, %v5707_v59  ;;  %v16347_v59 = vld [vmem:[#allocation92_spill] sm:$0xff]  ;;  %vm16357_vm9 = vmmov %vm16328_vm0 }
 0xda2   : > { %5709 = vrot.lane.b32.xlu1 %v5708_v30, %s8244_s30  ;;  %v4796_v37 = vmul.f32 1.442695, %v4795_v38 }
 0xda3   : > { %v13622_v31 = vpop.permute.xlu2 %5724 }
 0xda4   : > { %7971 = vpow2.f32 %v4796_v37 }
 0xda7   : > { %5732 = vrot.lane.b32.xlu0 %v16318_v50, %s8249_s14  ;;  %5800 = vrot.lane.b32.xlu2 %v16319_v53, %s8249_s14 }
 0xdaa   : > { %v7972_v50 = vpop.eup %7971 }
 0xdab   : > { %v5727_v60 = vpop.permute.xlu2 %5726 }
 0xdaf   : > { %5740 = vrot.lane.b32.xlu0 %v16320_v32, %s8249_s14  ;;  %5806 = vrot.lane.b32.xlu2 %v16321_v55, %s8249_s14  ;;  %v16348_v55 = vld [vmem:[#allocation89_spill] sm:$0xff] }
 0xdb3   : > { %v13638_v12 = vpop.permute.xlu2 %5728 }
 0xdb7   : > { %5744 = vrot.lane.b32.xlu0 %v16322_v15, %s8249_s14  ;;  %5812 = vrot.lane.b32.xlu2 %v16323_v57, %s8249_s14  ;;  %v16349_v15 = vld [vmem:[#allocation118_spill] sm:$0xff]  ;;  %v5920_v57 = vsel %vm16350_vm7, %v5727_v60, 0.0  ;;  %vm16362_vm7 = vmmov %vm16328_vm0 }
 0xdbb   : > { %v13644_v53 = vpop.permute.xlu2 %5730 }
 0xdbf   : > { %5750 = vrot.lane.b32.xlu0 %v16324_v23, %s8249_s14  ;;  %5818 = vrot.lane.b32.xlu2 %v16325_v44, %s8249_s14  ;;  %v16351_v23 = vld [vmem:[#allocation189_spill] sm:$0xff] }
 0xdc0   : > { %v5396_v44 = vmul.f32 %v7972_v50, %v16351_v23 }
 0xdc7   : > { %5756 = vrot.lane.b32.xlu0 %v16326_v43, %s8249_s14  ;;  %5824 = vrot.lane.b32.xlu2 %v16327_v5, %s8249_s14  ;;  %v13652_v5 = vpop.permute.xlu2 %5734 }
 0xdcc   : > { %5720 = vadd.xlane.f32.xlu1 %v5719_v13  ;;  %v16352_v13 = vld [vmem:[#allocation114_spill] sm:$0xff] }
 0xdcf   : > { %5762 = vrot.lane.b32.xlu0 %v16329_v4, %s8249_s14  ;;  %5830 = vrot.lane.b32.xlu2 %v16330_v27, %s8249_s14 }
 0xdd7   : > { %5768 = vrot.lane.b32.xlu0 %v16331_v26, %s8249_s14  ;;  %5836 = vrot.lane.b32.xlu2 %v16332_v62, %s8249_s14  ;;  %v16353_v26 = vld [vmem:[#allocation193_spill] sm:$0xff] }
 0xddf   : > { %5774 = vrot.lane.b32.xlu0 %v16333_v45, %s8249_s14  ;;  %5842 = vrot.lane.b32.xlu2 %v16334_v22, %s8249_s14  ;;  %v16355_v22 = vld [vmem:[#allocation161_spill] sm:$0xff] }
 0xde5   : > { %5736 = vrot.lane.b32.xlu1 %v16335_v51, %s8249_s14  ;;  %v5739_v51 = vpop.permute.xlu2 %5738 }
 0xde7   : > { %5780 = vrot.lane.b32.xlu0 %v16336_v48, %s8249_s14  ;;  %5848 = vrot.lane.b32.xlu2 %v16337_v24, %s8249_s14  ;;  %v16356_v48 = vld [vmem:[#allocation23_spill] sm:$0xff] }
 0xded   : > { %5748 = vrot.lane.b32.xlu1 %v16338_v49, %s8249_s14  ;;  %v5938_v49 = vsel %vm16357_vm9, %v5739_v51, 0.0  ;;  %v13670_v60 = vpop.permute.xlu2 %5742  ;;  %vm16370_vm9 = vmmov %vm16328_vm0  ;;  %v16373_v51 = vld [vmem:[#allocation50_spill] sm:$0xff] }
 0xdef   : > { %5786 = vrot.lane.b32.xlu0 %v16339_v0, %s8249_s14  ;;  %v16358_v0 = vld [vmem:[#allocation22_spill] sm:$0xff] }
 0xdf5   : > { %5754 = vrot.lane.b32.xlu1 %v16340_v16, %s8249_s14  ;;  %v16359_v16 = vld [vmem:[#allocation62_spill] sm:$0xff]  ;;  %v13678_v37 = vpop.permute.xlu2 %5746 }
 0xdf7   : > { %5792 = vrot.lane.b32.xlu0 %v16341_v25, %s8249_s14 }
 0xdfd   : > { %5760 = vrot.lane.b32.xlu1 %v16342_v10, %s8249_s14 }
 0xdff   : > { %5798 = vrot.lane.b32.xlu0 %v16345_v33, %s8249_s14 }
 0xe05   : > { %5766 = vrot.lane.b32.xlu1 %v16346_v42, %s8249_s14  ;;  %v16363_v42 = vld [vmem:[#allocation84_spill] sm:$0xff] }
 0xe06   : > { %v5393_v30 = vpop.xlane.xlu0 %5392 }
 0xe07   : > { %5804 = vrot.lane.b32.xlu0 %v16347_v59, %s8249_s14  ;;  %v5394_v32 = vadd.f32 %v7972_v50, %v5393_v30  ;;  %v16364_v59 = vld [vmem:[#allocation106_spill] sm:$0xff] }
 0xe09   : > { %7973 = vrcp.f32 %v5394_v32  ;;  %v13685_v32 = vpop.permute.xlu2 %5752 }
 0xe0d   : > { %5772 = vrot.lane.b32.xlu1 %v16348_v55, %s8249_s14  ;;  %v16366_v55 = vld [vmem:[#allocation105_spill] sm:$0xff] }
 0xe0f   : > { %5810 = vrot.lane.b32.xlu0 %v16349_v15, %s8249_s14  ;;  %v7974_v4 = vpop.eup %7973  ;;  %v16367_v15 = vld [vmem:[#allocation162_spill] sm:$0xff] }
 0xe10   : > { %5921 = vadd.xlane.f32.xlu2 %v5920_v57 }
 0xe14   : > { %v5710_v43 = vpop.permute.xlu1 %5709 }
 0xe15   : > { %v5712_v19 = vadd.f32 %v5710_v43, %v5396_v44  ;;  %5778 = vrot.lane.b32.xlu1 %v16352_v13, %s8249_s14  ;;  %v16369_v43 = vld [vmem:[#allocation140_spill] sm:$0xff] }
 0xe17   : > { %v5713_v27 = vmul.f32 %v7974_v4, %v5712_v19  ;;  %5816 = vrot.lane.b32.xlu0 %v16353_v26, %s8249_s14  ;;  %v13694_v19 = vpop.permute.xlu2 %5758 }
 0xe19   : > { %5715 = vst.msk [vmem:[#allocation2] sm:$0xff] %vm5714_vm8, %v5713_v27  ;;  %v5733_v62 = vpop.permute.xlu0 %5732  ;;  %vm16365_vm8 = vmmov %vm16328_vm0  ;;  %v16371_v27 = vld [vmem:[#allocation42_spill] sm:$0xff] }
 0xe1a   : > { %v5929_v45 = vsel %vm16354_vm1, %v5733_v62, 0.0  ;;  %vm16368_vm1 = vmmov %vm16328_vm0 }
 0xe1b   : > { %5930 = vadd.xlane.f32.xlu2 %v5929_v45 }
 0xe1d   : > { %5784 = vrot.lane.b32.xlu1 %v16355_v22, %s8249_s14 }
 0xe1f   : > { %5822 = vrot.lane.b32.xlu0 %v16356_v48, %s8249_s14  ;;  %v13701_v62 = vpop.permute.xlu2 %5764 }
 0xe21   : > { %v13663_v24 = vpop.permute.xlu0 %5740 }
 0xe23   : > { %5939 = vadd.xlane.f32.xlu2 %v5938_v49 }
 0xe25   : > { %5790 = vrot.lane.b32.xlu1 %v16358_v0, %s8249_s14 }
 0xe27   : > { %5828 = vrot.lane.b32.xlu0 %v16359_v16, %s8249_s14  ;;  %v13707_v16 = vpop.permute.xlu2 %5770 }
 0xe29   : > { %v5745_v25 = vpop.permute.xlu0 %5744 }
 0xe2a   : > { %v5947_v10 = vsel %vm16328_vm0, %v5745_v25, 0.0  ;;  %v16375_v25 = vld [vmem:[#allocation72_spill] sm:$0xff] }
 0xe2b   : > { %5948 = vadd.xlane.f32.xlu2 %v5947_v10 }
 0xe2d   : > { %5796 = vrot.lane.b32.xlu1 %v16360_v3, %s8249_s14 }
 0xe2f   : > { %5834 = vrot.lane.b32.xlu0 %v16361_v34, %s8249_s14 }
 0xe31   : > { %v5751_v38 = vpop.permute.xlu0 %5750 }
 0xe32   : > { %v5956_v33 = vsel %vm16362_vm7, %v5751_v38, 0.0  ;;  %vm16374_vm7 = vmmov %vm16328_vm0  ;;  %v13712_v38 = vpop.permute.xlu2 %5776 }
 0xe33   : > { %5957 = vadd.xlane.f32.xlu2 %v5956_v33  ;;  %v16377_v33 = vld [vmem:[#allocation94_spill] sm:$0xff] }
 0xe35   : > { %5802 = vrot.lane.b32.xlu1 %v16363_v42, %s8249_s14 }
 0xe37   : > { %5840 = vrot.lane.b32.xlu0 %v16364_v59, %s8249_s14 }
 0xe39   : > { %v5757_v30 = vpop.permute.xlu0 %5756 }
 0xe3a   : > { %v5965_v50 = vsel %vm16365_vm8, %v5757_v30, 0.0  ;;  %vm16376_vm8 = vmmov %vm16328_vm0 }
 0xe3b   : > { %5966 = vadd.xlane.f32.xlu2 %v5965_v50 }
 0xe3d   : > { %5808 = vrot.lane.b32.xlu1 %v16366_v55, %s8249_s14  ;;  %v16380_v55 = vld [vmem:[#allocation117_spill] sm:$0xff] }
 0xe3f   : > { %5846 = vrot.lane.b32.xlu0 %v16367_v15, %s8249_s14  ;;  %v13699_v26 = vpop.xlane.xlu1 %5720  ;;  %v13721_v15 = vpop.permute.xlu2 %5782 }
 0xe40   : > { %16372 = vst [vmem:[#allocation151_spill] sm:$0xff] %v13699_v26 }
 0xe41   : > { %v5763_v57 = vpop.permute.xlu0 %5762 }
 0xe42   : > { %v5974_v44 = vsel %vm16368_vm1, %v5763_v57, 0.0  ;;  %vm16378_vm1 = vmmov %vm16328_vm0  ;;  %v5926_v57 = vsel %vm16328_vm0, %v13644_v53, 0.0 }
 0xe43   : > { %5975 = vadd.xlane.f32.xlu2 %v5974_v44  ;;  %v5917_v42 = vsel %vm16378_vm1, %v13622_v31, 0.0  ;;  %vm16383_vm1 = vmmov %vm16328_vm0 }
 0xe45   : > { %5814 = vrot.lane.b32.xlu1 %v16369_v43, %s8249_s14 }
 0xe49   : > { %v5769_v13 = vpop.permute.xlu0 %5768 }
 0xe4a   : > { %v5983_v4 = vsel %vm16370_vm9, %v5769_v13, 0.0  ;;  %vm16379_vm9 = vmmov %vm16328_vm0 }
 0xe4b   : > { %5984 = vadd.xlane.f32.xlu2 %v5983_v4  ;;  %v13727_v4 = vpop.permute.xlu2 %5788 }
 0xe4d   : > { %5820 = vrot.lane.b32.xlu1 %v16371_v27, %s8249_s14 }
 0xe51   : > { %v5775_v45 = vpop.permute.xlu0 %5774 }
 0xe52   : > { %v5992_v22 = vsel %vm16328_vm0, %v5775_v45, 0.0 }
 0xe53   : > { %5993 = vadd.xlane.f32.xlu2 %v5992_v22 }
 0xe55   : > { %5826 = vrot.lane.b32.xlu1 %v16373_v51, %s8249_s14 }
 0xe57   : > { %v5737_v48 = vpop.permute.xlu1 %5736 }
 0xe59   : > { %v5781_v49 = vpop.permute.xlu0 %5780 }
 0xe5a   : > { %v6001_v0 = vsel %vm16374_vm7, %v5781_v49, 0.0  ;;  %vm16381_vm7 = vmmov %vm16328_vm0 }
 0xe5b   : > { %6002 = vadd.xlane.f32.xlu2 %v6001_v0  ;;  %v13733_v0 = vpop.permute.xlu2 %5794 }
 0xe5d   : > { %5832 = vrot.lane.b32.xlu1 %v16375_v25, %s8249_s14 }
 0xe5f   : > { %v5749_v3 = vpop.permute.xlu1 %5748 }
 0xe61   : > { %v5787_v10 = vpop.permute.xlu0 %5786 }
 0xe62   : > { %v6010_v34 = vsel %vm16376_vm8, %v5787_v10, 0.0  ;;  %vm16382_vm8 = vmmov %vm16328_vm0 }
 0xe63   : > { %6011 = vadd.xlane.f32.xlu2 %v6010_v34  ;;  %v5935_v13 = vsel %vm16382_vm8, %v5737_v48, 0.0  ;;  %vm16386_vm8 = vmmov %vm16328_vm0 }
 0xe65   : > { %5838 = vrot.lane.b32.xlu1 %v16377_v33, %s8249_s14  ;;  %v13737_v33 = vpop.permute.xlu2 %5800 }
 0xe67   : > { %v5755_v50 = vpop.permute.xlu1 %5754 }
 0xe69   : > { %5918 = vadd.xlane.f32.xlu0 %v5917_v42  ;;  %v5793_v59 = vpop.permute.xlu0 %5792 }
 0xe6a   : > { %v6019_v30 = vsel %vm16379_vm9, %v5793_v59, 0.0  ;;  %vm16384_vm9 = vmmov %vm16328_vm0 }
 0xe6b   : > { %6020 = vadd.xlane.f32.xlu2 %v6019_v30  ;;  %v5944_v51 = vsel %vm16384_vm9, %v13670_v60, 0.0  ;;  %vm16388_vm9 = vmmov %vm16328_vm0 }
 0xe6d   : > { %5844 = vrot.lane.b32.xlu1 %v16380_v55, %s8249_s14  ;;  %v5914_v55 = vsel %vm16328_vm0, %v13614_v63, 0.0  ;;  %s7261_s14 = scalar_lea.sflag [#allocation5], %s8385_s23 }
 0xe6f   : > { %v5761_v31 = vpop.permute.xlu1 %5760 }
 0xe71   : > { %5927 = vadd.xlane.f32.xlu0 %v5926_v57  ;;  %v5799_v44 = vpop.permute.xlu0 %5798 }
 0xe72   : > { %v6028_v43 = vsel %vm16381_vm7, %v5799_v44, 0.0  ;;  %vm16385_vm7 = vmmov %vm16328_vm0 }
 0xe73   : > { %6029 = vadd.xlane.f32.xlu2 %v6028_v43  ;;  %v5953_v48 = vsel %vm16385_vm7, %v5749_v3, 0.0  ;;  %v13743_v3 = vpop.permute.xlu2 %5806  ;;  %vm16389_vm7 = vmmov %vm16328_vm0 }
 0xe74   : > { %v5971_v57 = vsel %vm16389_vm7, %v5761_v31, 0.0  ;;  %vm16393_vm7 = vmmov %vm16328_vm0 }
 0xe75   : > { %v5932_v31 = vsel %vm16393_vm7, %v13652_v5, 0.0  ;;  %vm16397_vm7 = vmmov %vm16328_vm0 }
 0xe77   : > { %v5767_v22 = vpop.permute.xlu1 %5766 }
 0xe79   : > { %5936 = vadd.xlane.f32.xlu0 %v5935_v13  ;;  %v5805_v27 = vpop.permute.xlu0 %5804 }
 0xe7a   : > { %v6037_v45 = vsel %vm16383_vm1, %v5805_v27, 0.0  ;;  %vm16387_vm1 = vmmov %vm16328_vm0 }
 0xe7b   : > { %6038 = vadd.xlane.f32.xlu2 %v6037_v45  ;;  %v5962_v42 = vsel %vm16387_vm1, %v5755_v50, 0.0  ;;  %vm16391_vm1 = vmmov %vm16328_vm0  ;;  %v13750_v45 = vpop.permute.xlu2 %5812 }
 0xe7c   : > { %v5923_v13 = vsel %vm16391_vm1, %v13638_v12, 0.0  ;;  %vm16395_vm1 = vmmov %vm16328_vm0 }
 0xe7f   : > { %v5773_v10 = vpop.permute.xlu1 %5772 }
 0xe81   : > { %5945 = vadd.xlane.f32.xlu0 %v5944_v51  ;;  %v5811_v53 = vpop.permute.xlu0 %5810 }
 0xe82   : > { %v6046_v49 = vsel %vm16328_vm0, %v5811_v53, 0.0 }
 0xe83   : > { %6047 = vadd.xlane.f32.xlu2 %v6046_v49 }
 0xe87   : > { %v5779_v30 = vpop.permute.xlu1 %5778 }
 0xe89   : > { %5954 = vadd.xlane.f32.xlu0 %v5953_v48  ;;  %v5817_v25 = vpop.permute.xlu0 %5816 }
 0xe8a   : > { %v6055_v34 = vsel %vm16386_vm8, %v5817_v25, 0.0  ;;  %vm16390_vm8 = vmmov %vm16328_vm0  ;;  %v13757_v25 = vpop.permute.xlu2 %5818 }
 0xe8b   : > { %6056 = vadd.xlane.f32.xlu2 %v6055_v34  ;;  %v5998_v34 = vsel %vm16328_vm0, %v5779_v30, 0.0 }
 0xe8f   : > { %v5785_v50 = vpop.permute.xlu1 %5784 }
 0xe91   : > { %5963 = vadd.xlane.f32.xlu0 %v5962_v42  ;;  %v5823_v60 = vpop.permute.xlu0 %5822 }
 0xe92   : > { %v6064_v59 = vsel %vm16388_vm9, %v5823_v60, 0.0  ;;  %vm16392_vm9 = vmmov %vm16328_vm0 }
 0xe93   : > { %6065 = vadd.xlane.f32.xlu2 %v6064_v59  ;;  %v5980_v27 = vsel %vm16392_vm9, %v5767_v22, 0.0  ;;  %vm16396_vm9 = vmmov %vm16328_vm0 }
 0xe94   : > { %v5941_v22 = vsel %vm16396_vm9, %v13663_v24, 0.0  ;;  %vm16400_vm9 = vmmov %vm16328_vm0 }
 0xe95   : > { %v5959_v24 = vsel %vm16400_vm9, %v13685_v32, 0.0  ;;  %vm16404_vm9 = vmmov %vm16328_vm0 }
 0xe97   : > { %5915 = vadd.xlane.f32.xlu1 %v5914_v55  ;;  %v5791_v53 = vpop.permute.xlu1 %5790 }
 0xe99   : > { %5972 = vadd.xlane.f32.xlu0 %v5971_v57  ;;  %v5829_v44 = vpop.permute.xlu0 %5828 }
 0xe9a   : > { %v6073_v43 = vsel %vm16390_vm8, %v5829_v44, 0.0  ;;  %vm16394_vm8 = vmmov %vm16328_vm0  ;;  %v6016_v44 = vsel %vm16328_vm0, %v5791_v53, 0.0 }
 0xe9b   : > { %6074 = vadd.xlane.f32.xlu2 %v6073_v43  ;;  %v5989_v49 = vsel %vm16394_vm8, %v5773_v10, 0.0  ;;  %v13763_v10 = vpop.permute.xlu2 %5824  ;;  %vm16398_vm8 = vmmov %vm16328_vm0 }
 0xe9c   : > { %v5950_v59 = vsel %vm16398_vm8, %v13678_v37, 0.0  ;;  %vm16402_vm8 = vmmov %vm16328_vm0 }
 0xe9f   : > { %5924 = vadd.xlane.f32.xlu1 %v5923_v13  ;;  %v5797_v5 = vpop.permute.xlu1 %5796 }
 0xea0   : > { %v6025_v37 = vsel %vm16402_vm8, %v5797_v5, 0.0  ;;  %vm16406_vm8 = vmmov %vm16328_vm0 }
 0xea1   : > { %5981 = vadd.xlane.f32.xlu0 %v5980_v27  ;;  %v5835_v63 = vpop.permute.xlu0 %5834 }
 0xea2   : > { %v6082_v51 = vsel %vm16328_vm0, %v5835_v63, 0.0 }
 0xea3   : > { %6083 = vadd.xlane.f32.xlu2 %v6082_v51  ;;  %v13770_v30 = vpop.permute.xlu2 %5830 }
 0xea7   : > { %5933 = vadd.xlane.f32.xlu1 %v5932_v31  ;;  %v5803_v57 = vpop.permute.xlu1 %5802  ;;  %v5986_v31 = vsel %vm16328_vm0, %v13707_v16, 0.0 }
 0xea8   : > { %v6034_v63 = vsel %vm16404_vm9, %v5803_v57, 0.0  ;;  %vm16410_vm9 = vmmov %vm16328_vm0 }
 0xea9   : > { %5990 = vadd.xlane.f32.xlu0 %v5989_v49  ;;  %v5841_v48 = vpop.permute.xlu0 %5840  ;;  %v6004_v16 = vsel %vm16410_vm9, %v13721_v15, 0.0  ;;  %vm16416_vm9 = vmmov %vm16328_vm0 }
 0xeaa   : > { %v6091_v12 = vsel %vm16395_vm1, %v5841_v48, 0.0  ;;  %vm16399_vm1 = vmmov %vm16328_vm0 }
 0xeab   : > { %6092 = vadd.xlane.f32.xlu2 %v6091_v12  ;;  %v6007_v55 = vsel %vm16399_vm1, %v5785_v50, 0.0  ;;  %v13776_v27 = vpop.permute.xlu2 %5836  ;;  %vm16403_vm1 = vmmov %vm16328_vm0 }
 0xeac   : > { %v5977_v50 = vsel %vm16403_vm1, %v13701_v62, 0.0  ;;  %v5995_v62 = vsel %vm16406_vm8, %v13712_v38, 0.0  ;;  %vm16407_vm1 = vmmov %vm16328_vm0 }
 0xead   : > { %vm16414_vm8 = vmmov %vm16328_vm0 }
 0xeaf   : > { %5942 = vadd.xlane.f32.xlu1 %v5941_v22  ;;  %v5809_v43 = vpop.permute.xlu1 %5808 }
 0xeb1   : > { %5999 = vadd.xlane.f32.xlu0 %v5998_v34  ;;  %v5847_v42 = vpop.permute.xlu0 %5846 }
 0xeb2   : > { %v6100_v60 = vsel %vm16397_vm7, %v5847_v42, 0.0  ;;  %vm16401_vm7 = vmmov %vm16328_vm0 }
 0xeb3   : > { %6101 = vadd.xlane.f32.xlu2 %v6100_v60  ;;  %v5968_v13 = vsel %vm16401_vm7, %v13694_v19, 0.0  ;;  %v13781_v51 = vpop.permute.xlu2 %5842  ;;  %vm16405_vm7 = vmmov %vm16328_vm0 }
 0xeb4   : > { %v6043_v19 = vsel %vm16405_vm7, %v5809_v43, 0.0  ;;  %vm16412_vm7 = vmmov %vm16328_vm0 }
 0xeb5   : > { %v6013_v38 = vsel %vm16412_vm7, %v13727_v4, 0.0  ;;  %v6031_v4 = vsel %vm16328_vm0, %v13737_v33, 0.0  ;;  %vm16418_vm7 = vmmov %vm16328_vm0 }
 0xeb7   : > { %5951 = vadd.xlane.f32.xlu1 %v5950_v59  ;;  %v5815_v32 = vpop.permute.xlu1 %5814 }
 0xeb8   : > { %v6052_v48 = vsel %vm16407_vm1, %v5815_v32, 0.0  ;;  %vm16415_vm1 = vmmov %vm16328_vm0 }
 0xeb9   : > { %6008 = vadd.xlane.f32.xlu0 %v6007_v55  ;;  %v6022_v57 = vsel %vm16415_vm1, %v13733_v0, 0.0  ;;  %vm16422_vm1 = vmmov %vm16328_vm0 }
 0xebb   : > { %v13786_v49 = vpop.permute.xlu2 %5848 }
 0xebf   : > { %5960 = vadd.xlane.f32.xlu1 %v5959_v24  ;;  %v5821_v53 = vpop.permute.xlu1 %5820 }
 0xec0   : > { %v6061_v42 = vsel %vm16328_vm0, %v5821_v53, 0.0 }
 0xec1   : > { %6017 = vadd.xlane.f32.xlu0 %v6016_v44 }
 0xec3   : > { %v13793_v34 = vpop.xlane.xlu2 %5921 }
 0xec4   : > { %16409 = vst [vmem:[#allocation212_spill] sm:$0xff] %v13793_v34 }
 0xec7   : > { %5969 = vadd.xlane.f32.xlu1 %v5968_v13  ;;  %v5827_v12 = vpop.permute.xlu1 %5826 }
 0xec8   : > { %v6070_v55 = vsel %vm16414_vm8, %v5827_v12, 0.0  ;;  %vm16421_vm8 = vmmov %vm16328_vm0 }
 0xec9   : > { %6026 = vadd.xlane.f32.xlu0 %v6025_v37  ;;  %v6040_v32 = vsel %vm16421_vm8, %v13743_v3, 0.0  ;;  %vm16430_vm8 = vmmov %vm16328_vm0 }
 0xecb   : > { %v13802_v59 = vpop.xlane.xlu2 %5930 }
 0xecc   : > { %16413 = vst [vmem:[#allocation46_spill] sm:$0xff] %v13802_v59 }
 0xecf   : > { %5978 = vadd.xlane.f32.xlu1 %v5977_v50  ;;  %v5833_v5 = vpop.permute.xlu1 %5832 }
 0xed0   : > { %v6079_v15 = vsel %vm16416_vm9, %v5833_v5, 0.0  ;;  %vm16424_vm9 = vmmov %vm16328_vm0 }
 0xed1   : > { %6035 = vadd.xlane.f32.xlu0 %v6034_v63  ;;  %v6049_v53 = vsel %vm16424_vm9, %v13750_v45, 0.0  ;;  %vm16434_vm9 = vmmov %vm16328_vm0 }
 0xed3   : > { %v13810_v43 = vpop.xlane.xlu2 %5939 }
 0xed4   : > { %16417 = vst [vmem:[#allocation31_spill] sm:$0xff] %v13810_v43 }
 0xed7   : > { %5987 = vadd.xlane.f32.xlu1 %v5986_v31  ;;  %v5839_v24 = vpop.permute.xlu1 %5838 }
 0xed8   : > { %v6088_v13 = vsel %vm16418_vm7, %v5839_v24, 0.0  ;;  %vm16428_vm7 = vmmov %vm16328_vm0 }
 0xed9   : > { %6044 = vadd.xlane.f32.xlu0 %v6043_v19 }
 0xedb   : > { %v13817_v0 = vpop.xlane.xlu2 %5948 }
 0xedc   : > { %v13791_v22 = vpop.xlane.xlu0 %5918  ;;  %16420 = vst [vmem:[#allocation164_spill] sm:$0xff] %v13817_v0 }
 0xedd   : > { %16408 = vst [vmem:[#allocation153_spill] sm:$0xff] %v13791_v22 }
 0xedf   : > { %5996 = vadd.xlane.f32.xlu1 %v5995_v62  ;;  %v5845_v37 = vpop.permute.xlu1 %5844 }
 0xee0   : > { %v6097_v63 = vsel %vm16422_vm1, %v5845_v37, 0.0  ;;  %vm16431_vm1 = vmmov %vm16328_vm0 }
 0xee1   : > { %6053 = vadd.xlane.f32.xlu0 %v6052_v48  ;;  %v6058_v48 = vsel %vm16328_vm0, %v13757_v25, 0.0  ;;  %v6076_v25 = vsel %vm16430_vm8, %v13770_v30, 0.0  ;;  %v6094_v30 = vsel %vm16434_vm9, %v13781_v51, 0.0 }
 0xee3   : > { %v13826_v33 = vpop.xlane.xlu2 %5957 }
 0xee4   : > { %v13798_v60 = vpop.xlane.xlu0 %5927 }
 0xee5   : > { %16411 = vst [vmem:[#allocation148_spill] sm:$0xff] %v13798_v60 }
 0xee7   : > { %6005 = vadd.xlane.f32.xlu1 %v6004_v16 }
 0xee9   : > { %6062 = vadd.xlane.f32.xlu0 %v6061_v42  ;;  %v6067_v42 = vsel %vm16428_vm7, %v13763_v10, 0.0  ;;  %v6085_v10 = vsel %vm16431_vm1, %v13776_v27, 0.0  ;;  %vm16463_vm7 = vcmask 523712  }
 0xeea   : > { %vm16465_vm8 = vmmov %vm16463_vm7 }
 0xeeb   : > { %v13836_v12 = vpop.xlane.xlu2 %5966  ;;  %vm16467_vm1 = vmmov %vm16463_vm7 }
 0xeec   : > { %v13808_v44 = vpop.xlane.xlu0 %5936  ;;  %16427 = vst [vmem:[#allocation143_spill] sm:$0xff] %v13836_v12  ;;  %vm16469_vm9 = vmmov %vm16467_vm1 }
 0xeef   : > { %6014 = vadd.xlane.f32.xlu1 %v6013_v38 }
 0xef1   : > { %6071 = vadd.xlane.f32.xlu0 %v6070_v55 }
 0xef3   : > { %v13844_v45 = vpop.xlane.xlu2 %5975 }
 0xef4   : > { %v13815_v50 = vpop.xlane.xlu0 %5945 }
 0xef5   : > { %16419 = vst [vmem:[#allocation197_spill] sm:$0xff] %v13815_v50 }
 0xef7   : > { %6023 = vadd.xlane.f32.xlu1 %v6022_v57 }
 0xef9   : > { %6080 = vadd.xlane.f32.xlu0 %v6079_v15 }
 0xefb   : > { %v13854_v15 = vpop.xlane.xlu2 %5984 }
 0xefc   : > { %v13824_v19 = vpop.xlane.xlu0 %5954 }
 0xeff   : > { %6032 = vadd.xlane.f32.xlu1 %v6031_v4 }
 0xf01   : > { %6089 = vadd.xlane.f32.xlu0 %v6088_v13 }
 0xf03   : > { %v13862_v13 = vpop.xlane.xlu2 %5993 }
 0xf04   : > { %v13834_v3 = vpop.xlane.xlu0 %5963  ;;  %16433 = vst [vmem:[#allocation146_spill] sm:$0xff] %v13862_v13 }
 0xf05   : > { %16426 = vst [vmem:[#allocation187_spill] sm:$0xff] %v13834_v3 }
 0xf07   : > { %6041 = vadd.xlane.f32.xlu1 %v6040_v32  ;;  %v6103_v32 = vsel %vm16328_vm0, %v13786_v49, 0.0  ;;  %vm16471_vm0 = vmmov %vm16467_vm1 }
 0xf09   : > { %6098 = vadd.xlane.f32.xlu0 %v6097_v63 }
 0xf0a   : > { %v13822_v31 = vpop.xlane.xlu1 %5915 }
 0xf0b   : > { %16423 = vst [vmem:[#allocation185_spill] sm:$0xff] %v13822_v31  ;;  %v6170_v35 = vperm.slane %v13822_v31, %v16230_v40  ;;  %v6190_v31 = vperm.slane %v13817_v0, %v16238_v1  ;;  %v6218_v0 = vperm.slane %v13862_v13, %v16234_v7 }
 0xf0c   : > { %v13842_v5 = vpop.xlane.xlu0 %5972 }
 0xf0f   : > { %6050 = vadd.xlane.f32.xlu1 %v6049_v53  ;;  %v13872_v53 = vpop.xlane.xlu2 %6002 }
 0xf12   : > { %v13830_v62 = vpop.xlane.xlu1 %5924 }
 0xf13   : > { %16425 = vst [vmem:[#allocation190_spill] sm:$0xff] %v13830_v62 }
 0xf14   : > { %v13850_v55 = vpop.xlane.xlu0 %5981 }
 0xf17   : > { %6059 = vadd.xlane.f32.xlu1 %v6058_v48 }
 0xf1a   : > { %v13838_v16 = vpop.xlane.xlu1 %5933 }
 0xf1c   : > { %v13860_v4 = vpop.xlane.xlu0 %5990 }
 0xf1f   : > { %6068 = vadd.xlane.f32.xlu1 %v6067_v42  ;;  %v13878_v42 = vpop.xlane.xlu2 %6011 }
 0xf20   : > { %16437 = vst [vmem:[#allocation207_spill] sm:$0xff] %v13878_v42 }
 0xf22   : > { %v13846_v38 = vpop.xlane.xlu1 %5942 }
 0xf23   : > { %16429 = vst [vmem:[#allocation194_spill] sm:$0xff] %v13846_v38  ;;  %v6186_v26 = vperm.slane %v13846_v38, %v16229_v17  ;;  %v6201_v38 = vperm.slane %v13836_v12, %v16229_v17 }
 0xf24   : > { %v13870_v63 = vpop.xlane.xlu0 %5999 }
 0xf27   : > { %6077 = vadd.xlane.f32.xlu1 %v6076_v25 }
 0xf2a   : > { %v13852_v57 = vpop.xlane.xlu1 %5951 }
 0xf2c   : > { %v13876_v48 = vpop.xlane.xlu0 %6008 }
 0xf2d   : > { %16436 = vst [vmem:[#allocation178_spill] sm:$0xff] %v13876_v48  ;;  %v6171_v48 = vperm.slane %v13791_v22, %v16229_v17 }
 0xf2f   : > { %6086 = vadd.xlane.f32.xlu1 %v6085_v10  ;;  %v6172_v22 = vsel %vm1574_vm10, %v6171_v48, %v6170_v35  ;;  %v6230_v35 = vperm.slane %v13878_v42, %v16230_v40  ;;  %v6188_v48 = vperm.slane %v13815_v50, %v16234_v7 }
 0xf32   : > { %v13858_v24 = vpop.xlane.xlu1 %5960 }
 0xf33   : > { %16432 = vst [vmem:[#allocation204_spill] sm:$0xff] %v13858_v24 }
 0xf34   : > { %v13882_v51 = vpop.xlane.xlu0 %6017 }
 0xf37   : > { %6095 = vadd.xlane.f32.xlu1 %v6094_v30  ;;  %v13886_v30 = vpop.xlane.xlu2 %6020 }
 0xf3a   : > { %v13866_v37 = vpop.xlane.xlu1 %5969 }
 0xf3b   : > { %16435 = vst [vmem:[#allocation209_spill] sm:$0xff] %v13866_v37 }
 0xf3c   : > { %v13890_v23 = vpop.xlane.xlu0 %6026 }
 0xf3d   : > { %16440 = vst [vmem:[#allocation123_spill] sm:$0xff] %v13890_v23 }
 0xf3f   : > { %6104 = vadd.xlane.f32.xlu1 %v6103_v32  ;;  %v13892_v39 = vpop.xlane.xlu2 %6029 }
 0xf42   : > { %v13874_v27 = vpop.xlane.xlu1 %5978 }
 0xf44   : > { %v13896_v41 = vpop.xlane.xlu0 %6035 }
 0xf47   : > { %v13898_v14 = vpop.xlane.xlu2 %6038 }
 0xf48   : > { %16442 = vst [vmem:[#allocation137_spill] sm:$0xff] %v13898_v14 }
 0xf4a   : > { %v13880_v25 = vpop.xlane.xlu1 %5987 }
 0xf4b   : > { %16438 = vst [vmem:[#allocation223_spill] sm:$0xff] %v13880_v25 }
 0xf4c   : > { %v13902_v54 = vpop.xlane.xlu0 %6044 }
 0xf4f   : > { %v13904_v2 = vpop.xlane.xlu2 %6047 }
 0xf52   : > { %v13884_v10 = vpop.xlane.xlu1 %5996 }
 0xf53   : > { %16439 = vst [vmem:[#allocation195_spill] sm:$0xff] %v13884_v10 }
 0xf54   : > { %v13908_v21 = vpop.xlane.xlu0 %6053 }
 0xf55   : > { %16444 = vst [vmem:[#allocation144_spill] sm:$0xff] %v13908_v21  ;;  %v6179_v21 = vperm.slane %v13802_v59, %v10055_v36  ;;  %v6200_v59 = vperm.slane %v13834_v3, %v16230_v40  ;;  %v6192_v3 = vperm.slane %v13852_v57, %v15714_v58 }
 0xf57   : > { %v13912_v61 = vpop.xlane.xlu2 %6056 }
 0xf5a   : > { %v13888_v49 = vpop.xlane.xlu1 %6005 }
 0xf5c   : > { %v13916_v47 = vpop.xlane.xlu0 %6062 }
 0xf5f   : > { %v13918_v56 = vpop.xlane.xlu2 %6065 }
 0xf60   : > { %16447 = vst [vmem:[#allocation173_spill] sm:$0xff] %v13918_v56 }
 0xf62   : > { %v13894_v32 = vpop.xlane.xlu1 %6014 }
 0xf63   : > { %16441 = vst [vmem:[#allocation132_spill] sm:$0xff] %v13894_v32 }
 0xf64   : > { %v13922_v9 = vpop.xlane.xlu0 %6071 }
 0xf65   : > { %16449 = vst [vmem:[#allocation171_spill] sm:$0xff] %v13922_v9  ;;  %v6185_v9 = vperm.slane %v13810_v43, %v16230_v40  ;;  %v6203_v43 = vperm.slane %v13866_v37, %v16234_v7  ;;  %v6205_v37 = vperm.slane %v13842_v5, %v16238_v1 }
 0xf67   : > { %v13924_v6 = vpop.xlane.xlu2 %6074  ;;  %v6187_v24 = vsel %vm1574_vm10, %v6186_v26, %v6185_v9  ;;  %v6177_v9 = vperm.slane %v13798_v60, %v15714_v58  ;;  %v6263_v26 = vperm.slane %v13918_v56, %v16234_v7 }
 0xf68   : > { %v6189_v50 = vsel %vm1578_vm11, %v6188_v48, %v6187_v24  ;;  %v6202_v48 = vsel %vm1574_vm10, %v6201_v38, %v6200_v59  ;;  %v6231_v38 = vperm.slane %v13894_v32, %v16229_v17 }
 0xf69   : > { %v6204_v59 = vsel %vm1578_vm11, %v6203_v43, %v6202_v48 }
 0xf6a   : > { %v13900_v52 = vpop.xlane.xlu1 %6023 }
 0xf6c   : > { %v13964_v12 = vpop.xlane.xlu0 %6080 }
 0xf6f   : > { %v13973_v13 = vpop.xlane.xlu2 %6083 }
 0xf70   : > { %v6275_v48 = vperm.slane %v13973_v13, %v16230_v40 }
 0xf72   : > { %v13906_v11 = vpop.xlane.xlu1 %6032 }
 0xf73   : > { %16443 = vst [vmem:[#allocation133_spill] sm:$0xff] %v13906_v11  ;;  %v6173_v11 = vperm.slane %v13793_v34, %v16234_v7  ;;  %v6175_v34 = vperm.slane %v13830_v62, %v16238_v1 }
 0xf75   : > { %v6174_v23 = vsel %vm1578_vm11, %v6173_v11, %v6172_v22  ;;  %v6246_v11 = vperm.slane %v13898_v14, %v16229_v17  ;;  %v6181_v14 = vperm.slane %v13838_v16, %v10101_v8  ;;  %v6216_v22 = vperm.slane %v13860_v4, %v16229_v17 }
 0xf76   : > { %v6176_v42 = vsel %vm1582_vm12, %v6175_v34, %v6174_v23  ;;  %v6215_v23 = vperm.slane %v13880_v25, %v16230_v40  ;;  %v6194_v34 = vperm.slane %v13824_v19, %v10055_v36  ;;  %v6191_v25 = vsel %vm1582_vm12, %v6190_v31, %v6189_v50 }
 0xf77   : > { %v6178_v60 = vsel %vm1586_vm13, %v6177_v9, %v6176_v42  ;;  %v6193_v24 = vsel %vm1586_vm13, %v6192_v3, %v6191_v25  ;;  %v6245_v9 = vperm.slane %v13896_v41, %v16230_v40  ;;  %v6220_v50 = vperm.slane %v13884_v10, %v16238_v1 }
 0xf78   : > { %v6217_v56 = vsel %vm1574_vm10, %v6216_v22, %v6215_v23  ;;  %v6211_v31 = vperm.slane %v13850_v55, %v10101_v8  ;;  %v6180_v3 = vsel %vm1590_vm14, %v6179_v21, %v6178_v60  ;;  %v6195_v22 = vsel %vm1590_vm14, %v6194_v34, %v6193_v24 }
 0xf79   : > { %v6182_v42 = vsel %vm1594_vm15, %v6181_v14, %v6180_v3  ;;  %v6206_v23 = vsel %vm1582_vm12, %v6205_v37, %v6204_v59  ;;  %v6209_v10 = vperm.slane %v13874_v27, %v10055_v36  ;;  %v6219_v21 = vsel %vm1578_vm11, %v6218_v0, %v6217_v56 }
 0xf7a   : > { %v13910_v29 = vpop.xlane.xlu1 %6041  ;;  %v6261_v60 = vperm.slane %v13916_v47, %v16229_v17  ;;  %v6233_v14 = vperm.slane %v13882_v51, %v16234_v7  ;;  %v6247_v37 = vsel %vm1574_vm10, %v6246_v11, %v6245_v9  ;;  %v6221_v34 = vsel %vm1582_vm12, %v6220_v50, %v6219_v21 }
 0xf7b   : > { %16445 = vst [vmem:[#allocation166_spill] sm:$0xff] %v13910_v29  ;;  %v6248_v43 = vperm.slane %v13910_v29, %v16234_v7  ;;  %v6232_v29 = vsel %vm1574_vm10, %v6231_v38, %v6230_v35  ;;  %v6222_v0 = vperm.slane %v13870_v63, %v15714_v58  ;;  %v16452_v38 = vperm.slane %v13844_v45, %v15714_v58 }
 0xf7c   : > { %v6250_v9 = vperm.slane %v13902_v54, %v16238_v1  ;;  %v6234_v50 = vsel %vm1578_vm11, %v6233_v14, %v6232_v29  ;;  %v6237_v3 = vperm.slane %v13900_v52, %v15714_v58 }
 0xf7d   : > { %v6249_v35 = vsel %vm1578_vm11, %v6248_v43, %v6247_v37  ;;  %v6208_v11 = vsel %vm1586_vm13, %v16452_v38, %v6206_v23  ;;  %v6223_v23 = vsel %vm1586_vm13, %v6222_v0, %v6221_v34  ;;  %v16455_v0 = vld [vmem:[#allocation204_spill] sm:$0xff] }
 0xf7e   : > { %v6251_v37 = vsel %vm1582_vm12, %v6250_v9, %v6249_v35  ;;  %v6198_v35 = vperm.slane %v16455_v0, %v10106_v46 }
 0xf82   : > { %v13914_v20 = vpop.xlane.xlu1 %6050 }
 0xf83   : > { %16446 = vst [vmem:[#allocation174_spill] sm:$0xff] %v13914_v20  ;;  %v6254_v29 = vperm.slane %v13914_v20, %v10055_v36 }
 0xf8a   : > { %v13920_v28 = vpop.xlane.xlu1 %6059 }
 0xf8b   : > { %16448 = vst [vmem:[#allocation211_spill] sm:$0xff] %v13920_v28  ;;  %v6260_v25 = vperm.slane %v13920_v28, %v16230_v40  ;;  %v14035_v28 = vpop.xlane.xlu0 %6089  ;;  %v14039_v40 = vpop.xlane.xlu2 %6092 }
 0xf8c   : > { %16451 = vst [vmem:[#allocation203_spill] sm:$0xff] %v14039_v40  ;;  %v6280_v43 = vperm.slane %v14039_v40, %v16238_v1  ;;  %v16454_v40 = vperm.slane %v13886_v30, %v16238_v1 }
 0xf8d   : > { %v6262_v24 = vsel %vm1574_vm10, %v6261_v60, %v6260_v25  ;;  %v16453_v25 = vperm.slane %v13826_v33, %v10101_v8  ;;  %v6210_v60 = vsel %vm1590_vm14, %v6209_v10, %v6208_v11  ;;  %v6278_v10 = vperm.slane %v14035_v28, %v16234_v7 }
 0xf8e   : > { %v6264_v14 = vsel %vm1578_vm11, %v6263_v26, %v6262_v24  ;;  %v16456_v26 = vld [vmem:[#allocation123_spill] sm:$0xff]  ;;  %v6212_v9 = vsel %vm1594_vm15, %v6211_v31, %v6210_v60 }
 0xf8f   : > { %v6197_v21 = vsel %vm1594_vm15, %v16453_v25, %v6195_v22  ;;  %v6236_v22 = vsel %vm1582_vm12, %v16454_v40, %v6234_v50  ;;  %v6239_v24 = vperm.slane %v16456_v26, %v10055_v36  ;;  %v16458_v40 = vperm.slane %v13872_v53, %v10055_v36 }
 0xf90   : > { %v6238_v11 = vsel %vm1586_vm13, %v6237_v3, %v6236_v22 }
 0xf91   : > { %v6225_v50 = vsel %vm1590_vm14, %v16458_v40, %v6223_v23  ;;  %v16460_v23 = vld [vmem:[#allocation144_spill] sm:$0xff] }
 0xf92   : > { %v13928_v18 = vpop.xlane.xlu1 %6068  ;;  %v6256_v22 = vperm.slane %v16460_v23, %v10101_v8 }
 0xf93   : > { %v6265_v59 = vperm.slane %v13928_v18, %v16238_v1 }
 0xf95   : > { %v6266_v34 = vsel %vm1582_vm12, %v6265_v59, %v6264_v14  ;;  %v16459_v59 = vperm.slane %v13904_v2, %v15714_v58 }
 0xf97   : > { %v6253_v25 = vsel %vm1586_vm13, %v16459_v59, %v6251_v37  ;;  %v6240_v37 = vsel %vm1590_vm14, %v6239_v24, %v6238_v11  ;;  %v14115_v59 = vpop.xlane.xlu0 %6098 }
 0xf98   : > { %v6255_v1 = vsel %vm1590_vm14, %v6254_v29, %v6253_v25  ;;  %v16462_v29 = vperm.slane %v13808_v44, %v10106_v46 }
 0xf99   : > { %v6257_v11 = vsel %vm1594_vm15, %v6256_v22, %v6255_v1 }
 0xf9a   : > { %v13981_v62 = vpop.xlane.xlu1 %6077 }
 0xf9b   : > { %16450 = vst [vmem:[#allocation202_spill] sm:$0xff] %v13981_v62  ;;  %v6271_v31 = vperm.slane %v13981_v62, %v10101_v8  ;;  %v6199_v62 = vsel %vm16465_vm8, %v6198_v35, %v6197_v21  ;;  %vm16474_vm8 = vmmov %vm16471_vm0 }
 0xfa2   : > { %v14037_v32 = vpop.xlane.xlu1 %6086 }
 0xfa3   : > { %v6276_v56 = vperm.slane %v14037_v32, %v16229_v17  ;;  %v6226_v17 = vperm.slane %v13888_v49, %v10101_v8 }
 0xfa5   : > { %v6277_v38 = vsel %vm1574_vm10, %v6276_v56, %v6275_v48  ;;  %v16457_v48 = vld [vmem:[#allocation171_spill] sm:$0xff]  ;;  %v6227_v40 = vsel %vm1594_vm15, %v6226_v17, %v6225_v50  ;;  %v16466_v17 = vperm.slane %v13854_v15, %v10106_v46  ;;  %v16468_v50 = vperm.slane %v13924_v6, %v10055_v36 }
 0xfa6   : > { %v6267_v56 = vperm.slane %v16457_v48, %v15714_v58  ;;  %v6279_v14 = vsel %vm1578_vm11, %v6278_v10, %v6277_v38  ;;  %v16461_v38 = vld [vmem:[#allocation133_spill] sm:$0xff] }
 0xfa7   : > { %v6243_v10 = vperm.slane %v16461_v38, %v10106_v46  ;;  %v6281_v23 = vsel %vm1582_vm12, %v6280_v43, %v6279_v14  ;;  %v6214_v24 = vsel %vm16467_vm1, %v16466_v17, %v6212_v9  ;;  %v16470_v43 = vperm.slane %v13892_v39, %v10101_v8  ;;  %vm16475_vm1 = vmmov %vm16471_vm0 }
 0xfa8   : > { %v6268_v3 = vsel %vm1586_vm13, %v6267_v56, %v6266_v34  ;;  %v6184_v34 = vsel %vm16463_vm7, %v16462_v29, %v6182_v42  ;;  %v16464_v56 = vld [vmem:[#allocation178_spill] sm:$0xff]  ;;  %v14135_v29 = vpop.xlane.xlu2 %6101  ;;  %v6284_v9 = vperm.slane %v14115_v59, %v10055_v36  ;;  %vm16473_vm7 = vmmov %vm16471_vm0 }
 0xfa9   : > { %v6228_v25 = vperm.slane %v16464_v56, %v10106_v46  ;;  %v6270_v38 = vsel %vm1590_vm14, %v16468_v50, %v6268_v3  ;;  %v6242_v35 = vsel %vm1594_vm15, %v16470_v43, %v6240_v37  ;;  %v6290_v14 = vsel %vm618_vm2, %v6199_v62, %v6184_v34 }
 0xfaa   : > { %v14101_v20 = vpop.xlane.xlu1 %6095  ;;  %v6272_v1 = vsel %vm1594_vm15, %v6271_v31, %v6270_v38  ;;  %v6273_v3 = vperm.slane %v13964_v12, %v10106_v46 }
 0xfab   : > { %v6282_v60 = vperm.slane %v14101_v20, %v15714_v58  ;;  %v6229_v21 = vsel %vm16469_vm9, %v6228_v25, %v6227_v40  ;;  %v16472_v40 = vperm.slane %v13912_v61, %v10106_v46  ;;  %v6286_v25 = vperm.slane %v14135_v29, %v10101_v8 }
 0xfac   : > { %v6274_v38 = vsel %vm16474_vm8, %v6273_v3, %v6272_v1  ;;  %vm16476_vm9 = vcmask 1046534   ;;  %vm7032_vm8 = vcmask 1048448  }
 0xfad   : > { %v6283_v42 = vsel %vm1586_vm13, %v6282_v60, %v6281_v23  ;;  %v6244_v60 = vsel %vm16471_vm0, %v6243_v10, %v6242_v35  ;;  %v6291_v23 = vsel %vm621_vm3, %v6214_v24, %v6290_v14  ;;  %v6259_v37 = vsel %vm16473_vm7, %v16472_v40, %v6257_v11  ;;  %v16479_v35 = vld [vmem:[#allocation151_spill] sm:$0xff]  ;;  %v16480_v14 = vld [vmem:[#allocation212_spill] sm:$0xff] }
 0xfae   : > { %v6285_v22 = vsel %vm1590_vm14, %v6284_v9, %v6283_v42  ;;  %v6292_v31 = vsel %vm624_vm4, %v6229_v21, %v6291_v23  ;;  %vm16477_vm0 = vcmask 1047559   ;;  %vm16478_vm7 = vcmask 523264  }
 0xfaf   : > { %v6293_v10 = vsel %vm627_vm5, %v6244_v60, %v6292_v31  ;;  %v6287_v17 = vsel %vm1594_vm15, %v6286_v25, %v6285_v22  ;;  %v16481_v60 = vld [vmem:[#allocation153_spill] sm:$0xff] }
 0xfb0   : > { %v6294_v24 = vsel %vm630_vm6, %v6259_v37, %v6293_v10  ;;  %v16482_v22 = vld [vmem:[#allocation185_spill] sm:$0xff] }
 0xfb1   : > { %v6295_v50 = vsel %vm16476_vm9, %v6274_v38, %v6294_v24  ;;  %v16483_v38 = vld [vmem:[#allocation148_spill] sm:$0xff]  ;;  %v16485_v24 = vld [vmem:[#allocation190_spill] sm:$0xff]  ;;  %vm16526_vm9 = vmmov %vm16475_vm1 }
 0xfb2   : > { %v14158_v62 = vpop.xlane.xlu1 %6104 }
 0xfb3   : > { %v6288_v34 = vperm.slane %v14158_v62, %v10106_v46 }
 0xfb5   : > { %v6289_v11 = vsel %vm16475_vm1, %v6288_v34, %v6287_v17  ;;  %v16484_v34 = vld [vmem:[#allocation46_spill] sm:$0xff] }
 0xfb6   : > { %v6296_v42 = vsel %vm16477_vm0, %v6289_v11, %v6295_v50  ;;  %vm16535_vm0 = vmmov %vm16475_vm1 }
 0xfb7   : > { %v6298_v21 = vsel %vm16478_vm7, %v6296_v42, -inf }
 0xfb8   : > { %6299 = vmax.xlane.f32.xlu0 %v6298_v21 }
0x102b   : > { %v6300_v43 = vpop.xlane.xlu0 %6299 }
0x102c   : > { %v14171_v9 = vmax.f32 %v6300_v43, %v16479_v35 }
0x102e   : > { %v6306_v1 = vperm.slane %v14171_v9, 0  ;;  %v14181_v42 = vperm.slane %v14171_v9, 1 }
0x1030   : > { %v6324_v3 = vsub.f32 %v16480_v14, %v6306_v1  ;;  %v6323_v23 = vsub.f32 %v16481_v60, %v6306_v1  ;;  %v6322_v40 = vsub.f32 %v16482_v22, %v6306_v1  ;;  %v6326_v10 = vsub.f32 %v16483_v38, %v6306_v1  ;;  %v16486_v22 = vld [vmem:[#allocation31_spill] sm:$0xff] }
0x1031   : > { %v6327_v17 = vsub.f32 %v16484_v34, %v6306_v1  ;;  %v6325_v11 = vsub.f32 %v16485_v24, %v6306_v1  ;;  %v16487_v24 = vld [vmem:[#allocation197_spill] sm:$0xff] }
0x1032   : > { %v6390_v37 = vmul.f32 1.442695, %v6324_v3  ;;  %v6388_v25 = vmul.f32 1.442695, %v6323_v23  ;;  %v6386_v31 = vmul.f32 1.442695, %v6322_v40  ;;  %v6329_v23 = vsub.f32 %v13808_v44, %v6306_v1 }
0x1033   : > { %v6394_v50 = vmul.f32 1.442695, %v6326_v10  ;;  %v6396_v21 = vmul.f32 1.442695, %v6327_v17  ;;  %v6392_v14 = vmul.f32 1.442695, %v6325_v11  ;;  %v6330_v40 = vsub.f32 %v16486_v22, %v14181_v42 }
0x1034   : > { %7975 = vpow2.f32 %v6390_v37  ;;  %v6328_v37 = vsub.f32 %v13838_v16, %v6306_v1  ;;  %v6332_v44 = vsub.f32 %v16487_v24, %v14181_v42  ;;  %v16488_v11 = vld [vmem:[#allocation164_spill] sm:$0xff]  ;;  %v16489_v16 = vld [vmem:[#allocation194_spill] sm:$0xff]  ;;  %v6335_v22 = vsub.f32 %v13824_v19, %v14181_v42  ;;  %v16490_v19 = vld [vmem:[#allocation187_spill] sm:$0xff] }
0x1035   : > { %7977 = vpow2.f32 %v6388_v25  ;;  %v6400_v25 = vmul.f32 1.442695, %v6329_v23  ;;  %v6331_v1 = vsub.f32 %v16489_v16, %v14181_v42 }
0x1036   : > { %7979 = vpow2.f32 %v6386_v31  ;;  %v6402_v31 = vmul.f32 1.442695, %v6330_v40  ;;  %v6398_v10 = vmul.f32 1.442695, %v6328_v37  ;;  %v6336_v40 = vsub.f32 %v13826_v33, %v14181_v42  ;;  %v16491_v33 = vld [vmem:[#allocation143_spill] sm:$0xff] }
0x1037   : > { %7981 = vpow2.f32 %v6394_v50  ;;  %v6333_v50 = vsub.f32 %v16488_v11, %v14181_v42  ;;  %v6334_v37 = vsub.f32 %v13852_v57, %v14181_v42  ;;  %v6337_v57 = vsub.f32 %v16455_v0, %v14181_v42 }
0x1038   : > { %7983 = vpow2.f32 %v6396_v21  ;;  %v6406_v21 = vmul.f32 1.442695, %v6332_v44 }
0x1039   : > { %7985 = vpow2.f32 %v6392_v14 }
0x103a   : > { %v7976_v43 = vpop.eup %7975  ;;  %7987 = vpow2.f32 %v6400_v25  ;;  %v6308_v25 = vperm.slane %v14171_v9, 2 }
0x103b   : > { %v7978_v60 = vpop.eup %7977  ;;  %6585 = vperm.xlu0 %7574, %v7976_v43   ;;  %7989 = vpow2.f32 %v6402_v31  ;;  %v6408_v43 = vmul.f32 1.442695, %v6333_v50  ;;  %v6412_v31 = vmul.f32 1.442695, %v6335_v22 }
0x103c   : > { %v7980_v3 = vpop.eup %7979  ;;  %6582 = vperm.xlu1 %7572, %v7978_v60   ;;  %7991 = vpow2.f32 %v6398_v10  ;;  %v6404_v60 = vmul.f32 1.442695, %v6331_v1  ;;  %v6338_v44 = vsub.f32 %v16490_v19, %v6308_v25  ;;  %v6339_v11 = vsub.f32 %v16491_v33, %v6308_v25 }
0x103d   : > { %6579 = vperm.xlu2 %7573, %v7980_v3   ;;  %v7982_v38 = vpop.eup %7981  ;;  %7993 = vpow2.f32 %v6406_v21  ;;  %v6416_v21 = vmul.f32 1.442695, %v6337_v57  ;;  %v16494_v57 = vld [vmem:[#allocation223_spill] sm:$0xff] }
0x103e   : > { %v7984_v34 = vpop.eup %7983  ;;  %7995 = vpow2.f32 %v6408_v43  ;;  %v6418_v50 = vmul.f32 1.442695, %v6338_v44  ;;  %v6420_v16 = vmul.f32 1.442695, %v6339_v11 }
0x103f   : > { %v7986_v17 = vpop.eup %7985  ;;  %7997 = vpow2.f32 %v6404_v60  ;;  %v6341_v60 = vsub.f32 %v13842_v5, %v6308_v25  ;;  %v6345_v5 = vsub.f32 %v13854_v15, %v6308_v25 }
0x1040   : > { %v7988_v14 = vpop.eup %7987  ;;  %7999 = vpow2.f32 %v6412_v31 }
0x1041   : > { %v7990_v3 = vpop.eup %7989  ;;  %v6432_v19 = vmul.f32 1.442695, %v6345_v5 }
0x1042   : > { %v7992_v23 = vpop.eup %7991 }
0x1043   : > { %6591 = vperm.xlu0 %7574, %v7982_v38   ;;  %v6414_v38 = vmul.f32 1.442695, %v6336_v40  ;;  %v7994_v10 = vpop.eup %7993  ;;  %v6424_v40 = vmul.f32 1.442695, %v6341_v60 }
0x1044   : > { %6594 = vperm.xlu1 %7572, %v7984_v34   ;;  %v6410_v34 = vmul.f32 1.442695, %v6334_v37 }
0x1045   : > { %6588 = vperm.xlu2 %7573, %v7986_v17   ;;  %v7996_v17 = vpop.eup %7995  ;;  %8001 = vpow2.f32 %v6414_v38 }
0x1046   : > { %v7998_v24 = vpop.eup %7997  ;;  %8003 = vpow2.f32 %v6410_v34  ;;  %v14211_v34 = vperm.slane %v14171_v9, 3 }
0x1047   : > { %v8000_v1 = vpop.eup %7999  ;;  %8005 = vpow2.f32 %v6418_v50 }
0x1048   : > { %8007 = vpow2.f32 %v6420_v16  ;;  %v6347_v15 = vsub.f32 %v13860_v4, %v14211_v34  ;;  %v6346_v50 = vsub.f32 %v16494_v57, %v14211_v34  ;;  %v16495_v4 = vld [vmem:[#allocation146_spill] sm:$0xff] }
0x1049   : > { %8009 = vpow2.f32 %v6416_v21 }
0x104a   : > { %8011 = vpow2.f32 %v6424_v40  ;;  %v6436_v16 = vmul.f32 1.442695, %v6347_v15  ;;  %v16496_v40 = vld [vmem:[#allocation132_spill] sm:$0xff] }
0x104b   : > { %6600 = vperm.xlu0 %7574, %v7988_v14   ;;  %v8002_v43 = vpop.eup %8001 }
0x104c   : > { %6603 = vperm.xlu1 %7572, %v7990_v3   ;;  %v8004_v14 = vpop.eup %8003  ;;  %v6342_v3 = vsub.f32 %v13844_v45, %v6308_v25  ;;  %v6343_v45 = vsub.f32 %v13874_v27, %v6308_v25  ;;  %v16493_v27 = vld [vmem:[#allocation207_spill] sm:$0xff] }
0x104d   : > { %6597 = vperm.xlu2 %7573, %v7992_v23   ;;  %v16492_v23 = vld [vmem:[#allocation209_spill] sm:$0xff]  ;;  %v8006_v42 = vpop.eup %8005 }
0x104e   : > { %v6340_v22 = vsub.f32 %v16492_v23, %v6308_v25  ;;  %v6426_v0 = vmul.f32 1.442695, %v6342_v3  ;;  %v8008_v31 = vpop.eup %8007  ;;  %v6428_v33 = vmul.f32 1.442695, %v6343_v45  ;;  %v6348_v23 = vsub.f32 %v16495_v4, %v14211_v34 }
0x104f   : > { %v8010_v38 = vpop.eup %8009 }
0x1050   : > { %v6422_v37 = vmul.f32 1.442695, %v6340_v22  ;;  %8013 = vpow2.f32 %v6426_v0  ;;  %v8012_v44 = vpop.eup %8011 }
0x1052   : > { %8015 = vpow2.f32 %v6422_v37  ;;  %v14232_v37 = vperm.slane %v14171_v9, 6 }
0x1053   : > { %6609 = vperm.xlu0 %7574, %v7994_v10   ;;  %v6344_v10 = vsub.f32 %v13850_v55, %v6308_v25 }
0x1054   : > { %6612 = vperm.xlu1 %7572, %v7996_v17  }
0x1055   : > { %6606 = vperm.xlu2 %7573, %v7998_v24   ;;  %v6430_v17 = vmul.f32 1.442695, %v6344_v10  ;;  %v14214_v24 = vperm.slane %v14171_v9, 4 }
0x1056   : > { %v8014_v11 = vpop.eup %8013 }
0x1057   : > { %8017 = vpow2.f32 %v6430_v17  ;;  %v6354_v25 = vsub.f32 %v16493_v27, %v14214_v24  ;;  %v6355_v0 = vsub.f32 %v16496_v40, %v14214_v24  ;;  %v6356_v17 = vsub.f32 %v13882_v51, %v14214_v24  ;;  %v16499_v51 = vld [vmem:[#allocation195_spill] sm:$0xff] }
0x1058   : > { %v8016_v55 = vpop.eup %8015  ;;  %8019 = vpow2.f32 %v6432_v19 }
0x1059   : > { %8021 = vpow2.f32 %v6428_v33  ;;  %v6450_v21 = vmul.f32 1.442695, %v6354_v25  ;;  %v6452_v10 = vmul.f32 1.442695, %v6355_v0 }
0x105a   : > { %8023 = vpow2.f32 %v6436_v16  ;;  %v16500_v16 = vld [vmem:[#allocation166_spill] sm:$0xff] }
0x105b   : > { %6618 = vperm.xlu0 %7574, %v8000_v1   ;;  %v14223_v1 = vperm.slane %v14171_v9, 5  ;;  %8025 = vpow2.f32 %v6450_v21 }
0x105c   : > { %6621 = vperm.xlu1 %7572, %v8002_v43  }
0x105d   : > { %6615 = vperm.xlu2 %7573, %v8004_v14   ;;  %v8018_v43 = vpop.eup %8017  ;;  %v6434_v14 = vmul.f32 1.442695, %v6346_v50  ;;  %v6362_v22 = vsub.f32 %v13896_v41, %v14223_v1  ;;  %v16497_v41 = vld [vmem:[#allocation211_spill] sm:$0xff]  ;;  %v6349_v50 = vsub.f32 %v16499_v51, %v14211_v34  ;;  %v6364_v21 = vsub.f32 %v16500_v16, %v14223_v1 }
0x105e   : > { %v8020_v60 = vpop.eup %8019  ;;  %v6370_v19 = vsub.f32 %v16497_v41, %v14232_v37 }
0x105f   : > { %v8022_v3 = vpop.eup %8021  ;;  %8027 = vpow2.f32 %v6434_v14  ;;  %v14247_v14 = vperm.slane %v14171_v9, 7 }
0x1061   : > { %v6379_v0 = vsub.f32 %v14037_v32, %v14247_v14  ;;  %v6350_v32 = vsub.f32 %v13870_v63, %v14211_v34  ;;  %v6358_v63 = vsub.f32 %v13900_v52, %v14214_v24  ;;  %v6366_v52 = vsub.f32 %v13904_v2, %v14223_v1 }
0x1063   : > { %6627 = vperm.xlu0 %7574, %v8006_v42   ;;  %v6438_v42 = vmul.f32 1.442695, %v6348_v23  ;;  %v6458_v51 = vmul.f32 1.442695, %v6358_v63  ;;  %v16508_v63 = vld [vmem:[#allocation228_spill] sm:$0xff] }
0x1064   : > { %6630 = vperm.xlu1 %7572, %v8008_v31   ;;  %v6466_v31 = vmul.f32 1.442695, %v6362_v22 }
0x1065   : > { %6624 = vperm.xlu2 %7573, %v8010_v38   ;;  %v8024_v38 = vpop.eup %8023  ;;  %8029 = vpow2.f32 %v6438_v42  ;;  %v6378_v42 = vsub.f32 %v13973_v13, %v14247_v14  ;;  %v16501_v13 = vld [vmem:[#allocation173_spill] sm:$0xff] }
0x1066   : > { %v8026_v5 = vpop.eup %8025  ;;  %8031 = vpow2.f32 %v6466_v31  ;;  %v6500_v31 = vmul.f32 1.442695, %v6379_v0  ;;  %v6372_v41 = vsub.f32 %v16501_v13, %v14232_v37  ;;  %v16505_v13 = vld [vmem:[#allocation27_spill] sm:$0xff] }
0x1067   : > { %v8028_v45 = vpop.eup %8027  ;;  %8033 = vpow2.f32 %v6452_v10 }
0x106b   : > { %6636 = vperm.xlu0 %7574, %v8012_v44   ;;  %v16498_v44 = vld [vmem:[#allocation137_spill] sm:$0xff]  ;;  %v8030_v15 = vpop.eup %8029 }
0x106c   : > { %6639 = vperm.xlu1 %7572, %v8014_v11   ;;  %v6363_v33 = vsub.f32 %v16498_v44, %v14223_v1  ;;  %v6454_v11 = vmul.f32 1.442695, %v6356_v17  ;;  %v8032_v25 = vpop.eup %8031  ;;  %v6442_v44 = vmul.f32 1.442695, %v6350_v32  ;;  %v16504_v32 = vld [vmem:[#allocation222_spill] sm:$0xff] }
0x106d   : > { %6633 = vperm.xlu2 %7573, %v8016_v55   ;;  %v6482_v55 = vmul.f32 1.442695, %v6370_v19  ;;  %v8034_v57 = vpop.eup %8033 }
0x106e   : > { %v6468_v27 = vmul.f32 1.442695, %v6363_v33  ;;  %8035 = vpow2.f32 %v6454_v11 }
0x106f   : > { %8037 = vpow2.f32 %v6482_v55  ;;  %v6486_v55 = vmul.f32 1.442695, %v6372_v41 }
0x1070   : > { %8039 = vpow2.f32 %v6468_v27 }
0x1073   : > { %6645 = vperm.xlu0 %7574, %v8018_v43   ;;  %v6371_v43 = vsub.f32 %v13916_v47, %v14232_v37  ;;  %v6357_v47 = vsub.f32 %v13886_v30, %v14214_v24  ;;  %v6365_v30 = vsub.f32 %v13902_v54, %v14223_v1  ;;  %v6373_v54 = vsub.f32 %v13928_v18, %v14232_v37  ;;  %v16502_v18 = vld [vmem:[#allocation203_spill] sm:$0xff] }
0x1074   : > { %6648 = vperm.xlu1 %7572, %v8020_v60   ;;  %v6440_v60 = vmul.f32 1.442695, %v6349_v50  ;;  %v8036_v4 = vpop.eup %8035 }
0x1075   : > { %6642 = vperm.xlu2 %7573, %v8022_v3   ;;  %v6470_v3 = vmul.f32 1.442695, %v6364_v21  ;;  %v6484_v23 = vmul.f32 1.442695, %v6371_v43  ;;  %v8038_v22 = vpop.eup %8037  ;;  %v6472_v33 = vmul.f32 1.442695, %v6365_v30 }
0x1076   : > { %v8040_v40 = vpop.eup %8039  ;;  %8041 = vpow2.f32 %v6440_v60  ;;  %v6488_v50 = vmul.f32 1.442695, %v6373_v54 }
0x1077   : > { %8043 = vpow2.f32 %v6470_v3  ;;  %v6381_v3 = vsub.f32 %v16502_v18, %v14247_v14 }
0x1078   : > { %8045 = vpow2.f32 %v6484_v23  ;;  %v6474_v23 = vmul.f32 1.442695, %v6366_v52 }
0x1079   : > { %8047 = vpow2.f32 %v6500_v31  ;;  %v16503_v31 = vld [vmem:[#allocation34_spill] sm:$0xff] }
0x107b   : > { %6654 = vperm.xlu0 %7574, %v8024_v38   ;;  %v6456_v38 = vmul.f32 1.442695, %v6357_v47 }
0x107c   : > { %6675 = vperm.xlu1 %7572, %v8026_v5   ;;  %v8042_v10 = vpop.eup %8041  ;;  %v6498_v5 = vmul.f32 1.442695, %v6378_v42 }
0x107d   : > { %6651 = vperm.xlu2 %7573, %v8028_v45   ;;  %v8044_v45 = vpop.eup %8043  ;;  %8049 = vpow2.f32 %v6456_v38  ;;  %v6374_v38 = vsub.f32 %v16457_v48, %v14232_v37  ;;  %v16506_v48 = vld [vmem:[#allocation224_spill] sm:$0xff] }
0x107e   : > { %v8046_v17 = vpop.eup %8045  ;;  %8051 = vpow2.f32 %v6498_v5 }
0x107f   : > { %v8048_v11 = vpop.eup %8047  ;;  %8053 = vpow2.f32 %v6442_v44 }
0x1080   : > { %8055 = vpow2.f32 %v6472_v33  ;;  %v16507_v33 = vld [vmem:[#allocation21_spill] sm:$0xff] }
0x1081   : > { %8057 = vpow2.f32 %v6486_v55 }
0x1082   : > { %8059 = vpow2.f32 %v6458_v51 }
0x1083   : > { %6657 = vperm.xlu0 %7574, %v8030_v15   ;;  %v8050_v15 = vpop.eup %8049  ;;  %8061 = vpow2.f32 %v6488_v50 }
0x1084   : > { %6699 = vperm.xlu1 %7572, %v8032_v25   ;;  %v8052_v27 = vpop.eup %8051  ;;  %v6380_v25 = vsub.f32 %v14035_v28, %v14247_v14  ;;  %v6351_v28 = vsub.f32 %v13872_v53, %v14211_v34  ;;  %v6352_v53 = vsub.f32 %v13888_v49, %v14211_v34 }
0x1085   : > { %6678 = vperm.xlu2 %7573, %v8034_v57   ;;  %v8054_v16 = vpop.eup %8053 }
0x1086   : > { %v6502_v21 = vmul.f32 1.442695, %v6380_v25  ;;  %v8056_v43 = vpop.eup %8055  ;;  %v6444_v0 = vmul.f32 1.442695, %v6351_v28  ;;  %v16509_v25 = vld [vmem:[#allocation29_spill] sm:$0xff] }
0x1087   : > { %v8058_v60 = vpop.eup %8057 }
0x1088   : > { %8063 = vpow2.f32 %v6502_v21 }
0x1089   : > { %8065 = vpow2.f32 %v6474_v23 }
0x108b   : > { %6681 = vperm.xlu0 %7574, %v8036_v4  }
0x108c   : > { %6723 = vperm.xlu1 %7572, %v8038_v22   ;;  %v6504_v22 = vmul.f32 1.442695, %v6381_v3  ;;  %v6382_v3 = vsub.f32 %v14101_v20, %v14247_v14 }
0x108d   : > { %6702 = vperm.xlu2 %7573, %v8040_v40   ;;  %v8060_v40 = vpop.eup %8059 }
0x108e   : > { %v8062_v47 = vpop.eup %8061  ;;  %8067 = vpow2.f32 %v6504_v22 }
0x108f   : > { %v8064_v42 = vpop.eup %8063  ;;  %8069 = vpow2.f32 %v6444_v0  ;;  %v16510_v0 = vld [vmem:[#allocation174_spill] sm:$0xff] }
0x1090   : > { %v8066_v50 = vpop.eup %8065 }
0x1093   : > { %6660 = vperm.xlu0 %7574, %v8042_v10  }
0x1094   : > { %6705 = vperm.xlu1 %7572, %v8044_v45  }
0x1095   : > { %6726 = vperm.xlu2 %7573, %v8046_v17   ;;  %v6359_v17 = vsub.f32 %v16456_v26, %v14214_v24 }
0x1097   : > { %v14261_v19 = vpop.permute.xlu2 %6579 }
0x1098   : > { %v6968_v2 = vmul.f32 %v14261_v19, %v16503_v31  ;;  %v6770_v30 = vperm.slane %v14261_v19, %v16504_v32  ;;  %v16511_v31 = vld [vmem:[#allocation51_spill] sm:$0xff] }
0x109a   : > { %v7033_v55 = vsel %vm7032_vm8, %v6968_v2, 0.0 }
0x109b   : > { %6750 = vperm.xlu0 %7574, %v8048_v11  }
0x109c   : > { %6684 = vperm.xlu1 %7572, %v8050_v15   ;;  %v6490_v15 = vmul.f32 1.442695, %v6374_v38 }
0x109d   : > { %6747 = vperm.xlu2 %7573, %v8052_v27   ;;  %v6446_v27 = vmul.f32 1.442695, %v6352_v53 }
0x109e   : > { %8071 = vpow2.f32 %v6490_v15 }
0x109f   : > { %v6589_v57 = vpop.permute.xlu2 %6588  ;;  %8073 = vpow2.f32 %v6446_v27 }
0x10a0   : > { %v6775_v54 = vperm.slane %v6589_v57, %v16508_v63  ;;  %v6971_v51 = vmul.f32 %v6589_v57, %v16509_v25 }
0x10a2   : > { %v7038_v23 = vsel %vm7032_vm8, %v6971_v51, 0.0 }
0x10a3   : > { %6663 = vperm.xlu0 %7574, %v8054_v16  }
0x10a4   : > { %6708 = vperm.xlu1 %7572, %v8056_v43   ;;  %v6460_v43 = vmul.f32 1.442695, %v6359_v17  ;;  %v6506_v17 = vmul.f32 1.442695, %v6382_v3 }
0x10a5   : > { %6729 = vperm.xlu2 %7573, %v8058_v60   ;;  %v8068_v60 = vpop.eup %8067 }
0x10a6   : > { %v8070_v28 = vpop.eup %8069  ;;  %8075 = vpow2.f32 %v6460_v43  ;;  %v16515_v43 = vld [vmem:[#allocation85_spill] sm:$0xff] }
0x10a7   : > { %v14275_v4 = vpop.permute.xlu2 %6597  ;;  %v8072_v15 = vpop.eup %8071  ;;  %8077 = vpow2.f32 %v6506_v17 }
0x10a8   : > { %v8074_v51 = vpop.eup %8073 }
0x10ab   : > { %6687 = vperm.xlu0 %7574, %v8060_v40   ;;  %v6360_v40 = vsub.f32 %v13892_v39, %v14214_v24  ;;  %v6781_v39 = vperm.slane %v14275_v4, %v10101_v8 }
0x10ac   : > { %6732 = vperm.xlu1 %7572, %v8062_v47   ;;  %v6367_v47 = vsub.f32 %v16510_v0, %v14223_v1 }
0x10ad   : > { %6753 = vperm.xlu2 %7573, %v8064_v42   ;;  %v6586_v10 = vpop.permute.xlu0 %6585 }
0x10ae   : > { %v6773_v5 = vperm.slane %v6586_v10, %v16234_v7  ;;  %v6583_v45 = vpop.permute.xlu1 %6582  ;;  %v6970_v41 = vmul.f32 %v6586_v10, %v16505_v13  ;;  %v16512_v10 = vld [vmem:[#allocation57_spill] sm:$0xff]  ;;  %v6476_v25 = vmul.f32 1.442695, %v6367_v47 }
0x10af   : > { %v6771_v44 = vperm.slane %v6583_v45, %v16506_v48  ;;  %v6969_v49 = vmul.f32 %v6583_v45, %v16507_v33  ;;  %v14291_v11 = vpop.permute.xlu2 %6606 }
0x10b0   : > { %v7036_v52 = vsel %vm7032_vm8, %v6970_v41, 0.0 }
0x10b1   : > { %v6772_v26 = vsel %vm1574_vm10, %v6771_v44, %v6770_v30  ;;  %v7034_v19 = vsel %vm7032_vm8, %v6969_v49, 0.0  ;;  %v16513_v30 = vld [vmem:[#allocation67_spill] sm:$0xff] }
0x10b2   : > { %v6774_v16 = vsel %vm1578_vm11, %v6773_v5, %v6772_v26  ;;  %v7035_v21 = vadd.f32 %v7034_v19, %v7033_v55  ;;  %v6974_v13 = vmul.f32 %v14275_v4, %v16513_v30  ;;  %v6462_v55 = vmul.f32 1.442695, %v6360_v40  ;;  %v8076_v19 = vpop.eup %8075  ;;  %v16517_v40 = vld [vmem:[#allocation78_spill] sm:$0xff]  ;;  %v16518_v30 = vld [vmem:[#allocation133_spill] sm:$0xff] }
0x10b3   : > { %6711 = vperm.xlu0 %7574, %v8066_v50   ;;  %v6776_v18 = vsel %vm1582_vm12, %v6775_v54, %v6774_v16  ;;  %v6353_v50 = vsub.f32 %v16464_v56, %v14211_v34  ;;  %v16514_v16 = vld [vmem:[#allocation144_spill] sm:$0xff]  ;;  %v6786_v56 = vperm.slane %v14291_v11, %v16506_v48 }
0x10b4   : > { %v7037_v57 = vadd.f32 %v7036_v52, %v7035_v21  ;;  %6756 = vperm.xlu1 %7572, %v8068_v60   ;;  %v7044_v4 = vsel %vm7032_vm8, %v6974_v13, 0.0  ;;  %v6368_v21 = vsub.f32 %v16514_v16, %v14223_v1  ;;  %v6977_v60 = vmul.f32 %v14291_v11, %v16515_v43  ;;  %v16522_v16 = vld [vmem:[#allocation111_spill] sm:$0xff] }
0x10b5   : > { %6666 = vperm.xlu2 %7573, %v8070_v28   ;;  %v6592_v22 = vpop.permute.xlu0 %6591  ;;  %8079 = vpow2.f32 %v6462_v55  ;;  %v16516_v28 = vld [vmem:[#allocation69_spill] sm:$0xff]  ;;  %v6361_v13 = vsub.f32 %v16518_v30, %v14214_v24 }
0x10b6   : > { %v6777_v42 = vperm.slane %v6592_v22, %v15714_v58  ;;  %v6972_v2 = vmul.f32 %v6592_v22, %v16511_v31  ;;  %v7039_v20 = vadd.f32 %v7038_v23, %v7037_v57  ;;  %v6595_v38 = vpop.permute.xlu1 %6594  ;;  %8081 = vpow2.f32 %v6476_v25 }
0x10b7   : > { %v6779_v53 = vperm.slane %v6595_v38, %v10055_v36  ;;  %v6973_v5 = vmul.f32 %v6595_v38, %v16512_v10  ;;  %v14312_v45 = vpop.permute.xlu2 %6615  ;;  %v6375_v22 = vsub.f32 %v13924_v6, %v14232_v37  ;;  %v7055_v38 = vsel %vm7032_vm8, %v6977_v60, 0.0  ;;  %v8078_v10 = vpop.eup %8077 }
0x10b8   : > { %v6778_v41 = vsel %vm1586_vm13, %v6777_v42, %v6776_v18  ;;  %v7040_v44 = vsel %vm7032_vm8, %v6972_v2, 0.0  ;;  %v6448_v2 = vmul.f32 1.442695, %v6353_v50  ;;  %v6383_v25 = vsub.f32 %v14115_v59, %v14247_v14 }
0x10b9   : > { %v7041_v33 = vadd.f32 %v7040_v44, %v7039_v20  ;;  %v6780_v49 = vsel %vm1590_vm14, %v6779_v53, %v6778_v41  ;;  %v7042_v27 = vsel %vm7032_vm8, %v6973_v5, 0.0  ;;  %v6478_v20 = vmul.f32 1.442695, %v6368_v21 }
0x10ba   : > { %v6782_v54 = vsel %vm1594_vm15, %v6781_v39, %v6780_v49  ;;  %v6492_v17 = vmul.f32 1.442695, %v6375_v22  ;;  %8083 = vpow2.f32 %v6448_v2  ;;  %v6792_v50 = vperm.slane %v14312_v45, %v15714_v58 }
0x10bb   : > { %v7043_v26 = vadd.f32 %v7042_v27, %v7041_v33  ;;  %6735 = vperm.xlu0 %7574, %v8072_v15   ;;  %v8080_v39 = vpop.eup %8079  ;;  %8085 = vpow2.f32 %v6478_v20  ;;  %v16519_v33 = vld [vmem:[#allocation202_spill] sm:$0xff]  ;;  %v16520_v15 = vld [vmem:[#allocation95_spill] sm:$0xff]  ;;  %v6980_v21 = vmul.f32 %v14312_v45, %v16522_v16  ;;  %v6384_v45 = vsub.f32 %v14135_v29, %v14247_v14 }
0x10bc   : > { %6669 = vperm.xlu1 %7572, %v8074_v51   ;;  %v8082_v41 = vpop.eup %8081  ;;  %v6376_v49 = vsub.f32 %v16519_v33, %v14232_v37  ;;  %8087 = vpow2.f32 %v6492_v17  ;;  %v16521_v51 = vld [vmem:[#allocation107_spill] sm:$0xff]  ;;  %v6377_v2 = vsub.f32 %v13964_v12, %v14232_v37  ;;  %v6369_v29 = vsub.f32 %v13912_v61, %v14223_v1  ;;  %v16525_v12 = vld [vmem:[#allocation149_spill] sm:$0xff] }
0x10bd   : > { %6690 = vperm.xlu2 %7573, %v8076_v19   ;;  %v6601_v52 = vpop.permute.xlu0 %6600  ;;  %v7045_v18 = vadd.f32 %v7044_v4, %v7043_v26  ;;  %v6464_v4 = vmul.f32 1.442695, %v6361_v13  ;;  %v6510_v30 = vmul.f32 1.442695, %v6384_v45  ;;  %v16527_v16 = vld [vmem:[#allocation39_spill] sm:$0xff] }
0x10be   : > { %v6783_v3 = vperm.slane %v6601_v52, %v10106_v46  ;;  %v6975_v57 = vmul.f32 %v6601_v52, %v16516_v28  ;;  %v6604_v23 = vpop.permute.xlu1 %6603  ;;  %v6496_v1 = vmul.f32 1.442695, %v6377_v2 }
0x10bf   : > { %v6785_v34 = vperm.slane %v6604_v23, %v16504_v32  ;;  %v6976_v0 = vmul.f32 %v6604_v23, %v16517_v40  ;;  %v14338_v47 = vpop.permute.xlu2 %6624  ;;  %v6508_v23 = vmul.f32 1.442695, %v6383_v25  ;;  %v7061_v40 = vsel %vm7032_vm8, %v6980_v21, 0.0 }
0x10c0   : > { %v14341_v42 = vsel %vm16475_vm1, %v6783_v3, %v6782_v54  ;;  %v7046_v31 = vsel %vm7032_vm8, %v6975_v57, 0.0  ;;  %v8084_v3 = vpop.eup %8083  ;;  %8089 = vpow2.f32 %v6464_v4  ;;  %v6798_v13 = vperm.slane %v14338_v47, %v10106_v46 }
0x10c1   : > { %v14345_v53 = vadd.f32 %v7046_v31, %v7045_v18  ;;  %v6787_v6 = vsel %vm1574_vm10, %v6786_v56, %v6785_v34  ;;  %v7054_v11 = vsel %vm7032_vm8, %v6976_v0, 0.0  ;;  %v6494_v18 = vmul.f32 1.442695, %v6376_v49  ;;  %v8086_v22 = vpop.eup %8085 }
0x10c2   : > { %v7056_v5 = vadd.f32 %v7055_v38, %v7054_v11  ;;  %v8088_v34 = vpop.eup %8087  ;;  %v16523_v38 = vld [vmem:[#allocation119_spill] sm:$0xff]  ;;  %v6983_v37 = vmul.f32 %v14338_v47, %v16525_v12 }
0x10c3   : > { %6759 = vperm.xlu0 %7574, %v8078_v10   ;;  %8091 = vpow2.f32 %v6494_v18  ;;  %v16529_v18 = vld [vmem:[#allocation15_spill] sm:$0xff] }
0x10c4   : > { %6693 = vperm.xlu1 %7572, %v8080_v39   ;;  %8093 = vpow2.f32 %v6508_v23 }
0x10c5   : > { %6714 = vperm.xlu2 %7573, %v8082_v41   ;;  %v6610_v44 = vpop.permute.xlu0 %6609  ;;  %8095 = vpow2.f32 %v6510_v30 }
0x10c6   : > { %v6788_v55 = vperm.slane %v6610_v44, %v16234_v7  ;;  %v6978_v27 = vmul.f32 %v6610_v44, %v16520_v15  ;;  %v6613_v54 = vpop.permute.xlu1 %6612  ;;  %v8090_v49 = vpop.eup %8089  ;;  %8097 = vpow2.f32 %v6496_v1 }
0x10c7   : > { %v6790_v24 = vperm.slane %v6613_v54, %v16508_v63  ;;  %v6979_v26 = vmul.f32 %v6613_v54, %v16521_v51  ;;  %v14359_v19 = vpop.permute.xlu2 %6633  ;;  %v7067_v51 = vsel %vm7032_vm8, %v6983_v37, 0.0 }
0x10c8   : > { %v6789_v43 = vsel %vm1578_vm11, %v6788_v55, %v6787_v6  ;;  %v7057_v60 = vsel %vm7032_vm8, %v6978_v27, 0.0  ;;  %v6480_v27 = vmul.f32 1.442695, %v6369_v29 }
0x10c9   : > { %v7058_v52 = vadd.f32 %v7057_v60, %v7056_v5  ;;  %v6791_v59 = vsel %vm1582_vm12, %v6790_v24, %v6789_v43  ;;  %v7059_v28 = vsel %vm7032_vm8, %v6979_v26, 0.0  ;;  %v16524_v5 = vld [vmem:[#allocation170_spill] sm:$0xff]  ;;  %v8092_v54 = vpop.eup %8091 }
0x10ca   : > { %v6793_v57 = vsel %vm1586_vm13, %v6792_v50, %v6791_v59  ;;  %v8094_v24 = vpop.eup %8093  ;;  %8099 = vpow2.f32 %v6480_v27  ;;  %v16528_v60 = vld [vmem:[#allocation14_spill] sm:$0xff] }
0x10cb   : > { %v7060_v56 = vadd.f32 %v7059_v28, %v7058_v52  ;;  %6672 = vperm.xlu0 %7574, %v8084_v3   ;;  %v6986_v52 = vmul.f32 %v14359_v19, %v16528_v60  ;;  %v8096_v45 = vpop.eup %8095 }
0x10cc   : > { %6717 = vperm.xlu1 %7572, %v8086_v22  }
0x10cd   : > { %6738 = vperm.xlu2 %7573, %v8088_v34   ;;  %v6619_v0 = vpop.permute.xlu0 %6618  ;;  %v7062_v31 = vadd.f32 %v7061_v40, %v7060_v56  ;;  %v8098_v40 = vpop.eup %8097 }
0x10ce   : > { %v6794_v20 = vperm.slane %v6619_v0, %v10055_v36  ;;  %v6981_v6 = vmul.f32 %v6619_v0, %v16523_v38  ;;  %v6622_v11 = vpop.permute.xlu1 %6621  ;;  %v7078_v0 = vsel %vm7032_vm8, %v6986_v52, 0.0  ;;  %v16530_v38 = vld [vmem:[#allocation35_spill] sm:$0xff] }
0x10cf   : > { %v6796_v10 = vperm.slane %v6622_v11, %v10101_v8  ;;  %v6982_v17 = vmul.f32 %v6622_v11, %v16524_v5  ;;  %v14381_v39 = vpop.permute.xlu2 %6642 }
0x10d0   : > { %v6795_v41 = vsel %vm1590_vm14, %v6794_v20, %v6793_v57  ;;  %v7063_v44 = vsel %vm7032_vm8, %v6981_v6, 0.0  ;;  %v6803_v57 = vperm.slane %v14359_v19, %v16234_v7  ;;  %v6809_v30 = vperm.slane %v14381_v39, %v10055_v36 }
0x10d1   : > { %v7064_v33 = vadd.f32 %v7063_v44, %v7062_v31  ;;  %v6797_v61 = vsel %vm1594_vm15, %v6796_v10, %v6795_v41  ;;  %v7065_v15 = vsel %vm7032_vm8, %v6982_v17, 0.0  ;;  %v8100_v31 = vpop.eup %8099  ;;  %v16531_v10 = vld [vmem:[#allocation53_spill] sm:$0xff] }
0x10d2   : > { %v6799_v55 = vsel %vm16526_vm9, %v6798_v13, %v6797_v61  ;;  %v16532_v13 = vld [vmem:[#allocation47_spill] sm:$0xff] }
0x10d3   : > { %v7066_v25 = vadd.f32 %v7065_v15, %v7064_v33  ;;  %6696 = vperm.xlu0 %7574, %v8090_v49   ;;  %v14394_v47 = vsel %vm618_vm2, %v6799_v55, %v14341_v42  ;;  %v6385_v42 = vsub.f32 %v14158_v62, %v14247_v14  ;;  %v6989_v12 = vmul.f32 %v14381_v39, %v16532_v13 }
0x10d4   : > { %6741 = vperm.xlu1 %7572, %v8092_v54  }
0x10d5   : > { %v14397_v26 = vadd.f32 %v7067_v51, %v7066_v25  ;;  %6762 = vperm.xlu2 %7573, %v8094_v24   ;;  %v6628_v4 = vpop.permute.xlu0 %6627  ;;  %v6512_v34 = vmul.f32 1.442695, %v6385_v42  ;;  %v7084_v15 = vsel %vm7032_vm8, %v6989_v12, 0.0  ;;  %v16533_v25 = vld [vmem:[#allocation63_spill] sm:$0xff] }
0x10d6   : > { %v6800_v50 = vperm.slane %v6628_v4, %v16504_v32  ;;  %v6984_v21 = vmul.f32 %v6628_v4, %v16527_v16  ;;  %v6631_v43 = vpop.permute.xlu1 %6630 }
0x10d7   : > { %v6801_v59 = vperm.slane %v6631_v43, %v16506_v48  ;;  %v6985_v3 = vmul.f32 %v6631_v43, %v16529_v18  ;;  %v14407_v28 = vpop.permute.xlu2 %6651  ;;  %8101 = vpow2.f32 %v6512_v34  ;;  %v16538_v34 = vld [vmem:[#allocation86_spill] sm:$0xff] }
0x10d8   : > { %v7075_v23 = vsel %vm7032_vm8, %v6984_v21, 0.0 }
0x10d9   : > { %v6802_v22 = vsel %vm1574_vm10, %v6801_v59, %v6800_v50  ;;  %v7076_v56 = vsel %vm7032_vm8, %v6985_v3, 0.0  ;;  %v16534_v50 = vld [vmem:[#allocation73_spill] sm:$0xff] }
0x10da   : > { %v7077_v62 = vadd.f32 %v7076_v56, %v7075_v23  ;;  %v6804_v14 = vsel %vm1578_vm11, %v6803_v57, %v6802_v22  ;;  %v16536_v57 = vld [vmem:[#allocation77_spill] sm:$0xff] }
0x10db   : > { %6765 = vperm.xlu0 %7574, %v8096_v45   ;;  %v6992_v23 = vmul.f32 %v14407_v28, %v16536_v57  ;;  %v16537_v22 = vld [vmem:[#allocation13_spill] sm:$0xff] }
0x10dc   : > { %6744 = vperm.xlu1 %7572, %v8098_v40   ;;  %v7079_v2 = vadd.f32 %v7078_v0, %v7077_v62  ;;  %v6815_v62 = vperm.slane %v14407_v28, %v16504_v32 }
0x10dd   : > { %6720 = vperm.xlu2 %7573, %v8100_v31   ;;  %v6637_v19 = vpop.permute.xlu0 %6636  ;;  %v8102_v55 = vpop.eup %8101 }
0x10de   : > { %v6805_v20 = vperm.slane %v6637_v19, %v16508_v63  ;;  %v6987_v6 = vmul.f32 %v6637_v19, %v16530_v38  ;;  %v6640_v11 = vpop.permute.xlu1 %6639  ;;  %v7096_v38 = vsel %vm7032_vm8, %v6992_v23, 0.0  ;;  %v16545_v23 = vld [vmem:[#allocation177_spill] sm:$0xff] }
0x10df   : > { %v6807_v29 = vperm.slane %v6640_v11, %v15714_v58  ;;  %v6988_v5 = vmul.f32 %v6640_v11, %v16531_v10  ;;  %v6679_v17 = vpop.permute.xlu2 %6678 }
0x10e0   : > { %v6806_v37 = vsel %vm1582_vm12, %v6805_v20, %v6804_v14  ;;  %v7080_v41 = vsel %vm7032_vm8, %v6987_v6, 0.0  ;;  %v7001_v56 = vmul.f32 %v6679_v17, %v16537_v22 }
0x10e1   : > { %v7081_v44 = vadd.f32 %v7080_v41, %v7079_v2  ;;  %v6808_v33 = vsel %vm1586_vm13, %v6807_v29, %v6806_v37  ;;  %v7082_v61 = vsel %vm7032_vm8, %v6988_v5, 0.0  ;;  %v16539_v2 = vld [vmem:[#allocation25_spill] sm:$0xff] }
0x10e2   : > { %v6810_v1 = vsel %vm1590_vm14, %v6809_v30, %v6808_v33  ;;  %v7118_v28 = vsel %vm7032_vm8, %v7001_v56, 0.0  ;;  %v16541_v41 = vld [vmem:[#allocation97_spill] sm:$0xff] }
0x10e3   : > { %v7083_v49 = vadd.f32 %v7082_v61, %v7081_v44 }
0x10e5   : > { %6768 = vperm.xlu2 %7573, %v8102_v55   ;;  %v6646_v27 = vpop.permute.xlu0 %6645  ;;  %v7085_v54 = vadd.f32 %v7084_v15, %v7083_v49  ;;  %v16542_v49 = vld [vmem:[#allocation83_spill] sm:$0xff] }
0x10e6   : > { %v6811_v39 = vperm.slane %v6646_v27, %v10101_v8  ;;  %v6990_v24 = vmul.f32 %v6646_v27, %v16533_v25  ;;  %v6649_v51 = vpop.permute.xlu1 %6648 }
0x10e7   : > { %v6813_v4 = vperm.slane %v6649_v51, %v10106_v46  ;;  %v6991_v16 = vmul.f32 %v6649_v51, %v16534_v50  ;;  %v6703_v21 = vpop.permute.xlu2 %6702  ;;  %v16543_v50 = vld [vmem:[#allocation20_spill] sm:$0xff] }
0x10e8   : > { %v6812_v43 = vsel %vm1594_vm15, %v6811_v39, %v6810_v1  ;;  %v7086_v42 = vsel %vm7032_vm8, %v6990_v24, 0.0  ;;  %v6846_v61 = vperm.slane %v6703_v21, %v16506_v48 }
0x10e9   : > { %v7087_v60 = vadd.f32 %v7086_v42, %v7085_v54  ;;  %v6814_v52 = vsel %vm16535_vm0, %v6813_v4, %v6812_v43  ;;  %v7088_v18 = vsel %vm7032_vm8, %v6991_v16, 0.0  ;;  %v16544_v42 = vld [vmem:[#allocation43_spill] sm:$0xff] }
0x10ea   : > { %v14439_v59 = vsel %vm621_vm3, %v6814_v52, %v14394_v47  ;;  %v6831_v47 = vperm.slane %v6679_v17, %v16506_v48  ;;  %v16540_v17 = vld [vmem:[#allocation88_spill] sm:$0xff] }
0x10eb   : > { %v14442_v3 = vadd.f32 %v7088_v18, %v7087_v60  ;;  %v7009_v13 = vmul.f32 %v6703_v21, %v16540_v17 }
0x10ed   : > { %v6655_v45 = vpop.permute.xlu0 %6654  ;;  %v7139_v39 = vsel %vm7032_vm8, %v7009_v13, 0.0 }
0x10ee   : > { %v6816_v14 = vperm.slane %v6655_v45, %v16506_v48  ;;  %v6993_v40 = vmul.f32 %v6655_v45, %v16538_v34  ;;  %v6676_v0 = vpop.permute.xlu1 %6675 }
0x10ef   : > { %v6830_v31 = vperm.slane %v6676_v0, %v16504_v32  ;;  %v7000_v19 = vmul.f32 %v6676_v0, %v16539_v2  ;;  %v6727_v20 = vpop.permute.xlu2 %6726  ;;  %v7048_v2 = vrot.slane %v14345_v53, 4 }
0x10f0   : > { %v6817_v6 = vsel %vm1574_vm10, %v6816_v14, %v6815_v62  ;;  %v7097_v11 = vsel %vm7032_vm8, %v6993_v40, 0.0  ;;  %v7017_v16 = vmul.f32 %v6727_v20, %v16543_v50  ;;  %v6861_v18 = vperm.slane %v6727_v20, %v16506_v48 }
0x10f1   : > { %v7098_v29 = vadd.f32 %v7097_v11, %v7096_v38  ;;  %v6832_v10 = vsel %vm1574_vm10, %v6831_v47, %v6830_v31  ;;  %v7117_v5 = vsel %vm7032_vm8, %v7000_v19, 0.0  ;;  %v7069_v47 = vrot.slane %v14397_v26, 4 }
0x10f2   : > { %v7119_v30 = vadd.f32 %v7118_v28, %v7117_v5  ;;  %v7160_v14 = vsel %vm7032_vm8, %v7017_v16, 0.0 }
0x10f3   : > { %v7070_v20 = vadd.f32 %v7069_v47, %v14397_v26 }
0x10f5   : > { %v6658_v12 = vpop.permute.xlu0 %6657 }
0x10f6   : > { %v6818_v37 = vperm.slane %v6658_v12, %v16234_v7  ;;  %v6994_v44 = vmul.f32 %v6658_v12, %v16541_v41  ;;  %v6700_v33 = vpop.permute.xlu1 %6699 }
0x10f7   : > { %v6845_v1 = vperm.slane %v6700_v33, %v16504_v32  ;;  %v7008_v55 = vmul.f32 %v6700_v33, %v16542_v49  ;;  %v14466_v15 = vpop.permute.xlu2 %6747 }
0x10f8   : > { %v6819_v27 = vsel %vm1578_vm11, %v6818_v37, %v6817_v6  ;;  %v7099_v54 = vsel %vm7032_vm8, %v6994_v44, 0.0 }
0x10f9   : > { %v14471_v25 = vadd.f32 %v7099_v54, %v7098_v29  ;;  %v6847_v24 = vsel %vm1574_vm10, %v6846_v61, %v6845_v1  ;;  %v7138_v51 = vsel %vm7032_vm8, %v7008_v55, 0.0  ;;  %v7049_v29 = vadd.f32 %v7048_v2, %v14345_v53 }
0x10fa   : > { %v14475_v4 = vadd.f32 %v7139_v39, %v7138_v51  ;;  %v7090_v53 = vrot.slane %v14442_v3, 4 }
0x10fb   : > { %v7050_v17 = vrot.slane %v7049_v29, 2 }
0x10fc   : > { %v7091_v54 = vadd.f32 %v7090_v53, %v14442_v3 }
0x10fd   : > { %v6682_v21 = vpop.permute.xlu0 %6681  ;;  %v7051_v41 = vadd.f32 %v7050_v17, %v7049_v29 }
0x10fe   : > { %v6833_v43 = vperm.slane %v6682_v21, %v16234_v7  ;;  %v7002_v60 = vmul.f32 %v6682_v21, %v16544_v42  ;;  %v6724_v52 = vpop.permute.xlu1 %6723  ;;  %v7092_v51 = vrot.slane %v7091_v54, 2 }
0x10ff   : > { %v6860_v57 = vperm.slane %v6724_v52, %v16504_v32  ;;  %v7016_v22 = vmul.f32 %v6724_v52, %v16545_v23  ;;  %v6730_v56 = vpop.permute.xlu2 %6729  ;;  %v7052_v33 = vrot.slane %v7051_v41, 1  ;;  %v16546_v52 = vld [vmem:[#allocation81_spill] sm:$0xff] }
0x1100   : > { %v14484_v45 = vsel %vm1578_vm11, %v6833_v43, %v6832_v10  ;;  %v7120_v62 = vsel %vm7032_vm8, %v7002_v60, 0.0  ;;  %v7093_v21 = vadd.f32 %v7092_v51, %v7091_v54  ;;  %v16548_v23 = vld [vmem:[#allocation101_spill] sm:$0xff] }
0x1101   : > { %v14488_v34 = vadd.f32 %v7120_v62, %v7119_v30  ;;  %v6862_v40 = vsel %vm1574_vm10, %v6861_v18, %v6860_v57  ;;  %v7159_v0 = vsel %vm7032_vm8, %v7016_v22, 0.0  ;;  %v7071_v30 = vrot.slane %v7070_v20, 2  ;;  %v16547_v57 = vld [vmem:[#allocation19_spill] sm:$0xff] }
0x1102   : > { %v7161_v31 = vadd.f32 %v7160_v14, %v7159_v0  ;;  %v7094_v42 = vrot.slane %v7093_v21, 1  ;;  %v7024_v18 = vmul.f32 %v14466_v15, %v16546_v52  ;;  %v7018_v3 = vmul.f32 %v6730_v56, %v16547_v57  ;;  %v16549_v0 = vld [vmem:[#allocation99_spill] sm:$0xff] }
0x1103   : > { %v7072_v12 = vadd.f32 %v7071_v30, %v7070_v20  ;;  %v6863_v14 = vperm.slane %v6730_v56, %v16234_v7  ;;  %v16550_v20 = vld [vmem:[#allocation90_spill] sm:$0xff] }
0x1104   : > { %v7095_v2 = vadd.f32 %v7094_v42, %v7093_v21  ;;  %v7180_v29 = vsel %vm7032_vm8, %v7024_v18, 0.0  ;;  %v7162_v30 = vsel %vm7032_vm8, %v7018_v3, 0.0  ;;  %v16555_v18 = vld [vmem:[#allocation103_spill] sm:$0xff]  ;;  %v16556_v3 = vld [vmem:[#allocation38_spill] sm:$0xff] }
0x1105   : > { %v6661_v19 = vpop.permute.xlu0 %6660  ;;  %v7073_v44 = vrot.slane %v7072_v12, 1  ;;  %v6864_v56 = vsel %vm1578_vm11, %v6863_v14, %v6862_v40 }
0x1106   : > { %v6820_v38 = vperm.slane %v6661_v19, %v16508_v63  ;;  %v6706_v6 = vpop.permute.xlu1 %6705  ;;  %v6995_v22 = vmul.f32 %v6661_v19, %v16548_v23 }
0x1107   : > { %v6848_v11 = vperm.slane %v6706_v6, %v16234_v7  ;;  %v14497_v28 = vpop.permute.xlu2 %6753  ;;  %v7074_v1 = vadd.f32 %v7073_v44, %v7072_v12  ;;  %v7010_v47 = vmul.f32 %v6706_v6, %v16549_v0  ;;  %v16551_v12 = vld [vmem:[#allocation26_spill] sm:$0xff]  ;;  %v7163_v44 = vadd.f32 %v7162_v30, %v7161_v31  ;;  %v16557_v0 = vld [vmem:[#allocation116_spill] sm:$0xff] }
0x1108   : > { %v14501_v10 = vsel %vm1582_vm12, %v6820_v38, %v6819_v27  ;;  %v7053_v27 = vadd.f32 %v7052_v33, %v7051_v41  ;;  %v7101_v17 = vsel %vm7032_vm8, %v6995_v22, 0.0  ;;  %v16552_v33 = vld [vmem:[#allocation91_spill] sm:$0xff]  ;;  %v6878_v31 = vperm.slane %v14497_v28, %v16234_v7 }
0x1109   : > { %v14504_v5 = vsel %vm1578_vm11, %v6848_v11, %v6847_v24  ;;  %v6875_v11 = vperm.slane %v14466_v15, %v16504_v32  ;;  %v7141_v6 = vsel %vm7032_vm8, %v7010_v47, 0.0  ;;  %v7102_v40 = vadd.f32 %v7101_v17, %v14471_v25 }
0x110a   : > { %v7209_v39 = vsel %vm618_vm2, %v7074_v1, %v7053_v27  ;;  %v7026_v1 = vmul.f32 %v14497_v28, %v16552_v33  ;;  %v16553_v27 = vld [vmem:[#allocation113_spill] sm:$0xff]  ;;  %v7142_v25 = vadd.f32 %v7141_v6, %v14475_v4  ;;  %vm16570_vm2 = vmmov %vm16535_vm0 }
0x110c   : > { %v7183_v23 = vsel %vm7032_vm8, %v7026_v1, 0.0  ;;  %v16560_v1 = vld [vmem:[#allocation104_spill] sm:$0xff] }
0x110d   : > { %v6751_v13 = vpop.permute.xlu0 %6750 }
0x110e   : > { %v6685_v26 = vpop.permute.xlu1 %6684  ;;  %v7025_v38 = vmul.f32 %v6751_v13, %v16550_v20  ;;  %v6876_v19 = vperm.slane %v6751_v13, %v16506_v48  ;;  %v14553_v48 = vsel %vm621_vm3, %v7095_v2, %v7209_v39  ;;  %v16554_v13 = vld [vmem:[#allocation134_spill] sm:$0xff]  ;;  %vm16573_vm3 = vmmov %vm16535_vm0 }
0x110f   : > { %v14506_v37 = vpop.permute.xlu2 %6666  ;;  %v7003_v41 = vmul.f32 %v6685_v26, %v16551_v12  ;;  %v6835_v15 = vperm.slane %v6685_v26, %v16508_v63 }
0x1110   : > { %v7181_v32 = vsel %vm7032_vm8, %v7025_v38, 0.0  ;;  %v6997_v21 = vmul.f32 %v14506_v37, %v16554_v13  ;;  %v6877_v52 = vsel %vm1574_vm10, %v6876_v19, %v6875_v11  ;;  %v6824_v28 = vperm.slane %v14506_v37, %v10055_v36  ;;  %v16559_v19 = vld [vmem:[#allocation54_spill] sm:$0xff]  ;;  %vm16574_vm10 = vmmov %vm16535_vm0 }
0x1111   : > { %v7122_v26 = vsel %vm7032_vm8, %v7003_v41, 0.0  ;;  %v7182_v7 = vadd.f32 %v7181_v32, %v7180_v29  ;;  %v6879_v38 = vsel %vm1578_vm11, %v6878_v31, %v6877_v52  ;;  %v16558_v29 = vld [vmem:[#allocation32_spill] sm:$0xff]  ;;  %vm16579_vm11 = vmmov %vm16535_vm0 }
0x1112   : > { %v7123_v4 = vadd.f32 %v7122_v26, %v14488_v34  ;;  %v7105_v20 = vsel %vm7032_vm8, %v6997_v21, 0.0  ;;  %v16562_v21 = vld [vmem:[#allocation124_spill] sm:$0xff] }
0x1115   : > { %v6664_v61 = vpop.permute.xlu0 %6663 }
0x1116   : > { %v14509_v49 = vpop.permute.xlu1 %6708  ;;  %v6996_v54 = vmul.f32 %v6664_v61, %v16553_v27  ;;  %v6822_v42 = vperm.slane %v6664_v61, %v15714_v58  ;;  %v6836_v61 = vsel %vm1582_vm12, %v6835_v15, %v14484_v45 }
0x1117   : > { %v14511_v55 = vpop.permute.xlu2 %6690  ;;  %v7011_v57 = vmul.f32 %v14509_v49, %v16555_v18  ;;  %v6850_v14 = vperm.slane %v14509_v49, %v16508_v63 }
0x1118   : > { %v7103_v22 = vsel %vm7032_vm8, %v6996_v54, 0.0  ;;  %v6823_v37 = vsel %vm1586_vm13, %v6822_v42, %v14501_v10  ;;  %v6839_v34 = vperm.slane %v14511_v55, %v10055_v36  ;;  %v7005_v12 = vmul.f32 %v14511_v55, %v16559_v19 }
0x1119   : > { %v7143_v45 = vsel %vm7032_vm8, %v7011_v57, 0.0  ;;  %v7104_v17 = vadd.f32 %v7103_v22, %v7102_v40  ;;  %v7184_v10 = vadd.f32 %v7183_v23, %v7182_v7  ;;  %v6851_v6 = vsel %vm1582_vm12, %v6850_v14, %v14504_v5  ;;  %v16561_v40 = vld [vmem:[#allocation136_spill] sm:$0xff] }
0x111a   : > { %v7144_v27 = vadd.f32 %v7143_v45, %v7142_v25  ;;  %v6825_v31 = vsel %vm1590_vm14, %v6824_v28, %v6823_v37  ;;  %v7126_v52 = vsel %vm7032_vm8, %v7005_v12, 0.0  ;;  %v16567_v12 = vld [vmem:[#allocation135_spill] sm:$0xff] }
0x111b   : > { %v7106_v57 = vadd.f32 %v7105_v20, %v7104_v17  ;;  %v16564_v20 = vld [vmem:[#allocation49_spill] sm:$0xff] }
0x111d   : > { %v14515_v24 = vpop.permute.xlu0 %6687 }
0x111e   : > { %v14517_v50 = vpop.permute.xlu1 %6732  ;;  %v7004_v39 = vmul.f32 %v14515_v24, %v16556_v3  ;;  %v6837_v11 = vperm.slane %v14515_v24, %v15714_v58 }
0x111f   : > { %v14519_v16 = vpop.permute.xlu2 %6714  ;;  %v7019_v30 = vmul.f32 %v14517_v50, %v16558_v29  ;;  %v6865_v24 = vperm.slane %v14517_v50, %v16508_v63 }
0x1120   : > { %v7124_v49 = vsel %vm7032_vm8, %v7004_v39, 0.0  ;;  %v7013_v55 = vmul.f32 %v14519_v16, %v16561_v40  ;;  %v6838_v13 = vsel %vm1586_vm13, %v6837_v11, %v6836_v61  ;;  %v6854_v39 = vperm.slane %v14519_v16, %v10055_v36 }
0x1121   : > { %v7125_v54 = vadd.f32 %v7124_v49, %v7123_v4  ;;  %v7164_v5 = vsel %vm7032_vm8, %v7019_v30, 0.0  ;;  %v6866_v3 = vsel %vm1582_vm12, %v6865_v24, %v6864_v56  ;;  %v6840_v28 = vsel %vm1590_vm14, %v6839_v34, %v6838_v13  ;;  %v16565_v49 = vld [vmem:[#allocation157_spill] sm:$0xff]  ;;  %v16566_v34 = vld [vmem:[#allocation191_spill] sm:$0xff] }
0x1122   : > { %v7165_v23 = vadd.f32 %v7164_v5, %v7163_v44  ;;  %v7147_v7 = vsel %vm7032_vm8, %v7013_v55, 0.0  ;;  %v7231_v5 = vld [vmem:[%s14780_s5 + $0x38] sm:$0xff] }
0x1123   : > { %v7127_v61 = vadd.f32 %v7126_v52, %v7125_v54  ;;  %7246 = vmatpush.msrb.mxu3 %v7231_v5 }
0x1125   : > { %v14521_v43 = vpop.permute.xlu0 %6711 }
0x1126   : > { %v14523_v60 = vpop.permute.xlu1 %6756  ;;  %v7012_v47 = vmul.f32 %v14521_v43, %v16557_v0  ;;  %v6852_v50 = vperm.slane %v14521_v43, %v15714_v58 }
0x1127   : > { %v14529_v62 = vpop.permute.xlu2 %6738  ;;  %v7027_v32 = vmul.f32 %v14523_v60, %v16560_v1  ;;  %v6880_v18 = vperm.slane %v14523_v60, %v16508_v63  ;;  %v16563_v60 = vld [vmem:[#allocation61_spill] sm:$0xff] }
0x1128   : > { %v7145_v33 = vsel %vm7032_vm8, %v7012_v47, 0.0  ;;  %v6853_v22 = vsel %vm1586_vm13, %v6852_v50, %v6851_v6  ;;  %v6869_v63 = vperm.slane %v14529_v62, %v10055_v36  ;;  %v7021_v56 = vmul.f32 %v14529_v62, %v16563_v60  ;;  %v16568_v6 = vld [vmem:[#allocation109_spill] sm:$0xff] }
0x1129   : > { %v7146_v26 = vadd.f32 %v7145_v33, %v7144_v27  ;;  %v7185_v25 = vsel %vm7032_vm8, %v7027_v32, 0.0  ;;  %v6881_v0 = vsel %vm1582_vm12, %v6880_v18, %v6879_v38  ;;  %v16569_v33 = vld [vmem:[#allocation65_spill] sm:$0xff]  ;;  %vm16580_vm12 = vmmov %vm16535_vm0 }
0x112a   : > { %v7168_v55 = vsel %vm7032_vm8, %v7021_v56, 0.0 }
0x112b   : > { %v7148_v4 = vadd.f32 %v7147_v7, %v7146_v26  ;;  %v16571_v26 = vld [vmem:[#allocation115_spill] sm:$0xff] }
0x112d   : > { %v14545_v53 = vpop.permute.xlu0 %6735 }
0x112e   : > { %v14550_v51 = vpop.permute.xlu1 %6669  ;;  %v6867_v44 = vperm.slane %v14545_v53, %v15714_v58  ;;  %v7020_v37 = vmul.f32 %v14545_v53, %v16564_v20 }
0x112f   : > { %v14578_v2 = vpop.permute.xlu2 %6762  ;;  %v6998_v42 = vmul.f32 %v14550_v51, %v16562_v21  ;;  %v6826_v43 = vperm.slane %v14550_v51, %v10101_v8  ;;  %v7186_v51 = vadd.f32 %v7185_v25, %v7184_v10 }
0x1130   : > { %v6868_v50 = vsel %vm1586_vm13, %v6867_v44, %v6866_v3  ;;  %v7029_v18 = vmul.f32 %v14578_v2, %v16571_v26 }
0x1131   : > { %v7107_v16 = vsel %vm7032_vm8, %v6998_v42, 0.0  ;;  %v6827_v45 = vsel %vm1594_vm15, %v6826_v43, %v6825_v31  ;;  %v7166_v31 = vsel %vm7032_vm8, %v7020_v37, 0.0  ;;  %v7229_v43 = vld [vmem:[%s14780_s5 + $0x28] sm:$0xff]  ;;  %v7228_v37 = vld [vmem:[%s14780_s5 + $0x20] sm:$0xff] }
0x1132   : > { %v7108_v17 = vadd.f32 %v7107_v16, %v7106_v57  ;;  %v7167_v3 = vadd.f32 %v7166_v31, %v7165_v23 }
0x1135   : > { %v14595_v41 = vpop.permute.xlu0 %6759 }
0x1136   : > { %v14604_v15 = vpop.permute.xlu1 %6693  ;;  %v6882_v38 = vperm.slane %v14595_v41, %v15714_v58  ;;  %v7028_v24 = vmul.f32 %v14595_v41, %v16568_v6  ;;  %v6855_v41 = vsel %vm1590_vm14, %v6854_v39, %v6853_v22  ;;  %v16576_v6 = vld [vmem:[#allocation145_spill] sm:$0xff] }
0x1137   : > { %v6721_v14 = vpop.permute.xlu2 %6720  ;;  %v7006_v53 = vmul.f32 %v14604_v15, %v16569_v33  ;;  %v6841_v21 = vperm.slane %v14604_v15, %v10101_v8 }
0x1138   : > { %v7015_v19 = vmul.f32 %v6721_v14, %v16566_v34  ;;  %v7187_v57 = vsel %vm7032_vm8, %v7028_v24, 0.0  ;;  %v6883_v7 = vsel %vm1586_vm13, %v6882_v38, %v6881_v0  ;;  %v6858_v56 = vperm.slane %v6721_v14, %v10106_v46  ;;  %v7227_v38 = vld [vmem:[%s14780_s5 + $0x18] sm:$0xff] }
0x1139   : > { %v7128_v39 = vsel %vm7032_vm8, %v7006_v53, 0.0  ;;  %v7188_v23 = vadd.f32 %v7187_v57, %v7186_v51  ;;  %v6842_v0 = vsel %vm1594_vm15, %v6841_v21, %v6840_v28  ;;  %v16575_v28 = vld [vmem:[#allocation59_spill] sm:$0xff]  ;;  %vm16581_vm13 = vcmask 1046534  }
0x113a   : > { %v7151_v42 = vsel %vm7032_vm8, %v7015_v19, 0.0  ;;  %v7226_v53 = vld [vmem:[%s14780_s5 + $0x10] sm:$0xff] }
0x113b   : > { %v16578_v57 = vld [vmem:[#allocation71_spill] sm:$0xff] }
0x113d   : > { %v6673_v47 = vpop.permute.xlu0 %6672 }
0x113e   : > { %v6828_v11 = vperm.slane %v6673_v47, %v10106_v46  ;;  %v6999_v29 = vmul.f32 %v6673_v47, %v16565_v49  ;;  %v6718_v30 = vpop.permute.xlu1 %6717  ;;  %v16572_v47 = vld [vmem:[#allocation75_spill] sm:$0xff] }
0x113f   : > { %v7014_v10 = vmul.f32 %v6718_v30, %v16567_v12  ;;  %v6856_v58 = vperm.slane %v6718_v30, %v10101_v8  ;;  %v6769_v49 = vpop.permute.xlu2 %6768  ;;  %v6884_v12 = vperm.slane %v14578_v2, %v10055_v36 }
0x1140   : > { %v6829_v1 = vsel %vm16570_vm2, %v6828_v11, %v6827_v45  ;;  %v7109_v32 = vsel %vm7032_vm8, %v6999_v29, 0.0  ;;  %v7129_v45 = vadd.f32 %v7128_v39, %v7127_v61  ;;  %v7031_v24 = vmul.f32 %v6769_v49, %v16576_v6 }
0x1141   : > { %v6892_v27 = vsel %vm624_vm4, %v6829_v1, %v14439_v59  ;;  %v7110_v54 = vadd.f32 %v7109_v32, %v7108_v17  ;;  %v7149_v40 = vsel %vm7032_vm8, %v7014_v10, 0.0  ;;  %v7230_v59 = vld [vmem:[%s14780_s5 + $0x30] sm:$0xff]  ;;  %v6857_v22 = vsel %vm1594_vm15, %v6856_v58, %v6855_v41  ;;  %v7225_v41 = vld [vmem:[%s14780_s5 + $0x8] sm:$0xff] }
0x1142   : > { %v7150_v13 = vadd.f32 %v7149_v40, %v7148_v4  ;;  %7247 = vmatpush.msrb.mxu3 %v7230_v59  ;;  %v6859_v29 = vsel %vm16573_vm3, %v6858_v56, %v6857_v22  ;;  %v7189_v1 = vsel %vm7032_vm8, %v7029_v18, 0.0  ;;  %v7169_v58 = vadd.f32 %v7168_v55, %v7167_v3 }
0x1143   : > { %v7111_v52 = vrot.slane %v7110_v54, 4  ;;  %v6885_v40 = vsel %vm1590_vm14, %v6884_v12, %v6883_v7  ;;  %v7190_v31 = vadd.f32 %v7189_v1, %v7188_v23  ;;  %v6888_v5 = vperm.slane %v6769_v49, %v10106_v46 }
0x1144   : > { %v7152_v25 = vadd.f32 %v7151_v42, %v7150_v13  ;;  %7248 = vmatpush.msrb.mxu3 %v7229_v43 }
0x1145   : > { %v7112_v15 = vadd.f32 %v7111_v52, %v7110_v54  ;;  %v6697_v60 = vpop.permute.xlu0 %6696  ;;  %v6870_v54 = vsel %vm1590_vm14, %v6869_v63, %v6868_v50  ;;  %v7193_v63 = vsel %vm7032_vm8, %v7031_v24, 0.0  ;;  %v16577_v50 = vld [vmem:[#allocation158_spill] sm:$0xff]  ;;  %vm16583_vm14 = vmmov %vm16478_vm7  ;;  %v7224_v24 = vld [vmem:[%s14780_s5] sm:$0xff] }
0x1146   : > { %v7153_v16 = vrot.slane %v7152_v25, 4  ;;  %v6843_v44 = vperm.slane %v6697_v60, %v10106_v46  ;;  %v7007_v4 = vmul.f32 %v6697_v60, %v16572_v47  ;;  %v6742_v20 = vpop.permute.xlu1 %6741  ;;  %7249 = vmatpush.msrb.mxu3 %v7228_v37 }
0x1147   : > { %v7113_v11 = vrot.slane %v7112_v15, 2  ;;  %v7022_v61 = vmul.f32 %v6742_v20, %v16575_v28  ;;  %v6871_v2 = vperm.slane %v6742_v20, %v10101_v8 }
0x1148   : > { %v7154_v14 = vadd.f32 %v7153_v16, %v7152_v25  ;;  %v6844_v30 = vsel %vm16574_vm10, %v6843_v44, %v6842_v0  ;;  %v7130_v17 = vsel %vm7032_vm8, %v7007_v4, 0.0  ;;  %7250 = vmatpush.msrb.mxu3 %v7227_v38 }
0x1149   : > { %v7114_v34 = vadd.f32 %v7113_v11, %v7112_v15  ;;  %v6893_v51 = vsel %vm627_vm5, %v6844_v30, %v6892_v27  ;;  %v7131_v19 = vadd.f32 %v7130_v17, %v7129_v45  ;;  %v7170_v21 = vsel %vm7032_vm8, %v7022_v61, 0.0 }
0x114a   : > { %v7155_v10 = vrot.slane %v7154_v14, 2  ;;  %v6894_v33 = vsel %vm630_vm6, %v6859_v29, %v6893_v51  ;;  %7251 = vmatpush.msrb.mxu3 %v7226_v53  ;;  %v6872_v43 = vsel %vm1594_vm15, %v6871_v2, %v6870_v54  ;;  %v7171_v3 = vadd.f32 %v7170_v21, %v7169_v58  ;;  %v16586_v54 = vld [vmem:[#allocation189_spill] sm:$0xff] }
0x114b   : > { %v7115_v32 = vrot.slane %v7114_v34, 1  ;;  %v7132_v27 = vrot.slane %v7131_v19, 4 }
0x114c   : > { %v7156_v62 = vadd.f32 %v7155_v10, %v7154_v14  ;;  %7252 = vmatpush.msrb.mxu3 %v7225_v41 }
0x114d   : > { %v7116_v13 = vadd.f32 %v7115_v32, %v7114_v34  ;;  %v7133_v59 = vadd.f32 %v7132_v27, %v7131_v19  ;;  %v6766_v36 = vpop.permute.xlu0 %6765 }
0x114e   : > { %v6886_v55 = vperm.slane %v6766_v36, %v10101_v8  ;;  %v7030_v42 = vmul.f32 %v6766_v36, %v16577_v50  ;;  %v6745_v52 = vpop.permute.xlu1 %6744  ;;  %7253 = vmatpush.msrb.mxu3 %v7224_v24 }
0x114f   : > { %v7134_v26 = vrot.slane %v7133_v59, 2  ;;  %v6873_v18 = vperm.slane %v6745_v52, %v10106_v46  ;;  %v7023_v39 = vmul.f32 %v6745_v52, %v16578_v57  ;;  %v7211_v25 = vsel %vm624_vm4, %v7116_v13, %v14553_v48 }
0x1150   : > { %v6887_v7 = vsel %vm1594_vm15, %v6886_v55, %v6885_v40  ;;  %v7191_v15 = vsel %vm7032_vm8, %v7030_v42, 0.0  ;;  %v7157_v46 = vrot.slane %v7156_v62, 1  ;;  %vm16582_vm4 = vcmask 1047559   ;;  %vm16584_vm15 = vmmov %vm16581_vm13 }
0x1151   : > { %v7135_v8 = vadd.f32 %v7134_v26, %v7133_v59  ;;  %v7192_v22 = vadd.f32 %v7191_v15, %v7190_v31  ;;  %v6874_v60 = vsel %vm16579_vm11, %v6873_v18, %v6872_v43  ;;  %v7172_v56 = vsel %vm7032_vm8, %v7023_v39, 0.0  ;;  %vm16585_vm7 = vmmov %vm16582_vm4 }
0x1152   : > { %v7173_v16 = vadd.f32 %v7172_v56, %v7171_v3  ;;  %v6889_v44 = vsel %vm16580_vm12, %v6888_v5, %v6887_v7  ;;  %v6895_v48 = vsel %vm16581_vm13, %v6874_v60, %v6894_v33  ;;  %v7158_v49 = vadd.f32 %v7157_v46, %v7156_v62 }
0x1153   : > { %v7136_v47 = vrot.slane %v7135_v8, 1  ;;  %v7194_v4 = vadd.f32 %v7193_v63, %v7192_v22  ;;  %v6896_v20 = vsel %vm16582_vm4, %v6889_v44, %v6895_v48  ;;  %v6302_v33 = vsub.f32 %v16479_v35, %v14171_v9  ;;  %v7576_v35 = vld [vmem:[%s14781_s6] ss:$0 sm:$0xff] }
0x1154   : > { %v7174_v37 = vrot.slane %v7173_v16, 4  ;;  %v6898_v23 = vsel %vm16583_vm14, %v6896_v20, 0.0  ;;  %vm7258_vm8 = vcmask 261120  }
0x1155   : > { %v7137_v0 = vadd.f32 %v7136_v47, %v7135_v8  ;;  %v7195_v45 = vrot.slane %v7194_v4, 4  ;;  %6899 = vadd.xlane.f32.xlu0 %v6898_v23  ;;  %v6303_v53 = vmul.f32 1.442695, %v6302_v33 }
0x1156   : > { %v7175_v11 = vadd.f32 %v7174_v37, %v7173_v16 }
0x1157   : > { %v7196_v29 = vadd.f32 %v7195_v45, %v7194_v4  ;;  %v7212_v14 = vsel %vm627_vm5, %v7137_v0, %v7211_v25  ;;  %8103 = vpow2.f32 %v6303_v53  ;;  %vm7221_vm5 = vcmask 523648  }
0x1158   : > { %v7176_v30 = vrot.slane %v7175_v11, 2  ;;  %v7213_v17 = vsel %vm630_vm6, %v7158_v49, %v7212_v14  ;;  %vm16587_vm6 = vmmov %vm16583_vm14 }
0x1159   : > { %v7197_v38 = vrot.slane %v7196_v29, 2 }
0x115a   : > { %v7177_v34 = vadd.f32 %v7176_v30, %v7175_v11 }
0x115b   : > { %v7198_v51 = vadd.f32 %v7197_v38, %v7196_v29 }
0x115c   : > { %v7178_v19 = vrot.slane %v7177_v34, 1 }
0x115d   : > { %v7199_v28 = vrot.slane %v7198_v51, 1  ;;  %v8104_v32 = vpop.eup %8103 }
0x115e   : > { %v7179_v61 = vadd.f32 %v7178_v19, %v7177_v34  ;;  %v6903_v2 = vmul.f32 %v8104_v32, %v16586_v54 }
0x115f   : > { %v7200_v12 = vadd.f32 %v7199_v28, %v7198_v51 }
0x1160   : > { %v7214_v10 = vsel %vm16584_vm15, %v7179_v61, %v7213_v17 }
0x1161   : > { %v7215_v6 = vsel %vm16585_vm7, %v7200_v12, %v7214_v10 }
0x1162   : > { %7216 = vrot.lane.b32.xlu1 %v7215_v6, %s8244_s30  ;;  %s7367_s30 = sshll.u32 %s8385_s23, 3 }
0x1163   : > { %s316_s10 = scalar_lea.vmem [#allocation8], %s7367_s30  ;;  %s8187_s30 = scalar_lea.hbm %s14782_s7, 16 }
0x1164   : > { %s7273_s11 = sshll.u32 %s316_s10, 4  ;;  %p8189_p9 = scmp.lt.s32.totalorder %s8187_s30, %s8183_s29  ;;  %s7274_s11 = int_to_ptr.vmem [resolvable:$true] %s7273_s11 }
0x1166   : > { %p8190_p2 = por %p8189_p9, %p8188_p11 }
0x1168   : > { %p8191_p10 = pnand %p8190_p2, %p8186_p8 }
0x11c8   : > { %v6900_v1 = vpop.xlane.xlu0 %6899 }
0x11c9   : > { %v6901_v27 = vadd.f32 %v8104_v32, %v6900_v1 }
0x11cb   : > { %8105 = vrcp.f32 %v6901_v27 }
0x11d1   : > { %v8106_v31 = vpop.eup %8105 }
0x11d4   : > { %v7217_v58 = vpop.permute.xlu1 %7216 }
0x11d5   : > { %v7219_v40 = vadd.f32 %v7217_v58, %v6903_v2 }
0x11d7   : > { %v7220_v41 = vmul.f32 %v8106_v31, %v7219_v40 }
0x11d9   : > { %7222 = vst.msk [vmem:[#allocation2] sm:$0xff] %vm7221_vm5, %v7220_v41 }
0x11e0   : > { %v7223_v13 = vld [vmem:[#allocation2] sm:$0xff] }
0x11e1   : > { %7434 = vmatmul.msk.f32.vlgmr.msrb.gmra.mxu3 %vm16587_vm6, %v7223_v13 }
0x1264   : > { %v7255_v9 = vpop.f32.mrf.mxu3 }
0x1265   : > { %v7256_v5 = vadd.f32 %v7576_v35, %v7255_v9 }
0x1267   : > { %7259 = vst.msk [vmem:[%s316_s10] sm:$0xff] %vm7258_vm8, %v7256_v5 }
0x1268   : > { %8194 = shalt.err (!%p8191_p10)
}
0x1269   : > { %7471 = dma.vmem_to_hbm [thread:$0]  (%p8357_p7), %s7274_s11, 128, %s7276_s22, %s7261_s14  }
0x126a PF: > { %s7287_s23 = sand.u32 1, %s8225_s24   ;;  %p16588_p12 = scmp.ge.s32.totalorder %s8237_s27, 2 }
0x126b   : > { %s7288_s16 = scalar_lea.sflag [#allocation5], %s7287_s23 }
0x126c   : > { %p7482_p13 = pnand %p16588_p12, %p8325_p6 }
0x126e   : > { %p7483_p0 = pneg %p7482_p13 }
0x1270   : > { %8220 = dma.done.wait (%p7483_p0), %s7288_s16, 128  }
0x1271   : > { %8222 = vsyncadd (%p7483_p0), %s7288_s16, 4294967168  ;;  %p21_p3 = scmp.ge.s32.totalorder %s8343_s15, 4   ;;  %s16589_s24 = smov %s8229_s25 }
0x1272   : > { %s16590_s25 = smov %s8233_s26  ;;  %s16591_s26 = smov %s8353_s20 }
0x1273   : > { %s16592_s27 = smov %s8343_s15  ;;  %23 = sbr.rel (!%p21_p3) target bundleno = 8 (0x8), region = 97 }
0x1278   :  { %7294 = vsyncpa [#allocation4], 1 }
0x1279   :  { %7296 = vsyncpa [#allocation4 + $0x1], 1 }
0x127a   :  { %7297 = vsyncpa [#allocation7], 1 }
0x127b   :  { %7298 = vsyncpa [#allocation5], 1 }
0x127c   :  { %7300 = vsyncpa [#allocation5 + $0x1], 1 }

</bundles_post_ra>
